<compile_context>
chip_gen: v5e
topology: v5e:2x2
jax: 0.10.0
libtpu: 0.0.40
codegen_flags: <defaults>
</compile_context>

<pallas_src>
import functools

import jax
import jax.numpy as jnp
from jax.experimental import pallas as pl
from jax.experimental.pallas import tpu as pltpu


def _round_up(x, m):
    return ((x + m - 1) // m) * m


# ---------------------------------------------------------------------------
# In-kernel 3x3 conv contribution as MXU matmuls
# ---------------------------------------------------------------------------
def _conv3x3_acc(win, w_ref, rows, cols, fused):
    """Accumulate a 3x3 conv contribution.

    win   : (rows+2, >=cols+2, C) value; win[r, c, :] is the (zero padded)
            input at data row (r-1), data col (c-1) relative to this window's
            first output.
    w_ref : (9*C, N) ref when `fused` else (9, C, N) ref; tap-major (dy, dx),
            cin-minor ordering.
    Returns (rows*cols, N) f32 partial sums.
    """
    c = win.shape[-1]
    taps = [win[dy:dy + rows, dx:dx + cols, :]
            for dy in range(3) for dx in range(3)]
    if fused:
        # Small-C path: one K = 9*C matmul keeps the contraction deep.
        xk = jnp.concatenate(taps, axis=-1)
        return jnp.dot(xk.reshape(rows * cols, 9 * c), w_ref[...],
                       preferred_element_type=jnp.float32)
    # Wide-C path: 9 unrolled K = C matmuls accumulated in f32; no
    # (rows, cols, 9*C) im2col tensor is ever written to VMEM.
    acc = None
    for k, tap in enumerate(taps):
        part = jnp.dot(tap.reshape(rows * cols, c), w_ref[k],
                       preferred_element_type=jnp.float32)
        acc = part if acc is None else acc + part
    return acc


# ---------------------------------------------------------------------------
# Fused kernel: conv1(+skip concat)+BN+ReLU -> conv2+BN+ReLU, one row tile
# ---------------------------------------------------------------------------
def _upblock_kernel(*refs, n_inputs, fused1, fused2, c1, c2):
    planes = refs[:n_inputs]                       # (H+4, Wp, c_i) each
    w1_refs = refs[n_inputs:2 * n_inputs]
    b1_ref, w2_ref, b2_ref, o_ref = refs[2 * n_inputs:]

    th, wd, _ = o_ref.shape                        # row tile, W, cout
    cdt = planes[0].dtype
    hh = planes[0].shape[0] - 4                    # image height H

    t = pl.program_id(1)
    row0 = t * th                                  # first output row of tile
    row_start = pl.multiple_of(row0, 8) if th % 8 == 0 else row0

    rows1 = th + 2                                 # conv1 rows incl. conv2 halo

    # ---- conv1: skip-connection concat fused as accumulation over inputs --
    acc1 = None
    for i in range(n_inputs):
        win = planes[i][pl.ds(row_start, th + 4)]  # (th+4, Wp, c_i)
        part = _conv3x3_acc(win, w1_refs[i], rows1, c1, fused1[i])
        acc1 = part if acc1 is None else acc1 + part
    h = jnp.maximum(acc1 + b1_ref[...], 0.0)       # folded BN + ReLU (f32)
    h = h.reshape(rows1, c1, -1)

    # Zero every h cell conv2 must see as padding: the recomputed halo rows
    # when they fall outside the image, and the left/right/alignment columns.
    vrow = row0 - 1 + jax.lax.broadcasted_iota(jnp.int32, (rows1, c1, 1), 0)
    vcol = jax.lax.broadcasted_iota(jnp.int32, (rows1, c1, 1), 1) - 1
    valid = (vrow >= 0) & (vrow < hh) & (vcol >= 0) & (vcol < wd)
    h = (h * valid.astype(h.dtype)).astype(cdt)

    # ---- conv2: consumes h straight from VMEM (never touches HBM) ---------
    acc2 = _conv3x3_acc(h, w2_ref, th, c2, fused2)
    y = jnp.maximum(acc2 + b2_ref[...], 0.0)
    y = y.reshape(th, c2, -1)
    o_ref[...] = y[:, :wd, :].astype(o_ref.dtype)


# ---------------------------------------------------------------------------
# VMEM budgeting / row-tile choice
# ---------------------------------------------------------------------------
def _vmem_budget_bytes():
    # Physical VMEM differs per generation (v5e/v6e: 128 MiB, v7x: 64 MiB per
    # TensorCore); keep headroom for Mosaic internal scratch.
    try:
        cap = pltpu.get_tpu_info().vmem_capacity_bytes
    except Exception:
        cap = 64 * 2 ** 20
    return int(cap) * 3 // 4


def _vmem_estimate(th, H, W, Wp, c1, c2, chans, mid, cout, cdt_size, out_size):
    cin_total = sum(chans)
    rows1 = th + 2
    est = 0
    # double-buffered HBM<->VMEM blocks managed by the BlockSpec pipeline
    est += 2 * sum((H + 4) * Wp * c for c in chans) * cdt_size        # planes
    est += 2 * 9 * (cin_total * mid + mid * cout) * cdt_size          # weights
    est += 2 * (mid + cout) * 4                                       # biases
    est += 2 * th * W * cout * out_size                               # out tile
    # per-tile temporaries: halo windows, tap staging, accumulators, h plane
    est += sum((th + 4) * Wp * c for c in chans) * cdt_size
    est += 9 * rows1 * c1 * cin_total * cdt_size                      # conv1 taps
    est += rows1 * c1 * mid * (4 + cdt_size)                          # acc1 + h
    est += 9 * th * c2 * mid * cdt_size                               # conv2 taps
    est += th * c2 * cout * (4 + out_size)                            # acc2 + y
    # Mosaic internal scratch / slack
    return int(est * 1.25) + (2 << 20)


def _choose_row_tile(H, W, est_fn, budget, row_tile=None):
    if row_tile is not None:
        assert H % row_tile == 0, "row_tile must divide H"
        return row_tile
    divisors = [d for d in range(1, H + 1) if H % d == 0]
    # Prefer sublane-aligned tiles (multiples of 8), <= ~4096 output pixels
    # per grid step, and a VMEM footprint inside the per-generation budget.
    for pref in (lambda d: d % 8 == 0, lambda d: True):
        cand = [d for d in divisors
                if pref(d) and d * W <= 4096 and est_fn(d) <= budget]
        if cand:
            return max(cand)
    # TODO(synk): manual halo DMA / W-tiling when even the smallest tile does
    # not fit the budget (huge images on v7x).
    return 1


# ---------------------------------------------------------------------------
# Host wrapper for the fused double conv (folded BN, ReLU)
# ---------------------------------------------------------------------------
def double_conv3x3_bn_relu(inputs, pads, w1, scale1, bias1, w2, scale2, bias2,
                           *, compute_dtype=jnp.bfloat16,
                           out_dtype=jnp.float32, row_tile=None):
    """Fused [conv3x3 -> BN -> ReLU] x2 over the implicit channel-concat of
    `inputs` (each NHWC, optionally placed with extra spatial `pads`)."""
    n_inputs = len(inputs)
    shapes = []
    for a, ((pt, pb), (pleft, pright)) in zip(inputs, pads):
        shapes.append((int(a.shape[0]),
                       int(a.shape[1]) + pt + pb,
                       int(a.shape[2]) + pleft + pright))
    N, H, W = shapes[0]
    assert all(s == (N, H, W) for s in shapes)
    chans = [int(a.shape[3]) for a in inputs]
    cin_total = sum(chans)
    mid = int(w1.shape[0])
    cout = int(w2.shape[0])
    assert int(w1.shape[1]) == cin_total and int(w2.shape[1]) == mid

    # Column geometry: conv2 is computed over c2 (>= W, sublane aligned)
    # columns; conv1 over c1 = h-plane width (conv2 halo + alignment); the
    # input plane carries 2 pad columns on the left plus zeros to Wp.
    c2 = _round_up(W, 8)
    c1 = _round_up(c2 + 2, 8)
    Wp = c1 + 2

    cdt = jnp.dtype(compute_dtype)
    odt = jnp.dtype(out_dtype)

    budget = _vmem_budget_bytes()
    est_fn = functools.partial(_vmem_estimate, H=H, W=W, Wp=Wp, c1=c1, c2=c2,
                               chans=chans, mid=mid, cout=cout,
                               cdt_size=cdt.itemsize, out_size=odt.itemsize)
    th = _choose_row_tile(H, W, est_fn, budget, row_tile)
    n_t = H // th
    vmem_limit = int(min(budget, max(32 * 2 ** 20, est_fn(th) * 13 // 10)))

    # Zero-padded input planes: 2 rows/cols of conv padding on the top/left
    # (conv1 is evaluated for one extra halo row/col), the placed data, and
    # zeros out to (H+4, Wp).  The placement pad (skip-size matching) is
    # merged into the same single jnp.pad.
    planes = []
    for a, ((pt, pb), (pleft, pright)) in zip(inputs, pads):
        top = 2 + pt
        bot = (H + 4) - top - int(a.shape[1])
        left = 2 + pleft
        right = Wp - left - int(a.shape[2])
        planes.append(jnp.pad(a.astype(cdt),
                              ((0, 0), (top, bot), (left, right), (0, 0))))

    # Weights: fold the inference-mode BN scale into the conv columns, split
    # conv1 along the (never materialized) channel concat, lay out tap-major /
    # cin-minor.  fused-K layout only for small channel counts.
    fused1 = tuple(c < 128 for c in chans)
    fused2 = mid < 128

    def prep_w(w_oihw, scale, fused):
        w = w_oihw * scale[:, None, None, None]            # fold BN scale
        w = jnp.transpose(w, (2, 3, 1, 0))                 # (ky, kx, cin, cout)
        ci, co = int(w.shape[2]), int(w.shape[3])
        w = w.reshape(9, ci, co)
        if fused:
            w = w.reshape(9 * ci, co)
        return w.astype(cdt)

    w1_blocks, off = [], 0
    for c, f in zip(chans, fused1):
        w1_blocks.append(prep_w(w1[:, off:off + c], scale1, f))
        off += c
    w2_k = prep_w(w2, scale2, fused2)
    b1 = bias1.astype(jnp.float32).reshape(1, mid)
    b2 = bias2.astype(jnp.float32).reshape(1, cout)

    in_specs = [pl.BlockSpec((None, H + 4, Wp, c), lambda n, t: (n, 0, 0, 0))
                for c in chans]
    for wb in w1_blocks:
        in_specs.append(pl.BlockSpec(
            wb.shape,
            (lambda n, t: (0, 0)) if wb.ndim == 2 else (lambda n, t: (0, 0, 0))))
    in_specs.append(pl.BlockSpec((1, mid), lambda n, t: (0, 0)))
    in_specs.append(pl.BlockSpec(
        w2_k.shape,
        (lambda n, t: (0, 0)) if w2_k.ndim == 2 else (lambda n, t: (0, 0, 0))))
    in_specs.append(pl.BlockSpec((1, cout), lambda n, t: (0, 0)))
    out_spec = pl.BlockSpec((None, th, W, cout), lambda n, t: (n, t, 0, 0))

    kernel = functools.partial(_upblock_kernel, n_inputs=n_inputs,
                               fused1=fused1, fused2=fused2, c1=c1, c2=c2)
    return pl.pallas_call(
        kernel,
        out_shape=jax.ShapeDtypeStruct((N, H, W, cout), odt),
        grid=(N, n_t),
        in_specs=in_specs,
        out_specs=out_spec,
        compiler_params=pltpu.CompilerParams(
            # Shard the batch axis across TensorCores (one set of resident
            # padded planes per core on v7x's 64 MiB VMEM); the row-tile axis
            # reuses the resident planes and is left "arbitrary".
            dimension_semantics=("parallel", "arbitrary"),
            vmem_limit_bytes=vmem_limit),
    )(*planes, *w1_blocks, b1, w2_k, b2)


# ---------------------------------------------------------------------------
# Glue: bilinear 2x upsample with align_corners=True (NHWC)
# ---------------------------------------------------------------------------
def upsample2x_bilinear_align_corners_nhwc(x):
    N, H, W, C = x.shape
    Ho, Wo = 2 * H, 2 * W

    def axis_params(n_in, n_out):
        if n_in == 1:
            z = jnp.zeros((n_out,), jnp.int32)
            return z, z, jnp.zeros((n_out,), jnp.float32)
        pos = jnp.arange(n_out, dtype=jnp.float32) * ((n_in - 1) / (n_out - 1))
        lo = jnp.clip(jnp.floor(pos).astype(jnp.int32), 0, n_in - 1)
        hi = jnp.clip(lo + 1, 0, n_in - 1)
        fr = pos - lo.astype(jnp.float32)
        return lo, hi, fr

    ylo, yhi, yf = axis_params(H, Ho)
    xlo, xhi, xf = axis_params(W, Wo)

    top = jnp.take(x, ylo, axis=1)
    bot = jnp.take(x, yhi, axis=1)
    rows = top * (1.0 - yf)[None, :, None, None] + bot * yf[None, :, None, None]
    left = jnp.take(rows, xlo, axis=2)
    right = jnp.take(rows, xhi, axis=2)
    return left * (1.0 - xf)[None, None, :, None] + right * xf[None, None, :, None]


# ---------------------------------------------------------------------------
# Full UpscalingBlock forward (NCHW in / NCHW out, like PyTorch)
# ---------------------------------------------------------------------------
def upscaling_block_forward(x, res, params, *, compute_dtype=jnp.bfloat16,
                            row_tile=None):
    x = jnp.transpose(x, (0, 2, 3, 1))             # NCHW -> NHWC
    res = jnp.transpose(res, (0, 2, 3, 1))

    x = upsample2x_bilinear_align_corners_nhwc(x)
    diffY = res.shape[1] - x.shape[1]
    diffX = res.shape[2] - x.shape[2]
    pads = [((0, 0), (0, 0)),                                     # res
            ((diffY // 2, diffY - diffY // 2),                    # upsampled x
             (diffX // 2, diffX - diffX // 2))]

    y = double_conv3x3_bn_relu(
        [res, x], pads,
        params["w1"], params["scale1"], params["bias1"],
        params["w2"], params["scale2"], params["bias2"],
        compute_dtype=compute_dtype, row_tile=row_tile)
    return jnp.transpose(y, (0, 3, 1, 2))          # NHWC -> NCHW


# ---------------------------------------------------------------------------
# Pure-JAX reference (for correctness check)
# ---------------------------------------------------------------------------
def reference_forward(x, res, params):
    xn = jnp.transpose(x, (0, 2, 3, 1))
    xn = upsample2x_bilinear_align_corners_nhwc(xn)
    x = jnp.transpose(xn, (0, 3, 1, 2))
    diffY = res.shape[2] - x.shape[2]
    diffX = res.shape[3] - x.shape[3]
    x = jnp.pad(x, ((0, 0), (0, 0),
                    (diffY // 2, diffY - diffY // 2),
                    (diffX // 2, diffX - diffX // 2)))
    x = jnp.concatenate([res, x], axis=1)

    def conv_bn_relu(x, w, scale, bias):
        y = jax.lax.conv_general_dilated(
            x, w, (1, 1), "SAME",
            dimension_numbers=("NCHW", "OIHW", "NCHW"))
        y = y * scale[None, :, None, None] + bias[None, :, None, None]
        return jnp.maximum(y, 0.0)

    x = conv_bn_relu(x, params["w1"], params["scale1"], params["bias1"])
    x = conv_bn_relu(x, params["w2"], params["scale2"], params["bias2"])
    return x


# ---------------------------------------------------------------------------
# Deterministic parameter init + run
# ---------------------------------------------------------------------------
def make_params(key, in_channels, out_channels):
    mid_channels = in_channels // 2
    eps = 1e-5
    ks = jax.random.split(key, 10)

    def bn_fold(kg, kb, km, kv, c):
        gamma = 1.0 + 0.1 * jax.random.normal(kg, (c,), jnp.float32)
        beta = 0.05 * jax.random.normal(kb, (c,), jnp.float32)
        mean = 0.02 * jax.random.normal(km, (c,), jnp.float32)
        var = 1.0 + 0.1 * jnp.abs(jax.random.normal(kv, (c,), jnp.float32))
        scale = gamma / jnp.sqrt(var + eps)
        bias = beta - mean * scale
        return scale, bias

    w1 = 0.1 * jax.random.normal(ks[0], (mid_channels, in_channels, 3, 3),
                                 jnp.float32)
    w2 = 0.1 * jax.random.normal(ks[1], (out_channels, mid_channels, 3, 3),
                                 jnp.float32)
    scale1, bias1 = bn_fold(ks[2], ks[3], ks[4], ks[5], mid_channels)
    scale2, bias2 = bn_fold(ks[6], ks[7], ks[8], ks[9], out_channels)
    return dict(w1=w1, scale1=scale1, bias1=bias1,
                w2=w2, scale2=scale2, bias2=bias2)


if __name__ == "__main__":
    key = jax.random.PRNGKey(0)
    k_x, k_res, k_p, k2_x, k2_res, k2_p = jax.random.split(key, 6)

    # ---- test 1: small channels (fused-K path), two row tiles per image ----
    in_channels, out_channels = 8, 4          # mid = in_channels // 2 = 4
    x = jax.random.normal(k_x, (2, in_channels // 2, 8, 8), jnp.float32)
    res = jax.random.normal(k_res, (2, in_channels // 2, 16, 16), jnp.float32)
    params = make_params(k_p, in_channels, out_channels)

    ref = jax.block_until_ready(reference_forward(x, res, params))

    out = jax.block_until_ready(
        upscaling_block_forward(x, res, params, compute_dtype=jnp.float32,
                                row_tile=8))
    assert out.shape == (2, out_channels, 16, 16), out.shape
    err = float(jnp.max(jnp.abs(out - ref)))
    assert jnp.allclose(out, ref, atol=1e-4, rtol=1e-4), err

    # bf16 activations / weights (f32 MXU accumulate + f32 epilogue).
    out_bf16 = jax.block_until_ready(
        upscaling_block_forward(x, res, params, compute_dtype=jnp.bfloat16,
                                row_tile=8))
    err_bf16 = float(jnp.max(jnp.abs(out_bf16 - ref)))
    assert err_bf16 < 0.25, err_bf16

    # ---- test 2: wide channels (per-tap K=Cin path, no zero-padded K) ------
    in2, out2 = 256, 64                       # mid = 128
    x2 = jax.random.normal(k2_x, (1, in2 // 2, 8, 8), jnp.float32)
    res2 = jax.random.normal(k2_res, (1, in2 // 2, 16, 16), jnp.float32)
    params2 = make_params(k2_p, in2, out2)
    ref2 = jax.block_until_ready(reference_forward(x2, res2, params2))
    out2_ = jax.block_until_ready(
        upscaling_block_forward(x2, res2, params2, compute_dtype=jnp.float32))
    assert out2_.shape == (1, out2, 16, 16), out2_.shape
    err2 = float(jnp.max(jnp.abs(out2_ - ref2)))
    assert jnp.allclose(out2_, ref2, atol=5e-3, rtol=5e-3), err2

    print("KERNEL_OK")
</pallas_src>

<mosaic_0001>
module attributes {stable_mosaic.version = 11 : i64} {
  func.func @_upblock_kernel(%arg0: i32, %arg1: i32, %arg2: memref<1x20x26x4xf32, #tpu.memory_space<vmem>>, %arg3: memref<1x20x26x4xf32, #tpu.memory_space<vmem>>, %arg4: memref<36x4xf32, #tpu.memory_space<vmem>>, %arg5: memref<36x4xf32, #tpu.memory_space<vmem>>, %arg6: memref<1x4xf32, #tpu.memory_space<vmem>>, %arg7: memref<36x4xf32, #tpu.memory_space<vmem>>, %arg8: memref<1x4xf32, #tpu.memory_space<vmem>>, %arg9: memref<1x8x16x4xf32, #tpu.memory_space<vmem>>) attributes {dimension_semantics = [#tpu.dimension_semantics<parallel>, #tpu.dimension_semantics<arbitrary>], iteration_bounds = array<i64: 2, 2>, scalar_prefetch = 0 : i64, scratch_operands = 0 : i64, tpu.core_type = #tpu.core_type<tc>, window_params = [{transform_indices = @transform_0, window_bounds = array<i64: 1, 20, 26, 4>}, {transform_indices = @transform_1, window_bounds = array<i64: 1, 20, 26, 4>}, {pipeline_mode = #tpu.pipeline_mode<synchronous>, transform_indices = @transform_2, window_bounds = array<i64: 36, 4>}, {pipeline_mode = #tpu.pipeline_mode<synchronous>, transform_indices = @transform_3, window_bounds = array<i64: 36, 4>}, {pipeline_mode = #tpu.pipeline_mode<synchronous>, transform_indices = @transform_4, window_bounds = array<i64: 1, 4>}, {pipeline_mode = #tpu.pipeline_mode<synchronous>, transform_indices = @transform_5, window_bounds = array<i64: 36, 4>}, {pipeline_mode = #tpu.pipeline_mode<synchronous>, transform_indices = @transform_6, window_bounds = array<i64: 1, 4>}, {transform_indices = @transform_7, window_bounds = array<i64: 1, 8, 16, 4>}]} {
    %c8_i32 = arith.constant 8 : i32
    %0 = arith.muli %arg1, %c8_i32 : i32
    %1 = tpu.assume_multiple %0, 8 : i32
    %c0 = arith.constant 0 : index
    %2 = arith.index_cast %1 : i32 to index
    %c0_0 = arith.constant 0 : index
    %c0_1 = arith.constant 0 : index
    %3 = vector.load %arg2[%c0, %2, %c0_0, %c0_1] : memref<1x20x26x4xf32, #tpu.memory_space<vmem>>, vector<1x12x26x4xf32>
    %4 = vector.shape_cast %3 : vector<1x12x26x4xf32> to vector<12x26x4xf32>
    %5 = vector.extract_strided_slice %4 {offsets = [0, 0, 0], sizes = [10, 24, 4], strides = [1, 1, 1]} : vector<12x26x4xf32> to vector<10x24x4xf32>
    %6 = vector.extract_strided_slice %4 {offsets = [0, 1, 0], sizes = [10, 24, 4], strides = [1, 1, 1]} : vector<12x26x4xf32> to vector<10x24x4xf32>
    %7 = vector.extract_strided_slice %4 {offsets = [0, 2, 0], sizes = [10, 24, 4], strides = [1, 1, 1]} : vector<12x26x4xf32> to vector<10x24x4xf32>
    %8 = vector.extract_strided_slice %4 {offsets = [1, 0, 0], sizes = [10, 24, 4], strides = [1, 1, 1]} : vector<12x26x4xf32> to vector<10x24x4xf32>
    %9 = vector.extract_strided_slice %4 {offsets = [1, 1, 0], sizes = [10, 24, 4], strides = [1, 1, 1]} : vector<12x26x4xf32> to vector<10x24x4xf32>
    %10 = vector.extract_strided_slice %4 {offsets = [1, 2, 0], sizes = [10, 24, 4], strides = [1, 1, 1]} : vector<12x26x4xf32> to vector<10x24x4xf32>
    %11 = vector.extract_strided_slice %4 {offsets = [2, 0, 0], sizes = [10, 24, 4], strides = [1, 1, 1]} : vector<12x26x4xf32> to vector<10x24x4xf32>
    %12 = vector.extract_strided_slice %4 {offsets = [2, 1, 0], sizes = [10, 24, 4], strides = [1, 1, 1]} : vector<12x26x4xf32> to vector<10x24x4xf32>
    %13 = vector.extract_strided_slice %4 {offsets = [2, 2, 0], sizes = [10, 24, 4], strides = [1, 1, 1]} : vector<12x26x4xf32> to vector<10x24x4xf32>
    %14 = tpu.concatenate %5, %6, %7, %8, %9, %10, %11, %12, %13 in 2 : vector<10x24x4xf32>, vector<10x24x4xf32>, vector<10x24x4xf32>, vector<10x24x4xf32>, vector<10x24x4xf32>, vector<10x24x4xf32>, vector<10x24x4xf32>, vector<10x24x4xf32>, vector<10x24x4xf32> -> vector<10x24x36xf32>
    %15 = vector.shape_cast %14 : vector<10x24x36xf32> to vector<240x36xf32>
    %c0_2 = arith.constant 0 : index
    %c0_3 = arith.constant 0 : index
    %16 = vector.load %arg4[%c0_2, %c0_3] : memref<36x4xf32, #tpu.memory_space<vmem>>, vector<36x4xf32>
    %cst = arith.constant dense<0.000000e+00> : vector<240x4xf32>
    %17 = tpu.matmul %15, %16, %cst {dimension_numbers = #tpu.dot_dimension_numbers<[1], [0], [0], [1], [0, 0, 1, 1], [], []>} : vector<240x36xf32>, vector<36x4xf32>, vector<240x4xf32> -> vector<240x4xf32>
    %c0_4 = arith.constant 0 : index
    %18 = arith.index_cast %1 : i32 to index
    %c0_5 = arith.constant 0 : index
    %c0_6 = arith.constant 0 : index
    %19 = vector.load %arg3[%c0_4, %18, %c0_5, %c0_6] : memref<1x20x26x4xf32, #tpu.memory_space<vmem>>, vector<1x12x26x4xf32>
    %20 = vector.shape_cast %19 : vector<1x12x26x4xf32> to vector<12x26x4xf32>
    %21 = vector.extract_strided_slice %20 {offsets = [0, 0, 0], sizes = [10, 24, 4], strides = [1, 1, 1]} : vector<12x26x4xf32> to vector<10x24x4xf32>
    %22 = vector.extract_strided_slice %20 {offsets = [0, 1, 0], sizes = [10, 24, 4], strides = [1, 1, 1]} : vector<12x26x4xf32> to vector<10x24x4xf32>
    %23 = vector.extract_strided_slice %20 {offsets = [0, 2, 0], sizes = [10, 24, 4], strides = [1, 1, 1]} : vector<12x26x4xf32> to vector<10x24x4xf32>
    %24 = vector.extract_strided_slice %20 {offsets = [1, 0, 0], sizes = [10, 24, 4], strides = [1, 1, 1]} : vector<12x26x4xf32> to vector<10x24x4xf32>
    %25 = vector.extract_strided_slice %20 {offsets = [1, 1, 0], sizes = [10, 24, 4], strides = [1, 1, 1]} : vector<12x26x4xf32> to vector<10x24x4xf32>
    %26 = vector.extract_strided_slice %20 {offsets = [1, 2, 0], sizes = [10, 24, 4], strides = [1, 1, 1]} : vector<12x26x4xf32> to vector<10x24x4xf32>
    %27 = vector.extract_strided_slice %20 {offsets = [2, 0, 0], sizes = [10, 24, 4], strides = [1, 1, 1]} : vector<12x26x4xf32> to vector<10x24x4xf32>
    %28 = vector.extract_strided_slice %20 {offsets = [2, 1, 0], sizes = [10, 24, 4], strides = [1, 1, 1]} : vector<12x26x4xf32> to vector<10x24x4xf32>
    %29 = vector.extract_strided_slice %20 {offsets = [2, 2, 0], sizes = [10, 24, 4], strides = [1, 1, 1]} : vector<12x26x4xf32> to vector<10x24x4xf32>
    %30 = tpu.concatenate %21, %22, %23, %24, %25, %26, %27, %28, %29 in 2 : vector<10x24x4xf32>, vector<10x24x4xf32>, vector<10x24x4xf32>, vector<10x24x4xf32>, vector<10x24x4xf32>, vector<10x24x4xf32>, vector<10x24x4xf32>, vector<10x24x4xf32>, vector<10x24x4xf32> -> vector<10x24x36xf32>
    %31 = vector.shape_cast %30 : vector<10x24x36xf32> to vector<240x36xf32>
    %c0_7 = arith.constant 0 : index
    %c0_8 = arith.constant 0 : index
    %32 = vector.load %arg5[%c0_7, %c0_8] : memref<36x4xf32, #tpu.memory_space<vmem>>, vector<36x4xf32>
    %cst_9 = arith.constant dense<0.000000e+00> : vector<240x4xf32>
    %33 = tpu.matmul %31, %32, %cst_9 {dimension_numbers = #tpu.dot_dimension_numbers<[1], [0], [0], [1], [0, 0, 1, 1], [], []>} : vector<240x36xf32>, vector<36x4xf32>, vector<240x4xf32> -> vector<240x4xf32>
    %34 = arith.addf %17, %33 : vector<240x4xf32>
    %c0_10 = arith.constant 0 : index
    %c0_11 = arith.constant 0 : index
    %35 = vector.load %arg6[%c0_10, %c0_11] : memref<1x4xf32, #tpu.memory_space<vmem>>, vector<1x4xf32>
    %36 = vector.broadcast %35 : vector<1x4xf32> to vector<240x4xf32>
    %37 = arith.addf %34, %36 : vector<240x4xf32>
    %cst_12 = arith.constant 0.000000e+00 : f32
    %38 = vector.broadcast %cst_12 : f32 to vector<240x4xf32>
    %39 = arith.maximumf %37, %38 : vector<240x4xf32>
    %40 = vector.shape_cast %39 : vector<240x4xf32> to vector<10x24x4xf32>
    %c1_i32 = arith.constant 1 : i32
    %41 = arith.subi %0, %c1_i32 : i32
    %42 = tpu.iota {dimensions = array<i32: 0>} : vector<10x24x1xi32>
    %43 = vector.broadcast %41 : i32 to vector<10x24x1xi32>
    %44 = arith.addi %43, %42 : vector<10x24x1xi32>
    %45 = tpu.iota {dimensions = array<i32: 1>} : vector<10x24x1xi32>
    %c1_i32_13 = arith.constant 1 : i32
    %46 = vector.broadcast %c1_i32_13 : i32 to vector<10x24x1xi32>
    %47 = arith.subi %45, %46 : vector<10x24x1xi32>
    %c0_i32 = arith.constant 0 : i32
    %48 = vector.broadcast %c0_i32 : i32 to vector<10x24x1xi32>
    %49 = arith.cmpi sge, %44, %48 : vector<10x24x1xi32>
    %c16_i32 = arith.constant 16 : i32
    %50 = vector.broadcast %c16_i32 : i32 to vector<10x24x1xi32>
    %51 = arith.cmpi slt, %44, %50 : vector<10x24x1xi32>
    %52 = arith.andi %49, %51 : vector<10x24x1xi1>
    %c0_i32_14 = arith.constant 0 : i32
    %53 = vector.broadcast %c0_i32_14 : i32 to vector<10x24x1xi32>
    %54 = arith.cmpi sge, %47, %53 : vector<10x24x1xi32>
    %55 = arith.andi %52, %54 : vector<10x24x1xi1>
    %c16_i32_15 = arith.constant 16 : i32
    %56 = vector.broadcast %c16_i32_15 : i32 to vector<10x24x1xi32>
    %57 = arith.cmpi slt, %47, %56 : vector<10x24x1xi32>
    %58 = arith.andi %55, %57 : vector<10x24x1xi1>
    %59 = arith.extui %58 : vector<10x24x1xi1> to vector<10x24x1xi32>
    %60 = arith.sitofp %59 : vector<10x24x1xi32> to vector<10x24x1xf32>
    %61 = vector.broadcast %60 : vector<10x24x1xf32> to vector<10x24x4xf32>
    %62 = arith.mulf %40, %61 : vector<10x24x4xf32>
    %63 = vector.extract_strided_slice %62 {offsets = [0, 0, 0], sizes = [8, 16, 4], strides = [1, 1, 1]} : vector<10x24x4xf32> to vector<8x16x4xf32>
    %64 = vector.extract_strided_slice %62 {offsets = [0, 1, 0], sizes = [8, 16, 4], strides = [1, 1, 1]} : vector<10x24x4xf32> to vector<8x16x4xf32>
    %65 = vector.extract_strided_slice %62 {offsets = [0, 2, 0], sizes = [8, 16, 4], strides = [1, 1, 1]} : vector<10x24x4xf32> to vector<8x16x4xf32>
    %66 = vector.extract_strided_slice %62 {offsets = [1, 0, 0], sizes = [8, 16, 4], strides = [1, 1, 1]} : vector<10x24x4xf32> to vector<8x16x4xf32>
    %67 = vector.extract_strided_slice %62 {offsets = [1, 1, 0], sizes = [8, 16, 4], strides = [1, 1, 1]} : vector<10x24x4xf32> to vector<8x16x4xf32>
    %68 = vector.extract_strided_slice %62 {offsets = [1, 2, 0], sizes = [8, 16, 4], strides = [1, 1, 1]} : vector<10x24x4xf32> to vector<8x16x4xf32>
    %69 = vector.extract_strided_slice %62 {offsets = [2, 0, 0], sizes = [8, 16, 4], strides = [1, 1, 1]} : vector<10x24x4xf32> to vector<8x16x4xf32>
    %70 = vector.extract_strided_slice %62 {offsets = [2, 1, 0], sizes = [8, 16, 4], strides = [1, 1, 1]} : vector<10x24x4xf32> to vector<8x16x4xf32>
    %71 = vector.extract_strided_slice %62 {offsets = [2, 2, 0], sizes = [8, 16, 4], strides = [1, 1, 1]} : vector<10x24x4xf32> to vector<8x16x4xf32>
    %72 = tpu.concatenate %63, %64, %65, %66, %67, %68, %69, %70, %71 in 2 : vector<8x16x4xf32>, vector<8x16x4xf32>, vector<8x16x4xf32>, vector<8x16x4xf32>, vector<8x16x4xf32>, vector<8x16x4xf32>, vector<8x16x4xf32>, vector<8x16x4xf32>, vector<8x16x4xf32> -> vector<8x16x36xf32>
    %73 = vector.shape_cast %72 : vector<8x16x36xf32> to vector<128x36xf32>
    %c0_16 = arith.constant 0 : index
    %c0_17 = arith.constant 0 : index
    %74 = vector.load %arg7[%c0_16, %c0_17] : memref<36x4xf32, #tpu.memory_space<vmem>>, vector<36x4xf32>
    %cst_18 = arith.constant dense<0.000000e+00> : vector<128x4xf32>
    %75 = tpu.matmul %73, %74, %cst_18 {dimension_numbers = #tpu.dot_dimension_numbers<[1], [0], [0], [1], [0, 0, 1, 1], [], []>} : vector<128x36xf32>, vector<36x4xf32>, vector<128x4xf32> -> vector<128x4xf32>
    %c0_19 = arith.constant 0 : index
    %c0_20 = arith.constant 0 : index
    %76 = vector.load %arg8[%c0_19, %c0_20] : memref<1x4xf32, #tpu.memory_space<vmem>>, vector<1x4xf32>
    %77 = vector.broadcast %76 : vector<1x4xf32> to vector<128x4xf32>
    %78 = arith.addf %75, %77 : vector<128x4xf32>
    %cst_21 = arith.constant 0.000000e+00 : f32
    %79 = vector.broadcast %cst_21 : f32 to vector<128x4xf32>
    %80 = arith.maximumf %78, %79 : vector<128x4xf32>
    %81 = vector.shape_cast %80 : vector<128x4xf32> to vector<8x16x4xf32>
    %c0_22 = arith.constant 0 : index
    %c0_23 = arith.constant 0 : index
    %c0_24 = arith.constant 0 : index
    %c0_25 = arith.constant 0 : index
    %82 = vector.load %arg9[%c0_22, %c0_23, %c0_24, %c0_25] : memref<1x8x16x4xf32, #tpu.memory_space<vmem>>, vector<1x8x16x4xf32>
    %83 = vector.shape_cast %82 : vector<1x8x16x4xf32> to vector<8x16x4xf32>
    %84 = vector.shape_cast %81 : vector<8x16x4xf32> to vector<1x8x16x4xf32>
    tpu.vector_store %arg9[%c0_22, %c0_23, %c0_24, %c0_25], %84 {strides = array<i32>} : memref<1x8x16x4xf32, #tpu.memory_space<vmem>>, vector<1x8x16x4xf32>,
    return
  }
  func.func @transform_0(%arg0: i32, %arg1: i32) -> (i32, i32, i32, i32) {
    %c0_i32 = arith.constant 0 : i32
    %c0_i32_0 = arith.constant 0 : i32
    %c0_i32_1 = arith.constant 0 : i32
    %c0_i32_2 = arith.constant 0 : i32
    return %arg0, %c0_i32, %c0_i32_0, %c0_i32_1 : i32, i32, i32, i32
  }
  func.func @transform_1(%arg0: i32, %arg1: i32) -> (i32, i32, i32, i32) {
    %c0_i32 = arith.constant 0 : i32
    %c0_i32_0 = arith.constant 0 : i32
    %c0_i32_1 = arith.constant 0 : i32
    %c0_i32_2 = arith.constant 0 : i32
    return %arg0, %c0_i32, %c0_i32_0, %c0_i32_1 : i32, i32, i32, i32
  }
  func.func @transform_2(%arg0: i32, %arg1: i32) -> (i32, i32) {
    %c0_i32 = arith.constant 0 : i32
    %c0_i32_0 = arith.constant 0 : i32
    %c0_i32_1 = arith.constant 0 : i32
    return %c0_i32, %c0_i32_0 : i32, i32
  }
  func.func @transform_3(%arg0: i32, %arg1: i32) -> (i32, i32) {
    %c0_i32 = arith.constant 0 : i32
    %c0_i32_0 = arith.constant 0 : i32
    %c0_i32_1 = arith.constant 0 : i32
    return %c0_i32, %c0_i32_0 : i32, i32
  }
  func.func @transform_4(%arg0: i32, %arg1: i32) -> (i32, i32) {
    %c0_i32 = arith.constant 0 : i32
    %c0_i32_0 = arith.constant 0 : i32
    %c0_i32_1 = arith.constant 0 : i32
    return %c0_i32, %c0_i32_0 : i32, i32
  }
  func.func @transform_5(%arg0: i32, %arg1: i32) -> (i32, i32) {
    %c0_i32 = arith.constant 0 : i32
    %c0_i32_0 = arith.constant 0 : i32
    %c0_i32_1 = arith.constant 0 : i32
    return %c0_i32, %c0_i32_0 : i32, i32
  }
  func.func @transform_6(%arg0: i32, %arg1: i32) -> (i32, i32) {
    %c0_i32 = arith.constant 0 : i32
    %c0_i32_0 = arith.constant 0 : i32
    %c0_i32_1 = arith.constant 0 : i32
    return %c0_i32, %c0_i32_0 : i32, i32
  }
  func.func @transform_7(%arg0: i32, %arg1: i32) -> (i32, i32, i32, i32) {
    %c0_i32 = arith.constant 0 : i32
    %c0_i32_0 = arith.constant 0 : i32
    %c0_i32_1 = arith.constant 0 : i32
    return %arg0, %arg1, %c0_i32, %c0_i32_0 : i32, i32, i32, i32
  }
}

</mosaic_0001>

<bundles_post_ra>
// kernel: tpu_custom_call.1
= control target key start
LH: loop header
LB: loop body
LE: loop exit
PB: predicated region body
PF: predicated region fallthrough
CT: control target
= control target key end

     0   :  { %s4726_s24 = smov 0   ;;  %s4728_s25 = smov 0   ;;  %s9606_s0 = inlined_call_operand.vmem [shape: f32[2,20,26,4], index: 0, kind: input, shape index: {}]   ;;  %s9607_s1 = inlined_call_operand.vmem [shape: f32[2,20,26,4], index: 1, kind: input, shape index: {}]   ;;  %s9608_s2 = inlined_call_operand.vmem [shape: f32[36,4], index: 2, kind: input, shape index: {}]   ;;  %s9609_s3 = inlined_call_operand.vmem [shape: f32[36,4], index: 3, kind: input, shape index: {}]   ;;  %s9610_s4 = inlined_call_operand.vmem [shape: f32[1,4], index: 4, kind: input, shape index: {}]   ;;  %s9611_s5 = inlined_call_operand.vmem [shape: f32[36,4], index: 5, kind: input, shape index: {}]   ;;  %s9612_s6 = inlined_call_operand.vmem [shape: f32[1,4], index: 6, kind: input, shape index: {}]   ;;  %s9613_s7 = inlined_call_operand.vmem [shape: f32[2,16,16,4], index: 7, kind: output, shape index: {}]  }
   0x1   :  { %s4730_s26 = smov 0   ;;  %s4732_s27 = smov 0  }
   0x2   :  { %s4734_s28 = smov 0  }
   0x3 LB: > { %s26_s29 = sadd.s32 1, %s4667_s26  ;;  %s29_s30 = sadd.s32 1, %s4671_s27  ;;  %s4675_s28 = sphi %s4734_s28, %s17_s28   ;;  %s4671_s27 = sphi %s4732_s27, %s10752_s27   ;;  %s4667_s26 = sphi %s4730_s26, %s10751_s26   ;;  %s4663_s25 = sphi %s4728_s25, %s10750_s25   ;;  %s4659_s24 = sphi %s4726_s24, %s10749_s24  }
   0x4   : > { %p27_p0 = scmp.ge.s32.totalorder %s26_s29, 2  ;;  %p4375_p1 = scmp.ge.s32.totalorder %s4675_s28, 1 }
   0x5   : > { %p261_p2 = scmp.lt.s32.totalorder %s4675_s28, 5 }
   0x6   : > { %s10754_s29 = smov (%p27_p0, %s26_s29), 0  ;;  %s10756_s30 = smov (!%p27_p0, %s29_s30), %s4671_s27 }
   0x7   : > { %p262_p3 = pnand %p4375_p1, %p261_p2  ;;  %p31_p4 = scmp.ge.s32.totalorder %s10756_s30, 2 }
   0x9   : > { %s10758_s30 = smov (%p31_p4, %s10756_s30), 0  ;;  %265 = sbr.rel (%p262_p3) target bundleno = 2114 (0x842), region = 48 }
   0xe   : > { %p303_p5 = scmp.lt.s32.totalorder %s4663_s25, 1  ;;  %s4499_s9 = sshll.u32 %s4659_s24, 8  ;;  %vm415_vm0 = vcmask 1046528   ;;  %vm576_vm1 = vcmask 1045504   ;;  %vm9783_vm2 = vcmask 1043456   ;;  %vm1313_vm3 = vcmask 31744  }
   0xf   : > { %s4677_s14 = smov 4   ;;  %s4678_s15 = smov 8   ;;  %vm1344_vm4 = vcmask 64512   ;;  %vm1375_vm5 = vcmask 97280   ;;  %vm1406_vm6 = vcmask 130048   ;;  %vm1437_vm7 = vcmask 162816  }
  0x10   : > { %s10760_s25 = smov (!%p303_p5, %s4663_s25), 1  ;;  %s4679_s16 = smov 12   ;;  %vm1468_vm8 = vcmask 195584   ;;  %vm9786_vm9 = vcmask 228352   ;;  %vm9784_vm10 = vcmask 293888   ;;  %vm9785_vm11 = vcmask 261120  }
  0x11   : > { %s4515_s8 = smul.u32 640, %s10760_s25  ;;  %s4680_s17 = smov 16  }
  0x12   : > { %s4681_s18 = smov 20   ;;  %s4682_s19 = smov 24  }
  0x13   : > { %s307_s12 = scalar_lea.vmem %s9606_s0, %s4515_s8  ;;  %s4683_s20 = smov 28  }
  0x14   : > { %s4769_s13 = scalar_lea.vmem %s307_s12, %s4499_s9  ;;  %s4684_s21 = smov 32  }
  0x15   : > { %v4772_v0 = vld [vmem:[%s4769_s13 + $0x28] sm:$0xff]  ;;  %v4775_v1 = vld [vmem:[%s4769_s13 + $0x30] sm:$0xff]  ;;  %v4783_v5 = vld [vmem:[%s4769_s13 + $0x18] sm:$0x3]  ;;  %s312_s10 = scalar_lea.vmem %s9607_s1, %s4515_s8  ;;  %s8332_s8 = sshll.u32 %s4659_s24, 3 }
  0x16   : > { %v4778_v2 = vld [vmem:[%s4769_s13 + $0x10] sm:$0xff]  ;;  %v424_v3 = vrot.slane %v4772_v0, 1  ;;  %v426_v4 = vrot.slane %v4775_v1, 1  ;;  %v4787_v7 = vld [vmem:[%s4769_s13] sm:$0xff]  ;;  %v421_v8 = vrot.slane %v4783_v5, 1  ;;  %v4791_v9 = vld [vmem:[%s4769_s13 + $0x8] sm:$0xff]  ;;  %s6068_s11 = scalar_lea.vmem %s312_s10, %s4499_s9 }
  0x17   : > { %v419_v6 = vrot.slane %v4778_v2, 1  ;;  %v416_v10 = vrot.slane %v4787_v7, 1  ;;  %v4795_v11 = vld [vmem:[%s4769_s13 + $0x38] sm:$0x3]  ;;  %v417_v13 = vrot.slane %v4791_v9, 1  ;;  %v4802_v14 = vld [vmem:[%s4769_s13 + $0x20] sm:$0xff] }
  0x18   : > { %v4798_v12 = vsel %vm415_vm0, %v424_v3, %v426_v4  ;;  %v428_v17 = vrot.slane %v4795_v11, 1  ;;  %v423_v18 = vrot.slane %v4802_v14, 1  ;;  %v4819_v21 = vld [vmem:[%s4769_s13 + $0x50] sm:$0xff]  ;;  %v4822_v22 = vld [vmem:[%s4769_s13 + $0x58] sm:$0x3]  ;;  %v4826_v24 = vld [vmem:[%s4769_s13 + $0x48] sm:$0xff] }
  0x19   : > { %494 = vrot.lane.b32.xlu2 %v4798_v12, %s4677_s14  ;;  %v422_v15 = vsel %vm415_vm0, %v419_v6, %v421_v8  ;;  %v418_v16 = vsel %vm415_vm0, %v416_v10, %v417_v13  ;;  %v420_v23 = vsel %vm415_vm0, %v417_v13, %v419_v6  ;;  %v4831_v25 = vld [vmem:[%s4769_s13 + $0x40] sm:$0xff]  ;;  %v433_v26 = vrot.slane %v4819_v21, 1  ;;  %v4847_v32 = vld [vmem:[%s4769_s13 + $0x70] sm:$0xff]  ;;  %v4850_v33 = vld [vmem:[%s4769_s13 + $0x78] sm:$0x3]  ;;  %s4446_s24 = sadd.s32 4294967295, %s8332_s8 }
  0x1a   : > { %490 = vrot.lane.b32.xlu1 %v422_v15, %s4677_s14  ;;  %486 = vrot.lane.b32.xlu0 %v418_v16, %s4677_s14  ;;  %v4813_v19 = vsel %vm415_vm0, %v426_v4, %v428_v17  ;;  %v4816_v20 = vsel %vm415_vm0, %v423_v18, %v424_v3  ;;  %v435_v27 = vrot.slane %v4822_v22, 1  ;;  %v431_v28 = vrot.slane %v4826_v24, 1  ;;  %v4856_v35 = vld [vmem:[%s4769_s13 + $0x68] sm:$0xff]  ;;  %v4861_v36 = vld [vmem:[%s4769_s13 + $0x60] sm:$0xff]  ;;  %p316_p6 = scmp.lt.s32.totalorder %s8332_s8, 15  ;;  %s4380_s23 = sshll.u32 %s10760_s25, 5 }
  0x1b   : > { %v430_v29 = vrot.slane %v4831_v25, 1  ;;  %v440_v37 = vrot.slane %v4847_v32, 1  ;;  %v442_v38 = vrot.slane %v4850_v33, 1  ;;  %v438_v39 = vrot.slane %v4856_v35, 1  ;;  %v4878_v43 = vld [vmem:[%s4769_s13 + $0x90] sm:$0xff]  ;;  %v4887_v46 = vld [vmem:[%s4769_s13 + $0x88] sm:$0xff] }
  0x1c   : > { %v4841_v30 = vsel %vm415_vm0, %v433_v26, %v435_v27  ;;  %v4844_v31 = vsel %vm415_vm0, %v431_v28, %v433_v26  ;;  %v437_v40 = vrot.slane %v4861_v36, 1  ;;  %v4881_v44 = vld [vmem:[%s4769_s13 + $0x98] sm:$0x3]  ;;  %v4892_v47 = vld [vmem:[%s4769_s13 + $0x80] sm:$0xff]  ;;  %v447_v48 = vrot.slane %v4878_v43, 1  ;;  %v4909_v54 = vld [vmem:[%s4769_s13 + $0xb0] sm:$0xff] }
  0x1d   : > { %v4853_v34 = vsel %vm415_vm0, %v430_v29, %v431_v28  ;;  %v4872_v41 = vsel %vm415_vm0, %v440_v37, %v442_v38  ;;  %v4875_v42 = vsel %vm415_vm0, %v438_v39, %v440_v37  ;;  %v449_v49 = vrot.slane %v4881_v44, 1  ;;  %v4912_v55 = vld [vmem:[%s4769_s13 + $0xb8] sm:$0x3]  ;;  %v4918_v57 = vld [vmem:[%s4769_s13 + $0xa8] sm:$0xff]  ;;  %v4923_v58 = vld [vmem:[%s4769_s13 + $0xa0] sm:$0xff]  ;;  %s10762_s8 = smov (!%p316_p6, %s8332_s8), 15 }
  0x1e   : > { %v4884_v45 = vsel %vm415_vm0, %v437_v40, %v438_v39  ;;  %v445_v50 = vrot.slane %v4887_v46, 1  ;;  %v444_v51 = vrot.slane %v4892_v47, 1  ;;  %v454_v59 = vrot.slane %v4909_v54, 1  ;;  %v4940_v4 = vld [vmem:[%s4769_s13 + $0xd0] sm:$0xff]  ;;  %v4943_v6 = vld [vmem:[%s4769_s13 + $0xd8] sm:$0x3] }
  0x1f   : > { %v4903_v52 = vsel %vm415_vm0, %v447_v48, %v449_v49  ;;  %v456_v60 = vrot.slane %v4912_v55, 1  ;;  %v452_v61 = vrot.slane %v4918_v57, 1  ;;  %v451_v62 = vrot.slane %v4923_v58, 1  ;;  %v4949_v10 = vld [vmem:[%s4769_s13 + $0xc8] sm:$0xff]  ;;  %v4954_v13 = vld [vmem:[%s4769_s13 + $0xc0] sm:$0xff]  ;;  %v4971_v27 = vld [vmem:[%s4769_s13 + $0xf0] sm:$0xff] }
  0x20   : > { %v4906_v53 = vsel %vm415_vm0, %v445_v50, %v447_v48  ;;  %v4915_v56 = vsel %vm415_vm0, %v444_v51, %v445_v50  ;;  %v461_v15 = vrot.slane %v4940_v4, 1  ;;  %v463_v16 = vrot.slane %v4943_v6, 1  ;;  %v4974_v28 = vld [vmem:[%s4769_s13 + $0xf8] sm:$0x3]  ;;  %v4980_v37 = vld [vmem:[%s4769_s13 + $0xe8] sm:$0xff]  ;;  %v4985_v38 = vld [vmem:[%s4769_s13 + $0xe0] sm:$0xff] }
  0x21   : > { %496 = vrot.lane.b32.xlu2 %v4813_v19, %s4677_s14  ;;  %v4934_v63 = vsel %vm415_vm0, %v454_v59, %v456_v60  ;;  %v4937_v3 = vsel %vm415_vm0, %v452_v61, %v454_v59  ;;  %v4946_v8 = vsel %vm415_vm0, %v451_v62, %v452_v61  ;;  %v459_v17 = vrot.slane %v4949_v10, 1  ;;  %v5002_v59 = vld [vmem:[%s4769_s13 + $0x110] sm:$0xff]  ;;  %v5005_v60 = vld [vmem:[%s4769_s13 + $0x118] sm:$0x3]  ;;  %v5011_v62 = vld [vmem:[%s4769_s13 + $0x108] sm:$0xff]  ;;  %s4379_s22 = sshll.u32 %s10762_s8, 1 }
  0x22   : > { %492 = vrot.lane.b32.xlu1 %v4816_v20, %s4677_s14  ;;  %488 = vrot.lane.b32.xlu0 %v420_v23, %s4677_s14  ;;  %v458_v18 = vrot.slane %v4954_v13, 1  ;;  %v4965_v23 = vsel %vm415_vm0, %v461_v15, %v463_v16  ;;  %v468_v39 = vrot.slane %v4971_v27, 1  ;;  %v470_v40 = vrot.slane %v4974_v28, 1 }
  0x23   : > { %9789 = vst [vmem:[#allocation2_spill] sm:$0xff] %v4965_v23  ;;  %v4968_v26 = vsel %vm415_vm0, %v459_v17, %v461_v15  ;;  %v466_v48 = vrot.slane %v4980_v37, 1  ;;  %v465_v49 = vrot.slane %v4985_v38, 1  ;;  %v5016_v15 = vld [vmem:[%s4769_s13 + $0x100] sm:$0xff]  ;;  %v475_v16 = vrot.slane %v5002_v59, 1 }
  0x24   : > { %9790 = vst [vmem:[#allocation3_spill] sm:$0xff] %v4968_v26  ;;  %v4977_v29 = vsel %vm415_vm0, %v458_v18, %v459_v17  ;;  %v4996_v50 = vsel %vm415_vm0, %v468_v39, %v470_v40  ;;  %v477_v17 = vrot.slane %v5005_v60, 1  ;;  %v473_v18 = vrot.slane %v5011_v62, 1 }
  0x25   : > { %9791 = vst [vmem:[#allocation4_spill] sm:$0xff] %v4977_v29  ;;  %v4999_v51 = vsel %vm415_vm0, %v466_v48, %v468_v39  ;;  %v5008_v61 = vsel %vm415_vm0, %v465_v49, %v466_v48  ;;  %v472_v39 = vrot.slane %v5016_v15, 1  ;;  %v5033_v49 = vld [vmem:[%s4769_s13 + $0x130] sm:$0xff] }
  0x26   : > { %9792 = vst [vmem:[#allocation5_spill] sm:$0xff] %v4996_v50  ;;  %v5027_v40 = vsel %vm415_vm0, %v475_v16, %v477_v17  ;;  %v5030_v48 = vsel %vm415_vm0, %v473_v18, %v475_v16  ;;  %v482_v16 = vrot.slane %v5033_v49, 1 }
  0x27   : > { %9793 = vst [vmem:[#allocation6_spill] sm:$0xff] %v4999_v51 }
  0x28   : > { %9794 = vst [vmem:[#allocation7_spill] sm:$0xff] %v5008_v61 }
  0x29   : > { %502 = vrot.lane.b32.xlu2 %v4841_v30, %s4677_s14  ;;  %9795 = vst [vmem:[#allocation8_spill] sm:$0xff] %v5027_v40 }
  0x2a   : > { %500 = vrot.lane.b32.xlu1 %v4844_v31, %s4677_s14  ;;  %498 = vrot.lane.b32.xlu0 %v4853_v34, %s4677_s14  ;;  %9796 = vst [vmem:[#allocation9_spill] sm:$0xff] %v5030_v48 }
  0x31   : > { %508 = vrot.lane.b32.xlu2 %v4872_v41, %s4677_s14 }
  0x32   : > { %506 = vrot.lane.b32.xlu1 %v4875_v42, %s4677_s14  ;;  %504 = vrot.lane.b32.xlu0 %v4884_v45, %s4677_s14 }
  0x39   : > { %514 = vrot.lane.b32.xlu2 %v4903_v52, %s4677_s14 }
  0x3a   : > { %512 = vrot.lane.b32.xlu1 %v4906_v53, %s4677_s14  ;;  %510 = vrot.lane.b32.xlu0 %v4915_v56, %s4677_s14 }
  0x41   : > { %520 = vrot.lane.b32.xlu2 %v4934_v63, %s4677_s14 }
  0x42   : > { %518 = vrot.lane.b32.xlu1 %v4937_v3, %s4677_s14  ;;  %516 = vrot.lane.b32.xlu0 %v4946_v8, %s4677_s14 }
  0x49   : > { %526 = vrot.lane.b32.xlu2 %v4965_v23, %s4677_s14 }
  0x4a   : > { %524 = vrot.lane.b32.xlu1 %v4968_v26, %s4677_s14  ;;  %522 = vrot.lane.b32.xlu0 %v4977_v29, %s4677_s14  ;;  %v5042_v29 = vld [vmem:[%s4769_s13 + $0x128] sm:$0xff] }
  0x51   : > { %532 = vrot.lane.b32.xlu2 %v4996_v50, %s4677_s14  ;;  %v5039_v50 = vsel %vm415_vm0, %v472_v39, %v473_v18  ;;  %v480_v18 = vrot.slane %v5042_v29, 1 }
  0x52   : > { %530 = vrot.lane.b32.xlu1 %v4999_v51, %s4677_s14  ;;  %528 = vrot.lane.b32.xlu0 %v5008_v61, %s4677_s14  ;;  %v5036_v51 = vld [vmem:[%s4769_s13 + $0x138] sm:$0x3]  ;;  %9797 = vst [vmem:[#allocation10_spill] sm:$0xff] %v5039_v50  ;;  %v5047_v61 = vld [vmem:[%s4769_s13 + $0x120] sm:$0xff] }
  0x53   : > { %v484_v17 = vrot.slane %v5036_v51, 1  ;;  %v479_v39 = vrot.slane %v5047_v61, 1 }
  0x55   : > { %v5058_v26 = vsel %vm415_vm0, %v482_v16, %v484_v17  ;;  %v5064_v23 = vsel %vm415_vm0, %v479_v39, %v480_v18  ;;  %v577_v17 = vrot.slane %v4787_v7, 2  ;;  %v584_v7 = vrot.slane %v4802_v14, 2 }
  0x56   : > { %9798 = vst [vmem:[#allocation11_spill] sm:$0xff] %v5058_v26 }
  0x59   : > { %538 = vrot.lane.b32.xlu2 %v5027_v40, %s4677_s14  ;;  %v5061_v40 = vsel %vm415_vm0, %v480_v18, %v482_v16  ;;  %v578_v16 = vrot.slane %v4791_v9, 2  ;;  %v585_v9 = vrot.slane %v4772_v0, 2 }
  0x5a   : > { %536 = vrot.lane.b32.xlu1 %v5030_v48, %s4677_s14  ;;  %534 = vrot.lane.b32.xlu0 %v5039_v50, %s4677_s14  ;;  %9799 = vst [vmem:[#allocation12_spill] sm:$0xff] %v5061_v40  ;;  %v580_v50 = vrot.slane %v4778_v2, 2  ;;  %v582_v48 = vrot.slane %v4783_v5, 2  ;;  %v587_v2 = vrot.slane %v4775_v1, 2  ;;  %v589_v5 = vrot.slane %v4795_v11, 2 }
  0x5b   : > { %v594_v11 = vrot.slane %v4819_v21, 2 }
  0x5c   : > { %v583_v18 = vsel %vm576_vm1, %v580_v50, %v582_v48  ;;  %v581_v39 = vsel %vm576_vm1, %v578_v16, %v580_v50  ;;  %v5087_v48 = vsel %vm576_vm1, %v587_v2, %v589_v5  ;;  %v5090_v50 = vsel %vm576_vm1, %v585_v9, %v587_v2 }
  0x61   : > { %544 = vrot.lane.b32.xlu2 %v5058_v26, %s4677_s14  ;;  %v579_v26 = vsel %vm576_vm1, %v577_v17, %v578_v16  ;;  %v5093_v16 = vsel %vm576_vm1, %v584_v7, %v585_v9  ;;  %v603_v7 = vrot.slane %v4850_v33, 2  ;;  %v608_v33 = vrot.slane %v4878_v43, 2 }
  0x62   : > { %542 = vrot.lane.b32.xlu1 %v5061_v40, %s4677_s14  ;;  %540 = vrot.lane.b32.xlu0 %v5064_v23, %s4677_s14 }
  0x69   : > { %651 = vrot.lane.b32.xlu2 %v583_v18, %s4678_s15  ;;  %v592_v18 = vrot.slane %v4826_v24, 2 }
  0x6a   : > { %649 = vrot.lane.b32.xlu1 %v581_v39, %s4678_s15  ;;  %647 = vrot.lane.b32.xlu0 %v579_v26, %s4678_s15  ;;  %v596_v26 = vrot.slane %v4822_v22, 2  ;;  %v591_v39 = vrot.slane %v4831_v25, 2  ;;  %v601_v22 = vrot.slane %v4847_v32, 2 }
  0x6b   : > { %v5111_v5 = vsel %vm576_vm1, %v592_v18, %v594_v11 }
  0x6c   : > { %v5108_v2 = vsel %vm576_vm1, %v594_v11, %v596_v26  ;;  %9801 = vst [vmem:[#allocation14_spill] sm:$0xff] %v5111_v5  ;;  %v5114_v9 = vsel %vm576_vm1, %v591_v39, %v592_v18  ;;  %v599_v11 = vrot.slane %v4856_v35, 2  ;;  %v598_v18 = vrot.slane %v4861_v36, 2 }
  0x6d   : > { %v5129_v39 = vsel %vm576_vm1, %v601_v22, %v603_v7 }
  0x6e   : > { %9803 = vst [vmem:[#allocation16_spill] sm:$0xff] %v5129_v39 }
  0x71   : > { %657 = vrot.lane.b32.xlu2 %v5087_v48, %s4678_s15 }
  0x72   : > { %655 = vrot.lane.b32.xlu1 %v5090_v50, %s4678_s15  ;;  %653 = vrot.lane.b32.xlu0 %v5093_v16, %s4678_s15 }
  0x73   : > { %v5103_v17 = vpop.permute.xlu2 %494 }
  0x74   : > { %9800 = vst [vmem:[#allocation13_spill] sm:$0xff] %v5103_v17  ;;  %v5132_v17 = vsel %vm576_vm1, %v599_v11, %v601_v22  ;;  %v606_v22 = vrot.slane %v4887_v46, 2 }
  0x75   : > { %9804 = vst [vmem:[#allocation17_spill] sm:$0xff] %v5132_v17 }
  0x79   : > { %663 = vrot.lane.b32.xlu2 %v5108_v2, %s4678_s15 }
  0x7a   : > { %661 = vrot.lane.b32.xlu1 %v5111_v5, %s4678_s15  ;;  %659 = vrot.lane.b32.xlu0 %v5114_v9, %s4678_s15  ;;  %v5135_v5 = vsel %vm576_vm1, %v598_v18, %v599_v11  ;;  %v605_v11 = vrot.slane %v4892_v47, 2 }
  0x7b   : > { %v5124_v26 = vpop.permute.xlu2 %496  ;;  %9805 = vst [vmem:[#allocation18_spill] sm:$0xff] %v5135_v5 }
  0x7c   : > { %9802 = vst [vmem:[#allocation15_spill] sm:$0xff] %v5124_v26  ;;  %v610_v26 = vrot.slane %v4881_v44, 2  ;;  %v615_v44 = vrot.slane %v4909_v54, 2 }
  0x7e   : > { %v5150_v18 = vsel %vm576_vm1, %v608_v33, %v610_v26 }
  0x7f   : > { %9807 = vst [vmem:[#allocation20_spill] sm:$0xff] %v5150_v18 }
  0x81   : > { %669 = vrot.lane.b32.xlu2 %v5129_v39, %s4678_s15  ;;  %v5153_v39 = vsel %vm576_vm1, %v606_v22, %v608_v33  ;;  %v613_v33 = vrot.slane %v4918_v57, 2 }
  0x82   : > { %667 = vrot.lane.b32.xlu1 %v5132_v17, %s4678_s15  ;;  %665 = vrot.lane.b32.xlu0 %v5135_v5, %s4678_s15  ;;  %9808 = vst [vmem:[#allocation21_spill] sm:$0xff] %v5153_v39  ;;  %v5156_v17 = vsel %vm576_vm1, %v605_v11, %v606_v22  ;;  %v612_v22 = vrot.slane %v4923_v58, 2 }
  0x83   : > { %v5145_v7 = vpop.permute.xlu2 %502  ;;  %9809 = vst [vmem:[#allocation22_spill] sm:$0xff] %v5156_v17 }
  0x84   : > { %9806 = vst [vmem:[#allocation19_spill] sm:$0xff] %v5145_v7  ;;  %v617_v7 = vrot.slane %v4912_v55, 2  ;;  %v5181_v55 = vsel %vm576_vm1, %v612_v22, %v613_v33 }
  0x85   : > { %9815 = vst [vmem:[#allocation28_spill] sm:$0xff] %v5181_v55 }
  0x89   : > { %675 = vrot.lane.b32.xlu2 %v5150_v18, %s4678_s15  ;;  %v5175_v18 = vsel %vm576_vm1, %v615_v44, %v617_v7 }
  0x8a   : > { %673 = vrot.lane.b32.xlu1 %v5153_v39, %s4678_s15  ;;  %671 = vrot.lane.b32.xlu0 %v5156_v17, %s4678_s15  ;;  %9813 = vst [vmem:[#allocation26_spill] sm:$0xff] %v5175_v18  ;;  %v5178_v39 = vsel %vm576_vm1, %v613_v33, %v615_v44  ;;  %v620_v44 = vrot.slane %v4949_v10, 2  ;;  %v619_v33 = vrot.slane %v4954_v13, 2 }
  0x8b   : > { %v5166_v26 = vpop.permute.xlu2 %508  ;;  %9814 = vst [vmem:[#allocation27_spill] sm:$0xff] %v5178_v39 }
  0x8c   : > { %9810 = vst [vmem:[#allocation23_spill] sm:$0xff] %v5166_v26  ;;  %v5169_v5 = vpop.permute.xlu1 %490  ;;  %v5172_v11 = vpop.permute.xlu0 %486  ;;  %v622_v26 = vrot.slane %v4940_v4, 2 }
  0x8d   : > { %9811 = vst [vmem:[#allocation24_spill] sm:$0xff] %v5169_v5  ;;  %v624_v5 = vrot.slane %v4943_v6, 2  ;;  %v5206_v6 = vsel %vm576_vm1, %v619_v33, %v620_v44 }
  0x8e   : > { %9812 = vst [vmem:[#allocation25_spill] sm:$0xff] %v5172_v11 }
  0x8f   : > { %9821 = vst [vmem:[#allocation34_spill] sm:$0xff] %v5206_v6 }
  0x91   : > { %681 = vrot.lane.b32.xlu2 %v5175_v18, %s4678_s15  ;;  %v5200_v18 = vsel %vm576_vm1, %v622_v26, %v624_v5 }
  0x92   : > { %679 = vrot.lane.b32.xlu1 %v5178_v39, %s4678_s15  ;;  %677 = vrot.lane.b32.xlu0 %v5181_v55, %s4678_s15  ;;  %9819 = vst [vmem:[#allocation32_spill] sm:$0xff] %v5200_v18  ;;  %v5203_v39 = vsel %vm576_vm1, %v620_v44, %v622_v26  ;;  %v627_v26 = vrot.slane %v4980_v37, 2  ;;  %v626_v44 = vrot.slane %v4985_v38, 2 }
  0x93   : > { %v5191_v7 = vpop.permute.xlu2 %514  ;;  %9820 = vst [vmem:[#allocation33_spill] sm:$0xff] %v5203_v39 }
  0x94   : > { %9816 = vst [vmem:[#allocation29_spill] sm:$0xff] %v5191_v7  ;;  %v5194_v11 = vpop.permute.xlu1 %492  ;;  %v5197_v22 = vpop.permute.xlu0 %488  ;;  %v629_v7 = vrot.slane %v4971_v27, 2 }
  0x95   : > { %9817 = vst [vmem:[#allocation30_spill] sm:$0xff] %v5194_v11  ;;  %v631_v11 = vrot.slane %v4974_v28, 2  ;;  %v5231_v28 = vsel %vm576_vm1, %v626_v44, %v627_v26 }
  0x96   : > { %9818 = vst [vmem:[#allocation31_spill] sm:$0xff] %v5197_v22 }
  0x97   : > { %9827 = vst [vmem:[#allocation40_spill] sm:$0xff] %v5231_v28 }
  0x99   : > { %687 = vrot.lane.b32.xlu2 %v5200_v18, %s4678_s15  ;;  %v5225_v18 = vsel %vm576_vm1, %v629_v7, %v631_v11 }
  0x9a   : > { %685 = vrot.lane.b32.xlu1 %v5203_v39, %s4678_s15  ;;  %683 = vrot.lane.b32.xlu0 %v5206_v6, %s4678_s15  ;;  %9825 = vst [vmem:[#allocation38_spill] sm:$0xff] %v5225_v18  ;;  %v5228_v39 = vsel %vm576_vm1, %v627_v26, %v629_v7  ;;  %v634_v7 = vrot.slane %v5011_v62, 2  ;;  %v633_v26 = vrot.slane %v5016_v15, 2 }
  0x9b   : > { %v5216_v5 = vpop.permute.xlu2 %520  ;;  %9826 = vst [vmem:[#allocation39_spill] sm:$0xff] %v5228_v39 }
  0x9c   : > { %9822 = vst [vmem:[#allocation35_spill] sm:$0xff] %v5216_v5  ;;  %v5219_v22 = vpop.permute.xlu1 %500  ;;  %v5222_v33 = vpop.permute.xlu0 %498  ;;  %v636_v5 = vrot.slane %v5002_v59, 2 }
  0x9d   : > { %9823 = vst [vmem:[#allocation36_spill] sm:$0xff] %v5219_v22  ;;  %v638_v22 = vrot.slane %v5005_v60, 2  ;;  %v5256_v60 = vsel %vm576_vm1, %v633_v26, %v634_v7 }
  0x9e   : > { %9824 = vst [vmem:[#allocation37_spill] sm:$0xff] %v5222_v33 }
  0x9f   : > { %9833 = vst [vmem:[#allocation46_spill] sm:$0xff] %v5256_v60 }
  0xa1   : > { %693 = vrot.lane.b32.xlu2 %v5225_v18, %s4678_s15  ;;  %v5250_v18 = vsel %vm576_vm1, %v636_v5, %v638_v22 }
  0xa2   : > { %691 = vrot.lane.b32.xlu1 %v5228_v39, %s4678_s15  ;;  %689 = vrot.lane.b32.xlu0 %v5231_v28, %s4678_s15  ;;  %9831 = vst [vmem:[#allocation44_spill] sm:$0xff] %v5250_v18  ;;  %v5253_v39 = vsel %vm576_vm1, %v634_v7, %v636_v5  ;;  %v641_v5 = vrot.slane %v5042_v29, 2  ;;  %v640_v7 = vrot.slane %v5047_v61, 2 }
  0xa3   : > { %v5241_v11 = vpop.permute.xlu2 %526  ;;  %9832 = vst [vmem:[#allocation45_spill] sm:$0xff] %v5253_v39 }
  0xa4   : > { %9828 = vst [vmem:[#allocation41_spill] sm:$0xff] %v5241_v11  ;;  %v5244_v33 = vpop.permute.xlu1 %506  ;;  %v5247_v44 = vpop.permute.xlu0 %504  ;;  %v643_v11 = vrot.slane %v5033_v49, 2 }
  0xa5   : > { %9829 = vst [vmem:[#allocation42_spill] sm:$0xff] %v5244_v33  ;;  %v645_v33 = vrot.slane %v5036_v51, 2  ;;  %v5281_v51 = vsel %vm576_vm1, %v640_v7, %v641_v5 }
  0xa6   : > { %9830 = vst [vmem:[#allocation43_spill] sm:$0xff] %v5247_v44 }
  0xa9   : > { %699 = vrot.lane.b32.xlu2 %v5250_v18, %s4678_s15  ;;  %v5275_v18 = vsel %vm576_vm1, %v643_v11, %v645_v33 }
  0xaa   : > { %697 = vrot.lane.b32.xlu1 %v5253_v39, %s4678_s15  ;;  %695 = vrot.lane.b32.xlu0 %v5256_v60, %s4678_s15  ;;  %9837 = vst [vmem:[#allocation50_spill] sm:$0xff] %v5275_v18  ;;  %v5278_v39 = vsel %vm576_vm1, %v641_v5, %v643_v11 }
  0xab   : > { %v5266_v22 = vpop.permute.xlu2 %532  ;;  %9838 = vst [vmem:[#allocation51_spill] sm:$0xff] %v5278_v39 }
  0xac   : > { %9834 = vst [vmem:[#allocation47_spill] sm:$0xff] %v5266_v22  ;;  %v5269_v44 = vpop.permute.xlu1 %512  ;;  %v5272_v26 = vpop.permute.xlu0 %510 }
  0xad   : > { %9835 = vst [vmem:[#allocation48_spill] sm:$0xff] %v5269_v44 }
  0xae   : > { %9836 = vst [vmem:[#allocation49_spill] sm:$0xff] %v5272_v26 }
  0xb1   : > { %705 = vrot.lane.b32.xlu2 %v5275_v18, %s4678_s15 }
  0xb2   : > { %703 = vrot.lane.b32.xlu1 %v5278_v39, %s4678_s15  ;;  %701 = vrot.lane.b32.xlu0 %v5281_v51, %s4678_s15 }
  0xb3   : > { %v5289_v22 = vpop.permute.xlu2 %538 }
  0xb4   : > { %9839 = vst [vmem:[#allocation52_spill] sm:$0xff] %v5289_v22  ;;  %v5291_v44 = vpop.permute.xlu1 %518  ;;  %v5293_v33 = vpop.permute.xlu0 %516 }
  0xb5   : > { %9840 = vst [vmem:[#allocation53_spill] sm:$0xff] %v5291_v44 }
  0xb6   : > { %9841 = vst [vmem:[#allocation54_spill] sm:$0xff] %v5293_v33 }
  0xb9   : > { %744 = vrot.lane.b32.xlu2 %v4775_v1, %s4679_s16 }
  0xba   : > { %742 = vrot.lane.b32.xlu1 %v4772_v0, %s4679_s16  ;;  %740 = vrot.lane.b32.xlu0 %v4802_v14, %s4679_s16 }
  0xbb   : > { %v5301_v11 = vpop.permute.xlu2 %544 }
  0xbc   : > { %9842 = vst [vmem:[#allocation55_spill] sm:$0xff] %v5301_v11  ;;  %v5303_v5 = vpop.permute.xlu1 %524  ;;  %v5305_v7 = vpop.permute.xlu0 %522 }
  0xbd   : > { %9843 = vst [vmem:[#allocation56_spill] sm:$0xff] %v5303_v5 }
  0xbe   : > { %9844 = vst [vmem:[#allocation57_spill] sm:$0xff] %v5305_v7 }
  0xc1   : > { %750 = vrot.lane.b32.xlu2 %v4819_v21, %s4679_s16 }
  0xc2   : > { %748 = vrot.lane.b32.xlu1 %v4826_v24, %s4679_s16  ;;  %746 = vrot.lane.b32.xlu0 %v4831_v25, %s4679_s16 }
  0xc3   : > { %v5313_v1 = vpop.permute.xlu2 %651 }
  0xc4   : > { %9845 = vst [vmem:[#allocation58_spill] sm:$0xff] %v5313_v1  ;;  %v5315_v0 = vpop.permute.xlu1 %530  ;;  %v5317_v14 = vpop.permute.xlu0 %528 }
  0xc5   : > { %9846 = vst [vmem:[#allocation59_spill] sm:$0xff] %v5315_v0 }
  0xc6   : > { %9847 = vst [vmem:[#allocation60_spill] sm:$0xff] %v5317_v14 }
  0xc9   : > { %756 = vrot.lane.b32.xlu2 %v4847_v32, %s4679_s16 }
  0xca   : > { %754 = vrot.lane.b32.xlu1 %v4856_v35, %s4679_s16  ;;  %752 = vrot.lane.b32.xlu0 %v4861_v36, %s4679_s16 }
  0xcb   : > { %v5325_v11 = vpop.permute.xlu2 %657 }
  0xcc   : > { %9848 = vst [vmem:[#allocation61_spill] sm:$0xff] %v5325_v11  ;;  %v5327_v22 = vpop.permute.xlu1 %536  ;;  %v5329_v5 = vpop.permute.xlu0 %534 }
  0xcd   : > { %9849 = vst [vmem:[#allocation62_spill] sm:$0xff] %v5327_v22 }
  0xce   : > { %9850 = vst [vmem:[#allocation63_spill] sm:$0xff] %v5329_v5 }
  0xd1   : > { %762 = vrot.lane.b32.xlu2 %v4878_v43, %s4679_s16 }
  0xd2   : > { %760 = vrot.lane.b32.xlu1 %v4887_v46, %s4679_s16  ;;  %758 = vrot.lane.b32.xlu0 %v4892_v47, %s4679_s16 }
  0xd3   : > { %v5337_v0 = vpop.permute.xlu2 %663 }
  0xd4   : > { %9851 = vst [vmem:[#allocation64_spill] sm:$0xff] %v5337_v0  ;;  %v5339_v14 = vpop.permute.xlu1 %542  ;;  %v5341_v7 = vpop.permute.xlu0 %540 }
  0xd5   : > { %9852 = vst [vmem:[#allocation65_spill] sm:$0xff] %v5339_v14 }
  0xd6   : > { %9853 = vst [vmem:[#allocation66_spill] sm:$0xff] %v5341_v7 }
  0xd9   : > { %768 = vrot.lane.b32.xlu2 %v4909_v54, %s4679_s16 }
  0xda   : > { %766 = vrot.lane.b32.xlu1 %v4918_v57, %s4679_s16  ;;  %764 = vrot.lane.b32.xlu0 %v4923_v58, %s4679_s16 }
  0xdb   : > { %v5349_v22 = vpop.permute.xlu2 %669 }
  0xdc   : > { %9854 = vst [vmem:[#allocation67_spill] sm:$0xff] %v5349_v22  ;;  %v5351_v5 = vpop.permute.xlu1 %649  ;;  %v5353_v44 = vpop.permute.xlu0 %647 }
  0xdd   : > { %9855 = vst [vmem:[#allocation68_spill] sm:$0xff] %v5351_v5 }
  0xde   : > { %9856 = vst [vmem:[#allocation69_spill] sm:$0xff] %v5353_v44 }
  0xe1   : > { %774 = vrot.lane.b32.xlu2 %v4940_v4, %s4679_s16 }
  0xe2   : > { %772 = vrot.lane.b32.xlu1 %v4949_v10, %s4679_s16  ;;  %770 = vrot.lane.b32.xlu0 %v4954_v13, %s4679_s16 }
  0xe3   : > { %v5361_v14 = vpop.permute.xlu2 %675 }
  0xe4   : > { %9857 = vst [vmem:[#allocation70_spill] sm:$0xff] %v5361_v14  ;;  %v5363_v7 = vpop.permute.xlu1 %655  ;;  %v5365_v33 = vpop.permute.xlu0 %653 }
  0xe5   : > { %9858 = vst [vmem:[#allocation71_spill] sm:$0xff] %v5363_v7 }
  0xe6   : > { %9859 = vst [vmem:[#allocation72_spill] sm:$0xff] %v5365_v33 }
  0xe9   : > { %780 = vrot.lane.b32.xlu2 %v4971_v27, %s4679_s16 }
  0xea   : > { %778 = vrot.lane.b32.xlu1 %v4980_v37, %s4679_s16  ;;  %776 = vrot.lane.b32.xlu0 %v4985_v38, %s4679_s16 }
  0xeb   : > { %v5373_v26 = vpop.permute.xlu2 %681 }
  0xec   : > { %9860 = vst [vmem:[#allocation73_spill] sm:$0xff] %v5373_v26  ;;  %v5375_v22 = vpop.permute.xlu1 %661  ;;  %v5377_v14 = vpop.permute.xlu0 %659 }
  0xed   : > { %9861 = vst [vmem:[#allocation74_spill] sm:$0xff] %v5375_v22 }
  0xee   : > { %9862 = vst [vmem:[#allocation75_spill] sm:$0xff] %v5377_v14 }
  0xf1   : > { %786 = vrot.lane.b32.xlu2 %v5002_v59, %s4679_s16 }
  0xf2   : > { %784 = vrot.lane.b32.xlu1 %v5011_v62, %s4679_s16  ;;  %782 = vrot.lane.b32.xlu0 %v5016_v15, %s4679_s16 }
  0xf3   : > { %v5385_v0 = vpop.permute.xlu2 %687 }
  0xf4   : > { %9863 = vst [vmem:[#allocation76_spill] sm:$0xff] %v5385_v0  ;;  %v5387_v11 = vpop.permute.xlu1 %667  ;;  %v5389_v26 = vpop.permute.xlu0 %665  ;;  %v5404_v0 = vld [vmem:[%s4769_s13 + $0x150] sm:$0xff] }
  0xf5   : > { %9864 = vst [vmem:[#allocation77_spill] sm:$0xff] %v5387_v11  ;;  %v5407_v11 = vld [vmem:[%s4769_s13 + $0x148] sm:$0xff] }
  0xf6   : > { %9865 = vst [vmem:[#allocation78_spill] sm:$0xff] %v5389_v26  ;;  %v5410_v26 = vld [vmem:[%s4769_s13 + $0x140] sm:$0xff] }
  0xf9   : > { %792 = vrot.lane.b32.xlu2 %v5033_v49, %s4679_s16 }
  0xfa   : > { %790 = vrot.lane.b32.xlu1 %v5042_v29, %s4679_s16  ;;  %788 = vrot.lane.b32.xlu0 %v5047_v61, %s4679_s16 }
  0xfb   : > { %v5397_v22 = vpop.permute.xlu2 %693 }
  0xfc   : > { %9866 = vst [vmem:[#allocation79_spill] sm:$0xff] %v5397_v22  ;;  %v5399_v14 = vpop.permute.xlu1 %673  ;;  %v5401_v7 = vpop.permute.xlu0 %671 }
  0xfd   : > { %9867 = vst [vmem:[#allocation80_spill] sm:$0xff] %v5399_v14 }
  0xfe   : > { %9868 = vst [vmem:[#allocation81_spill] sm:$0xff] %v5401_v7 }
 0x101   : > { %798 = vrot.lane.b32.xlu2 %v5404_v0, %s4679_s16 }
 0x102   : > { %796 = vrot.lane.b32.xlu1 %v5407_v11, %s4679_s16  ;;  %794 = vrot.lane.b32.xlu0 %v5410_v26, %s4679_s16 }
 0x103   : > { %v5418_v22 = vpop.permute.xlu2 %699 }
 0x104   : > { %9869 = vst [vmem:[#allocation82_spill] sm:$0xff] %v5418_v22  ;;  %v5420_v14 = vpop.permute.xlu1 %679  ;;  %v5422_v7 = vpop.permute.xlu0 %677 }
 0x105   : > { %9870 = vst [vmem:[#allocation83_spill] sm:$0xff] %v5420_v14 }
 0x106   : > { %9871 = vst [vmem:[#allocation84_spill] sm:$0xff] %v5422_v7  ;;  %v9887_v7 = vld [vmem:[#allocation2_spill] sm:$0xff] }
 0x109   : > { %842 = vrot.lane.b32.xlu2 %v4813_v19, %s4680_s17 }
 0x10a   : > { %840 = vrot.lane.b32.xlu1 %v4798_v12, %s4680_s17  ;;  %838 = vrot.lane.b32.xlu0 %v4816_v20, %s4680_s17 }
 0x10b   : > { %v5430_v33 = vpop.permute.xlu2 %705 }
 0x10c   : > { %9872 = vst [vmem:[#allocation85_spill] sm:$0xff] %v5430_v33  ;;  %v5432_v1 = vpop.permute.xlu1 %685  ;;  %v5434_v5 = vpop.permute.xlu0 %683 }
 0x10d   : > { %9873 = vst [vmem:[#allocation86_spill] sm:$0xff] %v5432_v1 }
 0x10e   : > { %9874 = vst [vmem:[#allocation87_spill] sm:$0xff] %v5434_v5 }
 0x111   : > { %848 = vrot.lane.b32.xlu2 %v4841_v30, %s4680_s17 }
 0x112   : > { %846 = vrot.lane.b32.xlu1 %v4844_v31, %s4680_s17  ;;  %844 = vrot.lane.b32.xlu0 %v4853_v34, %s4680_s17 }
 0x113   : > { %v5442_v19 = vpop.permute.xlu2 %744 }
 0x114   : > { %9875 = vst [vmem:[#allocation88_spill] sm:$0xff] %v5442_v19  ;;  %v5444_v12 = vpop.permute.xlu1 %691  ;;  %v5446_v20 = vpop.permute.xlu0 %689 }
 0x115   : > { %9876 = vst [vmem:[#allocation89_spill] sm:$0xff] %v5444_v12 }
 0x116   : > { %9877 = vst [vmem:[#allocation90_spill] sm:$0xff] %v5446_v20 }
 0x119   : > { %854 = vrot.lane.b32.xlu2 %v4872_v41, %s4680_s17 }
 0x11a   : > { %852 = vrot.lane.b32.xlu1 %v4875_v42, %s4680_s17  ;;  %850 = vrot.lane.b32.xlu0 %v4884_v45, %s4680_s17 }
 0x11b   : > { %v5454_v33 = vpop.permute.xlu2 %750 }
 0x11c   : > { %9878 = vst [vmem:[#allocation91_spill] sm:$0xff] %v5454_v33  ;;  %v5456_v22 = vpop.permute.xlu1 %697  ;;  %v5458_v1 = vpop.permute.xlu0 %695 }
 0x11d   : > { %9879 = vst [vmem:[#allocation92_spill] sm:$0xff] %v5456_v22 }
 0x11e   : > { %9880 = vst [vmem:[#allocation93_spill] sm:$0xff] %v5458_v1 }
 0x121   : > { %860 = vrot.lane.b32.xlu2 %v4903_v52, %s4680_s17 }
 0x122   : > { %858 = vrot.lane.b32.xlu1 %v4906_v53, %s4680_s17  ;;  %856 = vrot.lane.b32.xlu0 %v4915_v56, %s4680_s17 }
 0x123   : > { %v5466_v12 = vpop.permute.xlu2 %756 }
 0x124   : > { %9881 = vst [vmem:[#allocation94_spill] sm:$0xff] %v5466_v12  ;;  %v5468_v20 = vpop.permute.xlu1 %703  ;;  %v5470_v5 = vpop.permute.xlu0 %701 }
 0x125   : > { %9882 = vst [vmem:[#allocation95_spill] sm:$0xff] %v5468_v20  ;;  %v9888_v20 = vld [vmem:[#allocation3_spill] sm:$0xff] }
 0x126   : > { %9883 = vst [vmem:[#allocation96_spill] sm:$0xff] %v5470_v5  ;;  %v9889_v5 = vld [vmem:[#allocation4_spill] sm:$0xff] }
 0x129   : > { %866 = vrot.lane.b32.xlu2 %v4934_v63, %s4680_s17 }
 0x12a   : > { %864 = vrot.lane.b32.xlu1 %v4937_v3, %s4680_s17  ;;  %862 = vrot.lane.b32.xlu0 %v4946_v8, %s4680_s17 }
 0x12b   : > { %v5478_v22 = vpop.permute.xlu2 %762 }
 0x12c   : > { %9884 = vst [vmem:[#allocation97_spill] sm:$0xff] %v5478_v22  ;;  %v5480_v1 = vpop.permute.xlu1 %742  ;;  %v5482_v14 = vpop.permute.xlu0 %740  ;;  %v9893_v22 = vld [vmem:[#allocation5_spill] sm:$0xff] }
 0x12d   : > { %9885 = vst [vmem:[#allocation98_spill] sm:$0xff] %v5480_v1  ;;  %v9894_v1 = vld [vmem:[#allocation6_spill] sm:$0xff] }
 0x12e   : > { %9886 = vst [vmem:[#allocation99_spill] sm:$0xff] %v5482_v14  ;;  %v9895_v14 = vld [vmem:[#allocation7_spill] sm:$0xff] }
 0x131   : > { %872 = vrot.lane.b32.xlu2 %v9887_v7, %s4680_s17 }
 0x132   : > { %870 = vrot.lane.b32.xlu1 %v9888_v20, %s4680_s17  ;;  %868 = vrot.lane.b32.xlu0 %v9889_v5, %s4680_s17 }
 0x133   : > { %v5490_v12 = vpop.permute.xlu2 %768 }
 0x134   : > { %9890 = vst [vmem:[#allocation100_spill] sm:$0xff] %v5490_v12  ;;  %v5492_v33 = vpop.permute.xlu1 %748  ;;  %v5494_v19 = vpop.permute.xlu0 %746  ;;  %v9899_v12 = vld [vmem:[#allocation8_spill] sm:$0xff] }
 0x135   : > { %9891 = vst [vmem:[#allocation101_spill] sm:$0xff] %v5492_v33  ;;  %v9900_v33 = vld [vmem:[#allocation9_spill] sm:$0xff] }
 0x136   : > { %9892 = vst [vmem:[#allocation102_spill] sm:$0xff] %v5494_v19  ;;  %v9901_v19 = vld [vmem:[#allocation10_spill] sm:$0xff] }
 0x139   : > { %878 = vrot.lane.b32.xlu2 %v9893_v22, %s4680_s17 }
 0x13a   : > { %876 = vrot.lane.b32.xlu1 %v9894_v1, %s4680_s17  ;;  %874 = vrot.lane.b32.xlu0 %v9895_v14, %s4680_s17 }
 0x13b   : > { %v5502_v44 = vpop.permute.xlu2 %774 }
 0x13c   : > { %9896 = vst [vmem:[#allocation103_spill] sm:$0xff] %v5502_v44  ;;  %v5504_v20 = vpop.permute.xlu1 %754  ;;  %v5506_v5 = vpop.permute.xlu0 %752  ;;  %v5521_v44 = vld [vmem:[%s4769_s13 + $0x158] sm:$0x3] }
 0x13d   : > { %9897 = vst [vmem:[#allocation104_spill] sm:$0xff] %v5504_v20  ;;  %v9905_v20 = vld [vmem:[#allocation11_spill] sm:$0xff] }
 0x13e   : > { %9898 = vst [vmem:[#allocation105_spill] sm:$0xff] %v5506_v5  ;;  %v834_v5 = vrot.slane %v5404_v0, 1 }
 0x141   : > { %884 = vrot.lane.b32.xlu2 %v9899_v12, %s4680_s17 }
 0x142   : > { %882 = vrot.lane.b32.xlu1 %v9900_v33, %s4680_s17  ;;  %880 = vrot.lane.b32.xlu0 %v9901_v19, %s4680_s17  ;;  %v836_v33 = vrot.slane %v5521_v44, 1  ;;  %v831_v19 = vrot.slane %v5410_v26, 1 }
 0x143   : > { %v5514_v22 = vpop.permute.xlu2 %780 }
 0x144   : > { %9902 = vst [vmem:[#allocation106_spill] sm:$0xff] %v5514_v22  ;;  %v5516_v1 = vpop.permute.xlu1 %760  ;;  %v5518_v14 = vpop.permute.xlu0 %758 }
 0x145   : > { %9903 = vst [vmem:[#allocation107_spill] sm:$0xff] %v5516_v1  ;;  %v832_v1 = vrot.slane %v5407_v11, 1 }
 0x146   : > { %9904 = vst [vmem:[#allocation108_spill] sm:$0xff] %v5518_v14 }
 0x147   : > { %v5546_v7 = vsel %vm415_vm0, %v831_v19, %v832_v1 }
 0x149   : > { %890 = vrot.lane.b32.xlu2 %v9905_v20, %s4680_s17  ;;  %v5540_v20 = vsel %vm415_vm0, %v834_v5, %v836_v33 }
 0x14a   : > { %888 = vrot.lane.b32.xlu1 %v5061_v40, %s4680_s17  ;;  %886 = vrot.lane.b32.xlu0 %v5064_v23, %s4680_s17  ;;  %v5543_v40 = vsel %vm415_vm0, %v832_v1, %v834_v5 }
 0x14b   : > { %v5531_v22 = vpop.permute.xlu2 %786 }
 0x14c   : > { %9906 = vst [vmem:[#allocation109_spill] sm:$0xff] %v5531_v22  ;;  %v5534_v14 = vpop.permute.xlu1 %766  ;;  %v5537_v12 = vpop.permute.xlu0 %764 }
 0x14d   : > { %9907 = vst [vmem:[#allocation110_spill] sm:$0xff] %v5534_v14 }
 0x14e   : > { %9908 = vst [vmem:[#allocation111_spill] sm:$0xff] %v5537_v12 }
 0x151   : > { %896 = vrot.lane.b32.xlu2 %v5540_v20, %s4680_s17 }
 0x152   : > { %894 = vrot.lane.b32.xlu1 %v5543_v40, %s4680_s17  ;;  %892 = vrot.lane.b32.xlu0 %v5546_v7, %s4680_s17 }
 0x153   : > { %v5554_v22 = vpop.permute.xlu2 %792 }
 0x154   : > { %9909 = vst [vmem:[#allocation112_spill] sm:$0xff] %v5554_v22  ;;  %v5556_v14 = vpop.permute.xlu1 %772  ;;  %v5558_v33 = vpop.permute.xlu0 %770  ;;  %v9915_v22 = vld [vmem:[#allocation14_spill] sm:$0xff] }
 0x155   : > { %9910 = vst [vmem:[#allocation113_spill] sm:$0xff] %v5556_v14 }
 0x156   : > { %9911 = vst [vmem:[#allocation114_spill] sm:$0xff] %v5558_v33 }
 0x159   : > { %939 = vrot.lane.b32.xlu2 %v5087_v48, %s4681_s18 }
 0x15a   : > { %937 = vrot.lane.b32.xlu1 %v5090_v50, %s4681_s18  ;;  %935 = vrot.lane.b32.xlu0 %v5093_v16, %s4681_s18 }
 0x15b   : > { %v5566_v5 = vpop.permute.xlu2 %798 }
 0x15c   : > { %9912 = vst [vmem:[#allocation115_spill] sm:$0xff] %v5566_v5  ;;  %v5568_v1 = vpop.permute.xlu1 %778  ;;  %v5570_v19 = vpop.permute.xlu0 %776  ;;  %v9919_v5 = vld [vmem:[#allocation16_spill] sm:$0xff] }
 0x15d   : > { %9913 = vst [vmem:[#allocation116_spill] sm:$0xff] %v5568_v1  ;;  %v9920_v1 = vld [vmem:[#allocation17_spill] sm:$0xff] }
 0x15e   : > { %9914 = vst [vmem:[#allocation117_spill] sm:$0xff] %v5570_v19  ;;  %v9921_v19 = vld [vmem:[#allocation18_spill] sm:$0xff] }
 0x161   : > { %945 = vrot.lane.b32.xlu2 %v5108_v2, %s4681_s18 }
 0x162   : > { %943 = vrot.lane.b32.xlu1 %v9915_v22, %s4681_s18  ;;  %941 = vrot.lane.b32.xlu0 %v5114_v9, %s4681_s18 }
 0x163   : > { %v5578_v48 = vpop.permute.xlu2 %842 }
 0x164   : > { %9916 = vst [vmem:[#allocation14_spill] sm:$0xff] %v5578_v48  ;;  %v5580_v50 = vpop.permute.xlu1 %784  ;;  %v5582_v16 = vpop.permute.xlu0 %782  ;;  %v9925_v48 = vld [vmem:[#allocation20_spill] sm:$0xff] }
 0x165   : > { %9917 = vst [vmem:[#allocation118_spill] sm:$0xff] %v5580_v50  ;;  %v9926_v50 = vld [vmem:[#allocation21_spill] sm:$0xff] }
 0x166   : > { %9918 = vst [vmem:[#allocation119_spill] sm:$0xff] %v5582_v16 }
 0x169   : > { %951 = vrot.lane.b32.xlu2 %v9919_v5, %s4681_s18 }
 0x16a   : > { %949 = vrot.lane.b32.xlu1 %v9920_v1, %s4681_s18  ;;  %947 = vrot.lane.b32.xlu0 %v9921_v19, %s4681_s18 }
 0x16b   : > { %v5590_v14 = vpop.permute.xlu2 %848 }
 0x16c   : > { %9922 = vst [vmem:[#allocation16_spill] sm:$0xff] %v5590_v14  ;;  %v5592_v33 = vpop.permute.xlu1 %790  ;;  %v5594_v12 = vpop.permute.xlu0 %788  ;;  %v9930_v14 = vld [vmem:[#allocation26_spill] sm:$0xff] }
 0x16d   : > { %9923 = vst [vmem:[#allocation120_spill] sm:$0xff] %v5592_v33  ;;  %v9931_v33 = vld [vmem:[#allocation27_spill] sm:$0xff] }
 0x16e   : > { %9924 = vst [vmem:[#allocation121_spill] sm:$0xff] %v5594_v12 }
 0x171   : > { %957 = vrot.lane.b32.xlu2 %v9925_v48, %s4681_s18 }
 0x172   : > { %955 = vrot.lane.b32.xlu1 %v9926_v50, %s4681_s18  ;;  %953 = vrot.lane.b32.xlu0 %v5156_v17, %s4681_s18 }
 0x173   : > { %v5602_v16 = vpop.permute.xlu2 %854 }
 0x174   : > { %9927 = vst [vmem:[#allocation20_spill] sm:$0xff] %v5602_v16  ;;  %v5604_v1 = vpop.permute.xlu1 %796  ;;  %v5606_v19 = vpop.permute.xlu0 %794  ;;  %v9935_v16 = vld [vmem:[#allocation32_spill] sm:$0xff] }
 0x175   : > { %9928 = vst [vmem:[#allocation122_spill] sm:$0xff] %v5604_v1  ;;  %v9936_v1 = vld [vmem:[#allocation33_spill] sm:$0xff] }
 0x176   : > { %9929 = vst [vmem:[#allocation123_spill] sm:$0xff] %v5606_v19 }
 0x179   : > { %963 = vrot.lane.b32.xlu2 %v9930_v14, %s4681_s18 }
 0x17a   : > { %961 = vrot.lane.b32.xlu1 %v9931_v33, %s4681_s18  ;;  %959 = vrot.lane.b32.xlu0 %v5181_v55, %s4681_s18 }
 0x17b   : > { %v5614_v12 = vpop.permute.xlu2 %860 }
 0x17c   : > { %9932 = vst [vmem:[#allocation26_spill] sm:$0xff] %v5614_v12  ;;  %v5616_v50 = vpop.permute.xlu1 %840  ;;  %v5618_v17 = vpop.permute.xlu0 %838  ;;  %v9940_v12 = vld [vmem:[#allocation38_spill] sm:$0xff] }
 0x17d   : > { %9933 = vst [vmem:[#allocation124_spill] sm:$0xff] %v5616_v50  ;;  %v9941_v50 = vld [vmem:[#allocation39_spill] sm:$0xff] }
 0x17e   : > { %9934 = vst [vmem:[#allocation125_spill] sm:$0xff] %v5618_v17 }
 0x181   : > { %969 = vrot.lane.b32.xlu2 %v9935_v16, %s4681_s18 }
 0x182   : > { %967 = vrot.lane.b32.xlu1 %v9936_v1, %s4681_s18  ;;  %965 = vrot.lane.b32.xlu0 %v5206_v6, %s4681_s18 }
 0x183   : > { %v5626_v19 = vpop.permute.xlu2 %866 }
 0x184   : > { %9937 = vst [vmem:[#allocation32_spill] sm:$0xff] %v5626_v19  ;;  %v5628_v33 = vpop.permute.xlu1 %846  ;;  %v5630_v55 = vpop.permute.xlu0 %844  ;;  %v9945_v19 = vld [vmem:[#allocation44_spill] sm:$0xff] }
 0x185   : > { %9938 = vst [vmem:[#allocation126_spill] sm:$0xff] %v5628_v33  ;;  %v9946_v33 = vld [vmem:[#allocation45_spill] sm:$0xff] }
 0x186   : > { %9939 = vst [vmem:[#allocation127_spill] sm:$0xff] %v5630_v55 }
 0x189   : > { %975 = vrot.lane.b32.xlu2 %v9940_v12, %s4681_s18 }
 0x18a   : > { %973 = vrot.lane.b32.xlu1 %v9941_v50, %s4681_s18  ;;  %971 = vrot.lane.b32.xlu0 %v5231_v28, %s4681_s18 }
 0x18b   : > { %v5638_v17 = vpop.permute.xlu2 %872 }
 0x18c   : > { %9942 = vst [vmem:[#allocation38_spill] sm:$0xff] %v5638_v17  ;;  %v5640_v1 = vpop.permute.xlu1 %852  ;;  %v5642_v6 = vpop.permute.xlu0 %850  ;;  %v931_v17 = vrot.slane %v5404_v0, 2 }
 0x18d   : > { %9943 = vst [vmem:[#allocation128_spill] sm:$0xff] %v5640_v1  ;;  %v933_v1 = vrot.slane %v5521_v44, 2 }
 0x18e   : > { %9944 = vst [vmem:[#allocation129_spill] sm:$0xff] %v5642_v6  ;;  %v929_v6 = vrot.slane %v5407_v11, 2 }
 0x191   : > { %981 = vrot.lane.b32.xlu2 %v9945_v19, %s4681_s18 }
 0x192   : > { %979 = vrot.lane.b32.xlu1 %v9946_v33, %s4681_s18  ;;  %977 = vrot.lane.b32.xlu0 %v5256_v60, %s4681_s18 }
 0x193   : > { %v5650_v55 = vpop.permute.xlu2 %878 }
 0x194   : > { %9947 = vst [vmem:[#allocation44_spill] sm:$0xff] %v5650_v55  ;;  %v5652_v50 = vpop.permute.xlu1 %858  ;;  %v5654_v28 = vpop.permute.xlu0 %856 }
 0x195   : > { %9948 = vst [vmem:[#allocation45_spill] sm:$0xff] %v5652_v50  ;;  %v928_v50 = vrot.slane %v5410_v26, 2 }
 0x196   : > { %9949 = vst [vmem:[#allocation130_spill] sm:$0xff] %v5654_v28 }
 0x197   : > { %v5679_v44 = vsel %vm576_vm1, %v928_v50, %v929_v6 }
 0x199   : > { %987 = vrot.lane.b32.xlu2 %v5275_v18, %s4681_s18  ;;  %v5673_v18 = vsel %vm576_vm1, %v931_v17, %v933_v1 }
 0x19a   : > { %985 = vrot.lane.b32.xlu1 %v5278_v39, %s4681_s18  ;;  %983 = vrot.lane.b32.xlu0 %v5281_v51, %s4681_s18  ;;  %v5676_v39 = vsel %vm576_vm1, %v929_v6, %v931_v17 }
 0x19b   : > { %v5665_v55 = vpop.permute.xlu2 %884 }
 0x19c   : > { %9950 = vst [vmem:[#allocation131_spill] sm:$0xff] %v5665_v55  ;;  %v5668_v28 = vpop.permute.xlu1 %864  ;;  %v5670_v60 = vpop.permute.xlu0 %862 }
 0x19d   : > { %9951 = vst [vmem:[#allocation132_spill] sm:$0xff] %v5668_v28 }
 0x19e   : > { %9952 = vst [vmem:[#allocation133_spill] sm:$0xff] %v5670_v60  ;;  %v6223_v60 = vld [vmem:[%s6068_s11 + $0x90] sm:$0xff] }
 0x1a1   : > { %993 = vrot.lane.b32.xlu2 %v5673_v18, %s4681_s18 }
 0x1a2   : > { %991 = vrot.lane.b32.xlu1 %v5676_v39, %s4681_s18  ;;  %989 = vrot.lane.b32.xlu0 %v5679_v44, %s4681_s18 }
 0x1a3   : > { %v5687_v55 = vpop.permute.xlu2 %890 }
 0x1a4   : > { %9953 = vst [vmem:[#allocation134_spill] sm:$0xff] %v5687_v55  ;;  %v5689_v28 = vpop.permute.xlu1 %870  ;;  %v5691_v1 = vpop.permute.xlu0 %868 }
 0x1a5   : > { %9954 = vst [vmem:[#allocation135_spill] sm:$0xff] %v5689_v28  ;;  %v6111_v28 = vld [vmem:[%s6068_s11 + $0x38] sm:$0x3] }
 0x1a6   : > { %9955 = vst [vmem:[#allocation136_spill] sm:$0xff] %v5691_v1 }
 0x1a9   : > { %1032 = vrot.lane.b32.xlu2 %v4819_v21, %s4682_s19 }
 0x1aa   : > { %1030 = vrot.lane.b32.xlu1 %v4826_v24, %s4682_s19  ;;  %1028 = vrot.lane.b32.xlu0 %v4831_v25, %s4682_s19 }
 0x1ab   : > { %v5699_v17 = vpop.permute.xlu2 %896 }
 0x1ac   : > { %9956 = vst [vmem:[#allocation137_spill] sm:$0xff] %v5699_v17  ;;  %v5701_v6 = vpop.permute.xlu1 %876  ;;  %v5703_v50 = vpop.permute.xlu0 %874  ;;  %v5802_v17 = vld [vmem:[%s4769_s13 + $0x170] sm:$0xff] }
 0x1ad   : > { %9957 = vst [vmem:[#allocation138_spill] sm:$0xff] %v5701_v6  ;;  %v9999_v6 = vld [vmem:[#allocation12_spill] sm:$0xff] }
 0x1ae   : > { %9958 = vst [vmem:[#allocation139_spill] sm:$0xff] %v5703_v50 }
 0x1b1   : > { %1038 = vrot.lane.b32.xlu2 %v4847_v32, %s4682_s19 }
 0x1b2   : > { %1036 = vrot.lane.b32.xlu1 %v4856_v35, %s4682_s19  ;;  %1034 = vrot.lane.b32.xlu0 %v4861_v36, %s4682_s19 }
 0x1b3   : > { %v5711_v21 = vpop.permute.xlu2 %939 }
 0x1b4   : > { %v5713_v24 = vpop.permute.xlu1 %882  ;;  %v5715_v25 = vpop.permute.xlu0 %880 }
 0x1b5   : > { %9959 = vst [vmem:[#allocation140_spill] sm:$0xff] %v5713_v24 }
 0x1b6   : > { %9960 = vst [vmem:[#allocation141_spill] sm:$0xff] %v5715_v25 }
 0x1b9   : > { %1044 = vrot.lane.b32.xlu2 %v4878_v43, %s4682_s19 }
 0x1ba   : > { %1042 = vrot.lane.b32.xlu1 %v4887_v46, %s4682_s19  ;;  %1040 = vrot.lane.b32.xlu0 %v4892_v47, %s4682_s19 }
 0x1bb   : > { %v5723_v32 = vpop.permute.xlu2 %945 }
 0x1bc   : > { %v5725_v35 = vpop.permute.xlu1 %888  ;;  %v5727_v36 = vpop.permute.xlu0 %886 }
 0x1bd   : > { %9961 = vst [vmem:[#allocation142_spill] sm:$0xff] %v5725_v35 }
 0x1be   : > { %9962 = vst [vmem:[#allocation143_spill] sm:$0xff] %v5727_v36 }
 0x1c1   : > { %1050 = vrot.lane.b32.xlu2 %v4909_v54, %s4682_s19 }
 0x1c2   : > { %1048 = vrot.lane.b32.xlu1 %v4918_v57, %s4682_s19  ;;  %1046 = vrot.lane.b32.xlu0 %v4923_v58, %s4682_s19 }
 0x1c3   : > { %v5735_v43 = vpop.permute.xlu2 %951 }
 0x1c4   : > { %v5737_v46 = vpop.permute.xlu1 %894  ;;  %v5739_v47 = vpop.permute.xlu0 %892 }
 0x1c5   : > { %9963 = vst [vmem:[#allocation144_spill] sm:$0xff] %v5737_v46  ;;  %v5805_v46 = vld [vmem:[%s4769_s13 + $0x168] sm:$0xff] }
 0x1c6   : > { %9964 = vst [vmem:[#allocation145_spill] sm:$0xff] %v5739_v47  ;;  %v5808_v47 = vld [vmem:[%s4769_s13 + $0x160] sm:$0xff] }
 0x1c9   : > { %1056 = vrot.lane.b32.xlu2 %v4940_v4, %s4682_s19 }
 0x1ca   : > { %1054 = vrot.lane.b32.xlu1 %v4949_v10, %s4682_s19  ;;  %1052 = vrot.lane.b32.xlu0 %v4954_v13, %s4682_s19 }
 0x1cb   : > { %v5747_v54 = vpop.permute.xlu2 %957 }
 0x1cc   : > { %9965 = vst [vmem:[#allocation146_spill] sm:$0xff] %v5747_v54  ;;  %v5749_v57 = vpop.permute.xlu1 %937  ;;  %v5751_v58 = vpop.permute.xlu0 %935 }
 0x1d1   : > { %1062 = vrot.lane.b32.xlu2 %v4971_v27, %s4682_s19 }
 0x1d2   : > { %1060 = vrot.lane.b32.xlu1 %v4980_v37, %s4682_s19  ;;  %1058 = vrot.lane.b32.xlu0 %v4985_v38, %s4682_s19 }
 0x1d3   : > { %v5759_v4 = vpop.permute.xlu2 %963 }
 0x1d4   : > { %9966 = vst [vmem:[#allocation147_spill] sm:$0xff] %v5759_v4  ;;  %v5761_v10 = vpop.permute.xlu1 %943  ;;  %v5763_v13 = vpop.permute.xlu0 %941 }
 0x1d9   : > { %1068 = vrot.lane.b32.xlu2 %v5002_v59, %s4682_s19 }
 0x1da   : > { %1066 = vrot.lane.b32.xlu1 %v5011_v62, %s4682_s19  ;;  %1064 = vrot.lane.b32.xlu0 %v5016_v15, %s4682_s19 }
 0x1db   : > { %v5771_v27 = vpop.permute.xlu2 %969 }
 0x1dc   : > { %9967 = vst [vmem:[#allocation148_spill] sm:$0xff] %v5771_v27  ;;  %v5773_v37 = vpop.permute.xlu1 %949  ;;  %v5775_v38 = vpop.permute.xlu0 %947 }
 0x1e1   : > { %1074 = vrot.lane.b32.xlu2 %v5033_v49, %s4682_s19 }
 0x1e2   : > { %1072 = vrot.lane.b32.xlu1 %v5042_v29, %s4682_s19  ;;  %1070 = vrot.lane.b32.xlu0 %v5047_v61, %s4682_s19 }
 0x1e3   : > { %v5783_v59 = vpop.permute.xlu2 %975 }
 0x1e4   : > { %9968 = vst [vmem:[#allocation149_spill] sm:$0xff] %v5783_v59  ;;  %v5785_v62 = vpop.permute.xlu1 %955  ;;  %v5787_v15 = vpop.permute.xlu0 %953  ;;  %v9994_v59 = vld [vmem:[#allocation8_spill] sm:$0xff] }
 0x1e5   : > { %9969 = vst [vmem:[#allocation150_spill] sm:$0xff] %v5785_v62 }
 0x1e6   : > { %9970 = vst [vmem:[#allocation151_spill] sm:$0xff] %v5787_v15 }
 0x1e9   : > { %1080 = vrot.lane.b32.xlu2 %v5404_v0, %s4682_s19 }
 0x1ea   : > { %1078 = vrot.lane.b32.xlu1 %v5407_v11, %s4682_s19  ;;  %1076 = vrot.lane.b32.xlu0 %v5410_v26, %s4682_s19 }
 0x1eb   : > { %v5795_v49 = vpop.permute.xlu2 %981 }
 0x1ec   : > { %9971 = vst [vmem:[#allocation152_spill] sm:$0xff] %v5795_v49  ;;  %v5797_v29 = vpop.permute.xlu1 %961  ;;  %v5799_v61 = vpop.permute.xlu0 %959  ;;  %v9991_v49 = vld [vmem:[#allocation6_spill] sm:$0xff] }
 0x1ed   : > { %9972 = vst [vmem:[#allocation153_spill] sm:$0xff] %v5797_v29  ;;  %v6189_v29 = vld [vmem:[%s6068_s11 + $0x78] sm:$0x3] }
 0x1ee   : > { %9973 = vst [vmem:[#allocation154_spill] sm:$0xff] %v5799_v61 }
 0x1f1   : > { %1086 = vrot.lane.b32.xlu2 %v5802_v17, %s4682_s19 }
 0x1f2   : > { %1084 = vrot.lane.b32.xlu1 %v5805_v46, %s4682_s19  ;;  %1082 = vrot.lane.b32.xlu0 %v5808_v47, %s4682_s19 }
 0x1f3   : > { %v5816_v26 = vpop.permute.xlu2 %987 }
 0x1f4   : > { %9974 = vst [vmem:[#allocation155_spill] sm:$0xff] %v5816_v26  ;;  %v5818_v11 = vpop.permute.xlu1 %967  ;;  %v5820_v0 = vpop.permute.xlu0 %965  ;;  %v9987_v26 = vld [vmem:[#allocation3_spill] sm:$0xff] }
 0x1f5   : > { %9975 = vst [vmem:[#allocation156_spill] sm:$0xff] %v5818_v11 }
 0x1f6   : > { %9976 = vst [vmem:[#allocation157_spill] sm:$0xff] %v5820_v0  ;;  %v6118_v0 = vld [vmem:[%s6068_s11 + $0x28] sm:$0xff] }
 0x1f9   : > { %1130 = vrot.lane.b32.xlu2 %v4841_v30, %s4683_s20 }
 0x1fa   : > { %1128 = vrot.lane.b32.xlu1 %v4844_v31, %s4683_s20  ;;  %1126 = vrot.lane.b32.xlu0 %v4853_v34, %s4683_s20 }
 0x1fb   : > { %v5828_v55 = vpop.permute.xlu2 %993 }
 0x1fc   : > { %9977 = vst [vmem:[#allocation158_spill] sm:$0xff] %v5828_v55  ;;  %v5830_v35 = vpop.permute.xlu1 %973  ;;  %v5832_v36 = vpop.permute.xlu0 %971  ;;  %v9986_v55 = vld [vmem:[#allocation2_spill] sm:$0xff] }
 0x1fd   : > { %9978 = vst [vmem:[#allocation159_spill] sm:$0xff] %v5830_v35  ;;  %v9998_v35 = vld [vmem:[#allocation11_spill] sm:$0xff] }
 0x1fe   : > { %9979 = vst [vmem:[#allocation160_spill] sm:$0xff] %v5832_v36  ;;  %v5924_v36 = vld [vmem:[%s4769_s13 + $0x178] sm:$0x3] }
 0x201   : > { %1136 = vrot.lane.b32.xlu2 %v4872_v41, %s4683_s20 }
 0x202   : > { %1134 = vrot.lane.b32.xlu1 %v4875_v42, %s4683_s20  ;;  %1132 = vrot.lane.b32.xlu0 %v4884_v45, %s4683_s20 }
 0x203   : > { %v5840_v30 = vpop.permute.xlu2 %1032 }
 0x204   : > { %v5842_v31 = vpop.permute.xlu1 %979  ;;  %v5844_v34 = vpop.permute.xlu0 %977 }
 0x205   : > { %9980 = vst [vmem:[#allocation161_spill] sm:$0xff] %v5842_v31  ;;  %v9992_v31 = vld [vmem:[#allocation7_spill] sm:$0xff] }
 0x206   : > { %9981 = vst [vmem:[#allocation162_spill] sm:$0xff] %v5844_v34 }
 0x209   : > { %1142 = vrot.lane.b32.xlu2 %v4903_v52, %s4683_s20 }
 0x20a   : > { %1140 = vrot.lane.b32.xlu1 %v4906_v53, %s4683_s20  ;;  %1138 = vrot.lane.b32.xlu0 %v4915_v56, %s4683_s20 }
 0x20b   : > { %v5852_v41 = vpop.permute.xlu2 %1038 }
 0x20c   : > { %v5854_v42 = vpop.permute.xlu1 %985  ;;  %v5856_v45 = vpop.permute.xlu0 %983 }
 0x20d   : > { %9982 = vst [vmem:[#allocation163_spill] sm:$0xff] %v5854_v42 }
 0x20e   : > { %9983 = vst [vmem:[#allocation164_spill] sm:$0xff] %v5856_v45  ;;  %v1120_v45 = vrot.slane %v5805_v46, 1 }
 0x211   : > { %1148 = vrot.lane.b32.xlu2 %v4934_v63, %s4683_s20  ;;  %v9988_v63 = vld [vmem:[#allocation4_spill] sm:$0xff] }
 0x212   : > { %1146 = vrot.lane.b32.xlu1 %v4937_v3, %s4683_s20  ;;  %1144 = vrot.lane.b32.xlu0 %v4946_v8, %s4683_s20  ;;  %v1122_v8 = vrot.slane %v5802_v17, 1 }
 0x213   : > { %v5864_v52 = vpop.permute.xlu2 %1044 }
 0x214   : > { %v5866_v53 = vpop.permute.xlu1 %991  ;;  %v5868_v56 = vpop.permute.xlu0 %989 }
 0x215   : > { %9984 = vst [vmem:[#allocation165_spill] sm:$0xff] %v5866_v53 }
 0x216   : > { %9985 = vst [vmem:[#allocation166_spill] sm:$0xff] %v5868_v56  ;;  %v1119_v56 = vrot.slane %v5808_v47, 1 }
 0x219   : > { %1154 = vrot.lane.b32.xlu2 %v9986_v55, %s4683_s20  ;;  %v9990_v55 = vld [vmem:[#allocation5_spill] sm:$0xff] }
 0x21a   : > { %1152 = vrot.lane.b32.xlu1 %v9987_v26, %s4683_s20  ;;  %1150 = vrot.lane.b32.xlu0 %v9988_v63, %s4683_s20  ;;  %v1123_v26 = vsel %vm415_vm0, %v1120_v45, %v1122_v8  ;;  %v1121_v63 = vsel %vm415_vm0, %v1119_v56, %v1120_v45 }
 0x21b   : > { %v5876_v42 = vpop.permute.xlu2 %1050 }
 0x21c   : > { %9989 = vst [vmem:[#allocation2_spill] sm:$0xff] %v5876_v42  ;;  %v5878_v3 = vpop.permute.xlu1 %1030  ;;  %v5882_v53 = vpop.permute.xlu0 %1028  ;;  %v6232_v42 = vld [vmem:[%s6068_s11 + $0x88] sm:$0xff] }
 0x21d   : > { %10059 = vst [vmem:[#allocation192_spill] sm:$0xff] %v6232_v42 }
 0x221   : > { %1160 = vrot.lane.b32.xlu2 %v9990_v55, %s4683_s20  ;;  %v9995_v55 = vld [vmem:[#allocation9_spill] sm:$0xff] }
 0x222   : > { %1158 = vrot.lane.b32.xlu1 %v9991_v49, %s4683_s20  ;;  %1156 = vrot.lane.b32.xlu0 %v9992_v31, %s4683_s20  ;;  %v9996_v49 = vld [vmem:[#allocation10_spill] sm:$0xff] }
 0x223   : > { %v5893_v24 = vpop.permute.xlu2 %1056 }
 0x224   : > { %9993 = vst [vmem:[#allocation3_spill] sm:$0xff] %v5893_v24  ;;  %v5895_v34 = vpop.permute.xlu1 %1036  ;;  %v5897_v25 = vpop.permute.xlu0 %1034  ;;  %v6152_v24 = vld [vmem:[%s6068_s11 + $0x58] sm:$0x3] }
 0x229   : > { %1166 = vrot.lane.b32.xlu2 %v9994_v59, %s4683_s20 }
 0x22a   : > { %1164 = vrot.lane.b32.xlu1 %v9995_v55, %s4683_s20  ;;  %1162 = vrot.lane.b32.xlu0 %v9996_v49, %s4683_s20 }
 0x22b   : > { %v5905_v45 = vpop.permute.xlu2 %1062 }
 0x22c   : > { %9997 = vst [vmem:[#allocation4_spill] sm:$0xff] %v5905_v45  ;;  %v5907_v56 = vpop.permute.xlu1 %1042  ;;  %v5909_v31 = vpop.permute.xlu0 %1040 }
 0x231   : > { %1172 = vrot.lane.b32.xlu2 %v9998_v35, %s4683_s20  ;;  %v1124_v35 = vrot.slane %v5924_v36, 1 }
 0x232   : > { %1170 = vrot.lane.b32.xlu1 %v9999_v6, %s4683_s20  ;;  %1168 = vrot.lane.b32.xlu0 %v5064_v23, %s4683_s20 }
 0x233   : > { %v5917_v59 = vpop.permute.xlu2 %1068  ;;  %v1125_v50 = vsel %vm415_vm0, %v1122_v8, %v1124_v35  ;;  %v10016_v35 = vld [vmem:[#allocation21_spill] sm:$0xff] }
 0x234   : > { %10000 = vst [vmem:[#allocation5_spill] sm:$0xff] %v5917_v59  ;;  %v5919_v55 = vpop.permute.xlu1 %1048  ;;  %v5921_v49 = vpop.permute.xlu0 %1046 }
 0x235   : > { %10001 = vst [vmem:[#allocation6_spill] sm:$0xff] %v5919_v55  ;;  %v10064_v55 = vld [vmem:[#allocation25_spill] sm:$0xff] }
 0x236   : > { %10002 = vst [vmem:[#allocation7_spill] sm:$0xff] %v5921_v49  ;;  %v6266_v49 = vld [vmem:[%s6068_s11 + $0xb8] sm:$0x3] }
 0x239   : > { %1178 = vrot.lane.b32.xlu2 %v5540_v20, %s4683_s20 }
 0x23a   : > { %1176 = vrot.lane.b32.xlu1 %v5543_v40, %s4683_s20  ;;  %1174 = vrot.lane.b32.xlu0 %v5546_v7, %s4683_s20 }
 0x23b   : > { %v5933_v23 = vpop.permute.xlu2 %1074 }
 0x23c   : > { %10003 = vst [vmem:[#allocation8_spill] sm:$0xff] %v5933_v23  ;;  %v5935_v6 = vpop.permute.xlu1 %1054  ;;  %v5937_v59 = vpop.permute.xlu0 %1052 }
 0x23d   : > { %10004 = vst [vmem:[#allocation9_spill] sm:$0xff] %v5935_v6  ;;  %v6186_v6 = vld [vmem:[%s6068_s11 + $0x70] sm:$0xff] }
 0x23e   : > { %10005 = vst [vmem:[#allocation10_spill] sm:$0xff] %v5937_v59 }
 0x241   : > { %1184 = vrot.lane.b32.xlu2 %v1125_v50, %s4683_s20 }
 0x242   : > { %1182 = vrot.lane.b32.xlu1 %v1123_v26, %s4683_s20  ;;  %1180 = vrot.lane.b32.xlu0 %v1121_v63, %s4683_s20  ;;  %v10012_v26 = vld [vmem:[#allocation17_spill] sm:$0xff] }
 0x243   : > { %v5943_v40 = vpop.permute.xlu2 %1080 }
 0x244   : > { %10006 = vst [vmem:[#allocation11_spill] sm:$0xff] %v5943_v40  ;;  %v5945_v20 = vpop.permute.xlu1 %1060  ;;  %v5947_v45 = vpop.permute.xlu0 %1058  ;;  %v10020_v40 = vld [vmem:[#allocation27_spill] sm:$0xff] }
 0x245   : > { %10007 = vst [vmem:[#allocation12_spill] sm:$0xff] %v5945_v20 }
 0x246   : > { %10008 = vst [vmem:[#allocation167_spill] sm:$0xff] %v5947_v45 }
 0x249   : > { %1227 = vrot.lane.b32.xlu2 %v5108_v2, %s4684_s21  ;;  %v10013_v2 = vld [vmem:[#allocation18_spill] sm:$0xff] }
 0x24a   : > { %1225 = vrot.lane.b32.xlu1 %v9915_v22, %s4684_s21  ;;  %1223 = vrot.lane.b32.xlu0 %v5114_v9, %s4684_s21 }
 0x24b   : > { %v5955_v7 = vpop.permute.xlu2 %1086 }
 0x24c   : > { %10009 = vst [vmem:[#allocation168_spill] sm:$0xff] %v5955_v7  ;;  %v5957_v50 = vpop.permute.xlu1 %1066  ;;  %v5959_v8 = vpop.permute.xlu0 %1064 }
 0x24d   : > { %10010 = vst [vmem:[#allocation169_spill] sm:$0xff] %v5957_v50 }
 0x24e   : > { %10011 = vst [vmem:[#allocation170_spill] sm:$0xff] %v5959_v8 }
 0x251   : > { %1233 = vrot.lane.b32.xlu2 %v9919_v5, %s4684_s21  ;;  %v10017_v5 = vld [vmem:[#allocation22_spill] sm:$0xff] }
 0x252   : > { %1231 = vrot.lane.b32.xlu1 %v10012_v26, %s4684_s21  ;;  %1229 = vrot.lane.b32.xlu0 %v10013_v2, %s4684_s21 }
 0x253   : > { %v5967_v63 = vpop.permute.xlu2 %1130 }
 0x254   : > { %v5969_v22 = vpop.permute.xlu1 %1072  ;;  %v5971_v9 = vpop.permute.xlu0 %1070 }
 0x255   : > { %10014 = vst [vmem:[#allocation17_spill] sm:$0xff] %v5969_v22  ;;  %v1217_v22 = vrot.slane %v5805_v46, 2 }
 0x256   : > { %10015 = vst [vmem:[#allocation18_spill] sm:$0xff] %v5971_v9  ;;  %v10028_v9 = vld [vmem:[#allocation40_spill] sm:$0xff] }
 0x259   : > { %1239 = vrot.lane.b32.xlu2 %v9925_v48, %s4684_s21  ;;  %v10021_v48 = vld [vmem:[#allocation28_spill] sm:$0xff] }
 0x25a   : > { %1237 = vrot.lane.b32.xlu1 %v10016_v35, %s4684_s21  ;;  %1235 = vrot.lane.b32.xlu0 %v10017_v5, %s4684_s21 }
 0x25b   : > { %v5979_v7 = vpop.permute.xlu2 %1136 }
 0x25c   : > { %v5981_v26 = vpop.permute.xlu1 %1078  ;;  %v5983_v2 = vpop.permute.xlu0 %1076 }
 0x25d   : > { %10018 = vst [vmem:[#allocation21_spill] sm:$0xff] %v5981_v26  ;;  %v10024_v26 = vld [vmem:[#allocation33_spill] sm:$0xff] }
 0x25e   : > { %10019 = vst [vmem:[#allocation22_spill] sm:$0xff] %v5983_v2 }
 0x261   : > { %1245 = vrot.lane.b32.xlu2 %v9930_v14, %s4684_s21  ;;  %v10025_v14 = vld [vmem:[#allocation34_spill] sm:$0xff] }
 0x262   : > { %1243 = vrot.lane.b32.xlu1 %v10020_v40, %s4684_s21  ;;  %1241 = vrot.lane.b32.xlu0 %v10021_v48, %s4684_s21  ;;  %v1219_v48 = vrot.slane %v5802_v17, 2 }
 0x263   : > { %v5991_v23 = vpop.permute.xlu2 %1142 }
 0x264   : > { %v5993_v35 = vpop.permute.xlu1 %1084  ;;  %v5995_v5 = vpop.permute.xlu0 %1082 }
 0x265   : > { %10022 = vst [vmem:[#allocation27_spill] sm:$0xff] %v5993_v35 }
 0x266   : > { %10023 = vst [vmem:[#allocation28_spill] sm:$0xff] %v5995_v5  ;;  %v1216_v5 = vrot.slane %v5808_v47, 2 }
 0x269   : > { %1251 = vrot.lane.b32.xlu2 %v9935_v16, %s4684_s21  ;;  %v1220_v16 = vsel %vm576_vm1, %v1217_v22, %v1219_v48 }
 0x26a   : > { %1249 = vrot.lane.b32.xlu1 %v10024_v26, %s4684_s21  ;;  %1247 = vrot.lane.b32.xlu0 %v10025_v14, %s4684_s21  ;;  %v10027_v26 = vld [vmem:[#allocation39_spill] sm:$0xff]  ;;  %v1218_v14 = vsel %vm576_vm1, %v1216_v5, %v1217_v22  ;;  %v10032_v5 = vld [vmem:[#allocation50_spill] sm:$0xff] }
 0x26b   : > { %v6003_v2 = vpop.permute.xlu2 %1148 }
 0x26c   : > { %10026 = vst [vmem:[#allocation33_spill] sm:$0xff] %v6003_v2  ;;  %v6005_v40 = vpop.permute.xlu1 %1128  ;;  %v6009_v35 = vpop.permute.xlu0 %1126  ;;  %v6226_v2 = vld [vmem:[%s6068_s11 + $0x98] sm:$0x3] }
 0x271   : > { %1257 = vrot.lane.b32.xlu2 %v9940_v12, %s4684_s21  ;;  %v10030_v12 = vld [vmem:[#allocation46_spill] sm:$0xff] }
 0x272   : > { %1255 = vrot.lane.b32.xlu1 %v10027_v26, %s4684_s21  ;;  %1253 = vrot.lane.b32.xlu0 %v10028_v9, %s4684_s21  ;;  %v10033_v26 = vld [vmem:[#allocation51_spill] sm:$0xff] }
 0x273   : > { %v6020_v17 = vpop.permute.xlu2 %1154 }
 0x274   : > { %10029 = vst [vmem:[#allocation34_spill] sm:$0xff] %v6020_v17  ;;  %v6022_v46 = vpop.permute.xlu1 %1134  ;;  %v6024_v50 = vpop.permute.xlu0 %1132  ;;  %v6149_v17 = vld [vmem:[%s6068_s11 + $0x50] sm:$0xff] }
 0x279   : > { %1263 = vrot.lane.b32.xlu2 %v9945_v19, %s4684_s21 }
 0x27a   : > { %1261 = vrot.lane.b32.xlu1 %v9946_v33, %s4684_s21  ;;  %1259 = vrot.lane.b32.xlu0 %v10030_v12, %s4684_s21 }
 0x27b   : > { %v6032_v47 = vpop.permute.xlu2 %1160 }
 0x27c   : > { %10031 = vst [vmem:[#allocation39_spill] sm:$0xff] %v6032_v47  ;;  %v6034_v22 = vpop.permute.xlu1 %1140  ;;  %v6036_v9 = vpop.permute.xlu0 %1138 }
 0x281   : > { %1269 = vrot.lane.b32.xlu2 %v10032_v5, %s4684_s21  ;;  %v1221_v5 = vrot.slane %v5924_v36, 2  ;;  %v6077_v36 = vld [vmem:[%s6068_s11 + $0x18] sm:$0x3] }
 0x282   : > { %1267 = vrot.lane.b32.xlu1 %v10033_v26, %s4684_s21  ;;  %1265 = vrot.lane.b32.xlu0 %v5281_v51, %s4684_s21  ;;  %v1660_v47 = vrot.slane %v6077_v36, 1 }
 0x283   : > { %v6044_v33 = vpop.permute.xlu2 %1166 }
 0x284   : > { %10034 = vst [vmem:[#allocation40_spill] sm:$0xff] %v6044_v33  ;;  %v6046_v19 = vpop.permute.xlu1 %1146  ;;  %v6048_v12 = vpop.permute.xlu0 %1144  ;;  %v6074_v33 = vld [vmem:[%s6068_s11 + $0x10] sm:$0xff] }
 0x285   : > { %10035 = vst [vmem:[#allocation46_spill] sm:$0xff] %v6046_v19  ;;  %v1658_v8 = vrot.slane %v6074_v33, 1  ;;  %v4567_v19 = vld [vmem:[%s4769_s13] sm:$0xff] }
 0x286   : > { %10036 = vst [vmem:[#allocation50_spill] sm:$0xff] %v6048_v12  ;;  %v6263_v12 = vld [vmem:[%s6068_s11 + $0xb0] sm:$0xff] }
 0x287   : > { %v1661_v11 = vsel %vm415_vm0, %v1658_v8, %v1660_v47  ;;  %v6122_v47 = vld [vmem:[%s6068_s11 + $0x20] sm:$0xff] }
 0x289   : > { %1275 = vrot.lane.b32.xlu2 %v5673_v18, %s4684_s21 }
 0x28a   : > { %1273 = vrot.lane.b32.xlu1 %v5676_v39, %s4684_s21  ;;  %1271 = vrot.lane.b32.xlu0 %v5679_v44, %s4684_s21  ;;  %v1222_v39 = vsel %vm576_vm1, %v1219_v48, %v1221_v5  ;;  %v6080_v44 = vld [vmem:[%s6068_s11 + $0x8] sm:$0xff] }
 0x28b   : > { %v6062_v51 = vpop.permute.xlu2 %1172  ;;  %v1656_v5 = vrot.slane %v6080_v44, 1 }
 0x28c   : > { %10037 = vst [vmem:[#allocation51_spill] sm:$0xff] %v6062_v51  ;;  %v6064_v26 = vpop.permute.xlu1 %1152  ;;  %v6070_v18 = vpop.permute.xlu0 %1150  ;;  %v6084_v51 = vld [vmem:[%s6068_s11] sm:$0xff] }
 0x28d   : > { %10038 = vst [vmem:[#allocation171_spill] sm:$0xff] %v6064_v26 }
 0x28e   : > { %10039 = vst [vmem:[#allocation172_spill] sm:$0xff] %v6070_v18 }
 0x291   : > { %1281 = vrot.lane.b32.xlu2 %v1222_v39, %s4684_s21  ;;  %v1655_v39 = vrot.slane %v6084_v51, 1 }
 0x292   : > { %1279 = vrot.lane.b32.xlu1 %v1220_v16, %s4684_s21  ;;  %1277 = vrot.lane.b32.xlu0 %v1218_v14, %s4684_s21  ;;  %v1565_v16 = vld [vmem:[%s9608_s2 + $0x20] sm:$0xf]  ;;  %v1564_v14 = vld [vmem:[%s9608_s2 + $0x18] sm:$0xff] }
 0x293   : > { %v6090_v48 = vpop.permute.xlu2 %1178  ;;  %4415 = vmatpush.msk.msra.mxu1 %vm9783_vm2, %v1565_v16  ;;  %v1657_v45 = vsel %vm415_vm0, %v1655_v39, %v1656_v5  ;;  %v1667_v16 = vrot.slane %v6111_v28, 1  ;;  %v1663_v39 = vrot.slane %v6118_v0, 1 }
 0x294   : > { %10040 = vst [vmem:[#allocation173_spill] sm:$0xff] %v6090_v48  ;;  %v6093_v27 = vpop.permute.xlu1 %1158  ;;  %v6096_v20 = vpop.permute.xlu0 %1156  ;;  %v1659_v48 = vsel %vm415_vm0, %v1656_v5, %v1658_v8 }
 0x295   : > { %10041 = vst [vmem:[#allocation174_spill] sm:$0xff] %v6093_v27  ;;  %v6108_v27 = vld [vmem:[%s6068_s11 + $0x30] sm:$0xff]  ;;  %3103 = vmatpush.msra.mxu1 %v1564_v14  ;;  %v1662_v14 = vrot.slane %v6122_v47, 1 }
 0x296   : > { %10042 = vst [vmem:[#allocation175_spill] sm:$0xff] %v6096_v20  ;;  %v1563_v20 = vld [vmem:[%s9608_s2 + $0x10] sm:$0xff]  ;;  %v1665_v8 = vrot.slane %v6108_v27, 1 }
 0x297   : > { %3104 = vmatpush.msra.mxu1 %v1563_v20 }
 0x298   : > { %v6143_v20 = vsel %vm415_vm0, %v1665_v8, %v1667_v16  ;;  %v6163_v16 = vld [vmem:[%s6068_s11 + $0x40] sm:$0xff] }
 0x299   : > { %1729 = vrot.lane.b32.xlu2 %v1661_v11, %s4677_s14  ;;  %v1562_v11 = vld [vmem:[%s9608_s2 + $0x8] sm:$0xff]  ;;  %10046 = vst [vmem:[#allocation179_spill] sm:$0xff] %v6143_v20 }
 0x29a   : > { %1727 = vrot.lane.b32.xlu1 %v1659_v48, %s4677_s14  ;;  %1725 = vrot.lane.b32.xlu0 %v1657_v45, %s4677_s14  ;;  %v1561_v45 = vld [vmem:[%s9608_s2] sm:$0xff] }
 0x29b   : > { %v6128_v5 = vpop.permute.xlu2 %1184  ;;  %3105 = vmatpush.msra.mxu1 %v1562_v11  ;;  %v6155_v11 = vsel %vm415_vm0, %v1662_v14, %v1663_v39 }
 0x29c   : > { %10043 = vst [vmem:[#allocation176_spill] sm:$0xff] %v6128_v5  ;;  %v6134_v48 = vpop.permute.xlu1 %1164  ;;  %v6137_v1 = vpop.permute.xlu0 %1162  ;;  %v6146_v5 = vsel %vm415_vm0, %v1663_v39, %v1665_v8  ;;  %v1672_v8 = vrot.slane %v6149_v17, 1 }
 0x29d   : > { %10044 = vst [vmem:[#allocation177_spill] sm:$0xff] %v6134_v48  ;;  %3106 = vmatpush.msra.mxu1 %v1561_v45  ;;  %v6158_v48 = vld [vmem:[%s6068_s11 + $0x48] sm:$0xff]  ;;  %v1674_v45 = vrot.slane %v6152_v24, 1 }
 0x29e   : > { %10045 = vst [vmem:[#allocation178_spill] sm:$0xff] %v6137_v1  ;;  %v1670_v14 = vrot.slane %v6158_v48, 1 }
 0x29f   : > { %10047 = vst [vmem:[#allocation180_spill] sm:$0xff] %v6146_v5 }
 0x2a0   : > { %10048 = vst [vmem:[#allocation181_spill] sm:$0xff] %v6155_v11  ;;  %v6183_v26 = vsel %vm415_vm0, %v1670_v14, %v1672_v8 }
 0x2a1   : > { %1735 = vrot.lane.b32.xlu2 %v6143_v20, %s4677_s14  ;;  %v1669_v20 = vrot.slane %v6163_v16, 1  ;;  %10052 = vst [vmem:[#allocation185_spill] sm:$0xff] %v6183_v26 }
 0x2a2   : > { %1733 = vrot.lane.b32.xlu1 %v6146_v5, %s4677_s14  ;;  %1731 = vrot.lane.b32.xlu0 %v6155_v11, %s4677_s14  ;;  %v6180_v5 = vsel %vm415_vm0, %v1672_v8, %v1674_v45  ;;  %v6200_v45 = vld [vmem:[%s6068_s11 + $0x60] sm:$0xff]  ;;  %v1679_v8 = vrot.slane %v6186_v6, 1 }
 0x2a3   : > { %v6171_v39 = vpop.permute.xlu2 %1227  ;;  %10051 = vst [vmem:[#allocation184_spill] sm:$0xff] %v6180_v5  ;;  %v6192_v11 = vsel %vm415_vm0, %v1669_v20, %v1670_v14 }
 0x2a4   : > { %v6174_v1 = vpop.permute.xlu1 %1170  ;;  %v6177_v4 = vpop.permute.xlu0 %1168  ;;  %10053 = vst [vmem:[#allocation186_spill] sm:$0xff] %v6192_v11 }
 0x2a5   : > { %10049 = vst [vmem:[#allocation182_spill] sm:$0xff] %v6174_v1  ;;  %v6195_v1 = vld [vmem:[%s6068_s11 + $0x68] sm:$0xff] }
 0x2a6   : > { %10050 = vst [vmem:[#allocation183_spill] sm:$0xff] %v6177_v4  ;;  %v1681_v4 = vrot.slane %v6189_v29, 1  ;;  %v1677_v14 = vrot.slane %v6195_v1, 1 }
 0x2a8   : > { %v6220_v61 = vsel %vm415_vm0, %v1677_v14, %v1679_v8 }
 0x2a9   : > { %1741 = vrot.lane.b32.xlu2 %v6180_v5, %s4677_s14  ;;  %v1676_v5 = vrot.slane %v6200_v45, 1  ;;  %10057 = vst [vmem:[#allocation190_spill] sm:$0xff] %v6220_v61 }
 0x2aa   : > { %1739 = vrot.lane.b32.xlu1 %v6183_v26, %s4677_s14  ;;  %1737 = vrot.lane.b32.xlu0 %v6192_v11, %s4677_s14  ;;  %v6217_v26 = vsel %vm415_vm0, %v1679_v8, %v1681_v4  ;;  %v1686_v4 = vrot.slane %v6223_v60, 1  ;;  %v1688_v8 = vrot.slane %v6226_v2, 1 }
 0x2ab   : > { %v6208_v20 = vpop.permute.xlu2 %1233  ;;  %10056 = vst [vmem:[#allocation189_spill] sm:$0xff] %v6217_v26  ;;  %v6229_v11 = vsel %vm415_vm0, %v1676_v5, %v1677_v14  ;;  %v1684_v14 = vrot.slane %v6232_v42, 1  ;;  %v10069_v42 = vld [vmem:[#allocation99_spill] sm:$0xff] }
 0x2ac   : > { %v6211_v18 = vpop.permute.xlu1 %1176  ;;  %v6214_v59 = vpop.permute.xlu0 %1174  ;;  %10058 = vst [vmem:[#allocation191_spill] sm:$0xff] %v6229_v11  ;;  %v6254_v54 = vsel %vm415_vm0, %v1686_v4, %v1688_v8  ;;  %v6274_v8 = vld [vmem:[%s6068_s11 + $0xa8] sm:$0xff] }
 0x2ad   : > { %10054 = vst [vmem:[#allocation187_spill] sm:$0xff] %v6211_v18  ;;  %v6237_v18 = vld [vmem:[%s6068_s11 + $0x80] sm:$0xff]  ;;  %v6260_v62 = vsel %vm415_vm0, %v1684_v14, %v1686_v4  ;;  %v10071_v4 = vld [vmem:[#allocation125_spill] sm:$0xff] }
 0x2ae   : > { %10055 = vst [vmem:[#allocation188_spill] sm:$0xff] %v6214_v59 }
 0x2af   : > { %10060 = vst [vmem:[#allocation193_spill] sm:$0xff] %v6237_v18 }
 0x2b0   : > { %10063 = vst [vmem:[#allocation196_spill] sm:$0xff] %v6254_v54 }
 0x2b1   : > { %1747 = vrot.lane.b32.xlu2 %v6217_v26, %s4677_s14  ;;  %v1683_v26 = vrot.slane %v6237_v18, 1  ;;  %10065 = vst [vmem:[#allocation25_spill] sm:$0xff] %v6260_v62 }
 0x2b2   : > { %1745 = vrot.lane.b32.xlu1 %v6220_v61, %s4677_s14  ;;  %1743 = vrot.lane.b32.xlu0 %v6229_v11, %s4677_s14  ;;  %v1314_v11 = vsel %vm1313_vm3, %v4567_v19, %v10064_v55  ;;  %10068 = vst [vmem:[#allocation197_spill] sm:$0xff] %v6274_v8  ;;  %v6281_v19 = vld [vmem:[%s6068_s11 + $0xa0] sm:$0xff] }
 0x2b3   : > { %v6245_v5 = vpop.permute.xlu2 %1239  ;;  %10070 = vst [vmem:[#allocation99_spill] sm:$0xff] %v6281_v19 }
 0x2b4   : > { %v6248_v59 = vpop.permute.xlu1 %1182  ;;  %v6251_v61 = vpop.permute.xlu0 %1180 }
 0x2b5   : > { %10061 = vst [vmem:[#allocation194_spill] sm:$0xff] %v6248_v59  ;;  %v10066_v59 = vld [vmem:[#allocation69_spill] sm:$0xff] }
 0x2b6   : > { %10062 = vst [vmem:[#allocation195_spill] sm:$0xff] %v6251_v61  ;;  %v1345_v18 = vsel %vm1344_vm4, %v1314_v11, %v10066_v59  ;;  %v6271_v61 = vsel %vm415_vm0, %v1683_v26, %v1684_v14  ;;  %v1693_v59 = vrot.slane %v6263_v12, 1  ;;  %v1695_v26 = vrot.slane %v6266_v49, 1 }
 0x2b7   : > { %10067 = vst [vmem:[#allocation69_spill] sm:$0xff] %v6271_v61  ;;  %v1376_v55 = vsel %vm1375_vm5, %v1345_v18, %v10069_v42  ;;  %v1691_v11 = vrot.slane %v6274_v8, 1 }
 0x2b8   : > { %v1407_v15 = vsel %vm1406_vm6, %v1376_v55, %v10071_v4  ;;  %v1690_v4 = vrot.slane %v6281_v19, 1  ;;  %v6313_v19 = vld [vmem:[%s6068_s11 + $0xd0] sm:$0xff] }
 0x2b9   : > { %1753 = vrot.lane.b32.xlu2 %v6254_v54, %s4677_s14  ;;  %v1438_v42 = vsel %vm1437_vm7, %v1407_v15, %v5751_v58  ;;  %v4568_v54 = vld [vmem:[%s4769_s13 + $0x8] sm:$0xff] }
 0x2ba   : > { %1751 = vrot.lane.b32.xlu1 %v6260_v62, %s4677_s14  ;;  %1749 = vrot.lane.b32.xlu0 %v6271_v61, %s4677_s14  ;;  %v1469_v14 = vsel %vm1468_vm8, %v1438_v42, %v5882_v53  ;;  %v6303_v62 = vsel %vm415_vm0, %v1693_v59, %v1695_v26  ;;  %v6310_v42 = vsel %vm415_vm0, %v1691_v11, %v1693_v59  ;;  %v6324_v26 = vld [vmem:[%s6068_s11 + $0xc8] sm:$0xff]  ;;  %v10081_v59 = vld [vmem:[#allocation124_spill] sm:$0xff] }
 0x2bb   : > { %v6293_v18 = vpop.permute.xlu2 %1245  ;;  %v1500_v58 = vsel %vm9786_vm9, %v1469_v14, %v6009_v35  ;;  %10073 = vst [vmem:[#allocation198_spill] sm:$0xff] %v6303_v62  ;;  %v6316_v35 = vld [vmem:[%s6068_s11 + $0xd8] sm:$0x3]  ;;  %v10076_v14 = vld [vmem:[#allocation68_spill] sm:$0xff] }
 0x2bc   : > { %10072 = vst [vmem:[#allocation125_spill] sm:$0xff] %v6293_v18  ;;  %v1226_v55 = vpop.permute.xlu1 %1225  ;;  %v1224_v15 = vpop.permute.xlu0 %1223  ;;  %v10074_v18 = vld [vmem:[#allocation31_spill] sm:$0xff] }
 0x2bd   : > { %v1531_v61 = vsel %vm9785_vm11, %v1500_v58, %v1224_v15  ;;  %v1315_v53 = vsel %vm1313_vm3, %v4568_v54, %v10074_v18  ;;  %10075 = vst [vmem:[#allocation31_spill] sm:$0xff] %v6310_v42  ;;  %v6321_v58 = vsel %vm415_vm0, %v1690_v4, %v1691_v11  ;;  %v10079_v15 = vld [vmem:[#allocation98_spill] sm:$0xff]  ;;  %v1700_v11 = vrot.slane %v6313_v19, 1 }
 0x2be   : > { %4416 = vmatmul.msk.f32.vlgmr.msra.gmra.mxu1 %vm9784_vm10, %v1531_v61  ;;  %v1346_v8 = vsel %vm1344_vm4, %v1315_v53, %v10076_v14  ;;  %10077 = vst [vmem:[#allocation68_spill] sm:$0xff] %v6321_v58  ;;  %v6331_v61 = vld [vmem:[%s6068_s11 + $0xc0] sm:$0xff]  ;;  %v1702_v4 = vrot.slane %v6316_v35, 1  ;;  %v1698_v14 = vrot.slane %v6324_v26, 1 }
 0x2bf   : > { %10078 = vst [vmem:[#allocation199_spill] sm:$0xff] %v6324_v26  ;;  %v1377_v54 = vsel %vm1375_vm5, %v1346_v8, %v10079_v15 }
 0x2c0   : > { %10080 = vst [vmem:[#allocation98_spill] sm:$0xff] %v6331_v61  ;;  %v1408_v18 = vsel %vm1406_vm6, %v1377_v54, %v10081_v59  ;;  %v1697_v59 = vrot.slane %v6331_v61, 1  ;;  %v6368_v61 = vld [vmem:[%s6068_s11 + $0xf8] sm:$0x3] }
 0x2c1   : > { %1759 = vrot.lane.b32.xlu2 %v6303_v62, %s4677_s14  ;;  %v1439_v8 = vsel %vm1437_vm7, %v1408_v18, %v5749_v57  ;;  %v4569_v62 = vld [vmem:[%s4769_s13 + $0x10] sm:$0xff] }
 0x2c2   : > { %1757 = vrot.lane.b32.xlu1 %v6310_v42, %s4677_s14  ;;  %1755 = vrot.lane.b32.xlu0 %v6321_v58, %s4677_s14  ;;  %v1470_v15 = vsel %vm1468_vm8, %v1439_v8, %v5878_v3  ;;  %v6355_v58 = vsel %vm415_vm0, %v1700_v11, %v1702_v4  ;;  %v6362_v3 = vsel %vm415_vm0, %v1698_v14, %v1700_v11  ;;  %v6365_v8 = vld [vmem:[%s6068_s11 + $0xf0] sm:$0xff]  ;;  %v6376_v4 = vld [vmem:[%s6068_s11 + $0xe8] sm:$0xff]  ;;  %v10091_v11 = vld [vmem:[#allocation14_spill] sm:$0xff] }
 0x2c3   : > { %v6343_v53 = vpop.permute.xlu2 %1251  ;;  %v1501_v57 = vsel %vm9786_vm9, %v1470_v15, %v6005_v40  ;;  %10083 = vst [vmem:[#allocation200_spill] sm:$0xff] %v6355_v58  ;;  %v10086_v40 = vld [vmem:[#allocation58_spill] sm:$0xff] }
 0x2c4   : > { %10082 = vst [vmem:[#allocation124_spill] sm:$0xff] %v6343_v53  ;;  %v6348_v54 = vpop.permute.xlu1 %1231  ;;  %v1230_v18 = vpop.permute.xlu0 %1229  ;;  %v1532_v42 = vsel %vm9785_vm11, %v1501_v57, %v1226_v55  ;;  %v10084_v53 = vld [vmem:[#allocation24_spill] sm:$0xff]  ;;  %v6373_v55 = vsel %vm415_vm0, %v1697_v59, %v1698_v14  ;;  %v1709_v14 = vrot.slane %v6368_v61, 1 }
 0x2c5   : > { %v1316_v26 = vsel %vm1313_vm3, %v4569_v62, %v10084_v53  ;;  %10085 = vst [vmem:[#allocation24_spill] sm:$0xff] %v6362_v3  ;;  %v10089_v57 = vld [vmem:[#allocation88_spill] sm:$0xff] }
 0x2c6   : > { %4417 = vmatmul.msk.f32.gmra.mxu1 %vm9784_vm10, %v1532_v42  ;;  %v1347_v15 = vsel %vm1344_vm4, %v1316_v26, %v10086_v40  ;;  %10087 = vst [vmem:[#allocation58_spill] sm:$0xff] %v6373_v55  ;;  %v6383_v42 = vld [vmem:[%s6068_s11 + $0xe0] sm:$0xff]  ;;  %v1707_v26 = vrot.slane %v6365_v8, 1 }
 0x2c7   : > { %10088 = vst [vmem:[#allocation201_spill] sm:$0xff] %v6376_v4  ;;  %v1378_v62 = vsel %vm1375_vm5, %v1347_v15, %v10089_v57  ;;  %v1705_v15 = vrot.slane %v6376_v4, 1 }
 0x2c8   : > { %10090 = vst [vmem:[#allocation88_spill] sm:$0xff] %v6383_v42  ;;  %v1409_v53 = vsel %vm1406_vm6, %v1378_v62, %v10091_v11  ;;  %v1704_v11 = vrot.slane %v6383_v42, 1  ;;  %v6420_v42 = vld [vmem:[%s6068_s11 + $0x110] sm:$0xff] }
 0x2c9   : > { %1765 = vrot.lane.b32.xlu2 %v6355_v58, %s4677_s14  ;;  %v1440_v59 = vsel %vm1437_vm7, %v1409_v53, %v5711_v21  ;;  %v4570_v58 = vld [vmem:[%s4769_s13 + $0x20] sm:$0xff] }
 0x2ca   : > { %1763 = vrot.lane.b32.xlu1 %v6362_v3, %s4677_s14  ;;  %1761 = vrot.lane.b32.xlu0 %v6373_v55, %s4677_s14  ;;  %v1471_v57 = vsel %vm1468_vm8, %v1440_v59, %v5840_v30  ;;  %v6410_v3 = vsel %vm415_vm0, %v1707_v26, %v1709_v14  ;;  %v6417_v59 = vsel %vm415_vm0, %v1705_v15, %v1707_v26  ;;  %v6431_v14 = vld [vmem:[%s6068_s11 + $0x108] sm:$0xff] }
 0x2cb   : > { %v6395_v40 = vpop.permute.xlu2 %1257  ;;  %v1502_v21 = vsel %vm9786_vm9, %v1471_v57, %v5967_v63  ;;  %10093 = vst [vmem:[#allocation202_spill] sm:$0xff] %v6410_v3  ;;  %v6423_v63 = vld [vmem:[%s6068_s11 + $0x118] sm:$0x3]  ;;  %v10096_v57 = vld [vmem:[#allocation72_spill] sm:$0xff]  ;;  %v10101_v26 = vld [vmem:[#allocation127_spill] sm:$0xff] }
 0x2cc   : > { %10092 = vst [vmem:[#allocation14_spill] sm:$0xff] %v6395_v40  ;;  %v6400_v62 = vpop.permute.xlu1 %1237  ;;  %v6405_v53 = vpop.permute.xlu0 %1235  ;;  %v1533_v55 = vsel %vm9785_vm11, %v1502_v21, %v6171_v39  ;;  %v10094_v40 = vld [vmem:[#allocation30_spill] sm:$0xff]  ;;  %v6428_v39 = vsel %vm415_vm0, %v1704_v11, %v1705_v15  ;;  %v1714_v15 = vrot.slane %v6420_v42, 1  ;;  %v1716_v11 = vrot.slane %v6423_v63, 1 }
 0x2cd   : > { %v1317_v30 = vsel %vm1313_vm3, %v4570_v58, %v10094_v40  ;;  %10095 = vst [vmem:[#allocation30_spill] sm:$0xff] %v6417_v59  ;;  %v10099_v21 = vld [vmem:[#allocation102_spill] sm:$0xff] }
 0x2ce   : > { %4418 = vmatmul.msk.f32.gmra.mxu1 %vm9784_vm10, %v1533_v55  ;;  %v1348_v4 = vsel %vm1344_vm4, %v1317_v30, %v10096_v57  ;;  %10097 = vst [vmem:[#allocation72_spill] sm:$0xff] %v6428_v39  ;;  %v6438_v55 = vld [vmem:[%s6068_s11 + $0x100] sm:$0xff]  ;;  %v1712_v57 = vrot.slane %v6431_v14, 1 }
 0x2cf   : > { %10098 = vst [vmem:[#allocation203_spill] sm:$0xff] %v6431_v14  ;;  %v1379_v58 = vsel %vm1375_vm5, %v1348_v4, %v10099_v21 }
 0x2d0   : > { %10100 = vst [vmem:[#allocation102_spill] sm:$0xff] %v6438_v55  ;;  %v1410_v40 = vsel %vm1406_vm6, %v1379_v58, %v10101_v26  ;;  %v1711_v26 = vrot.slane %v6438_v55, 1  ;;  %v6477_v55 = vld [vmem:[%s6068_s11 + $0x138] sm:$0x3] }
 0x2d1   : > { %1771 = vrot.lane.b32.xlu2 %v6410_v3, %s4677_s14  ;;  %v1441_v4 = vsel %vm1437_vm7, %v1410_v40, %v5763_v13  ;;  %v10104_v3 = vld [vmem:[#allocation13_spill] sm:$0xff] }
 0x2d2   : > { %1769 = vrot.lane.b32.xlu1 %v6417_v59, %s4677_s14  ;;  %1767 = vrot.lane.b32.xlu0 %v6428_v39, %s4677_s14  ;;  %v1472_v21 = vsel %vm1468_vm8, %v1441_v4, %v5897_v25  ;;  %v4571_v59 = vld [vmem:[%s4769_s13 + $0x28] sm:$0xff]  ;;  %v6471_v25 = vsel %vm415_vm0, %v1712_v57, %v1714_v15  ;;  %v6474_v4 = vld [vmem:[%s6068_s11 + $0x130] sm:$0xff] }
 0x2d3   : > { %v6450_v30 = vpop.permute.xlu2 %1263  ;;  %v1503_v13 = vsel %vm9786_vm9, %v1472_v21, %v6024_v50  ;;  %v1318_v14 = vsel %vm1313_vm3, %v4571_v59, %v10104_v3  ;;  %10105 = vst [vmem:[#allocation13_spill] sm:$0xff] %v6471_v25  ;;  %v10106_v50 = vld [vmem:[#allocation71_spill] sm:$0xff]  ;;  %v6492_v59 = vld [vmem:[%s6068_s11 + $0x120] sm:$0xff] }
 0x2d4   : > { %10102 = vst [vmem:[#allocation127_spill] sm:$0xff] %v6450_v30  ;;  %v6455_v58 = vpop.permute.xlu1 %1243  ;;  %v6460_v40 = vpop.permute.xlu0 %1241  ;;  %v1534_v39 = vsel %vm9785_vm11, %v1503_v13, %v1230_v18  ;;  %v6464_v30 = vsel %vm415_vm0, %v1714_v15, %v1716_v11  ;;  %v1349_v21 = vsel %vm1344_vm4, %v1318_v14, %v10106_v50  ;;  %v6482_v18 = vsel %vm415_vm0, %v1711_v26, %v1712_v57  ;;  %v6485_v11 = vld [vmem:[%s6068_s11 + $0x128] sm:$0xff]  ;;  %v10109_v13 = vld [vmem:[#allocation101_spill] sm:$0xff] }
 0x2d5   : > { %10103 = vst [vmem:[#allocation204_spill] sm:$0xff] %v6464_v30  ;;  %v1380_v3 = vsel %vm1375_vm5, %v1349_v21, %v10109_v13  ;;  %v1721_v14 = vrot.slane %v6474_v4, 1  ;;  %v1723_v57 = vrot.slane %v6477_v55, 1  ;;  %v1719_v21 = vrot.slane %v6485_v11, 1 }
 0x2d6   : > { %4419 = vmatmul.msk.f32.gmra.mxu1 %vm9784_vm10, %v1534_v39  ;;  %10107 = vst [vmem:[#allocation71_spill] sm:$0xff] %v6482_v18  ;;  %v10111_v39 = vld [vmem:[#allocation126_spill] sm:$0xff] }
 0x2d7   : > { %10108 = vst [vmem:[#allocation205_spill] sm:$0xff] %v6485_v11  ;;  %v1411_v15 = vsel %vm1406_vm6, %v1380_v3, %v10111_v39  ;;  %v1718_v39 = vrot.slane %v6492_v59, 1 }
 0x2d8   : > { %10110 = vst [vmem:[#allocation101_spill] sm:$0xff] %v6492_v59  ;;  %v1442_v26 = vsel %vm1437_vm7, %v1411_v15, %v5761_v10  ;;  %v6519_v15 = vsel %vm415_vm0, %v1721_v14, %v1723_v57  ;;  %v10116_v59 = vld [vmem:[#allocation91_spill] sm:$0xff] }
 0x2d9   : > { %1777 = vrot.lane.b32.xlu2 %v6464_v30, %s4677_s14  ;;  %v1473_v13 = vsel %vm1468_vm8, %v1442_v26, %v5895_v34  ;;  %v6526_v34 = vsel %vm415_vm0, %v1719_v21, %v1721_v14  ;;  %v10114_v26 = vld [vmem:[#allocation61_spill] sm:$0xff]  ;;  %v1818_v14 = vrot.slane %v6074_v33, 2 }
 0x2da   : > { %1775 = vrot.lane.b32.xlu1 %v6471_v25, %s4677_s14  ;;  %1773 = vrot.lane.b32.xlu0 %v6482_v18, %s4677_s14  ;;  %v1504_v25 = vsel %vm9786_vm9, %v1473_v13, %v6022_v46  ;;  %v10113_v18 = vld [vmem:[#allocation15_spill] sm:$0xff]  ;;  %v6531_v13 = vsel %vm415_vm0, %v1718_v39, %v1719_v21 }
 0x2db   : > { %v6504_v50 = vpop.permute.xlu2 %1269  ;;  %v1535_v10 = vsel %vm9785_vm11, %v1504_v25, %v6348_v54  ;;  %10115 = vst [vmem:[#allocation15_spill] sm:$0xff] %v6531_v13  ;;  %v10117_v25 = vld [vmem:[#allocation16_spill] sm:$0xff] }
 0x2dc   : > { %10112 = vst [vmem:[#allocation126_spill] sm:$0xff] %v6504_v50  ;;  %v6509_v3 = vpop.permute.xlu1 %1249  ;;  %v6514_v30 = vpop.permute.xlu0 %1247  ;;  %v4572_v50 = vld [vmem:[%s4769_s13 + $0x30] sm:$0xff] }
 0x2dd   : > { %v1319_v11 = vsel %vm1313_vm3, %v4572_v50, %v10113_v18  ;;  %v1816_v50 = vrot.slane %v6080_v44, 2 }
 0x2de   : > { %4420 = vmatmul.msk.f32.gmra.mxu1 %vm9784_vm10, %v1535_v10  ;;  %v1350_v46 = vsel %vm1344_vm4, %v1319_v11, %v10114_v26  ;;  %v1820_v11 = vrot.slane %v6077_v36, 2  ;;  %v1815_v10 = vrot.slane %v6084_v51, 2 }
 0x2df   : > { %v1381_v54 = vsel %vm1375_vm5, %v1350_v46, %v10116_v59  ;;  %v4573_v46 = vld [vmem:[%s4769_s13 + $0x40] sm:$0xff] }
 0x2e0   : > { %v1412_v18 = vsel %vm1406_vm6, %v1381_v54, %v10117_v25  ;;  %v1821_v26 = vsel %vm576_vm1, %v1818_v14, %v1820_v11  ;;  %v10119_v54 = vld [vmem:[#allocation37_spill] sm:$0xff]  ;;  %v10120_v25 = vld [vmem:[#allocation75_spill] sm:$0xff] }
 0x2e1   : > { %1783 = vrot.lane.b32.xlu2 %v6519_v15, %s4677_s14  ;;  %v1443_v57 = vsel %vm1437_vm7, %v1412_v18, %v5723_v32  ;;  %v1320_v44 = vsel %vm1313_vm3, %v4573_v46, %v10119_v54  ;;  %v10121_v18 = vld [vmem:[#allocation105_spill] sm:$0xff]  ;;  %v1822_v46 = vrot.slane %v6122_v47, 2 }
 0x2e2   : > { %1781 = vrot.lane.b32.xlu1 %v6526_v34, %s4677_s14  ;;  %1779 = vrot.lane.b32.xlu0 %v6531_v13, %s4677_s14  ;;  %v1474_v21 = vsel %vm1468_vm8, %v1443_v57, %v5852_v41  ;;  %v1819_v41 = vsel %vm576_vm1, %v1816_v50, %v1818_v14  ;;  %v1351_v51 = vsel %vm1344_vm4, %v1320_v44, %v10120_v25  ;;  %v1827_v14 = vrot.slane %v6111_v28, 2  ;;  %v10125_v25 = vld [vmem:[#allocation36_spill] sm:$0xff] }
 0x2e3   : > { %v6547_v59 = vpop.permute.xlu2 %1275  ;;  %v1505_v33 = vsel %vm9786_vm9, %v1474_v21, %v5979_v7  ;;  %v1817_v7 = vsel %vm576_vm1, %v1815_v10, %v1816_v50  ;;  %v1382_v57 = vsel %vm1375_vm5, %v1351_v51, %v10121_v18  ;;  %v1825_v21 = vrot.slane %v6108_v27, 2 }
 0x2e4   : > { %10118 = vst [vmem:[#allocation61_spill] sm:$0xff] %v6547_v59  ;;  %v6552_v39 = vpop.permute.xlu1 %1255  ;;  %v6557_v36 = vpop.permute.xlu0 %1253  ;;  %v1536_v32 = vsel %vm9785_vm11, %v1505_v33, %v6208_v20  ;;  %v10122_v20 = vld [vmem:[#allocation129_spill] sm:$0xff]  ;;  %v1823_v10 = vrot.slane %v6118_v0, 2  ;;  %v10151_v59 = vld [vmem:[#allocation42_spill] sm:$0xff] }
 0x2e5   : > { %v1413_v11 = vsel %vm1406_vm6, %v1382_v57, %v10122_v20  ;;  %v6596_v44 = vsel %vm576_vm1, %v1825_v21, %v1827_v14  ;;  %v10127_v57 = vld [vmem:[#allocation104_spill] sm:$0xff]  ;;  %v1834_v14 = vrot.slane %v6152_v24, 2 }
 0x2e6   : > { %4421 = vmatmul.msk.f32.gmra.mxu1 %vm9784_vm10, %v1536_v32  ;;  %v1444_v33 = vsel %vm1437_vm7, %v1413_v11, %v5775_v38  ;;  %v6608_v18 = vsel %vm576_vm1, %v1822_v46, %v1823_v10  ;;  %v10128_v20 = vld [vmem:[#allocation128_spill] sm:$0xff] }
 0x2e7   : > { %v1475_v32 = vsel %vm1468_vm8, %v1444_v33, %v5909_v31  ;;  %v6603_v31 = vsel %vm576_vm1, %v1823_v10, %v1825_v21  ;;  %v1832_v21 = vrot.slane %v6149_v17, 2 }
 0x2e8   : > { %v1506_v54 = vsel %vm9786_vm9, %v1475_v32, %v6036_v9  ;;  %v1830_v32 = vrot.slane %v6158_v48, 2 }
 0x2e9   : > { %1889 = vrot.lane.b32.xlu2 %v1821_v26, %s4678_s15  ;;  %v1537_v38 = vsel %vm9785_vm11, %v1506_v54, %v6405_v53 }
 0x2ea   : > { %1887 = vrot.lane.b32.xlu1 %v1819_v41, %s4678_s15  ;;  %1885 = vrot.lane.b32.xlu0 %v1817_v7, %s4678_s15  ;;  %v4574_v41 = vld [vmem:[%s4769_s13 + $0x48] sm:$0xff]  ;;  %v10126_v7 = vld [vmem:[#allocation74_spill] sm:$0xff] }
 0x2eb   : > { %v6581_v50 = vpop.permute.xlu2 %1281  ;;  %v1321_v51 = vsel %vm1313_vm3, %v4574_v41, %v10125_v25  ;;  %v6639_v25 = vsel %vm576_vm1, %v1832_v21, %v1834_v14 }
 0x2ec   : > { %10123 = vst [vmem:[#allocation91_spill] sm:$0xff] %v6581_v50  ;;  %v6586_v26 = vpop.permute.xlu1 %1261  ;;  %v6591_v28 = vpop.permute.xlu0 %1259  ;;  %v1352_v9 = vsel %vm1344_vm4, %v1321_v51, %v10126_v7  ;;  %v4575_v51 = vld [vmem:[%s4769_s13 + $0x50] sm:$0xff]  ;;  %v10132_v7 = vld [vmem:[#allocation19_spill] sm:$0xff] }
 0x2ed   : > { %10124 = vst [vmem:[#allocation16_spill] sm:$0xff] %v6586_v26  ;;  %v1383_v53 = vsel %vm1375_vm5, %v1352_v9, %v10127_v57  ;;  %v1322_v9 = vsel %vm1313_vm3, %v4575_v51, %v10132_v7  ;;  %v10133_v57 = vld [vmem:[#allocation64_spill] sm:$0xff]  ;;  %v1836_v51 = vrot.slane %v6200_v45, 2  ;;  %v4577_v50 = vld [vmem:[%s4769_s13 + $0x68] sm:$0xff] }
 0x2ee   : > { %4422 = vmatmul.msk.f32.gmra.mxu1 %vm9784_vm10, %v1537_v38  ;;  %v1414_v11 = vsel %vm1406_vm6, %v1383_v53, %v10128_v20  ;;  %v1829_v38 = vrot.slane %v6163_v16, 2  ;;  %v10134_v20 = vld [vmem:[#allocation94_spill] sm:$0xff] }
 0x2ef   : > { %v1445_v33 = vsel %vm1437_vm7, %v1414_v11, %v5773_v37  ;;  %v10135_v11 = vld [vmem:[#allocation20_spill] sm:$0xff] }
 0x2f0   : > { %v1476_v46 = vsel %vm1468_vm8, %v1445_v33, %v5907_v56  ;;  %v6646_v56 = vsel %vm576_vm1, %v1830_v32, %v1832_v21  ;;  %v6651_v53 = vsel %vm576_vm1, %v1829_v38, %v1830_v32  ;;  %v1839_v21 = vrot.slane %v6186_v6, 2 }
 0x2f1   : > { %1895 = vrot.lane.b32.xlu2 %v6596_v44, %s4678_s15  ;;  %v1507_v24 = vsel %vm9786_vm9, %v1476_v46, %v6034_v22  ;;  %v1353_v22 = vsel %vm1344_vm4, %v1322_v9, %v10133_v57  ;;  %v1841_v33 = vrot.slane %v6189_v29, 2  ;;  %v1837_v38 = vrot.slane %v6195_v1, 2  ;;  %v4576_v57 = vld [vmem:[%s4769_s13 + $0x60] sm:$0xff] }
 0x2f2   : > { %1893 = vrot.lane.b32.xlu1 %v6603_v31, %s4678_s15  ;;  %1891 = vrot.lane.b32.xlu0 %v6608_v18, %s4678_s15  ;;  %v1538_v37 = vsel %vm9785_vm11, %v1507_v24, %v6400_v62  ;;  %v1384_v62 = vsel %vm1375_vm5, %v1353_v22, %v10134_v20  ;;  %v10139_v22 = vld [vmem:[#allocation43_spill] sm:$0xff] }
 0x2f3   : > { %v6624_v10 = vpop.permute.xlu2 %1729  ;;  %v1415_v14 = vsel %vm1406_vm6, %v1384_v62, %v10135_v11  ;;  %v6682_v9 = vsel %vm576_vm1, %v1839_v21, %v1841_v33  ;;  %v1323_v20 = vsel %vm1313_vm3, %v4576_v57, %v10139_v22  ;;  %v10140_v62 = vld [vmem:[#allocation78_spill] sm:$0xff]  ;;  %v6694_v11 = vsel %vm576_vm1, %v1836_v51, %v1837_v38  ;;  %v10146_v22 = vld [vmem:[#allocation7_spill] sm:$0xff] }
 0x2f4   : > { %10129 = vst [vmem:[#allocation37_spill] sm:$0xff] %v6624_v10  ;;  %v6629_v54 = vpop.permute.xlu1 %1267  ;;  %v6634_v41 = vpop.permute.xlu0 %1265  ;;  %v1446_v32 = vsel %vm1437_vm7, %v1415_v14, %v5735_v43  ;;  %v10141_v14 = vld [vmem:[#allocation108_spill] sm:$0xff]  ;;  %v10142_v33 = vld [vmem:[#allocation130_spill] sm:$0xff] }
 0x2f5   : > { %10130 = vst [vmem:[#allocation75_spill] sm:$0xff] %v6629_v54  ;;  %v1477_v24 = vsel %vm1468_vm8, %v1446_v32, %v5864_v52  ;;  %v6689_v52 = vsel %vm576_vm1, %v1837_v38, %v1839_v21  ;;  %v1846_v21 = vrot.slane %v6223_v60, 2  ;;  %v4578_v54 = vld [vmem:[%s4769_s13 + $0x70] sm:$0xff] }
 0x2f6   : > { %10131 = vst [vmem:[#allocation105_spill] sm:$0xff] %v6634_v41  ;;  %4423 = vmatmul.msk.f32.gmra.mxu1 %vm9784_vm10, %v1538_v37  ;;  %v1508_v29 = vsel %vm9786_vm9, %v1477_v24, %v5991_v23  ;;  %v1354_v23 = vsel %vm1344_vm4, %v1323_v20, %v10140_v62  ;;  %v1848_v24 = vrot.slane %v6226_v2, 2  ;;  %v10163_v41 = vld [vmem:[#allocation23_spill] sm:$0xff] }
 0x2f7   : > { %v1539_v43 = vsel %vm9785_vm11, %v1508_v29, %v6245_v5  ;;  %v1385_v5 = vsel %vm1375_vm5, %v1354_v23, %v10141_v14  ;;  %v10143_v29 = vld [vmem:[#allocation151_spill] sm:$0xff]  ;;  %v10148_v23 = vld [vmem:[#allocation193_spill] sm:$0xff]  ;;  %v1325_v26 = vsel %vm1313_vm3, %v4578_v54, %v10163_v41  ;;  %v1860_v41 = vrot.slane %v6313_v19, 2 }
 0x2f8   : > { %v1416_v32 = vsel %vm1406_vm6, %v1385_v5, %v10142_v33  ;;  %v1843_v14 = vrot.slane %v10148_v23, 2  ;;  %v10149_v5 = vld [vmem:[#allocation50_spill] sm:$0xff] }
 0x2f9   : > { %1901 = vrot.lane.b32.xlu2 %v6639_v25, %s4678_s15  ;;  %v1447_v38 = vsel %vm1437_vm7, %v1416_v32, %v10143_v29  ;;  %v6725_v29 = vsel %vm576_vm1, %v1846_v21, %v1848_v24  ;;  %v10154_v24 = vld [vmem:[#allocation45_spill] sm:$0xff] }
 0x2fa   : > { %1899 = vrot.lane.b32.xlu1 %v6646_v56, %s4678_s15  ;;  %1897 = vrot.lane.b32.xlu0 %v6651_v53, %s4678_s15  ;;  %v1478_v20 = vsel %vm1468_vm8, %v1447_v38, %v10146_v22  ;;  %v10152_v22 = vld [vmem:[#allocation77_spill] sm:$0xff] }
 0x2fb   : > { %v6667_v46 = vpop.permute.xlu2 %1735  ;;  %v1509_v2 = vsel %vm9786_vm9, %v1478_v20, %v10149_v5 }
 0x2fc   : > { %10136 = vst [vmem:[#allocation129_spill] sm:$0xff] %v6667_v46  ;;  %v6672_v37 = vpop.permute.xlu1 %1273  ;;  %v6677_v7 = vpop.permute.xlu0 %1271  ;;  %v1540_v32 = vsel %vm9785_vm11, %v1509_v2, %v6460_v40 }
 0x2fd   : > { %10137 = vst [vmem:[#allocation36_spill] sm:$0xff] %v6672_v37  ;;  %v1324_v37 = vsel %vm1313_vm3, %v4577_v50, %v10151_v59  ;;  %v1853_v50 = vrot.slane %v6263_v12, 2 }
 0x2fe   : > { %10138 = vst [vmem:[#allocation74_spill] sm:$0xff] %v6677_v7  ;;  %4424 = vmatmul.msk.f32.gmra.mxu1 %vm9784_vm10, %v1539_v43  ;;  %v10145_v43 = vld [vmem:[#allocation192_spill] sm:$0xff]  ;;  %v1355_v20 = vsel %vm1344_vm4, %v1324_v37, %v10152_v22  ;;  %v1855_v37 = vrot.slane %v6266_v49, 2 }
 0x2ff   : > { %v1844_v57 = vrot.slane %v10145_v43, 2 }
 0x301   : > { %1907 = vrot.lane.b32.xlu2 %v6682_v9, %s4678_s15  ;;  %v6732_v38 = vsel %vm576_vm1, %v1844_v57, %v1846_v21  ;;  %v6737_v5 = vsel %vm576_vm1, %v1843_v14, %v1844_v57  ;;  %v10155_v21 = vld [vmem:[#allocation150_spill] sm:$0xff]  ;;  %v10157_v14 = vld [vmem:[#allocation197_spill] sm:$0xff] }
 0x302   : > { %1905 = vrot.lane.b32.xlu1 %v6689_v52, %s4678_s15  ;;  %1903 = vrot.lane.b32.xlu0 %v6694_v11, %s4678_s15  ;;  %v1851_v2 = vrot.slane %v10157_v14, 2 }
 0x303   : > { %v6710_v51 = vpop.permute.xlu2 %1741 }
 0x304   : > { %10144 = vst [vmem:[#allocation104_spill] sm:$0xff] %v6710_v51  ;;  %v6715_v62 = vpop.permute.xlu1 %1279  ;;  %v6720_v33 = vpop.permute.xlu0 %1277  ;;  %v10174_v51 = vld [vmem:[#allocation33_spill] sm:$0xff] }
 0x305   : > { %10147 = vst [vmem:[#allocation128_spill] sm:$0xff] %v6715_v62  ;;  %v10153_v62 = vld [vmem:[#allocation107_spill] sm:$0xff] }
 0x306   : > { %10150 = vst [vmem:[#allocation19_spill] sm:$0xff] %v6720_v33  ;;  %4425 = vmatmul.msk.f32.gmra.mxu1 %vm9784_vm10, %v1540_v32  ;;  %v1386_v40 = vsel %vm1375_vm5, %v1355_v20, %v10153_v62  ;;  %v10158_v32 = vld [vmem:[#allocation6_spill] sm:$0xff] }
 0x307   : > { %v1417_v59 = vsel %vm1406_vm6, %v1386_v40, %v10154_v24  ;;  %v10160_v40 = vld [vmem:[#allocation99_spill] sm:$0xff]  ;;  %v10161_v33 = vld [vmem:[#allocation46_spill] sm:$0xff] }
 0x308   : > { %v1448_v57 = vsel %vm1437_vm7, %v1417_v59, %v10155_v21  ;;  %v1850_v24 = vrot.slane %v10160_v40, 2  ;;  %v6768_v21 = vsel %vm576_vm1, %v1853_v50, %v1855_v37  ;;  %v10167_v37 = vld [vmem:[#allocation26_spill] sm:$0xff] }
 0x309   : > { %1913 = vrot.lane.b32.xlu2 %v6725_v29, %s4678_s15  ;;  %v1479_v22 = vsel %vm1468_vm8, %v1448_v57, %v10158_v32  ;;  %v6775_v57 = vsel %vm576_vm1, %v1851_v2, %v1853_v50  ;;  %v10164_v32 = vld [vmem:[#allocation67_spill] sm:$0xff]  ;;  %v10168_v50 = vld [vmem:[#allocation146_spill] sm:$0xff] }
 0x30a   : > { %1911 = vrot.lane.b32.xlu1 %v6732_v38, %s4678_s15  ;;  %1909 = vrot.lane.b32.xlu0 %v6737_v5, %s4678_s15  ;;  %v1510_v49 = vsel %vm9786_vm9, %v1479_v22, %v10161_v33  ;;  %v1356_v33 = vsel %vm1344_vm4, %v1325_v26, %v10164_v32  ;;  %v6780_v22 = vsel %vm576_vm1, %v1850_v24, %v1851_v2  ;;  %v1862_v26 = vrot.slane %v6316_v35, 2  ;;  %v10170_v24 = vld [vmem:[#allocation199_spill] sm:$0xff] }
 0x30b   : > { %v6753_v62 = vpop.permute.xlu2 %1747  ;;  %v1541_v59 = vsel %vm9785_vm11, %v1510_v49, %v6455_v58  ;;  %10165 = vst [vmem:[#allocation43_spill] sm:$0xff] %v6780_v22  ;;  %v1858_v49 = vrot.slane %v10170_v24, 2 }
 0x30c   : > { %10156 = vst [vmem:[#allocation64_spill] sm:$0xff] %v6753_v62  ;;  %v6758_v20 = vpop.permute.xlu1 %1727  ;;  %v6763_v7 = vpop.permute.xlu0 %1725  ;;  %v10166_v62 = vld [vmem:[#allocation97_spill] sm:$0xff]  ;;  %v6811_v10 = vsel %vm576_vm1, %v1860_v41, %v1862_v26 }
 0x30d   : > { %10159 = vst [vmem:[#allocation94_spill] sm:$0xff] %v6758_v20  ;;  %v1387_v58 = vsel %vm1375_vm5, %v1356_v33, %v10166_v62  ;;  %v10178_v20 = vld [vmem:[#allocation49_spill] sm:$0xff] }
 0x30e   : > { %10162 = vst [vmem:[#allocation20_spill] sm:$0xff] %v6763_v7  ;;  %4426 = vmatmul.msk.f32.gmra.mxu1 %vm9784_vm10, %v1541_v59  ;;  %v1418_v54 = vsel %vm1406_vm6, %v1387_v58, %v10167_v37  ;;  %v10171_v59 = vld [vmem:[#allocation2_spill] sm:$0xff]  ;;  %v10183_v26 = vld [vmem:[#allocation133_spill] sm:$0xff] }
 0x30f   : > { %v1449_v2 = vsel %vm1437_vm7, %v1418_v54, %v10168_v50  ;;  %v10173_v58 = vld [vmem:[#allocation98_spill] sm:$0xff]  ;;  %v10176_v54 = vld [vmem:[#allocation125_spill] sm:$0xff]  ;;  %10177 = vst [vmem:[#allocation151_spill] sm:$0xff] %v6811_v10 }
 0x310   : > { %v1480_v32 = vsel %vm1468_vm8, %v1449_v2, %v10171_v59  ;;  %v1857_v37 = vrot.slane %v10173_v58, 2  ;;  %v6818_v2 = vsel %vm576_vm1, %v1858_v49, %v1860_v41  ;;  %v10180_v59 = vld [vmem:[#allocation81_spill] sm:$0xff]  ;;  %v1867_v41 = vrot.slane %v6365_v8, 2 }
 0x311   : > { %1919 = vrot.lane.b32.xlu2 %v6768_v21, %s4678_s15  ;;  %v1511_v35 = vsel %vm9786_vm9, %v1480_v32, %v10174_v51  ;;  %10179 = vst [vmem:[#allocation192_spill] sm:$0xff] %v6818_v2 }
 0x312   : > { %1917 = vrot.lane.b32.xlu1 %v6775_v57, %s4678_s15  ;;  %1915 = vrot.lane.b32.xlu0 %v6780_v22, %s4678_s15  ;;  %v1542_v50 = vsel %vm9785_vm11, %v1511_v35, %v10176_v54  ;;  %v6823_v32 = vsel %vm576_vm1, %v1857_v37, %v1858_v49  ;;  %v10186_v37 = vld [vmem:[#allocation201_spill] sm:$0xff] }
 0x313   : > { %v6796_v62 = vpop.permute.xlu2 %1753  ;;  %10181 = vst [vmem:[#allocation7_spill] sm:$0xff] %v6823_v32  ;;  %v1865_v54 = vrot.slane %v10186_v37, 2 }
 0x314   : > { %10169 = vst [vmem:[#allocation78_spill] sm:$0xff] %v6796_v62  ;;  %v6801_v33 = vpop.permute.xlu1 %1733  ;;  %v6806_v46 = vpop.permute.xlu0 %1731  ;;  %v4579_v62 = vld [vmem:[%s4769_s13 + $0x80] sm:$0xff] }
 0x315   : > { %10172 = vst [vmem:[#allocation108_spill] sm:$0xff] %v6801_v33  ;;  %v1326_v7 = vsel %vm1313_vm3, %v4579_v62, %v10178_v20  ;;  %v10182_v33 = vld [vmem:[#allocation111_spill] sm:$0xff]  ;;  %v10184_v62 = vld [vmem:[#allocation154_spill] sm:$0xff] }
 0x316   : > { %10175 = vst [vmem:[#allocation130_spill] sm:$0xff] %v6806_v46  ;;  %4427 = vmatmul.msk.f32.gmra.mxu1 %vm9784_vm10, %v1542_v50  ;;  %v1357_v51 = vsel %vm1344_vm4, %v1326_v7, %v10180_v59  ;;  %v1869_v7 = vrot.slane %v6368_v61, 2  ;;  %v10187_v50 = vld [vmem:[#allocation10_spill] sm:$0xff]  ;;  %v10190_v46 = vld [vmem:[#allocation172_spill] sm:$0xff] }
 0x317   : > { %v1388_v35 = vsel %vm1375_vm5, %v1357_v51, %v10182_v33 }
 0x318   : > { %v1419_v20 = vsel %vm1406_vm6, %v1388_v35, %v10183_v26  ;;  %v10189_v35 = vld [vmem:[#allocation88_spill] sm:$0xff] }
 0x319   : > { %1925 = vrot.lane.b32.xlu2 %v6811_v10, %s4678_s15  ;;  %v1450_v49 = vsel %vm1437_vm7, %v1419_v20, %v10184_v62  ;;  %v1864_v26 = vrot.slane %v10189_v35, 2  ;;  %v6854_v62 = vsel %vm576_vm1, %v1867_v41, %v1869_v7  ;;  %v10198_v7 = vld [vmem:[#allocation132_spill] sm:$0xff] }
 0x31a   : > { %1923 = vrot.lane.b32.xlu1 %v6818_v2, %s4678_s15  ;;  %1921 = vrot.lane.b32.xlu0 %v6823_v32, %s4678_s15  ;;  %v1481_v59 = vsel %vm1468_vm8, %v1450_v49, %v10187_v50  ;;  %10192 = vst [vmem:[#allocation77_spill] sm:$0xff] %v6854_v62  ;;  %v10193_v32 = vld [vmem:[#allocation48_spill] sm:$0xff]  ;;  %v6861_v49 = vsel %vm576_vm1, %v1865_v54, %v1867_v41  ;;  %v1874_v41 = vrot.slane %v6420_v42, 2 }
 0x31b   : > { %v6839_v33 = vpop.permute.xlu2 %1759  ;;  %v1512_v61 = vsel %vm9786_vm9, %v1481_v59, %v10190_v46  ;;  %10194 = vst [vmem:[#allocation107_spill] sm:$0xff] %v6861_v49  ;;  %v10195_v50 = vld [vmem:[#allocation80_spill] sm:$0xff]  ;;  %v6866_v59 = vsel %vm576_vm1, %v1864_v26, %v1865_v54  ;;  %v10201_v26 = vld [vmem:[#allocation203_spill] sm:$0xff] }
 0x31c   : > { %10185 = vst [vmem:[#allocation193_spill] sm:$0xff] %v6839_v33  ;;  %v6844_v51 = vpop.permute.xlu1 %1739  ;;  %v6849_v2 = vpop.permute.xlu0 %1737  ;;  %v1543_v20 = vsel %vm9785_vm11, %v1512_v61, %v6514_v30  ;;  %v4580_v33 = vld [vmem:[%s4769_s13 + $0x88] sm:$0xff]  ;;  %v1872_v61 = vrot.slane %v10201_v26, 2 }
 0x31d   : > { %10188 = vst [vmem:[#allocation50_spill] sm:$0xff] %v6844_v51  ;;  %v1327_v10 = vsel %vm1313_vm3, %v4580_v33, %v10193_v32  ;;  %v10197_v51 = vld [vmem:[#allocation110_spill] sm:$0xff]  ;;  %v10199_v33 = vld [vmem:[#allocation153_spill] sm:$0xff] }
 0x31e   : > { %10191 = vst [vmem:[#allocation42_spill] sm:$0xff] %v6849_v2  ;;  %4428 = vmatmul.msk.f32.gmra.mxu1 %vm9784_vm10, %v1543_v20  ;;  %v1358_v46 = vsel %vm1344_vm4, %v1327_v10, %v10195_v50  ;;  %v1876_v10 = vrot.slane %v6423_v63, 2  ;;  %v10202_v20 = vld [vmem:[#allocation9_spill] sm:$0xff]  ;;  %v10205_v2 = vld [vmem:[#allocation171_spill] sm:$0xff] }
 0x31f   : > { %10196 = vst [vmem:[#allocation45_spill] sm:$0xff] %v6866_v59  ;;  %v1389_v30 = vsel %vm1375_vm5, %v1358_v46, %v10197_v51 }
 0x320   : > { %v1420_v32 = vsel %vm1406_vm6, %v1389_v30, %v10198_v7  ;;  %v10204_v30 = vld [vmem:[#allocation102_spill] sm:$0xff] }
 0x321   : > { %1931 = vrot.lane.b32.xlu2 %v6854_v62, %s4678_s15  ;;  %v1451_v54 = vsel %vm1437_vm7, %v1420_v32, %v10199_v33  ;;  %v1871_v7 = vrot.slane %v10204_v30, 2  ;;  %v6897_v33 = vsel %vm576_vm1, %v1874_v41, %v1876_v10  ;;  %v10213_v10 = vld [vmem:[#allocation32_spill] sm:$0xff] }
 0x322   : > { %1929 = vrot.lane.b32.xlu1 %v6861_v49, %s4678_s15  ;;  %1927 = vrot.lane.b32.xlu0 %v6866_v59, %s4678_s15  ;;  %v1482_v50 = vsel %vm1468_vm8, %v1451_v54, %v10202_v20  ;;  %10207 = vst [vmem:[#allocation99_spill] sm:$0xff] %v6897_v33  ;;  %v10208_v59 = vld [vmem:[#allocation29_spill] sm:$0xff]  ;;  %v6904_v54 = vsel %vm576_vm1, %v1872_v61, %v1874_v41  ;;  %v10210_v20 = vld [vmem:[#allocation70_spill] sm:$0xff]  ;;  %v1881_v41 = vrot.slane %v6474_v4, 2 }
 0x323   : > { %v6882_v51 = vpop.permute.xlu2 %1765  ;;  %v1513_v63 = vsel %vm9786_vm9, %v1482_v50, %v10205_v2  ;;  %10209 = vst [vmem:[#allocation46_spill] sm:$0xff] %v6904_v54  ;;  %v6909_v50 = vsel %vm576_vm1, %v1871_v7, %v1872_v61  ;;  %v10216_v7 = vld [vmem:[#allocation205_spill] sm:$0xff] }
 0x324   : > { %10200 = vst [vmem:[#allocation150_spill] sm:$0xff] %v6882_v51  ;;  %v6887_v46 = vpop.permute.xlu1 %1745  ;;  %v6892_v49 = vpop.permute.xlu0 %1743  ;;  %v1544_v32 = vsel %vm9785_vm11, %v1513_v63, %v6509_v3  ;;  %v4581_v51 = vld [vmem:[%s4769_s13 + $0x90] sm:$0xff]  ;;  %v1879_v63 = vrot.slane %v10216_v7, 2 }
 0x325   : > { %10203 = vst [vmem:[#allocation197_spill] sm:$0xff] %v6887_v46  ;;  %v1328_v62 = vsel %vm1313_vm3, %v4581_v51, %v10208_v59  ;;  %v10212_v46 = vld [vmem:[#allocation100_spill] sm:$0xff]  ;;  %v10214_v51 = vld [vmem:[#allocation147_spill] sm:$0xff] }
 0x326   : > { %10206 = vst [vmem:[#allocation6_spill] sm:$0xff] %v6892_v49  ;;  %4429 = vmatmul.msk.f32.gmra.mxu1 %vm9784_vm10, %v1544_v32  ;;  %v1359_v2 = vsel %vm1344_vm4, %v1328_v62, %v10210_v20  ;;  %v1883_v62 = vrot.slane %v6477_v55, 2  ;;  %v10217_v32 = vld [vmem:[#allocation3_spill] sm:$0xff]  ;;  %v10220_v49 = vld [vmem:[#allocation34_spill] sm:$0xff] }
 0x327   : > { %10211 = vst [vmem:[#allocation23_spill] sm:$0xff] %v6909_v50  ;;  %v1390_v3 = vsel %vm1375_vm5, %v1359_v2, %v10212_v46 }
 0x328   : > { %v1421_v59 = vsel %vm1406_vm6, %v1390_v3, %v10213_v10  ;;  %v10219_v3 = vld [vmem:[#allocation101_spill] sm:$0xff] }
 0x329   : > { %1937 = vrot.lane.b32.xlu2 %v6897_v33, %s4678_s15  ;;  %v1452_v61 = vsel %vm1437_vm7, %v1421_v59, %v10214_v51  ;;  %v1878_v10 = vrot.slane %v10219_v3, 2  ;;  %v10222_v59 = vld [vmem:[#allocation124_spill] sm:$0xff]  ;;  %v10223_v33 = vld [vmem:[#allocation54_spill] sm:$0xff] }
 0x32a   : > { %1935 = vrot.lane.b32.xlu1 %v6904_v54, %s4678_s15  ;;  %1933 = vrot.lane.b32.xlu0 %v6909_v50, %s4678_s15  ;;  %v1483_v20 = vsel %vm1468_vm8, %v1452_v61, %v10217_v32  ;;  %v6940_v50 = vsel %vm576_vm1, %v1881_v41, %v1883_v62  ;;  %v6947_v61 = vsel %vm576_vm1, %v1879_v63, %v1881_v41  ;;  %v10224_v32 = vld [vmem:[#allocation84_spill] sm:$0xff]  ;;  %v10228_v41 = vld [vmem:[#allocation157_spill] sm:$0xff] }
 0x32b   : > { %v6925_v46 = vpop.permute.xlu2 %1771  ;;  %v1514_v55 = vsel %vm9786_vm9, %v1483_v20, %v10220_v49  ;;  %v6952_v20 = vsel %vm576_vm1, %v1878_v10, %v1879_v63  ;;  %v10230_v63 = vld [vmem:[#allocation167_spill] sm:$0xff] }
 0x32c   : > { %10215 = vst [vmem:[#allocation67_spill] sm:$0xff] %v6925_v46  ;;  %v6930_v2 = vpop.permute.xlu1 %1751  ;;  %v6935_v54 = vpop.permute.xlu0 %1749  ;;  %v1545_v51 = vsel %vm9785_vm11, %v1514_v55, %v10222_v59  ;;  %v4582_v46 = vld [vmem:[%s4769_s13 + $0xa0] sm:$0xff]  ;;  %v10227_v59 = vld [vmem:[#allocation136_spill] sm:$0xff] }
 0x32d   : > { %10218 = vst [vmem:[#allocation97_spill] sm:$0xff] %v6930_v2  ;;  %v1329_v22 = vsel %vm1313_vm3, %v4582_v46, %v10223_v33  ;;  %v10226_v55 = vld [vmem:[#allocation114_spill] sm:$0xff]  ;;  %v10235_v2 = vld [vmem:[#allocation83_spill] sm:$0xff] }
 0x32e   : > { %10221 = vst [vmem:[#allocation26_spill] sm:$0xff] %v6935_v54  ;;  %4430 = vmatmul.msk.f32.gmra.mxu1 %vm9784_vm10, %v1545_v51  ;;  %v1360_v49 = vsel %vm1344_vm4, %v1329_v22, %v10224_v32  ;;  %v10232_v32 = vld [vmem:[#allocation175_spill] sm:$0xff] }
 0x32f   : > { %10225 = vst [vmem:[#allocation146_spill] sm:$0xff] %v6952_v20  ;;  %v1391_v62 = vsel %vm1375_vm5, %v1360_v49, %v10226_v55 }
 0x330   : > { %v1422_v33 = vsel %vm1406_vm6, %v1391_v62, %v10227_v59  ;;  %v4583_v59 = vld [vmem:[%s4769_s13 + $0xa8] sm:$0xff] }
 0x331   : > { %1943 = vrot.lane.b32.xlu2 %v6940_v50, %s4678_s15  ;;  %v1453_v46 = vsel %vm1437_vm7, %v1422_v33, %v10228_v41  ;;  %v10234_v33 = vld [vmem:[#allocation53_spill] sm:$0xff] }
 0x332   : > { %1941 = vrot.lane.b32.xlu1 %v6947_v61, %s4678_s15  ;;  %1939 = vrot.lane.b32.xlu0 %v6952_v20, %s4678_s15  ;;  %v1484_v10 = vsel %vm1468_vm8, %v1453_v46, %v10230_v63  ;;  %v1330_v41 = vsel %vm1313_vm3, %v4583_v59, %v10234_v33  ;;  %v10236_v63 = vld [vmem:[#allocation113_spill] sm:$0xff] }
 0x333   : > { %v6966_v22 = vpop.permute.xlu2 %1777  ;;  %v1515_v49 = vsel %vm9786_vm9, %v1484_v10, %v10232_v32  ;;  %v1361_v46 = vsel %vm1344_vm4, %v1330_v41, %v10235_v2  ;;  %v10237_v10 = vld [vmem:[#allocation135_spill] sm:$0xff]  ;;  %v10240_v2 = vld [vmem:[#allocation12_spill] sm:$0xff] }
 0x334   : > { %10229 = vst [vmem:[#allocation199_spill] sm:$0xff] %v6966_v22  ;;  %v6970_v51 = vpop.permute.xlu1 %1757  ;;  %v6974_v55 = vpop.permute.xlu0 %1755  ;;  %v1546_v62 = vsel %vm9785_vm11, %v1515_v49, %v6557_v36  ;;  %v10238_v36 = vld [vmem:[#allocation156_spill] sm:$0xff] }
 0x335   : > { %10231 = vst [vmem:[#allocation2_spill] sm:$0xff] %v6970_v51  ;;  %v1392_v51 = vsel %vm1375_vm5, %v1361_v46, %v10236_v63  ;;  %v4584_v46 = vld [vmem:[%s4769_s13 + $0xb0] sm:$0xff]  ;;  %v10244_v63 = vld [vmem:[#allocation35_spill] sm:$0xff] }
 0x336   : > { %10233 = vst [vmem:[#allocation98_spill] sm:$0xff] %v6974_v55  ;;  %4431 = vmatmul.msk.f32.gmra.mxu1 %vm9784_vm10, %v1546_v62  ;;  %v1423_v32 = vsel %vm1406_vm6, %v1392_v51, %v10237_v10  ;;  %v10245_v10 = vld [vmem:[#allocation73_spill] sm:$0xff] }
 0x337   : > { %v1454_v49 = vsel %vm1437_vm7, %v1423_v32, %v10238_v36  ;;  %v10246_v36 = vld [vmem:[#allocation103_spill] sm:$0xff] }
 0x338   : > { %v1485_v59 = vsel %vm1468_vm8, %v1454_v49, %v10240_v2  ;;  %v10247_v2 = vld [vmem:[#allocation38_spill] sm:$0xff] }
 0x339   : > { %1982 = vrot.lane.b32.xlu2 %v6108_v27, %s4679_s16  ;;  %v10242_v27 = vld [vmem:[#allocation174_spill] sm:$0xff] }
 0x33a   : > { %1980 = vrot.lane.b32.xlu1 %v6118_v0, %s4679_s16  ;;  %1978 = vrot.lane.b32.xlu0 %v6122_v47, %s4679_s16  ;;  %v1516_v41 = vsel %vm9786_vm9, %v1485_v59, %v10242_v27  ;;  %v1331_v47 = vsel %vm1313_vm3, %v4584_v46, %v10244_v63 }
 0x33b   : > { %v6996_v62 = vpop.permute.xlu2 %1783  ;;  %v1547_v0 = vsel %vm9785_vm11, %v1516_v41, %v6552_v39  ;;  %v1362_v32 = vsel %vm1344_vm4, %v1331_v47, %v10245_v10  ;;  %v10248_v39 = vld [vmem:[#allocation148_spill] sm:$0xff] }
 0x33c   : > { %10239 = vst [vmem:[#allocation33_spill] sm:$0xff] %v6996_v62  ;;  %v7000_v33 = vpop.permute.xlu1 %1763  ;;  %v7004_v51 = vpop.permute.xlu0 %1761  ;;  %v1393_v49 = vsel %vm1375_vm5, %v1362_v32, %v10246_v36  ;;  %v10253_v32 = vld [vmem:[#allocation14_spill] sm:$0xff]  ;;  %v10308_v62 = vld [vmem:[#allocation31_spill] sm:$0xff] }
 0x33d   : > { %10241 = vst [vmem:[#allocation125_spill] sm:$0xff] %v7000_v33  ;;  %v1424_v59 = vsel %vm1406_vm6, %v1393_v49, %v10247_v2  ;;  %v4585_v36 = vld [vmem:[%s4769_s13 + $0xc0] sm:$0xff]  ;;  %v10254_v49 = vld [vmem:[#allocation57_spill] sm:$0xff] }
 0x33e   : > { %10243 = vst [vmem:[#allocation49_spill] sm:$0xff] %v7004_v51  ;;  %4432 = vmatmul.msk.f32.gmra.mxu1 %vm9784_vm10, %v1547_v0  ;;  %v1455_v27 = vsel %vm1437_vm7, %v1424_v59, %v10248_v39  ;;  %v10249_v0 = vld [vmem:[#allocation4_spill] sm:$0xff]  ;;  %v1332_v2 = vsel %vm1313_vm3, %v4585_v36, %v10254_v49  ;;  %v10256_v39 = vld [vmem:[#allocation117_spill] sm:$0xff]  ;;  %v10297_v51 = vld [vmem:[#allocation191_spill] sm:$0xff] }
 0x33f   : > { %v1486_v46 = vsel %vm1468_vm8, %v1455_v27, %v10249_v0  ;;  %v10257_v0 = vld [vmem:[#allocation139_spill] sm:$0xff] }
 0x341   : > { %1988 = vrot.lane.b32.xlu2 %v6149_v17, %s4679_s16  ;;  %v10251_v17 = vld [vmem:[#allocation39_spill] sm:$0xff] }
 0x342   : > { %1986 = vrot.lane.b32.xlu1 %v6158_v48, %s4679_s16  ;;  %1984 = vrot.lane.b32.xlu0 %v6163_v16, %s4679_s16  ;;  %v1517_v47 = vsel %vm9786_vm9, %v1486_v46, %v10251_v17  ;;  %v10255_v16 = vld [vmem:[#allocation87_spill] sm:$0xff]  ;;  %v10258_v17 = vld [vmem:[#allocation160_spill] sm:$0xff] }
 0x343   : > { %v7026_v41 = vpop.permute.xlu2 %1889  ;;  %v1548_v48 = vsel %vm9785_vm11, %v1517_v47, %v10253_v32  ;;  %v1363_v59 = vsel %vm1344_vm4, %v1332_v2, %v10255_v16 }
 0x344   : > { %v7030_v63 = vpop.permute.xlu1 %1769  ;;  %v7034_v10 = vpop.permute.xlu0 %1767  ;;  %v1394_v27 = vsel %vm1375_vm5, %v1363_v59, %v10256_v39 }
 0x345   : > { %10250 = vst [vmem:[#allocation81_spill] sm:$0xff] %v7030_v63  ;;  %v1425_v46 = vsel %vm1406_vm6, %v1394_v27, %v10257_v0  ;;  %v7145_v27 = vld [vmem:[%s6068_s11 + $0x148] sm:$0xff]  ;;  %v7148_v0 = vld [vmem:[%s6068_s11 + $0x140] sm:$0xff] }
 0x346   : > { %10252 = vst [vmem:[#allocation111_spill] sm:$0xff] %v7034_v10  ;;  %4433 = vmatmul.msk.f32.gmra.mxu1 %vm9784_vm10, %v1548_v48  ;;  %v1456_v47 = vsel %vm1437_vm7, %v1425_v46, %v10258_v17  ;;  %v10260_v48 = vld [vmem:[#allocation170_spill] sm:$0xff]  ;;  %v10283_v46 = vld [vmem:[#allocation179_spill] sm:$0xff]  ;;  %v10284_v17 = vld [vmem:[#allocation180_spill] sm:$0xff] }
 0x347   : > { %v1487_v36 = vsel %vm1468_vm8, %v1456_v47, %v10260_v48  ;;  %v10285_v47 = vld [vmem:[#allocation181_spill] sm:$0xff] }
 0x349   : > { %1994 = vrot.lane.b32.xlu2 %v6186_v6, %s4679_s16  ;;  %v10262_v6 = vld [vmem:[#allocation178_spill] sm:$0xff] }
 0x34a   : > { %1992 = vrot.lane.b32.xlu1 %v6195_v1, %s4679_s16  ;;  %1990 = vrot.lane.b32.xlu0 %v6200_v45, %s4679_s16  ;;  %v1518_v2 = vsel %vm9786_vm9, %v1487_v36, %v10262_v6 }
 0x34b   : > { %v7056_v32 = vpop.permute.xlu2 %1895  ;;  %v1549_v1 = vsel %vm9785_vm11, %v1518_v2, %v6591_v28  ;;  %v10289_v2 = vld [vmem:[#allocation184_spill] sm:$0xff] }
 0x34c   : > { %10259 = vst [vmem:[#allocation133_spill] sm:$0xff] %v7056_v32  ;;  %v7060_v49 = vpop.permute.xlu1 %1775  ;;  %v7064_v16 = vpop.permute.xlu0 %1773 }
 0x34d   : > { %10261 = vst [vmem:[#allocation154_spill] sm:$0xff] %v7060_v49 }
 0x34e   : > { %10263 = vst [vmem:[#allocation201_spill] sm:$0xff] %v7064_v16  ;;  %4434 = vmatmul.msk.f32.gmra.mxu1 %vm9784_vm10, %v1549_v1  ;;  %v10290_v1 = vld [vmem:[#allocation185_spill] sm:$0xff]  ;;  %v10325_v16 = vld [vmem:[#allocation71_spill] sm:$0xff] }
 0x351   : > { %2000 = vrot.lane.b32.xlu2 %v6223_v60, %s4679_s16 }
 0x352   : > { %1998 = vrot.lane.b32.xlu1 %v10145_v43, %s4679_s16  ;;  %1996 = vrot.lane.b32.xlu0 %v10148_v23, %s4679_s16 }
 0x353   : > { %v7075_v45 = vpop.permute.xlu2 %1901 }
 0x354   : > { %10264 = vst [vmem:[#allocation10_spill] sm:$0xff] %v7075_v45  ;;  %v7077_v59 = vpop.permute.xlu1 %1781  ;;  %v7079_v39 = vpop.permute.xlu0 %1779  ;;  %v10324_v45 = vld [vmem:[#allocation13_spill] sm:$0xff] }
 0x355   : > { %10265 = vst [vmem:[#allocation88_spill] sm:$0xff] %v7077_v59 }
 0x356   : > { %10266 = vst [vmem:[#allocation172_spill] sm:$0xff] %v7079_v39  ;;  %v10311_v39 = vld [vmem:[#allocation200_spill] sm:$0xff] }
 0x359   : > { %2006 = vrot.lane.b32.xlu2 %v6263_v12, %s4679_s16 }
 0x35a   : > { %2004 = vrot.lane.b32.xlu1 %v10157_v14, %s4679_s16  ;;  %2002 = vrot.lane.b32.xlu0 %v10160_v40, %s4679_s16 }
 0x35b   : > { %v7087_v60 = vpop.permute.xlu2 %1907 }
 0x35c   : > { %10267 = vst [vmem:[#allocation48_spill] sm:$0xff] %v7087_v60  ;;  %v7089_v28 = vpop.permute.xlu1 %1887  ;;  %v7091_v43 = vpop.permute.xlu0 %1885 }
 0x361   : > { %2012 = vrot.lane.b32.xlu2 %v6313_v19, %s4679_s16 }
 0x362   : > { %2010 = vrot.lane.b32.xlu1 %v10170_v24, %s4679_s16  ;;  %2008 = vrot.lane.b32.xlu0 %v10173_v58, %s4679_s16 }
 0x363   : > { %v7099_v12 = vpop.permute.xlu2 %1913 }
 0x364   : > { %10268 = vst [vmem:[#allocation80_spill] sm:$0xff] %v7099_v12  ;;  %v7101_v23 = vpop.permute.xlu1 %1893  ;;  %v7103_v14 = vpop.permute.xlu0 %1891 }
 0x365   : > { %10269 = vst [vmem:[#allocation110_spill] sm:$0xff] %v7101_v23  ;;  %v10356_v23 = vld [vmem:[#allocation107_spill] sm:$0xff] }
 0x366   : > { %10270 = vst [vmem:[#allocation132_spill] sm:$0xff] %v7103_v14 }
 0x369   : > { %2018 = vrot.lane.b32.xlu2 %v6365_v8, %s4679_s16 }
 0x36a   : > { %2016 = vrot.lane.b32.xlu1 %v10186_v37, %s4679_s16  ;;  %2014 = vrot.lane.b32.xlu0 %v10189_v35, %s4679_s16 }
 0x36b   : > { %v7111_v19 = vpop.permute.xlu2 %1919 }
 0x36c   : > { %10271 = vst [vmem:[#allocation153_spill] sm:$0xff] %v7111_v19  ;;  %v7113_v40 = vpop.permute.xlu1 %1899  ;;  %v7115_v24 = vpop.permute.xlu0 %1897 }
 0x36d   : > { %10272 = vst [vmem:[#allocation203_spill] sm:$0xff] %v7113_v40 }
 0x36e   : > { %10273 = vst [vmem:[#allocation9_spill] sm:$0xff] %v7115_v24  ;;  %v2070_v24 = vrot.slane %v7145_v27, 1 }
 0x371   : > { %2024 = vrot.lane.b32.xlu2 %v6420_v42, %s4679_s16 }
 0x372   : > { %2022 = vrot.lane.b32.xlu1 %v10201_v26, %s4679_s16  ;;  %2020 = vrot.lane.b32.xlu0 %v10204_v30, %s4679_s16  ;;  %v7142_v30 = vld [vmem:[%s6068_s11 + $0x150] sm:$0xff] }
 0x373   : > { %v7123_v8 = vpop.permute.xlu2 %1925 }
 0x374   : > { %10274 = vst [vmem:[#allocation102_spill] sm:$0xff] %v7123_v8  ;;  %v7125_v58 = vpop.permute.xlu1 %1905  ;;  %v7127_v37 = vpop.permute.xlu0 %1903  ;;  %v10295_v8 = vld [vmem:[#allocation189_spill] sm:$0xff] }
 0x375   : > { %10275 = vst [vmem:[#allocation171_spill] sm:$0xff] %v7125_v58 }
 0x376   : > { %10276 = vst [vmem:[#allocation29_spill] sm:$0xff] %v7127_v37  ;;  %v10319_v37 = vld [vmem:[#allocation72_spill] sm:$0xff] }
 0x379   : > { %2030 = vrot.lane.b32.xlu2 %v6474_v4, %s4679_s16 }
 0x37a   : > { %2028 = vrot.lane.b32.xlu1 %v10216_v7, %s4679_s16  ;;  %2026 = vrot.lane.b32.xlu0 %v10219_v3, %s4679_s16 }
 0x37b   : > { %v7135_v42 = vpop.permute.xlu2 %1931 }
 0x37c   : > { %10277 = vst [vmem:[#allocation70_spill] sm:$0xff] %v7135_v42  ;;  %v7137_v35 = vpop.permute.xlu1 %1911  ;;  %v7139_v26 = vpop.permute.xlu0 %1909 }
 0x37d   : > { %10278 = vst [vmem:[#allocation100_spill] sm:$0xff] %v7137_v35  ;;  %v10307_v35 = vld [vmem:[#allocation198_spill] sm:$0xff] }
 0x37e   : > { %10279 = vst [vmem:[#allocation32_spill] sm:$0xff] %v7139_v26  ;;  %v10309_v26 = vld [vmem:[#allocation68_spill] sm:$0xff] }
 0x381   : > { %2036 = vrot.lane.b32.xlu2 %v7142_v30, %s4679_s16 }
 0x382   : > { %2034 = vrot.lane.b32.xlu1 %v7145_v27, %s4679_s16  ;;  %2032 = vrot.lane.b32.xlu0 %v7148_v0, %s4679_s16 }
 0x383   : > { %v7156_v4 = vpop.permute.xlu2 %1937 }
 0x384   : > { %10280 = vst [vmem:[#allocation147_spill] sm:$0xff] %v7156_v4  ;;  %v7158_v7 = vpop.permute.xlu1 %1917  ;;  %v7160_v3 = vpop.permute.xlu0 %1915 }
 0x385   : > { %10281 = vst [vmem:[#allocation205_spill] sm:$0xff] %v7158_v7  ;;  %v10301_v7 = vld [vmem:[#allocation196_spill] sm:$0xff] }
 0x386   : > { %10282 = vst [vmem:[#allocation3_spill] sm:$0xff] %v7160_v3  ;;  %v10303_v3 = vld [vmem:[#allocation69_spill] sm:$0xff] }
 0x389   : > { %2080 = vrot.lane.b32.xlu2 %v10283_v46, %s4680_s17  ;;  %v10291_v46 = vld [vmem:[#allocation186_spill] sm:$0xff] }
 0x38a   : > { %2078 = vrot.lane.b32.xlu1 %v10284_v17, %s4680_s17  ;;  %2076 = vrot.lane.b32.xlu0 %v10285_v47, %s4680_s17 }
 0x38b   : > { %v7168_v48 = vpop.permute.xlu2 %1943 }
 0x38c   : > { %10286 = vst [vmem:[#allocation101_spill] sm:$0xff] %v7168_v48  ;;  %v7170_v36 = vpop.permute.xlu1 %1923  ;;  %v7172_v6 = vpop.permute.xlu0 %1921 }
 0x38d   : > { %10287 = vst [vmem:[#allocation34_spill] sm:$0xff] %v7170_v36 }
 0x38e   : > { %10288 = vst [vmem:[#allocation124_spill] sm:$0xff] %v7172_v6  ;;  %v10296_v6 = vld [vmem:[#allocation190_spill] sm:$0xff] }
 0x391   : > { %2086 = vrot.lane.b32.xlu2 %v10289_v2, %s4680_s17 }
 0x392   : > { %2084 = vrot.lane.b32.xlu1 %v10290_v1, %s4680_s17  ;;  %2082 = vrot.lane.b32.xlu0 %v10291_v46, %s4680_s17 }
 0x393   : > { %v7180_v10 = vpop.permute.xlu2 %1982 }
 0x394   : > { %10292 = vst [vmem:[#allocation54_spill] sm:$0xff] %v7180_v10  ;;  %v7182_v17 = vpop.permute.xlu1 %1929  ;;  %v7184_v47 = vpop.permute.xlu0 %1927  ;;  %v7546_v10 = vld [vmem:[%s6068_s11 + $0x110] sm:$0xff] }
 0x395   : > { %10293 = vst [vmem:[#allocation84_spill] sm:$0xff] %v7182_v17 }
 0x396   : > { %10294 = vst [vmem:[#allocation114_spill] sm:$0xff] %v7184_v47  ;;  %v10302_v47 = vld [vmem:[#allocation25_spill] sm:$0xff] }
 0x397   : > { %10403 = vst [vmem:[#allocation233_spill] sm:$0xff] %v7546_v10 }
 0x399   : > { %2092 = vrot.lane.b32.xlu2 %v10295_v8, %s4680_s17 }
 0x39a   : > { %2090 = vrot.lane.b32.xlu1 %v10296_v6, %s4680_s17  ;;  %2088 = vrot.lane.b32.xlu0 %v10297_v51, %s4680_s17 }
 0x39b   : > { %v7192_v19 = vpop.permute.xlu2 %1988 }
 0x39c   : > { %10298 = vst [vmem:[#allocation136_spill] sm:$0xff] %v7192_v19  ;;  %v7194_v36 = vpop.permute.xlu1 %1935  ;;  %v7196_v33 = vpop.permute.xlu0 %1933 }
 0x39d   : > { %10299 = vst [vmem:[#allocation157_spill] sm:$0xff] %v7194_v36  ;;  %v10318_v36 = vld [vmem:[#allocation30_spill] sm:$0xff] }
 0x39e   : > { %10300 = vst [vmem:[#allocation167_spill] sm:$0xff] %v7196_v33 }
 0x3a1   : > { %2098 = vrot.lane.b32.xlu2 %v10301_v7, %s4680_s17 }
 0x3a2   : > { %2096 = vrot.lane.b32.xlu1 %v10302_v47, %s4680_s17  ;;  %2094 = vrot.lane.b32.xlu0 %v10303_v3, %s4680_s17 }
 0x3a3   : > { %v7204_v55 = vpop.permute.xlu2 %1994 }
 0x3a4   : > { %10304 = vst [vmem:[#allocation175_spill] sm:$0xff] %v7204_v55  ;;  %v7206_v12 = vpop.permute.xlu1 %1941  ;;  %v7208_v48 = vpop.permute.xlu0 %1939 }
 0x3a5   : > { %10305 = vst [vmem:[#allocation53_spill] sm:$0xff] %v7206_v12  ;;  %v10312_v12 = vld [vmem:[#allocation24_spill] sm:$0xff] }
 0x3a6   : > { %10306 = vst [vmem:[#allocation83_spill] sm:$0xff] %v7208_v48  ;;  %v10313_v48 = vld [vmem:[#allocation58_spill] sm:$0xff] }
 0x3a9   : > { %2104 = vrot.lane.b32.xlu2 %v10307_v35, %s4680_s17 }
 0x3aa   : > { %2102 = vrot.lane.b32.xlu1 %v10308_v62, %s4680_s17  ;;  %2100 = vrot.lane.b32.xlu0 %v10309_v26, %s4680_s17 }
 0x3ab   : > { %v7216_v59 = vpop.permute.xlu2 %2000 }
 0x3ac   : > { %10310 = vst [vmem:[#allocation113_spill] sm:$0xff] %v7216_v59  ;;  %v7218_v54 = vpop.permute.xlu1 %1980  ;;  %v7220_v60 = vpop.permute.xlu0 %1978  ;;  %v10317_v59 = vld [vmem:[#allocation202_spill] sm:$0xff] }
 0x3b1   : > { %2110 = vrot.lane.b32.xlu2 %v10311_v39, %s4680_s17 }
 0x3b2   : > { %2108 = vrot.lane.b32.xlu1 %v10312_v12, %s4680_s17  ;;  %2106 = vrot.lane.b32.xlu0 %v10313_v48, %s4680_s17 }
 0x3b3   : > { %v7228_v4 = vpop.permute.xlu2 %2006 }
 0x3b4   : > { %10314 = vst [vmem:[#allocation135_spill] sm:$0xff] %v7228_v4  ;;  %v7230_v58 = vpop.permute.xlu1 %1986  ;;  %v7232_v22 = vpop.permute.xlu0 %1984  ;;  %v10323_v4 = vld [vmem:[#allocation204_spill] sm:$0xff] }
 0x3b5   : > { %10315 = vst [vmem:[#allocation156_spill] sm:$0xff] %v7230_v58 }
 0x3b6   : > { %10316 = vst [vmem:[#allocation12_spill] sm:$0xff] %v7232_v22 }
 0x3b9   : > { %2116 = vrot.lane.b32.xlu2 %v10317_v59, %s4680_s17 }
 0x3ba   : > { %2114 = vrot.lane.b32.xlu1 %v10318_v36, %s4680_s17  ;;  %2112 = vrot.lane.b32.xlu0 %v10319_v37, %s4680_s17 }
 0x3bb   : > { %v7240_v49 = vpop.permute.xlu2 %2012 }
 0x3bc   : > { %10320 = vst [vmem:[#allocation174_spill] sm:$0xff] %v7240_v49  ;;  %v7242_v55 = vpop.permute.xlu1 %1992  ;;  %v7244_v33 = vpop.permute.xlu0 %1990  ;;  %v7259_v49 = vld [vmem:[%s6068_s11 + $0x158] sm:$0x3] }
 0x3bd   : > { %10321 = vst [vmem:[#allocation35_spill] sm:$0xff] %v7242_v55  ;;  %v2072_v55 = vrot.slane %v7142_v30, 1 }
 0x3be   : > { %10322 = vst [vmem:[#allocation73_spill] sm:$0xff] %v7244_v33  ;;  %v2074_v33 = vrot.slane %v7259_v49, 1 }
 0x3bf   : > { %v7281_v32 = vsel %vm415_vm0, %v2070_v24, %v2072_v55 }
 0x3c0   : > { %v7278_v19 = vsel %vm415_vm0, %v2072_v55, %v2074_v33 }
 0x3c1   : > { %2122 = vrot.lane.b32.xlu2 %v10323_v4, %s4680_s17 }
 0x3c2   : > { %2120 = vrot.lane.b32.xlu1 %v10324_v45, %s4680_s17  ;;  %2118 = vrot.lane.b32.xlu0 %v10325_v16, %s4680_s17  ;;  %v10357_v16 = vld [vmem:[#allocation45_spill] sm:$0xff] }
 0x3c3   : > { %v7252_v42 = vpop.permute.xlu2 %2018 }
 0x3c4   : > { %10326 = vst [vmem:[#allocation103_spill] sm:$0xff] %v7252_v42  ;;  %v7254_v40 = vpop.permute.xlu1 %1998  ;;  %v7256_v17 = vpop.permute.xlu0 %1996 }
 0x3c5   : > { %10327 = vst [vmem:[#allocation38_spill] sm:$0xff] %v7254_v40  ;;  %v2069_v40 = vrot.slane %v7148_v0, 1 }
 0x3c6   : > { %10328 = vst [vmem:[#allocation148_spill] sm:$0xff] %v7256_v17 }
 0x3c7   : > { %v7284_v58 = vsel %vm415_vm0, %v2069_v40, %v2070_v24 }
 0x3c9   : > { %2128 = vrot.lane.b32.xlu2 %v6519_v15, %s4680_s17 }
 0x3ca   : > { %2126 = vrot.lane.b32.xlu1 %v6526_v34, %s4680_s17  ;;  %2124 = vrot.lane.b32.xlu0 %v6531_v13, %s4680_s17 }
 0x3cb   : > { %v7270_v42 = vpop.permute.xlu2 %2024 }
 0x3cc   : > { %10329 = vst [vmem:[#allocation4_spill] sm:$0xff] %v7270_v42  ;;  %v7273_v17 = vpop.permute.xlu1 %2004  ;;  %v7275_v63 = vpop.permute.xlu0 %2002 }
 0x3cd   : > { %10330 = vst [vmem:[#allocation39_spill] sm:$0xff] %v7273_v17 }
 0x3ce   : > { %10331 = vst [vmem:[#allocation14_spill] sm:$0xff] %v7275_v63 }
 0x3d1   : > { %2134 = vrot.lane.b32.xlu2 %v7278_v19, %s4680_s17 }
 0x3d2   : > { %2132 = vrot.lane.b32.xlu1 %v7281_v32, %s4680_s17  ;;  %2130 = vrot.lane.b32.xlu0 %v7284_v58, %s4680_s17 }
 0x3d3   : > { %v7292_v17 = vpop.permute.xlu2 %2030 }
 0x3d4   : > { %10332 = vst [vmem:[#allocation57_spill] sm:$0xff] %v7292_v17  ;;  %v7294_v63 = vpop.permute.xlu1 %2010  ;;  %v7296_v33 = vpop.permute.xlu0 %2008  ;;  %v10347_v17 = vld [vmem:[#allocation43_spill] sm:$0xff] }
 0x3d5   : > { %10333 = vst [vmem:[#allocation87_spill] sm:$0xff] %v7294_v63 }
 0x3d6   : > { %10334 = vst [vmem:[#allocation117_spill] sm:$0xff] %v7296_v33 }
 0x3d9   : > { %2177 = vrot.lane.b32.xlu2 %v6596_v44, %s4681_s18 }
 0x3da   : > { %2175 = vrot.lane.b32.xlu1 %v6603_v31, %s4681_s18  ;;  %2173 = vrot.lane.b32.xlu0 %v6608_v18, %s4681_s18 }
 0x3db   : > { %v7304_v55 = vpop.permute.xlu2 %2036 }
 0x3dc   : > { %10335 = vst [vmem:[#allocation139_spill] sm:$0xff] %v7304_v55  ;;  %v7306_v40 = vpop.permute.xlu1 %2016  ;;  %v7308_v24 = vpop.permute.xlu0 %2014 }
 0x3dd   : > { %10336 = vst [vmem:[#allocation160_spill] sm:$0xff] %v7306_v40 }
 0x3de   : > { %10337 = vst [vmem:[#allocation170_spill] sm:$0xff] %v7308_v24 }
 0x3e1   : > { %2183 = vrot.lane.b32.xlu2 %v6639_v25, %s4681_s18 }
 0x3e2   : > { %2181 = vrot.lane.b32.xlu1 %v6646_v56, %s4681_s18  ;;  %2179 = vrot.lane.b32.xlu0 %v6651_v53, %s4681_s18 }
 0x3e3   : > { %v7316_v44 = vpop.permute.xlu2 %2080 }
 0x3e4   : > { %10338 = vst [vmem:[#allocation178_spill] sm:$0xff] %v7316_v44  ;;  %v7318_v31 = vpop.permute.xlu1 %2022  ;;  %v7320_v18 = vpop.permute.xlu0 %2020 }
 0x3e5   : > { %10339 = vst [vmem:[#allocation179_spill] sm:$0xff] %v7318_v31 }
 0x3e6   : > { %10340 = vst [vmem:[#allocation180_spill] sm:$0xff] %v7320_v18 }
 0x3e9   : > { %2189 = vrot.lane.b32.xlu2 %v6682_v9, %s4681_s18 }
 0x3ea   : > { %2187 = vrot.lane.b32.xlu1 %v6689_v52, %s4681_s18  ;;  %2185 = vrot.lane.b32.xlu0 %v6694_v11, %s4681_s18 }
 0x3eb   : > { %v7328_v24 = vpop.permute.xlu2 %2086 }
 0x3ec   : > { %10341 = vst [vmem:[#allocation181_spill] sm:$0xff] %v7328_v24  ;;  %v7330_v40 = vpop.permute.xlu1 %2028  ;;  %v7332_v63 = vpop.permute.xlu0 %2026 }
 0x3ed   : > { %10342 = vst [vmem:[#allocation184_spill] sm:$0xff] %v7330_v40 }
 0x3ee   : > { %10343 = vst [vmem:[#allocation185_spill] sm:$0xff] %v7332_v63 }
 0x3f1   : > { %2195 = vrot.lane.b32.xlu2 %v6725_v29, %s4681_s18 }
 0x3f2   : > { %2193 = vrot.lane.b32.xlu1 %v6732_v38, %s4681_s18  ;;  %2191 = vrot.lane.b32.xlu0 %v6737_v5, %s4681_s18 }
 0x3f3   : > { %v7340_v18 = vpop.permute.xlu2 %2092 }
 0x3f4   : > { %10344 = vst [vmem:[#allocation186_spill] sm:$0xff] %v7340_v18  ;;  %v7342_v33 = vpop.permute.xlu1 %2034  ;;  %v7344_v55 = vpop.permute.xlu0 %2032  ;;  %v10349_v18 = vld [vmem:[#allocation151_spill] sm:$0xff] }
 0x3f5   : > { %10345 = vst [vmem:[#allocation189_spill] sm:$0xff] %v7342_v33  ;;  %v10350_v33 = vld [vmem:[#allocation192_spill] sm:$0xff] }
 0x3f6   : > { %10346 = vst [vmem:[#allocation190_spill] sm:$0xff] %v7344_v55  ;;  %v10351_v55 = vld [vmem:[#allocation7_spill] sm:$0xff] }
 0x3f9   : > { %2201 = vrot.lane.b32.xlu2 %v6768_v21, %s4681_s18 }
 0x3fa   : > { %2199 = vrot.lane.b32.xlu1 %v6775_v57, %s4681_s18  ;;  %2197 = vrot.lane.b32.xlu0 %v10347_v17, %s4681_s18 }
 0x3fb   : > { %v7352_v40 = vpop.permute.xlu2 %2098 }
 0x3fc   : > { %10348 = vst [vmem:[#allocation191_spill] sm:$0xff] %v7352_v40  ;;  %v7354_v63 = vpop.permute.xlu1 %2078  ;;  %v7356_v42 = vpop.permute.xlu0 %2076  ;;  %v10355_v40 = vld [vmem:[#allocation77_spill] sm:$0xff] }
 0x401   : > { %2207 = vrot.lane.b32.xlu2 %v10349_v18, %s4681_s18 }
 0x402   : > { %2205 = vrot.lane.b32.xlu1 %v10350_v33, %s4681_s18  ;;  %2203 = vrot.lane.b32.xlu0 %v10351_v55, %s4681_s18 }
 0x403   : > { %v7364_v31 = vpop.permute.xlu2 %2104 }
 0x404   : > { %10352 = vst [vmem:[#allocation196_spill] sm:$0xff] %v7364_v31  ;;  %v7366_v24 = vpop.permute.xlu1 %2084  ;;  %v7368_v13 = vpop.permute.xlu0 %2082  ;;  %v10361_v31 = vld [vmem:[#allocation99_spill] sm:$0xff] }
 0x405   : > { %10353 = vst [vmem:[#allocation25_spill] sm:$0xff] %v7366_v24  ;;  %v10362_v24 = vld [vmem:[#allocation46_spill] sm:$0xff] }
 0x406   : > { %10354 = vst [vmem:[#allocation69_spill] sm:$0xff] %v7368_v13  ;;  %v10363_v13 = vld [vmem:[#allocation23_spill] sm:$0xff] }
 0x409   : > { %2213 = vrot.lane.b32.xlu2 %v10355_v40, %s4681_s18 }
 0x40a   : > { %2211 = vrot.lane.b32.xlu1 %v10356_v23, %s4681_s18  ;;  %2209 = vrot.lane.b32.xlu0 %v10357_v16, %s4681_s18 }
 0x40b   : > { %v7376_v4 = vpop.permute.xlu2 %2110 }
 0x40c   : > { %10358 = vst [vmem:[#allocation198_spill] sm:$0xff] %v7376_v4  ;;  %v7378_v22 = vpop.permute.xlu1 %2090  ;;  %v7380_v14 = vpop.permute.xlu0 %2088  ;;  %v2169_v4 = vrot.slane %v7142_v30, 2 }
 0x40d   : > { %10359 = vst [vmem:[#allocation31_spill] sm:$0xff] %v7378_v22  ;;  %v2171_v22 = vrot.slane %v7259_v49, 2 }
 0x40e   : > { %10360 = vst [vmem:[#allocation68_spill] sm:$0xff] %v7380_v14  ;;  %v2167_v14 = vrot.slane %v7145_v27, 2 }
 0x410   : > { %v7414_v49 = vsel %vm576_vm1, %v2167_v14, %v2169_v4 }
 0x411   : > { %2219 = vrot.lane.b32.xlu2 %v10361_v31, %s4681_s18 }
 0x412   : > { %2217 = vrot.lane.b32.xlu1 %v10362_v24, %s4681_s18  ;;  %2215 = vrot.lane.b32.xlu0 %v10363_v13, %s4681_s18  ;;  %v7411_v13 = vsel %vm576_vm1, %v2169_v4, %v2171_v22 }
 0x413   : > { %v7388_v40 = vpop.permute.xlu2 %2116 }
 0x414   : > { %10364 = vst [vmem:[#allocation200_spill] sm:$0xff] %v7388_v40  ;;  %v7390_v45 = vpop.permute.xlu1 %2096  ;;  %v7392_v44 = vpop.permute.xlu0 %2094 }
 0x415   : > { %10365 = vst [vmem:[#allocation24_spill] sm:$0xff] %v7390_v45  ;;  %v2166_v45 = vrot.slane %v7148_v0, 2 }
 0x416   : > { %10366 = vst [vmem:[#allocation58_spill] sm:$0xff] %v7392_v44 }
 0x417   : > { %v7417_v24 = vsel %vm576_vm1, %v2166_v45, %v2167_v14  ;;  %v7432_v45 = vld [vmem:[%s6068_s11 + $0x50] sm:$0xff]  ;;  %v7437_v14 = vld [vmem:[%s6068_s11 + $0x48] sm:$0xff] }
 0x418   : > { %10373 = vst [vmem:[#allocation7_spill] sm:$0xff] %v7432_v45 }
 0x419   : > { %2225 = vrot.lane.b32.xlu2 %v6940_v50, %s4681_s18  ;;  %10374 = vst [vmem:[#allocation107_spill] sm:$0xff] %v7437_v14 }
 0x41a   : > { %2223 = vrot.lane.b32.xlu1 %v6947_v61, %s4681_s18  ;;  %2221 = vrot.lane.b32.xlu0 %v6952_v20, %s4681_s18  ;;  %v7497_v20 = vld [vmem:[%s6068_s11 + $0xa8] sm:$0xff] }
 0x41b   : > { %v7403_v40 = vpop.permute.xlu2 %2122  ;;  %10391 = vst [vmem:[#allocation221_spill] sm:$0xff] %v7497_v20 }
 0x41c   : > { %10367 = vst [vmem:[#allocation202_spill] sm:$0xff] %v7403_v40  ;;  %v7406_v44 = vpop.permute.xlu1 %2102  ;;  %v7408_v31 = vpop.permute.xlu0 %2100  ;;  %v7458_v40 = vld [vmem:[%s6068_s11 + $0x68] sm:$0xff] }
 0x41d   : > { %10368 = vst [vmem:[#allocation30_spill] sm:$0xff] %v7406_v44 }
 0x41e   : > { %10369 = vst [vmem:[#allocation72_spill] sm:$0xff] %v7408_v31  ;;  %v7442_v31 = vld [vmem:[%s6068_s11 + $0x40] sm:$0xff] }
 0x41f   : > { %10375 = vst [vmem:[#allocation45_spill] sm:$0xff] %v7442_v31 }
 0x420   : > { %10380 = vst [vmem:[#allocation210_spill] sm:$0xff] %v7458_v40 }
 0x421   : > { %2231 = vrot.lane.b32.xlu2 %v7411_v13, %s4681_s18 }
 0x422   : > { %2229 = vrot.lane.b32.xlu1 %v7414_v49, %s4681_s18  ;;  %2227 = vrot.lane.b32.xlu0 %v7417_v24, %s4681_s18 }
 0x423   : > { %v7425_v44 = vpop.permute.xlu2 %2128 }
 0x424   : > { %10370 = vst [vmem:[#allocation43_spill] sm:$0xff] %v7425_v44  ;;  %v7427_v22 = vpop.permute.xlu1 %2108  ;;  %v7429_v4 = vpop.permute.xlu0 %2106 }
 0x425   : > { %10371 = vst [vmem:[#allocation151_spill] sm:$0xff] %v7427_v22 }
 0x426   : > { %10372 = vst [vmem:[#allocation192_spill] sm:$0xff] %v7429_v4 }
 0x429   : > { %2270 = vrot.lane.b32.xlu2 %v7432_v45, %s4682_s19  ;;  %v7453_v45 = vld [vmem:[%s6068_s11 + $0x70] sm:$0xff] }
 0x42a   : > { %2268 = vrot.lane.b32.xlu1 %v7437_v14, %s4682_s19  ;;  %2266 = vrot.lane.b32.xlu0 %v7442_v31, %s4682_s19  ;;  %10379 = vst [vmem:[#allocation209_spill] sm:$0xff] %v7453_v45  ;;  %v7463_v14 = vld [vmem:[%s6068_s11 + $0x60] sm:$0xff]  ;;  %v7479_v31 = vld [vmem:[%s6068_s11 + $0x88] sm:$0xff] }
 0x42b   : > { %v7446_v22 = vpop.permute.xlu2 %2134  ;;  %10381 = vst [vmem:[#allocation211_spill] sm:$0xff] %v7463_v14 }
 0x42c   : > { %10376 = vst [vmem:[#allocation206_spill] sm:$0xff] %v7446_v22  ;;  %v7448_v4 = vpop.permute.xlu1 %2114  ;;  %v7450_v44 = vpop.permute.xlu0 %2112 }
 0x42d   : > { %10377 = vst [vmem:[#allocation207_spill] sm:$0xff] %v7448_v4 }
 0x42e   : > { %10378 = vst [vmem:[#allocation208_spill] sm:$0xff] %v7450_v44 }
 0x42f   : > { %10386 = vst [vmem:[#allocation216_spill] sm:$0xff] %v7479_v31 }
 0x431   : > { %2276 = vrot.lane.b32.xlu2 %v7453_v45, %s4682_s19  ;;  %v7474_v45 = vld [vmem:[%s6068_s11 + $0x90] sm:$0xff] }
 0x432   : > { %2274 = vrot.lane.b32.xlu1 %v7458_v40, %s4682_s19  ;;  %2272 = vrot.lane.b32.xlu0 %v7463_v14, %s4682_s19  ;;  %10385 = vst [vmem:[#allocation215_spill] sm:$0xff] %v7474_v45  ;;  %v7484_v40 = vld [vmem:[%s6068_s11 + $0x80] sm:$0xff] }
 0x433   : > { %v7467_v4 = vpop.permute.xlu2 %2177  ;;  %10387 = vst [vmem:[#allocation217_spill] sm:$0xff] %v7484_v40 }
 0x434   : > { %10382 = vst [vmem:[#allocation212_spill] sm:$0xff] %v7467_v4  ;;  %v7469_v44 = vpop.permute.xlu1 %2120  ;;  %v7471_v22 = vpop.permute.xlu0 %2118 }
 0x435   : > { %10383 = vst [vmem:[#allocation213_spill] sm:$0xff] %v7469_v44 }
 0x436   : > { %10384 = vst [vmem:[#allocation214_spill] sm:$0xff] %v7471_v22 }
 0x439   : > { %2282 = vrot.lane.b32.xlu2 %v7474_v45, %s4682_s19  ;;  %v4595_v45 = vld [vmem:[%s6068_s11 + $0xb0] sm:$0xff] }
 0x43a   : > { %2280 = vrot.lane.b32.xlu1 %v7479_v31, %s4682_s19  ;;  %2278 = vrot.lane.b32.xlu0 %v7484_v40, %s4682_s19  ;;  %v7502_v31 = vld [vmem:[%s6068_s11 + $0xa0] sm:$0xff] }
 0x43b   : > { %v7488_v14 = vpop.permute.xlu2 %2183  ;;  %10392 = vst [vmem:[#allocation222_spill] sm:$0xff] %v7502_v31 }
 0x43c   : > { %10388 = vst [vmem:[#allocation218_spill] sm:$0xff] %v7488_v14  ;;  %v7490_v22 = vpop.permute.xlu1 %2126  ;;  %v7492_v44 = vpop.permute.xlu0 %2124  ;;  %v7515_v14 = vld [vmem:[%s6068_s11 + $0xc8] sm:$0xff] }
 0x43d   : > { %10389 = vst [vmem:[#allocation219_spill] sm:$0xff] %v7490_v22 }
 0x43e   : > { %10390 = vst [vmem:[#allocation220_spill] sm:$0xff] %v7492_v44 }
 0x43f   : > { %10396 = vst [vmem:[#allocation226_spill] sm:$0xff] %v7515_v14 }
 0x441   : > { %2288 = vrot.lane.b32.xlu2 %v4595_v45, %s4682_s19  ;;  %v4598_v45 = vld [vmem:[%s6068_s11 + $0xd0] sm:$0xff] }
 0x442   : > { %2286 = vrot.lane.b32.xlu1 %v7497_v20, %s4682_s19  ;;  %2284 = vrot.lane.b32.xlu0 %v7502_v31, %s4682_s19  ;;  %v4600_v20 = vld [vmem:[%s6068_s11 + $0xc0] sm:$0xff] }
 0x443   : > { %v7506_v40 = vpop.permute.xlu2 %2189 }
 0x444   : > { %10393 = vst [vmem:[#allocation223_spill] sm:$0xff] %v7506_v40  ;;  %v7508_v22 = vpop.permute.xlu1 %2132  ;;  %v7510_v44 = vpop.permute.xlu0 %2130 }
 0x445   : > { %10394 = vst [vmem:[#allocation224_spill] sm:$0xff] %v7508_v22 }
 0x446   : > { %10395 = vst [vmem:[#allocation225_spill] sm:$0xff] %v7510_v44  ;;  %v7528_v44 = vld [vmem:[%s6068_s11 + $0xf0] sm:$0xff] }
 0x447   : > { %10398 = vst [vmem:[#allocation228_spill] sm:$0xff] %v7528_v44 }
 0x449   : > { %2294 = vrot.lane.b32.xlu2 %v4598_v45, %s4682_s19  ;;  %v7533_v45 = vld [vmem:[%s6068_s11 + $0xe8] sm:$0xff] }
 0x44a   : > { %2292 = vrot.lane.b32.xlu1 %v7515_v14, %s4682_s19  ;;  %2290 = vrot.lane.b32.xlu0 %v4600_v20, %s4682_s19  ;;  %10399 = vst [vmem:[#allocation229_spill] sm:$0xff] %v7533_v45  ;;  %v4603_v14 = vld [vmem:[%s6068_s11 + $0xe0] sm:$0xff] }
 0x44b   : > { %v7521_v31 = vpop.permute.xlu2 %2195 }
 0x44c   : > { %10397 = vst [vmem:[#allocation227_spill] sm:$0xff] %v7521_v31  ;;  %v7523_v40 = vpop.permute.xlu1 %2175  ;;  %v7525_v22 = vpop.permute.xlu0 %2173 }
 0x451   : > { %2300 = vrot.lane.b32.xlu2 %v7528_v44, %s4682_s19  ;;  %v7551_v44 = vld [vmem:[%s6068_s11 + $0x108] sm:$0xff] }
 0x452   : > { %2298 = vrot.lane.b32.xlu1 %v7533_v45, %s4682_s19  ;;  %2296 = vrot.lane.b32.xlu0 %v4603_v14, %s4682_s19  ;;  %10404 = vst [vmem:[#allocation234_spill] sm:$0xff] %v7551_v44  ;;  %v7556_v45 = vld [vmem:[%s6068_s11 + $0x100] sm:$0xff] }
 0x453   : > { %v7539_v20 = vpop.permute.xlu2 %2201  ;;  %10405 = vst [vmem:[#allocation235_spill] sm:$0xff] %v7556_v45 }
 0x454   : > { %10400 = vst [vmem:[#allocation230_spill] sm:$0xff] %v7539_v20  ;;  %v7541_v31 = vpop.permute.xlu1 %2181  ;;  %v7543_v4 = vpop.permute.xlu0 %2179 }
 0x455   : > { %10401 = vst [vmem:[#allocation231_spill] sm:$0xff] %v7541_v31 }
 0x456   : > { %10402 = vst [vmem:[#allocation232_spill] sm:$0xff] %v7543_v4  ;;  %v7567_v4 = vld [vmem:[%s6068_s11 + $0x130] sm:$0xff] }
 0x457   : > { %10408 = vst [vmem:[#allocation238_spill] sm:$0xff] %v7567_v4 }
 0x459   : > { %2306 = vrot.lane.b32.xlu2 %v7546_v10, %s4682_s19  ;;  %v7572_v10 = vld [vmem:[%s6068_s11 + $0x128] sm:$0xff] }
 0x45a   : > { %2304 = vrot.lane.b32.xlu1 %v7551_v44, %s4682_s19  ;;  %2302 = vrot.lane.b32.xlu0 %v7556_v45, %s4682_s19  ;;  %10409 = vst [vmem:[#allocation239_spill] sm:$0xff] %v7572_v10  ;;  %v7577_v44 = vld [vmem:[%s6068_s11 + $0x120] sm:$0xff] }
 0x45b   : > { %v7560_v14 = vpop.permute.xlu2 %2207  ;;  %10410 = vst [vmem:[#allocation240_spill] sm:$0xff] %v7577_v44 }
 0x45c   : > { %10406 = vst [vmem:[#allocation236_spill] sm:$0xff] %v7560_v14  ;;  %v7562_v20 = vpop.permute.xlu1 %2187  ;;  %v7564_v31 = vpop.permute.xlu0 %2185 }
 0x45d   : > { %10407 = vst [vmem:[#allocation237_spill] sm:$0xff] %v7562_v20 }
 0x461   : > { %2312 = vrot.lane.b32.xlu2 %v7567_v4, %s4682_s19 }
 0x462   : > { %2310 = vrot.lane.b32.xlu1 %v7572_v10, %s4682_s19  ;;  %2308 = vrot.lane.b32.xlu0 %v7577_v44, %s4682_s19 }
 0x463   : > { %v7581_v14 = vpop.permute.xlu2 %2213 }
 0x464   : > { %10411 = vst [vmem:[#allocation241_spill] sm:$0xff] %v7581_v14  ;;  %v7583_v45 = vpop.permute.xlu1 %2193  ;;  %v7585_v20 = vpop.permute.xlu0 %2191  ;;  %v7600_v14 = vld [vmem:[%s6068_s11 + $0x170] sm:$0xff] }
 0x465   : > { %10412 = vst [vmem:[#allocation242_spill] sm:$0xff] %v7583_v45  ;;  %v7603_v45 = vld [vmem:[%s6068_s11 + $0x168] sm:$0xff] }
 0x466   : > { %10413 = vst [vmem:[#allocation243_spill] sm:$0xff] %v7585_v20  ;;  %v7606_v20 = vld [vmem:[%s6068_s11 + $0x160] sm:$0xff] }
 0x469   : > { %2318 = vrot.lane.b32.xlu2 %v7142_v30, %s4682_s19 }
 0x46a   : > { %2316 = vrot.lane.b32.xlu1 %v7145_v27, %s4682_s19  ;;  %2314 = vrot.lane.b32.xlu0 %v7148_v0, %s4682_s19 }
 0x46b   : > { %v7593_v4 = vpop.permute.xlu2 %2219 }
 0x46c   : > { %10414 = vst [vmem:[#allocation244_spill] sm:$0xff] %v7593_v4  ;;  %v7595_v10 = vpop.permute.xlu1 %2199  ;;  %v7597_v44 = vpop.permute.xlu0 %2197 }
 0x46d   : > { %10415 = vst [vmem:[#allocation245_spill] sm:$0xff] %v7595_v10 }
 0x46e   : > { %10416 = vst [vmem:[#allocation246_spill] sm:$0xff] %v7597_v44 }
 0x471   : > { %2324 = vrot.lane.b32.xlu2 %v7600_v14, %s4682_s19 }
 0x472   : > { %2322 = vrot.lane.b32.xlu1 %v7603_v45, %s4682_s19  ;;  %2320 = vrot.lane.b32.xlu0 %v7606_v20, %s4682_s19 }
 0x473   : > { %v7614_v30 = vpop.permute.xlu2 %2225 }
 0x474   : > { %v7616_v27 = vpop.permute.xlu1 %2205  ;;  %v7618_v0 = vpop.permute.xlu0 %2203 }
 0x475   : > { %10417 = vst [vmem:[#allocation247_spill] sm:$0xff] %v7616_v27 }
 0x479   : > { %2368 = vrot.lane.b32.xlu2 %v10289_v2, %s4683_s20 }
 0x47a   : > { %2366 = vrot.lane.b32.xlu1 %v10290_v1, %s4683_s20  ;;  %2364 = vrot.lane.b32.xlu0 %v10291_v46, %s4683_s20 }
 0x47b   : > { %v7626_v10 = vpop.permute.xlu2 %2231 }
 0x47c   : > { %v7628_v44 = vpop.permute.xlu1 %2211  ;;  %v7630_v4 = vpop.permute.xlu0 %2209 }
 0x47d   : > { %10418 = vst [vmem:[#allocation248_spill] sm:$0xff] %v7628_v44 }
 0x47e   : > { %10419 = vst [vmem:[#allocation249_spill] sm:$0xff] %v7630_v4 }
 0x481   : > { %2372 = vrot.lane.b32.xlu2 %v10296_v6, %s4683_s20 }
 0x482   : > { %2461 = vrot.lane.b32.xlu1 %v6651_v53, %s4684_s21  ;;  %2370 = vrot.lane.b32.xlu0 %v10297_v51, %s4683_s20 }
 0x483   : > { %v7638_v2 = vpop.permute.xlu2 %2270 }
 0x484   : > { %v7640_v1 = vpop.permute.xlu1 %2217  ;;  %v7642_v46 = vpop.permute.xlu0 %2215 }
 0x485   : > { %10420 = vst [vmem:[#allocation250_spill] sm:$0xff] %v7642_v46  ;;  %v2454_v46 = vrot.slane %v7606_v20, 2 }
 0x489   : > { %2376 = vrot.lane.b32.xlu2 %v10303_v3, %s4683_s20 }
 0x48a   : > { %2374 = vrot.lane.b32.xlu1 %v10295_v8, %s4683_s20  ;;  %2463 = vrot.lane.b32.xlu0 %v6646_v56, %s4684_s21 }
 0x48b   : > { %v7650_v6 = vpop.permute.xlu2 %2276 }
 0x48c   : > { %v7652_v53 = vpop.permute.xlu1 %2223  ;;  %v7654_v51 = vpop.permute.xlu0 %2221 }
 0x491   : > { %2380 = vrot.lane.b32.xlu2 %v10301_v7, %s4683_s20 }
 0x492   : > { %2378 = vrot.lane.b32.xlu1 %v10302_v47, %s4683_s20  ;;  %2465 = vrot.lane.b32.xlu0 %v6639_v25, %s4684_s21 }
 0x493   : > { %v7662_v3 = vpop.permute.xlu2 %2282 }
 0x494   : > { %v7664_v8 = vpop.permute.xlu1 %2229  ;;  %v7666_v56 = vpop.permute.xlu0 %2227 }
 0x499   : > { %2469 = vrot.lane.b32.xlu2 %v6689_v52, %s4684_s21 }
 0x49a   : > { %2382 = vrot.lane.b32.xlu1 %v10309_v26, %s4683_s20  ;;  %2467 = vrot.lane.b32.xlu0 %v6694_v11, %s4684_s21 }
 0x49b   : > { %v7674_v7 = vpop.permute.xlu2 %2288 }
 0x49c   : > { %v7676_v47 = vpop.permute.xlu1 %2268  ;;  %v7678_v25 = vpop.permute.xlu0 %2266 }
 0x4a1   : > { %2471 = vrot.lane.b32.xlu2 %v6682_v9, %s4684_s21 }
 0x4a2   : > { %2386 = vrot.lane.b32.xlu1 %v10307_v35, %s4683_s20  ;;  %2384 = vrot.lane.b32.xlu0 %v10308_v62, %s4683_s20 }
 0x4a3   : > { %v7686_v52 = vpop.permute.xlu2 %2294 }
 0x4a4   : > { %v7688_v26 = vpop.permute.xlu1 %2274  ;;  %v7690_v11 = vpop.permute.xlu0 %2272 }
 0x4a9   : > { %2473 = vrot.lane.b32.xlu2 %v6737_v5, %s4684_s21 }
 0x4aa   : > { %2390 = vrot.lane.b32.xlu1 %v10312_v12, %s4683_s20  ;;  %2388 = vrot.lane.b32.xlu0 %v10313_v48, %s4683_s20  ;;  %v2455_v48 = vrot.slane %v7603_v45, 2 }
 0x4ab   : > { %v7698_v9 = vpop.permute.xlu2 %2300 }
 0x4ac   : > { %10421 = vst [vmem:[#allocation251_spill] sm:$0xff] %v7698_v9  ;;  %v7700_v35 = vpop.permute.xlu1 %2280  ;;  %v7702_v62 = vpop.permute.xlu0 %2278  ;;  %v2358_v9 = vrot.slane %v7603_v45, 1  ;;  %v9782_v45 = vrot.slane %v7600_v14, 2 }
 0x4b1   : > { %2475 = vrot.lane.b32.xlu2 %v6732_v38, %s4684_s21  ;;  %v2357_v38 = vrot.slane %v7606_v20, 1 }
 0x4b2   : > { %2505 = vrot.lane.b32.xlu1 %v6947_v61, %s4684_s21  ;;  %2408 = vrot.lane.b32.xlu0 %v6526_v34, %s4683_s20  ;;  %v2456_v61 = vsel %vm576_vm1, %v2454_v46, %v2455_v48 }
 0x4b3   : > { %v7710_v5 = vpop.permute.xlu2 %2306  ;;  %v2359_v34 = vsel %vm415_vm0, %v2357_v38, %v2358_v9 }
 0x4b4   : > { %10422 = vst [vmem:[#allocation252_spill] sm:$0xff] %v7710_v5  ;;  %v7712_v12 = vpop.permute.xlu1 %2286  ;;  %v7716_v4 = vpop.permute.xlu0 %2284 }
 0x4b9   : > { %2477 = vrot.lane.b32.xlu2 %v6725_v29, %s4684_s21  ;;  %v9781_v29 = vrot.slane %v7600_v14, 1 }
 0x4ba   : > { %2507 = vrot.lane.b32.xlu1 %v6940_v50, %s4684_s21  ;;  %2410 = vrot.lane.b32.xlu0 %v6519_v15, %s4683_s20  ;;  %v2458_v50 = vsel %vm576_vm1, %v2455_v48, %v9782_v45  ;;  %v2792_v48 = vld [vmem:[%s9609_s3 + $0x8] sm:$0xff] }
 0x4bb   : > { %v7728_v5 = vpop.permute.xlu2 %2312  ;;  %v2361_v15 = vsel %vm415_vm0, %v2358_v9, %v9781_v29  ;;  %v2795_v9 = vld [vmem:[%s9609_s3 + $0x20] sm:$0xf] }
 0x4bc   : > { %v7730_v44 = vpop.permute.xlu1 %2292  ;;  %v7733_v20 = vpop.permute.xlu0 %2290  ;;  %4384 = vmatpush.msk.msra.mxu0 %vm9783_vm2, %v2795_v9  ;;  %4501 = vmatpush.msk.msra.mxu3 %vm9783_vm2, %v2795_v9 }
 0x4bd   : > { %4500 = vmatpush.msk.msra.mxu2 %vm9783_vm2, %v2795_v9 }
 0x4c1   : > { %2479 = vrot.lane.b32.xlu2 %v10347_v17, %s4684_s21 }
 0x4c2   : > { %2509 = vrot.lane.b32.xlu1 %v7417_v24, %s4684_s21  ;;  %2412 = vrot.lane.b32.xlu0 %v7284_v58, %s4683_s20 }
 0x4c3   : > { %v7748_v46 = vpop.permute.xlu2 %2318 }
 0x4c4   : > { %v7750_v38 = vpop.permute.xlu1 %2298  ;;  %v7752_v27 = vpop.permute.xlu0 %2296 }
 0x4c5   : > { %10423 = vst [vmem:[#allocation253_spill] sm:$0xff] %v7750_v38  ;;  %v10429_v38 = vld [vmem:[#allocation20_spill] sm:$0xff] }
 0x4c9   : > { %2481 = vrot.lane.b32.xlu2 %v6775_v57, %s4684_s21  ;;  %v2794_v57 = vld [vmem:[%s9609_s3 + $0x18] sm:$0xff] }
 0x4ca   : > { %2511 = vrot.lane.b32.xlu1 %v7414_v49, %s4684_s21  ;;  %2414 = vrot.lane.b32.xlu0 %v7281_v32, %s4683_s20  ;;  %v2793_v32 = vld [vmem:[%s9609_s3 + $0x10] sm:$0xff] }
 0x4cb   : > { %v7760_v17 = vpop.permute.xlu2 %2324  ;;  %2903 = vmatpush.msra.mxu0 %v2794_v57  ;;  %4503 = vmatpush.msra.mxu3 %v2794_v57 }
 0x4cc   : > { %v7762_v24 = vpop.permute.xlu1 %2304  ;;  %v7764_v58 = vpop.permute.xlu0 %2302  ;;  %4502 = vmatpush.msra.mxu2 %v2794_v57  ;;  %v4611_v57 = vld [vmem:[%s9608_s2 + $0x18] sm:$0xff] }
 0x4cd   : > { %10424 = vst [vmem:[#allocation254_spill] sm:$0xff] %v7762_v24  ;;  %2904 = vmatpush.msra.mxu0 %v2793_v32  ;;  %4505 = vmatpush.msra.mxu3 %v2793_v32  ;;  %v4615_v24 = vld [vmem:[%s6068_s11] sm:$0xff] }
 0x4ce   : > { %10425 = vst [vmem:[#allocation255_spill] sm:$0xff] %v7764_v58  ;;  %4504 = vmatpush.msra.mxu2 %v2793_v32  ;;  %v10428_v58 = vrot.slane %v7600_v14, 1 }
 0x4cf   : > { %2905 = vmatpush.msra.mxu0 %v2792_v48  ;;  %4507 = vmatpush.msra.mxu3 %v2792_v48 }
 0x4d0   : > { %4506 = vmatpush.msra.mxu2 %v2792_v48 }
 0x4d1   : > { %2483 = vrot.lane.b32.xlu2 %v6768_v21, %s4684_s21 }
 0x4d2   : > { %2513 = vrot.lane.b32.xlu1 %v7411_v13, %s4684_s21  ;;  %2416 = vrot.lane.b32.xlu0 %v7278_v19, %s4683_s20  ;;  %v2791_v13 = vld [vmem:[%s9609_s3] sm:$0xff] }
 0x4d3   : > { %v7784_v49 = vpop.permute.xlu2 %2368  ;;  %2906 = vmatpush.msra.mxu0 %v2791_v13  ;;  %4509 = vmatpush.msra.mxu3 %v2791_v13  ;;  %v4610_v19 = vld [vmem:[%s9608_s2 + $0x20] sm:$0xf] }
 0x4d4   : > { %v7789_v9 = vpop.permute.xlu1 %2310  ;;  %v7791_v21 = vpop.permute.xlu0 %2308  ;;  %4508 = vmatpush.msra.mxu2 %v2791_v13  ;;  %v4612_v13 = vld [vmem:[%s9608_s2 + $0x10] sm:$0xff] }
 0x4d5   : > { %10426 = vst [vmem:[#allocation256_spill] sm:$0xff] %v7791_v21  ;;  %4510 = vmatpush.msk.msrb.mxu3 %vm9783_vm2, %v4610_v19  ;;  %v10427_v21 = vrot.slane %v7600_v14, 2 }
 0x4d7   : > { %4511 = vmatpush.msrb.mxu3 %v4611_v57 }
 0x4d9   : > { %2485 = vrot.lane.b32.xlu2 %v10351_v55, %s4684_s21  ;;  %4512 = vmatpush.msrb.mxu3 %v4612_v13  ;;  %v4613_v55 = vld [vmem:[%s9608_s2 + $0x8] sm:$0xff] }
 0x4da   : > { %2515 = vrot.lane.b32.xlu1 %v2456_v61, %s4684_s21  ;;  %2418 = vrot.lane.b32.xlu0 %v2359_v34, %s4683_s20  ;;  %v1614_v61 = vld [vmem:[%s6068_s11 + $0x178] sm:$0x3]  ;;  %v4614_v34 = vld [vmem:[%s9608_s2] sm:$0xff] }
 0x4db   : > { %v7807_v32 = vpop.permute.xlu2 %2372  ;;  %4513 = vmatpush.msrb.mxu3 %v4613_v55  ;;  %v2459_v13 = vrot.slane %v1614_v61, 2  ;;  %v2362_v55 = vrot.slane %v1614_v61, 1 }
 0x4dc   : > { %v7809_v48 = vpop.permute.xlu1 %2316  ;;  %v7814_v19 = vpop.permute.xlu0 %2314 }
 0x4dd   : > { %4514 = vmatpush.msrb.mxu3 %v4614_v34  ;;  %v2460_v34 = vsel %vm576_vm1, %v10427_v21, %v2459_v13  ;;  %v2551_v21 = vsel %vm1313_vm3, %v4615_v24, %v10429_v38 }
 0x4de   : > { %v2581_v14 = vsel %vm1344_vm4, %v2551_v21, %v7091_v43 }
 0x4e1   : > { %2487 = vrot.lane.b32.xlu2 %v10350_v33, %s4684_s21  ;;  %v2363_v33 = vsel %vm415_vm0, %v10428_v58, %v2362_v55  ;;  %v2611_v58 = vsel %vm1375_vm5, %v2581_v14, %v7220_v60  ;;  %v10430_v55 = vld [vmem:[#allocation94_spill] sm:$0xff]  ;;  %v4617_v14 = vld [vmem:[%s6068_s11 + $0x10] sm:$0xff] }
 0x4e2   : > { %2517 = vrot.lane.b32.xlu1 %v2458_v50, %s4684_s21  ;;  %2420 = vrot.lane.b32.xlu0 %v2361_v15, %s4683_s20 }
 0x4e3   : > { %v7827_v57 = vpop.permute.xlu2 %2376 }
 0x4e4   : > { %v7829_v29 = vpop.permute.xlu1 %2322  ;;  %v7831_v45 = vpop.permute.xlu0 %2320 }
 0x4e9   : > { %2392 = vrot.lane.b32.xlu2 %v10311_v39, %s4683_s20  ;;  %v2641_v39 = vsel %vm1406_vm6, %v2611_v58, %v7356_v42 }
 0x4ea   : > { %2519 = vrot.lane.b32.xlu1 %v2460_v34, %s4684_s21  ;;  %2422 = vrot.lane.b32.xlu0 %v2363_v33, %s4683_s20  ;;  %v2671_v13 = vsel %vm1437_vm7, %v2641_v39, %v7525_v22  ;;  %v4616_v22 = vld [vmem:[%s6068_s11 + $0x8] sm:$0xff]  ;;  %v10434_v39 = vld [vmem:[#allocation178_spill] sm:$0xff] }
 0x4eb   : > { %v7843_v50 = vpop.permute.xlu2 %2380  ;;  %v2701_v38 = vsel %vm1468_vm8, %v2671_v13, %v7678_v25 }
 0x4ec   : > { %v2367_v15 = vpop.permute.xlu1 %2366  ;;  %v2365_v61 = vpop.permute.xlu0 %2364 }
 0x4ed   : > { %v2731_v60 = vsel %vm9786_vm9, %v2701_v38, %v2365_v61  ;;  %v10435_v38 = vld [vmem:[#allocation13_spill] sm:$0xff] }
 0x4f1   : > { %2491 = vrot.lane.b32.xlu2 %v10357_v16, %s4684_s21 }
 0x4f2   : > { %2394 = vrot.lane.b32.xlu1 %v10319_v37, %s4683_s20  ;;  %2489 = vrot.lane.b32.xlu0 %v10349_v18, %s4684_s21  ;;  %v2552_v37 = vsel %vm1313_vm3, %v4616_v22, %v10430_v55 }
 0x4f3   : > { %v7864_v43 = vpop.permute.xlu2 %2469  ;;  %v2582_v25 = vsel %vm1344_vm4, %v2552_v37, %v7089_v28 }
 0x4f4   : > { %v2462_v42 = vpop.permute.xlu1 %2461  ;;  %v2371_v24 = vpop.permute.xlu0 %2370  ;;  %v2612_v18 = vsel %vm1375_vm5, %v2582_v25, %v7218_v54 }
 0x4f5   : > { %v2761_v16 = vsel %vm9785_vm11, %v2731_v60, %v2462_v42  ;;  %v2642_v34 = vsel %vm1406_vm6, %v2612_v18, %v7354_v63  ;;  %v10436_v60 = vld [vmem:[#allocation212_spill] sm:$0xff]  ;;  %v4618_v18 = vld [vmem:[%s6068_s11 + $0x20] sm:$0xff] }
 0x4f6   : > { %4385 = vmatmul.msk.f32.vlgmr.msra.gmra.mxu0 %vm9784_vm10, %v2761_v16  ;;  %v2672_v33 = vsel %vm1437_vm7, %v2642_v34, %v7523_v40  ;;  %v10432_v40 = vld [vmem:[#allocation54_spill] sm:$0xff]  ;;  %v10437_v16 = vld [vmem:[#allocation77_spill] sm:$0xff] }
 0x4f7   : > { %v2702_v28 = vsel %vm1468_vm8, %v2672_v33, %v7676_v47  ;;  %v10438_v34 = vld [vmem:[#allocation130_spill] sm:$0xff] }
 0x4f8   : > { %v2732_v54 = vsel %vm9786_vm9, %v2702_v28, %v2367_v15  ;;  %v10433_v15 = vld [vmem:[#allocation46_spill] sm:$0xff]  ;;  %v2554_v33 = vsel %vm1313_vm3, %v4618_v18, %v10438_v34  ;;  %v10450_v34 = vld [vmem:[#allocation25_spill] sm:$0xff] }
 0x4f9   : > { %2398 = vrot.lane.b32.xlu2 %v10317_v59, %s4683_s20 }
 0x4fa   : > { %2493 = vrot.lane.b32.xlu1 %v10356_v23, %s4684_s21  ;;  %2396 = vrot.lane.b32.xlu0 %v10318_v36, %s4683_s20  ;;  %v10431_v23 = vld [vmem:[#allocation37_spill] sm:$0xff] }
 0x4fb   : > { %v7889_v21 = vpop.permute.xlu2 %2471  ;;  %v2553_v58 = vsel %vm1313_vm3, %v4617_v14, %v10431_v23  ;;  %v10441_v14 = vld [vmem:[#allocation204_spill] sm:$0xff] }
 0x4fc   : > { %v2375_v61 = vpop.permute.xlu1 %2374  ;;  %v2464_v59 = vpop.permute.xlu0 %2463  ;;  %v2583_v36 = vsel %vm1344_vm4, %v2553_v58, %v7026_v41  ;;  %v10443_v58 = vld [vmem:[#allocation23_spill] sm:$0xff] }
 0x4fd   : > { %v2762_v63 = vsel %vm9785_vm11, %v2732_v54, %v2464_v59  ;;  %v2613_v47 = vsel %vm1375_vm5, %v2583_v36, %v10432_v40  ;;  %v10439_v54 = vld [vmem:[#allocation132_spill] sm:$0xff] }
 0x4fe   : > { %4386 = vmatmul.msk.f32.gmra.mxu0 %vm9784_vm10, %v2762_v63  ;;  %v2643_v13 = vsel %vm1406_vm6, %v2613_v47, %v10434_v39  ;;  %v2584_v59 = vsel %vm1344_vm4, %v2554_v33, %v10439_v54  ;;  %v10444_v36 = vld [vmem:[#allocation232_spill] sm:$0xff]  ;;  %v10445_v47 = vld [vmem:[#allocation71_spill] sm:$0xff] }
 0x4ff   : > { %v2673_v42 = vsel %vm1437_vm7, %v2643_v13, %v10436_v60  ;;  %v10451_v54 = vld [vmem:[#allocation15_spill] sm:$0xff] }
 0x500   : > { %v2703_v41 = vsel %vm1468_vm8, %v2673_v42, %v7638_v2  ;;  %v10440_v2 = vld [vmem:[#allocation12_spill] sm:$0xff]  ;;  %v4619_v42 = vld [vmem:[%s6068_s11 + $0x28] sm:$0xff] }
 0x501   : > { %2499 = vrot.lane.b32.xlu2 %v10433_v15, %s4684_s21  ;;  %v2733_v55 = vsel %vm9786_vm9, %v2703_v41, %v7784_v49  ;;  %v2614_v63 = vsel %vm1375_vm5, %v2584_v59, %v10440_v2  ;;  %v10442_v49 = vld [vmem:[#allocation69_spill] sm:$0xff]  ;;  %v10452_v59 = vld [vmem:[#allocation231_spill] sm:$0xff] }
 0x502   : > { %2402 = vrot.lane.b32.xlu1 %v10435_v38, %s4683_s20  ;;  %2495 = vrot.lane.b32.xlu0 %v10437_v16, %s4684_s21  ;;  %v2644_v23 = vsel %vm1406_vm6, %v2614_v63, %v10442_v49  ;;  %v10446_v16 = vld [vmem:[#allocation108_spill] sm:$0xff]  ;;  %v10453_v63 = vld [vmem:[#allocation99_spill] sm:$0xff] }
 0x503   : > { %v2474_v28 = vpop.permute.xlu2 %2473  ;;  %v2674_v40 = vsel %vm1437_vm7, %v2644_v23, %v10444_v36  ;;  %v2555_v41 = vsel %vm1313_vm3, %v4619_v42, %v10446_v16  ;;  %v4620_v23 = vld [vmem:[%s6068_s11 + $0x30] sm:$0xff]  ;;  %v10457_v42 = vld [vmem:[#allocation181_spill] sm:$0xff] }
 0x504   : > { %v7912_v22 = vpop.permute.xlu1 %2378  ;;  %v2466_v37 = vpop.permute.xlu0 %2465  ;;  %v2704_v15 = vsel %vm1468_vm8, %v2674_v40, %v7690_v11 }
 0x505   : > { %v2763_v25 = vsel %vm9785_vm11, %v2733_v55, %v2466_v37  ;;  %v2734_v13 = vsel %vm9786_vm9, %v2704_v15, %v2371_v24  ;;  %v10447_v55 = vld [vmem:[#allocation110_spill] sm:$0xff]  ;;  %v10455_v15 = vld [vmem:[#allocation133_spill] sm:$0xff] }
 0x506   : > { %4387 = vmatmul.msk.f32.gmra.mxu0 %vm9784_vm10, %v2763_v25  ;;  %v2585_v37 = vsel %vm1344_vm4, %v2555_v41, %v10447_v55  ;;  %v10448_v25 = vld [vmem:[#allocation156_spill] sm:$0xff]  ;;  %v10449_v24 = vld [vmem:[#allocation146_spill] sm:$0xff] }
 0x507   : > { %v2615_v11 = vsel %vm1375_vm5, %v2585_v37, %v10448_v25  ;;  %v10458_v41 = vld [vmem:[#allocation218_spill] sm:$0xff] }
 0x508   : > { %v2645_v33 = vsel %vm1406_vm6, %v2615_v11, %v10450_v34  ;;  %v10459_v34 = vld [vmem:[#allocation42_spill] sm:$0xff] }
 0x509   : > { %2404 = vrot.lane.b32.xlu2 %v10441_v14, %s4683_s20  ;;  %v2675_v2 = vsel %vm1437_vm7, %v2645_v33, %v10452_v59  ;;  %v10460_v33 = vld [vmem:[#allocation45_spill] sm:$0xff] }
 0x50a   : > { %2497 = vrot.lane.b32.xlu1 %v10443_v58, %s4684_s21  ;;  %2400 = vrot.lane.b32.xlu0 %v10445_v47, %s4683_s20  ;;  %v2705_v14 = vsel %vm1468_vm8, %v2675_v2, %v7688_v26  ;;  %v10454_v58 = vld [vmem:[#allocation129_spill] sm:$0xff] }
 0x50b   : > { %v7949_v18 = vpop.permute.xlu2 %2475  ;;  %v2556_v36 = vsel %vm1313_vm3, %v4620_v23, %v10454_v58  ;;  %v2735_v40 = vsel %vm9786_vm9, %v2705_v14, %v7807_v32  ;;  %v10461_v59 = vld [vmem:[#allocation81_spill] sm:$0xff]  ;;  %v10464_v14 = vld [vmem:[#allocation84_spill] sm:$0xff] }
 0x50c   : > { %v7937_v39 = vpop.permute.xlu1 %2382  ;;  %v2468_v38 = vpop.permute.xlu0 %2467  ;;  %v10462_v2 = vld [vmem:[#allocation229_spill] sm:$0xff] }
 0x50d   : > { %v2764_v60 = vsel %vm9785_vm11, %v2734_v13, %v2468_v38  ;;  %v2586_v13 = vsel %vm1344_vm4, %v2556_v36, %v10455_v15  ;;  %v2765_v38 = vsel %vm9785_vm11, %v2735_v40, %v7864_v43  ;;  %v10465_v58 = vld [vmem:[#allocation73_spill] sm:$0xff]  ;;  %v10467_v15 = vld [vmem:[#allocation68_spill] sm:$0xff] }
 0x50e   : > { %4388 = vmatmul.msk.f32.gmra.mxu0 %vm9784_vm10, %v2764_v60  ;;  %v10456_v60 = vld [vmem:[#allocation136_spill] sm:$0xff] }
 0x50f   : > { %v2616_v26 = vsel %vm1375_vm5, %v2586_v13, %v10456_v60 }
 0x510   : > { %v2646_v16 = vsel %vm1406_vm6, %v2616_v26, %v10457_v42 }
 0x511   : > { %2503 = vrot.lane.b32.xlu2 %v10449_v24, %s4684_s21  ;;  %v2676_v55 = vsel %vm1437_vm7, %v2646_v16, %v10458_v41 }
 0x512   : > { %2406 = vrot.lane.b32.xlu1 %v10451_v54, %s4683_s20  ;;  %2501 = vrot.lane.b32.xlu0 %v10453_v63, %s4684_s21  ;;  %v2706_v32 = vsel %vm1468_vm8, %v2676_v55, %v7650_v6  ;;  %v2557_v54 = vsel %vm1313_vm3, %v10460_v33, %v10459_v34  ;;  %v2573_v6 = vsel %vm1313_vm3, %v10462_v2, %v10461_v59  ;;  %v10469_v33 = vld [vmem:[#allocation50_spill] sm:$0xff]  ;;  %v10471_v59 = vld [vmem:[#allocation67_spill] sm:$0xff] }
 0x513   : > { %v2736_v37 = vsel %vm9786_vm9, %v2706_v32, %v2375_v61  ;;  %v7986_v25 = vpop.permute.xlu2 %2477  ;;  %v10463_v61 = vld [vmem:[#allocation9_spill] sm:$0xff]  ;;  %v2603_v23 = vsel %vm1344_vm4, %v2573_v6, %v10464_v14 }
 0x514   : > { %v7963_v49 = vpop.permute.xlu1 %2386  ;;  %v7970_v47 = vpop.permute.xlu0 %2384  ;;  %v2766_v24 = vsel %vm9785_vm11, %v2736_v37, %v7889_v21  ;;  %v2587_v63 = vsel %vm1344_vm4, %v2557_v54, %v10463_v61  ;;  %v10466_v21 = vld [vmem:[#allocation179_spill] sm:$0xff]  ;;  %v10474_v61 = vld [vmem:[#allocation70_spill] sm:$0xff] }
 0x515   : > { %v2617_v36 = vsel %vm1375_vm5, %v2587_v63, %v10465_v58  ;;  %v2633_v40 = vsel %vm1375_vm5, %v2603_v23, %v10466_v21  ;;  %v10470_v54 = vld [vmem:[#allocation107_spill] sm:$0xff]  ;;  %v10476_v23 = vld [vmem:[#allocation4_spill] sm:$0xff] }
 0x516   : > { %4389 = vmatmul.msk.f32.gmra.mxu0 %vm9784_vm10, %v2765_v38  ;;  %v2647_v13 = vsel %vm1406_vm6, %v2617_v36, %v10467_v15  ;;  %v10468_v38 = vld [vmem:[#allocation213_spill] sm:$0xff]  ;;  %v10475_v63 = vld [vmem:[#allocation35_spill] sm:$0xff] }
 0x517   : > { %v2663_v60 = vsel %vm1406_vm6, %v2633_v40, %v10468_v38  ;;  %v2677_v26 = vsel %vm1437_vm7, %v2647_v13, %v7564_v31  ;;  %v10477_v36 = vld [vmem:[#allocation31_spill] sm:$0xff]  ;;  %v10478_v40 = vld [vmem:[#allocation202_spill] sm:$0xff]  ;;  %v10479_v13 = vld [vmem:[#allocation237_spill] sm:$0xff] }
 0x518   : > { %v2693_v42 = vsel %vm1437_vm7, %v2663_v60, %v7640_v1  ;;  %v2707_v16 = vsel %vm1468_vm8, %v2677_v26, %v7702_v62  ;;  %v2558_v1 = vsel %vm1313_vm3, %v10470_v54, %v10469_v33  ;;  %v10480_v60 = vld [vmem:[#allocation244_spill] sm:$0xff]  ;;  %v10482_v33 = vld [vmem:[#allocation7_spill] sm:$0xff] }
 0x519   : > { %v2723_v55 = vsel %vm1468_vm8, %v2693_v42, %v7789_v9  ;;  %v2737_v32 = vsel %vm9786_vm9, %v2707_v16, %v7827_v57  ;;  %v10472_v9 = vld [vmem:[#allocation228_spill] sm:$0xff]  ;;  %v10473_v57 = vld [vmem:[#allocation203_spill] sm:$0xff] }
 0x51a   : > { %v2767_v31 = vsel %vm9785_vm11, %v2737_v32, %v2474_v28  ;;  %v2574_v2 = vsel %vm1313_vm3, %v10472_v9, %v10471_v59  ;;  %v2588_v6 = vsel %vm1344_vm4, %v2558_v1, %v10473_v57  ;;  %v10487_v57 = vld [vmem:[#allocation175_spill] sm:$0xff] }
 0x51b   : > { %v8023_v37 = vpop.permute.xlu2 %2479  ;;  %v2604_v28 = vsel %vm1344_vm4, %v2574_v2, %v10474_v61  ;;  %v2618_v14 = vsel %vm1375_vm5, %v2588_v6, %v10475_v63  ;;  %v10486_v2 = vld [vmem:[#allocation167_spill] sm:$0xff]  ;;  %v10488_v61 = vld [vmem:[#allocation185_spill] sm:$0xff]  ;;  %v10489_v63 = vld [vmem:[#allocation186_spill] sm:$0xff] }
 0x51c   : > { %v7988_v11 = vpop.permute.xlu1 %2390  ;;  %v7990_v43 = vpop.permute.xlu0 %2388  ;;  %v2634_v58 = vsel %vm1375_vm5, %v2604_v28, %v10476_v23  ;;  %v2648_v21 = vsel %vm1406_vm6, %v2618_v14, %v10477_v36  ;;  %v10490_v23 = vld [vmem:[#allocation220_spill] sm:$0xff]  ;;  %v10491_v36 = vld [vmem:[#allocation223_spill] sm:$0xff] }
 0x51d   : > { %v2664_v15 = vsel %vm1406_vm6, %v2634_v58, %v10478_v40  ;;  %v2678_v38 = vsel %vm1437_vm7, %v2648_v21, %v10479_v13 }
 0x51e   : > { %4390 = vmatmul.msk.f32.gmra.mxu0 %vm9784_vm10, %v2766_v24  ;;  %v2694_v26 = vsel %vm1437_vm7, %v2664_v15, %v10480_v60  ;;  %v2708_v42 = vsel %vm1468_vm8, %v2678_v38, %v7700_v35 }
 0x523   : > { %v2482_v1 = vpop.permute.xlu2 %2481 }
 0x524   : > { %v2506_v41 = vpop.permute.xlu1 %2505  ;;  %v2409_v24 = vpop.permute.xlu0 %2408 }
 0x525   : > { %v2753_v34 = vsel %vm9786_vm9, %v2723_v55, %v2409_v24  ;;  %v2738_v55 = vsel %vm9786_vm9, %v2708_v42, %v7912_v22  ;;  %v10485_v22 = vld [vmem:[#allocation10_spill] sm:$0xff] }
 0x526   : > { %4391 = vmatmul.msk.f32.gmra.mxu0 %vm9784_vm10, %v2767_v31  ;;  %v2783_v62 = vsel %vm9785_vm11, %v2753_v34, %v2506_v41  ;;  %v2724_v41 = vsel %vm1468_vm8, %v2694_v26, %v7728_v5  ;;  %v2768_v34 = vsel %vm9785_vm11, %v2738_v55, %v7949_v18  ;;  %v10481_v31 = vld [vmem:[#allocation104_spill] sm:$0xff]  ;;  %v10484_v5 = vld [vmem:[#allocation235_spill] sm:$0xff] }
 0x527   : > { %4407 = vmatmul.msk.f32.vlgmr.msra.gmra.mxu3 %vm9784_vm10, %v2783_v62  ;;  %v2559_v54 = vsel %vm1313_vm3, %v10482_v33, %v10481_v31  ;;  %v10483_v62 = vld [vmem:[#allocation201_spill] sm:$0xff]  ;;  %v10493_v55 = vld [vmem:[#allocation211_spill] sm:$0xff]  ;;  %v10498_v33 = vld [vmem:[#allocation148_spill] sm:$0xff] }
 0x528   : > { %v2575_v59 = vsel %vm1313_vm3, %v10484_v5, %v10483_v62  ;;  %v2589_v9 = vsel %vm1344_vm4, %v2559_v54, %v10485_v22  ;;  %v10497_v31 = vld [vmem:[#allocation157_spill] sm:$0xff]  ;;  %v10499_v62 = vld [vmem:[#allocation184_spill] sm:$0xff] }
 0x529   : > { %v2605_v18 = vsel %vm1344_vm4, %v2575_v59, %v10486_v2  ;;  %v2619_v6 = vsel %vm1375_vm5, %v2589_v9, %v10487_v57  ;;  %v10500_v59 = vld [vmem:[#allocation58_spill] sm:$0xff]  ;;  %v10501_v9 = vld [vmem:[#allocation219_spill] sm:$0xff] }
 0x52a   : > { %v2635_v28 = vsel %vm1375_vm5, %v2605_v18, %v10488_v61  ;;  %v2649_v14 = vsel %vm1406_vm6, %v2619_v6, %v10489_v63  ;;  %v10502_v18 = vld [vmem:[#allocation243_spill] sm:$0xff] }
 0x52b   : > { %v2665_v58 = vsel %vm1406_vm6, %v2635_v28, %v10490_v23  ;;  %v2679_v21 = vsel %vm1437_vm7, %v2649_v14, %v10491_v36 }
 0x52c   : > { %v2508_v16 = vpop.permute.xlu1 %2507  ;;  %v2411_v32 = vpop.permute.xlu0 %2410  ;;  %v2695_v40 = vsel %vm1437_vm7, %v2665_v58, %v7654_v51  ;;  %v2709_v15 = vsel %vm1468_vm8, %v2679_v21, %v7662_v3  ;;  %v10503_v21 = vld [vmem:[#allocation197_spill] sm:$0xff] }
 0x52d   : > { %v2754_v24 = vsel %vm9786_vm9, %v2724_v41, %v2411_v32  ;;  %v2725_v38 = vsel %vm1468_vm8, %v2695_v40, %v7814_v19  ;;  %v2739_v60 = vsel %vm9786_vm9, %v2709_v15, %v7843_v50  ;;  %v10492_v41 = vld [vmem:[#allocation6_spill] sm:$0xff]  ;;  %v10505_v15 = vld [vmem:[#allocation199_spill] sm:$0xff] }
 0x52e   : > { %4392 = vmatmul.msk.f32.gmra.mxu0 %vm9784_vm10, %v2768_v34  ;;  %v2784_v35 = vsel %vm9785_vm11, %v2754_v24, %v2508_v16  ;;  %v2769_v16 = vsel %vm9785_vm11, %v2739_v60, %v7986_v25  ;;  %v2560_v51 = vsel %vm1313_vm3, %v10493_v55, %v10492_v41  ;;  %v10494_v32 = vld [vmem:[#allocation154_spill] sm:$0xff]  ;;  %v10496_v34 = vld [vmem:[#allocation29_spill] sm:$0xff]  ;;  %v10508_v60 = vld [vmem:[#allocation147_spill] sm:$0xff] }
 0x52f   : > { %4408 = vmatmul.msk.f32.gmra.mxu3 %vm9784_vm10, %v2784_v35  ;;  %v10495_v24 = vld [vmem:[#allocation234_spill] sm:$0xff]  ;;  %v2590_v50 = vsel %vm1344_vm4, %v2560_v51, %v10496_v34  ;;  %v2484_v35 = vpop.permute.xlu2 %2483  ;;  %v10511_v55 = vld [vmem:[#allocation24_spill] sm:$0xff] }
 0x530   : > { %v2576_v19 = vsel %vm1313_vm3, %v10495_v24, %v10494_v32  ;;  %v2620_v54 = vsel %vm1375_vm5, %v2590_v50, %v10498_v33  ;;  %v10504_v40 = vld [vmem:[#allocation210_spill] sm:$0xff] }
 0x531   : > { %v2606_v25 = vsel %vm1344_vm4, %v2576_v19, %v10497_v31  ;;  %v2650_v22 = vsel %vm1406_vm6, %v2620_v54, %v10500_v59  ;;  %v10513_v24 = vld [vmem:[#allocation242_spill] sm:$0xff] }
 0x532   : > { %v2636_v5 = vsel %vm1375_vm5, %v2606_v25, %v10499_v62  ;;  %v2680_v57 = vsel %vm1437_vm7, %v2650_v22, %v10502_v18  ;;  %v10514_v22 = vld [vmem:[#allocation64_spill] sm:$0xff] }
 0x533   : > { %v2666_v2 = vsel %vm1406_vm6, %v2636_v5, %v10501_v9  ;;  %v2710_v61 = vsel %vm1468_vm8, %v2680_v57, %v7716_v4  ;;  %v10515_v9 = vld [vmem:[#allocation209_spill] sm:$0xff]  ;;  %v10517_v18 = vld [vmem:[#allocation240_spill] sm:$0xff] }
 0x534   : > { %v2510_v13 = vpop.permute.xlu1 %2509  ;;  %v2413_v26 = vpop.permute.xlu0 %2412  ;;  %v2696_v6 = vsel %vm1437_vm7, %v2666_v2, %v7652_v53  ;;  %v2740_v14 = vsel %vm9786_vm9, %v2710_v61, %v7937_v39  ;;  %v2561_v53 = vsel %vm1313_vm3, %v10504_v40, %v10503_v21  ;;  %v2562_v2 = vsel %vm1313_vm3, %v10515_v9, %v10514_v22  ;;  %v10518_v57 = vld [vmem:[#allocation48_spill] sm:$0xff]  ;;  %v10520_v61 = vld [vmem:[#allocation113_spill] sm:$0xff]  ;;  %v10524_v40 = vld [vmem:[#allocation227_spill] sm:$0xff] }
 0x535   : > { %v2755_v42 = vsel %vm9786_vm9, %v2725_v38, %v2413_v26  ;;  %v2726_v63 = vsel %vm1468_vm8, %v2696_v6, %v7809_v48  ;;  %v2770_v36 = vsel %vm9785_vm11, %v2740_v14, %v8023_v37  ;;  %v10507_v38 = vld [vmem:[#allocation171_spill] sm:$0xff]  ;;  %v10509_v26 = vld [vmem:[#allocation38_spill] sm:$0xff] }
 0x536   : > { %4393 = vmatmul.msk.f32.gmra.mxu0 %vm9784_vm10, %v2769_v16  ;;  %v2785_v3 = vsel %vm9785_vm11, %v2755_v42, %v2510_v13  ;;  %v10506_v13 = vld [vmem:[#allocation233_spill] sm:$0xff]  ;;  %v2591_v39 = vsel %vm1344_vm4, %v2561_v53, %v10507_v38  ;;  %v10519_v6 = vld [vmem:[#allocation83_spill] sm:$0xff] }
 0x537   : > { %4409 = vmatmul.msk.f32.gmra.mxu3 %vm9784_vm10, %v2785_v3  ;;  %v2577_v48 = vsel %vm1313_vm3, %v10506_v13, %v10505_v15  ;;  %v2621_v42 = vsel %vm1375_vm5, %v2591_v39, %v10509_v26  ;;  %v10510_v16 = vld [vmem:[#allocation57_spill] sm:$0xff]  ;;  %v10512_v3 = vld [vmem:[#allocation43_spill] sm:$0xff]  ;;  %v2486_v34 = vpop.permute.xlu2 %2485 }
 0x538   : > { %v2607_v37 = vsel %vm1344_vm4, %v2577_v48, %v10508_v60  ;;  %v2651_v51 = vsel %vm1406_vm6, %v2621_v42, %v10511_v55  ;;  %v10525_v42 = vld [vmem:[#allocation26_spill] sm:$0xff]  ;;  %v10528_v55 = vld [vmem:[#allocation239_spill] sm:$0xff] }
 0x539   : > { %v2637_v41 = vsel %vm1375_vm5, %v2607_v37, %v10510_v16  ;;  %v2681_v19 = vsel %vm1437_vm7, %v2651_v51, %v10513_v24  ;;  %v10526_v16 = vld [vmem:[#allocation217_spill] sm:$0xff]  ;;  %v10529_v51 = vld [vmem:[#allocation32_spill] sm:$0xff]  ;;  %v10531_v24 = vld [vmem:[#allocation14_spill] sm:$0xff] }
 0x53a   : > { %v2667_v32 = vsel %vm1406_vm6, %v2637_v41, %v10512_v3  ;;  %v2711_v31 = vsel %vm1468_vm8, %v2681_v19, %v7712_v12  ;;  %v10516_v12 = vld [vmem:[#allocation172_spill] sm:$0xff]  ;;  %v8200_v41 = vpop.f32.mrf.mxu1 }
 0x53b   : > { %v2697_v50 = vsel %vm1437_vm7, %v2667_v32, %v7614_v30  ;;  %v2741_v54 = vsel %vm9786_vm9, %v2711_v31, %v7970_v47  ;;  %v2592_v47 = vsel %vm1344_vm4, %v2562_v2, %v10518_v57 }
 0x53c   : > { %v2512_v28 = vpop.permute.xlu1 %2511  ;;  %v2415_v23 = vpop.permute.xlu0 %2414  ;;  %v2727_v33 = vsel %vm1468_vm8, %v2697_v50, %v7748_v46  ;;  %v2771_v59 = vsel %vm9785_vm11, %v2741_v54, %v2482_v1  ;;  %v2578_v46 = vsel %vm1313_vm3, %v10517_v18, %v10516_v12  ;;  %v10532_v50 = vld [vmem:[#allocation189_spill] sm:$0xff]  ;;  %v10534_v54 = vld [vmem:[#allocation224_spill] sm:$0xff] }
 0x53d   : > { %v2756_v58 = vsel %vm9786_vm9, %v2726_v63, %v2415_v23  ;;  %v2608_v1 = vsel %vm1344_vm4, %v2578_v46, %v10519_v6  ;;  %v10521_v63 = vld [vmem:[#allocation190_spill] sm:$0xff]  ;;  %v10522_v23 = vld [vmem:[#allocation191_spill] sm:$0xff]  ;;  %v10537_v6 = vld [vmem:[#allocation216_spill] sm:$0xff] }
 0x53e   : > { %4394 = vmatmul.msk.f32.gmra.mxu0 %vm9784_vm10, %v2770_v36  ;;  %v2786_v4 = vsel %vm9785_vm11, %v2756_v58, %v2512_v28  ;;  %v2622_v28 = vsel %vm1375_vm5, %v2592_v47, %v10520_v61  ;;  %v2638_v14 = vsel %vm1375_vm5, %v2608_v1, %v10521_v63  ;;  %v10523_v36 = vld [vmem:[#allocation225_spill] sm:$0xff]  ;;  %v10540_v63 = vld [vmem:[#allocation100_spill] sm:$0xff] }
 0x53f   : > { %4410 = vmatmul.msk.f32.gmra.mxu3 %vm9784_vm10, %v2786_v4  ;;  %v2652_v58 = vsel %vm1406_vm6, %v2622_v28, %v10522_v23  ;;  %v2668_v21 = vsel %vm1406_vm6, %v2638_v14, %v10523_v36  ;;  %v2488_v39 = vpop.permute.xlu2 %2487  ;;  %v10536_v47 = vld [vmem:[#allocation97_spill] sm:$0xff]  ;;  %v10539_v28 = vld [vmem:[#allocation238_spill] sm:$0xff]  ;;  %v10542_v23 = vld [vmem:[#allocation39_spill] sm:$0xff] }
 0x540   : > { %v2682_v53 = vsel %vm1437_vm7, %v2652_v58, %v10524_v40  ;;  %v2698_v4 = vsel %vm1437_vm7, %v2668_v21, %v7666_v56  ;;  %v2563_v56 = vsel %vm1313_vm3, %v10526_v16, %v10525_v42  ;;  %v2564_v1 = vsel %vm1313_vm3, %v10537_v6, %v10536_v47  ;;  %v10538_v61 = vld [vmem:[#allocation33_spill] sm:$0xff]  ;;  %v10543_v21 = vld [vmem:[#allocation139_spill] sm:$0xff]  ;;  %v10559_v47 = vld [vmem:[#allocation98_spill] sm:$0xff] }
 0x541   : > { %v2712_v15 = vsel %vm1468_vm8, %v2682_v53, %v7674_v7  ;;  %v2728_v48 = vsel %vm1468_vm8, %v2698_v4, %v7831_v45  ;;  %v10527_v45 = vld [vmem:[#allocation88_spill] sm:$0xff]  ;;  %v2593_v3 = vsel %vm1344_vm4, %v2563_v56, %v10529_v51  ;;  %v10541_v14 = vld [vmem:[#allocation101_spill] sm:$0xff]  ;;  %v10544_v53 = vld [vmem:[#allocation30_spill] sm:$0xff] }
 0x542   : > { %v2742_v38 = vsel %vm9786_vm9, %v2712_v15, %v7963_v49  ;;  %v2579_v49 = vsel %vm1313_vm3, %v10528_v55, %v10527_v45  ;;  %v2623_v19 = vsel %vm1375_vm5, %v2593_v3, %v10531_v24  ;;  %v8245_v36 = vpop.f32.mrf.mxu1  ;;  %v10545_v15 = vld [vmem:[#allocation206_spill] sm:$0xff]  ;;  %v10549_v3 = vld [vmem:[#allocation56_spill] sm:$0xff]  ;;  %v10552_v24 = vld [vmem:[#allocation135_spill] sm:$0xff] }
 0x543   : > { %v2772_v26 = vsel %vm9785_vm11, %v2742_v38, %v2484_v35  ;;  %v10530_v35 = vld [vmem:[#allocation53_spill] sm:$0xff]  ;;  %v10547_v55 = vld [vmem:[#allocation78_spill] sm:$0xff] }
 0x544   : > { %v2514_v25 = vpop.permute.xlu1 %2513  ;;  %v2417_v62 = vpop.permute.xlu0 %2416  ;;  %v2609_v32 = vsel %vm1344_vm4, %v2579_v49, %v10530_v35  ;;  %v10548_v49 = vld [vmem:[#allocation215_spill] sm:$0xff]  ;;  %v10550_v35 = vld [vmem:[#allocation80_spill] sm:$0xff]  ;;  %v10560_v6 = vld [vmem:[#allocation222_spill] sm:$0xff] }
 0x545   : > { %v2757_v5 = vsel %vm9786_vm9, %v2727_v33, %v2417_v62  ;;  %v2639_v31 = vsel %vm1375_vm5, %v2609_v32, %v10532_v50  ;;  %v2565_v51 = vsel %vm1313_vm3, %v10548_v49, %v10547_v55  ;;  %v10551_v32 = vld [vmem:[#allocation86_spill] sm:$0xff]  ;;  %v10571_v49 = vld [vmem:[#allocation5_spill] sm:$0xff] }
 0x546   : > { %4395 = vmatmul.msk.f32.gmra.mxu0 %vm9784_vm10, %v2771_v59  ;;  %v2787_v30 = vsel %vm9785_vm11, %v2757_v5, %v2514_v25  ;;  %v10533_v25 = vld [vmem:[#allocation72_spill] sm:$0xff]  ;;  %v2669_v62 = vsel %vm1406_vm6, %v2639_v31, %v10534_v54  ;;  %v10535_v5 = vld [vmem:[#allocation246_spill] sm:$0xff] }
 0x547   : > { %4411 = vmatmul.msk.f32.gmra.mxu3 %vm9784_vm10, %v2787_v30  ;;  %v2653_v33 = vsel %vm1406_vm6, %v2623_v19, %v10533_v25  ;;  %v2699_v22 = vsel %vm1437_vm7, %v2669_v62, %v7664_v8  ;;  %v2393_v8 = vpop.permute.xlu2 %2392  ;;  %v10553_v31 = vld [vmem:[#allocation116_spill] sm:$0xff]  ;;  %v10555_v62 = vld [vmem:[#allocation138_spill] sm:$0xff] }
 0x548   : > { %v2683_v59 = vsel %vm1437_vm7, %v2653_v33, %v10535_v5  ;;  %v2729_v30 = vsel %vm1468_vm8, %v2699_v22, %v7829_v29  ;;  %v2580_v29 = vsel %vm1313_vm3, %v10539_v28, %v10538_v61  ;;  %v10554_v33 = vld [vmem:[#allocation196_spill] sm:$0xff]  ;;  %v10561_v28 = vld [vmem:[#allocation177_spill] sm:$0xff] }
 0x549   : > { %v2713_v9 = vsel %vm1468_vm8, %v2683_v59, %v7733_v20  ;;  %v10556_v59 = vld [vmem:[#allocation230_spill] sm:$0xff] }
 0x54a   : > { %v2743_v12 = vsel %vm9786_vm9, %v2713_v9, %v7990_v43  ;;  %v2594_v43 = vsel %vm1344_vm4, %v2564_v1, %v10540_v63  ;;  %v10557_v9 = vld [vmem:[#allocation159_spill] sm:$0xff]  ;;  %v2566_v1 = vsel %vm1313_vm3, %v10560_v6, %v10559_v47 }
 0x54b   : > { %v2773_v57 = vsel %vm9785_vm11, %v2743_v12, %v2486_v34  ;;  %v2610_v34 = vsel %vm1344_vm4, %v2580_v29, %v10541_v14  ;;  %v2624_v58 = vsel %vm1375_vm5, %v2594_v43, %v10542_v23  ;;  %v10562_v63 = vld [vmem:[#allocation3_spill] sm:$0xff]  ;;  %v10564_v23 = vld [vmem:[#allocation117_spill] sm:$0xff] }
 0x54c   : > { %v2516_v13 = vpop.permute.xlu1 %2515  ;;  %v2419_v60 = vpop.permute.xlu0 %2418  ;;  %v2640_v40 = vsel %vm1375_vm5, %v2610_v34, %v10543_v21  ;;  %v2654_v4 = vsel %vm1406_vm6, %v2624_v58, %v10544_v53  ;;  %v2596_v43 = vsel %vm1344_vm4, %v2566_v1, %v10562_v63  ;;  %v4622_v21 = vld [vmem:[%s4769_s13 + $0xd0] sm:$0xff]  ;;  %v10584_v6 = vld [vmem:[#allocation119_spill] sm:$0xff]  ;;  %v10587_v63 = vld [vmem:[#allocation141_spill] sm:$0xff] }
 0x54d   : > { %v2758_v37 = vsel %vm9786_vm9, %v2728_v48, %v2419_v60  ;;  %v10546_v48 = vld [vmem:[#allocation245_spill] sm:$0xff]  ;;  %v2626_v58 = vsel %vm1375_vm5, %v2596_v43, %v10564_v23  ;;  %v10566_v53 = vld [vmem:[#allocation192_spill] sm:$0xff] }
 0x54e   : > { %4396 = vmatmul.msk.f32.gmra.mxu0 %vm9784_vm10, %v2772_v26  ;;  %v2788_v7 = vsel %vm9785_vm11, %v2758_v37, %v2516_v13  ;;  %v2670_v13 = vsel %vm1406_vm6, %v2640_v40, %v10545_v15  ;;  %v2684_v38 = vsel %vm1437_vm7, %v2654_v4, %v10546_v48  ;;  %v2656_v4 = vsel %vm1406_vm6, %v2626_v58, %v10566_v53  ;;  %v10567_v15 = vld [vmem:[#allocation76_spill] sm:$0xff] }
 0x54f   : > { %4412 = vmatmul.msk.f32.gmra.mxu3 %vm9784_vm10, %v2788_v7  ;;  %v2700_v60 = vsel %vm1437_vm7, %v2670_v13, %v7626_v10  ;;  %v2714_v37 = vsel %vm1468_vm8, %v2684_v38, %v7730_v44  ;;  %v4621_v44 = vld [vmem:[%s4769_s13 + $0xc8] sm:$0xff]  ;;  %v2492_v50 = vpop.permute.xlu2 %2491  ;;  %v2686_v48 = vsel %vm1437_vm7, %v2656_v4, %v7618_v0  ;;  %v10568_v38 = vld [vmem:[#allocation106_spill] sm:$0xff]  ;;  %v3273_v0 = vlaneseq }
 0x550   : > { %v2730_v42 = vsel %vm1468_vm8, %v2700_v60, %v7760_v17  ;;  %v2744_v16 = vsel %vm9786_vm9, %v2714_v37, %v7988_v11  ;;  %v1333_v17 = vsel %vm1313_vm3, %v4621_v44, %v10549_v3  ;;  %v2595_v11 = vsel %vm1344_vm4, %v2565_v51, %v10550_v35 }
 0x551   : > { %v2774_v45 = vsel %vm9785_vm11, %v2744_v16, %v2488_v39  ;;  %v1364_v39 = vsel %vm1344_vm4, %v1333_v17, %v10551_v32  ;;  %v2625_v19 = vsel %vm1375_vm5, %v2595_v11, %v10552_v24  ;;  %v2716_v37 = vsel %vm1468_vm8, %v2686_v48, %v7752_v27  ;;  %v10573_v27 = vld [vmem:[#allocation221_spill] sm:$0xff]  ;;  %v10574_v17 = vld [vmem:[#allocation40_spill] sm:$0xff] }
 0x552   : > { %v1395_v25 = vsel %vm1375_vm5, %v1364_v39, %v10553_v31  ;;  %v2655_v54 = vsel %vm1406_vm6, %v2625_v19, %v10554_v33  ;;  %v10575_v32 = vld [vmem:[#allocation205_spill] sm:$0xff]  ;;  %v4623_v19 = vld [vmem:[%s4769_s13 + $0xe0] sm:$0xff]  ;;  %v10576_v31 = vld [vmem:[#allocation60_spill] sm:$0xff]  ;;  %v3274_v47 = vshrl.u32 %v3273_v0, 7  ;;  %v8377_v58 = vstv %s4446_s24 }
 0x553   : > { %v1426_v5 = vsel %vm1406_vm6, %v1395_v25, %v10555_v62  ;;  %v2685_v22 = vsel %vm1437_vm7, %v2655_v54, %v10556_v59  ;;  %v1335_v25 = vsel %vm1313_vm3, %v4623_v19, %v10576_v31  ;;  %v10577_v33 = vld [vmem:[#allocation125_spill] sm:$0xff]  ;;  %v10578_v54 = vld [vmem:[#allocation226_spill] sm:$0xff]  ;;  %vm3280_vm12 = vcmp.ge.s32.totalorder %v8377_v58, 0 }
 0x554   : > { %v2518_v2 = vpop.permute.xlu1 %2517  ;;  %v2421_v18 = vpop.permute.xlu0 %2420  ;;  %v2715_v12 = vsel %vm1468_vm8, %v2685_v22, %v7686_v52  ;;  %v10563_v52 = vld [vmem:[#allocation16_spill] sm:$0xff]  ;;  %v2570_v62 = vsel %vm1313_vm3, %v10578_v54, %v10577_v33  ;;  %v10580_v22 = vld [vmem:[#allocation127_spill] sm:$0xff]  ;;  %vm3290_vm13 = vcmp.lt.s32.totalorder %v8377_v58, 16  ;;  %v10598_v19 = vld [vmem:[#allocation105_spill] sm:$0xff] }
 0x555   : > { %v2759_v46 = vsel %vm9786_vm9, %v2729_v30, %v2421_v18  ;;  %v8290_v30 = vpop.f32.mrf.mxu1  ;;  %v10600_v54 = vld [vmem:[#allocation153_spill] sm:$0xff]  ;;  %vm8425_vm14 = vmand %vm3280_vm12, %vm3290_vm13 }
 0x556   : > { %4397 = vmatmul.msk.f32.gmra.mxu0 %vm9784_vm10, %v2773_v57  ;;  %v2789_v20 = vsel %vm9785_vm11, %v2759_v46, %v2518_v2  ;;  %v1457_v2 = vsel %vm1437_vm7, %v1426_v5, %v10557_v9  ;;  %v10558_v46 = vld [vmem:[#allocation169_spill] sm:$0xff]  ;;  %v10579_v5 = vld [vmem:[#allocation87_spill] sm:$0xff] }
 0x557   : > { %4413 = vmatmul.msk.f32.gmra.mxu3 %vm9784_vm10, %v2789_v20  ;;  %v1488_v57 = vsel %vm1468_vm8, %v1457_v2, %v10558_v46  ;;  %v2745_v20 = vsel %vm9786_vm9, %v2715_v12, %v2393_v8  ;;  %v10565_v8 = vld [vmem:[#allocation41_spill] sm:$0xff]  ;;  %v8326_v16 = vpop.permute.xlu2 %2398  ;;  %v10581_v2 = vld [vmem:[#allocation90_spill] sm:$0xff]  ;;  %v10583_v46 = vld [vmem:[#allocation151_spill] sm:$0xff] }
 0x558   : > { %v1519_v29 = vsel %vm9786_vm9, %v1488_v57, %v10561_v28  ;;  %v1334_v40 = vsel %vm1313_vm3, %v4622_v21, %v10565_v8  ;;  %v10582_v12 = vld [vmem:[#allocation34_spill] sm:$0xff]  ;;  %v10586_v28 = vld [vmem:[#allocation247_spill] sm:$0xff] }
 0x559   : > { %v1550_v34 = vsel %vm9785_vm11, %v1519_v29, %v10563_v52  ;;  %v1365_v13 = vsel %vm1344_vm4, %v1334_v40, %v10567_v15  ;;  %v10590_v21 = vld [vmem:[#allocation162_spill] sm:$0xff]  ;;  %v10591_v40 = vld [vmem:[#allocation248_spill] sm:$0xff] }
 0x55a   : > { %v1396_v60 = vsel %vm1375_vm5, %v1365_v13, %v10568_v38  ;;  %v10592_v13 = vld [vmem:[#allocation18_spill] sm:$0xff] }
 0x55b   : > { %v10593_v38 = vld [vmem:[#allocation254_spill] sm:$0xff] }
 0x55c   : > { %v2520_v26 = vpop.permute.xlu1 %2519  ;;  %v2423_v56 = vpop.permute.xlu0 %2422 }
 0x55d   : > { %v2760_v7 = vsel %vm9786_vm9, %v2730_v42, %v2423_v56  ;;  %v8341_v11 = vpop.f32.mrf.mxu1 }
 0x55e   : > { %4398 = vmatmul.msk.f32.gmra.mxu0 %vm9784_vm10, %v2774_v45  ;;  %v2790_v10 = vsel %vm9785_vm11, %v2760_v7, %v2520_v26  ;;  %v10569_v26 = vld [vmem:[#allocation44_spill] sm:$0xff]  ;;  %v10570_v7 = vld [vmem:[#allocation149_spill] sm:$0xff] }
 0x55f   : > { %4414 = vmatmul.msk.f32.gmra.mxu3 %vm9784_vm10, %v2790_v10  ;;  %v1427_v42 = vsel %vm1406_vm6, %v1396_v60, %v10569_v26  ;;  %v10572_v10 = vld [vmem:[#allocation2_spill] sm:$0xff] }
 0x560   : > { %v1458_v45 = vsel %vm1437_vm7, %v1427_v42, %v10570_v7  ;;  %v2567_v44 = vsel %vm1313_vm3, %v10573_v27, %v10572_v10  ;;  %v2500_v42 = vpop.permute.xlu2 %2499  ;;  %v8394_v7 = vld [vmem:[%s9610_s4] ss:$0 sm:$0xff]  ;;  %v10595_v27 = vld [vmem:[#allocation183_spill] sm:$0xff] }
 0x561   : > { %v1489_v51 = vsel %vm1468_vm8, %v1458_v45, %v10571_v49  ;;  %v2597_v39 = vsel %vm1344_vm4, %v2567_v44, %v10575_v32  ;;  %v4624_v49 = vld [vmem:[%s4769_s13 + $0xe8] sm:$0xff]  ;;  %v4625_v32 = vld [vmem:[%s6068_s11 + $0xb0] sm:$0xff] }
 0x562   : > { %v1520_v35 = vsel %vm9786_vm9, %v1489_v51, %v10574_v17  ;;  %v2627_v59 = vsel %vm1375_vm5, %v2597_v39, %v10579_v5  ;;  %v10594_v51 = vld [vmem:[#allocation59_spill] sm:$0xff]  ;;  %v10596_v17 = vld [vmem:[#allocation89_spill] sm:$0xff] }
 0x563   : > { %v1551_v9 = vsel %vm9785_vm11, %v1520_v35, %v10580_v22  ;;  %v2657_v57 = vsel %vm1406_vm6, %v2627_v59, %v10583_v46  ;;  %v1336_v10 = vsel %vm1313_vm3, %v4624_v49, %v10594_v51  ;;  %v10597_v39 = vld [vmem:[#allocation193_spill] sm:$0xff]  ;;  %v10603_v59 = vld [vmem:[#allocation140_spill] sm:$0xff] }
 0x564   : > { %v2395_v18 = vpop.permute.xlu1 %2394  ;;  %v2490_v61 = vpop.permute.xlu0 %2489  ;;  %v2687_v29 = vsel %vm1437_vm7, %v2657_v57, %v10586_v28  ;;  %v1367_v35 = vsel %vm1344_vm4, %v1336_v10, %v10596_v17  ;;  %v10606_v57 = vld [vmem:[#allocation161_spill] sm:$0xff]  ;;  %v10608_v28 = vld [vmem:[#allocation79_spill] sm:$0xff] }
 0x565   : > { %v2775_v14 = vsel %vm9785_vm11, %v2745_v20, %v2490_v61  ;;  %v2746_v56 = vsel %vm9786_vm9, %v2716_v37, %v2395_v18  ;;  %v2600_v18 = vsel %vm1344_vm4, %v2570_v62, %v10582_v12  ;;  %v10585_v20 = vld [vmem:[#allocation160_spill] sm:$0xff]  ;;  %v8388_v37 = vadd.s32 4294967295, %v3274_v47  ;;  %v8417_v33 = vpop.f32.mrf.mxu1 }
 0x566   : > { %4399 = vmatmul.msk.f32.gmra.mxu0 %vm9784_vm10, %v2775_v14  ;;  %v2776_v24 = vsel %vm9785_vm11, %v2746_v56, %v2492_v50  ;;  %v1366_v50 = vsel %vm1344_vm4, %v1335_v25, %v10581_v2  ;;  %v2630_v61 = vsel %vm1375_vm5, %v2600_v18, %v10585_v20  ;;  %v10588_v14 = vld [vmem:[#allocation207_spill] sm:$0xff]  ;;  %v10599_v25 = vld [vmem:[#allocation118_spill] sm:$0xff]  ;;  %v4626_v12 = vld [vmem:[%s4769_s13 + $0xf0] sm:$0xff] }
 0x567   : > { %4435 = vmatmul.msk.f32.vlgmr.msrb.gmra.mxu3 %vm9784_vm10, %v1550_v34  ;;  %v1397_v1 = vsel %vm1375_vm5, %v1366_v50, %v10584_v6  ;;  %v2660_v52 = vsel %vm1406_vm6, %v2630_v61, %v10588_v14  ;;  %v10589_v34 = vld [vmem:[#allocation253_spill] sm:$0xff]  ;;  %vm3310_vm15 = vcmp.ge.s32.totalorder %v8388_v37, 0  ;;  %v10605_v18 = vld [vmem:[#allocation47_spill] sm:$0xff]  ;;  %v3276_v61 = vadd.s32 16, %v3274_v47  ;;  %v10610_v14 = vld [vmem:[#allocation236_spill] sm:$0xff] }
 0x568   : > { %v1428_v43 = vsel %vm1406_vm6, %v1397_v1, %v10587_v63  ;;  %v2717_v23 = vsel %vm1468_vm8, %v2687_v29, %v10589_v34  ;;  %v2690_v53 = vsel %vm1437_vm7, %v2660_v52, %v10591_v40  ;;  %v1337_v46 = vsel %vm1313_vm3, %v4626_v12, %v10605_v18  ;;  %v10607_v1 = vld [vmem:[#allocation198_spill] sm:$0xff]  ;;  %v10609_v63 = vld [vmem:[#allocation17_spill] sm:$0xff]  ;;  %vm3313_vm12 = vmand %vm8425_vm14, %vm3310_vm15 }
 0x569   : > { %v1459_v8 = vsel %vm1437_vm7, %v1428_v43, %v10590_v21  ;;  %v2720_v60 = vsel %vm1468_vm8, %v2690_v53, %v10593_v38  ;;  %v1368_v29 = vsel %vm1344_vm4, %v1337_v46, %v10608_v28  ;;  %v10611_v34 = vld [vmem:[#allocation109_spill] sm:$0xff]  ;;  %v10612_v21 = vld [vmem:[#allocation182_spill] sm:$0xff]  ;;  %v10625_v46 = vld [vmem:[#allocation200_spill] sm:$0xff] }
 0x56a   : > { %v1490_v48 = vsel %vm1468_vm8, %v1459_v8, %v10592_v13  ;;  %v10613_v8 = vld [vmem:[#allocation251_spill] sm:$0xff] }
 0x56b   : > { %v1521_v44 = vsel %vm9786_vm9, %v1490_v48, %v10595_v27  ;;  %v8469_v27 = vadd.s32 4294967295, %v3276_v61  ;;  %v10627_v61 = vld [vmem:[#allocation8_spill] sm:$0xff] }
 0x56c   : > { %v2494_v55 = vpop.permute.xlu1 %2493  ;;  %v2397_v3 = vpop.permute.xlu0 %2396  ;;  %v1552_v31 = vsel %vm9785_vm11, %v1521_v44, %v10598_v19  ;;  %v4628_v44 = vld [vmem:[%s6068_s11 + $0xd0] sm:$0xff] }
 0x56d   : > { %v2747_v4 = vsel %vm9786_vm9, %v2717_v23, %v2397_v3  ;;  %v1399_v23 = vsel %vm1375_vm5, %v1368_v29, %v10611_v34  ;;  %v8498_v18 = vpop.f32.mrf.mxu1  ;;  %vm3345_vm13 = vcmp.lt.s32.totalorder %v8469_v27, 16  ;;  %v10628_v29 = vld [vmem:[#allocation241_spill] sm:$0xff]  ;;  %v10629_v34 = vld [vmem:[#allocation63_spill] sm:$0xff] }
 0x56e   : > { %4400 = vmatmul.msk.f32.gmra.mxu0 %vm9784_vm10, %v2776_v24  ;;  %v2568_v24 = vsel %vm1313_vm3, %v4625_v32, %v10597_v39  ;;  %v10619_v39 = vld [vmem:[#allocation131_spill] sm:$0xff] }
 0x56f   : > { %4436 = vmatmul.msk.f32.gmra.mxu3 %vm9784_vm10, %v1551_v9  ;;  %v2598_v62 = vsel %vm1344_vm4, %v2568_v24, %v10600_v54  ;;  %v10604_v9 = vld [vmem:[#allocation174_spill] sm:$0xff]  ;;  %v1430_v24 = vsel %vm1406_vm6, %v1399_v23, %v10619_v39  ;;  %v10622_v54 = vld [vmem:[#allocation103_spill] sm:$0xff] }
 0x570   : > { %v2628_v2 = vsel %vm1375_vm5, %v2598_v62, %v10604_v9 }
 0x571   : > { %v2658_v20 = vsel %vm1406_vm6, %v2628_v2, %v10607_v1 }
 0x572   : > { %v2688_v52 = vsel %vm1437_vm7, %v2658_v20, %v10610_v14  ;;  %v2405_v20 = vpop.permute.xlu2 %2404 }
 0x573   : > { %v2908_v15 = vpop.f32.mrf.mxu0  ;;  %v2718_v40 = vsel %vm1468_vm8, %v2688_v52, %v10613_v8  ;;  %v4629_v52 = vld [vmem:[%s4769_s13 + $0x100] sm:$0xff] }
 0x574   : > { %v2403_v26 = vpop.permute.xlu1 %2402  ;;  %v3109_v56 = vadd.f32 %v8200_v41, %v2908_v15  ;;  %v2496_v0 = vpop.permute.xlu0 %2495  ;;  %v2777_v41 = vsel %vm9785_vm11, %v2747_v4, %v2494_v55  ;;  %v1398_v55 = vsel %vm1375_vm5, %v1367_v35, %v10599_v25  ;;  %v4627_v4 = vld [vmem:[%s6068_s11 + $0xc0] sm:$0xff]  ;;  %v10614_v15 = vld [vmem:[#allocation49_spill] sm:$0xff]  ;;  %v2748_v48 = vsel %vm9786_vm9, %v2718_v40, %v8326_v16  ;;  %v10618_v35 = vld [vmem:[#allocation75_spill] sm:$0xff] }
 0x575   : > { %v2750_v45 = vsel %vm9786_vm9, %v2720_v60, %v2403_v26  ;;  %v1429_v22 = vsel %vm1406_vm6, %v1398_v55, %v10603_v59  ;;  %v2569_v13 = vsel %vm1313_vm3, %v4627_v4, %v10614_v15  ;;  %v2778_v10 = vsel %vm9785_vm11, %v2748_v48, %v2496_v0  ;;  %v10617_v16 = vld [vmem:[#allocation170_spill] sm:$0xff]  ;;  %v10623_v59 = vld [vmem:[#allocation249_spill] sm:$0xff]  ;;  %v10631_v40 = vld [vmem:[#allocation111_spill] sm:$0xff] }
 0x576   : > { %v2780_v3 = vsel %vm9785_vm11, %v2750_v45, %v2500_v42  ;;  %4401 = vmatmul.msk.f32.gmra.mxu0 %vm9784_vm10, %v2777_v41  ;;  %v3202_v50 = vadd.f32 %v8394_v7, %v3109_v56  ;;  %v1460_v6 = vsel %vm1437_vm7, %v1429_v22, %v10606_v57  ;;  %v10615_v42 = vld [vmem:[#allocation124_spill] sm:$0xff]  ;;  %v9787_v45 = vmov 0.0   ;;  %v10616_v41 = vld [vmem:[#allocation150_spill] sm:$0xff] }
 0x577   : > { %4404 = vmatmul.msk.f32.vlgmr.msra.gmra.mxu2 %vm9784_vm10, %v2780_v3  ;;  %4437 = vmatmul.msk.f32.gmra.mxu3 %vm9784_vm10, %v1552_v31  ;;  %v1491_v43 = vsel %vm1468_vm8, %v1460_v6, %v10609_v63  ;;  %v2599_v56 = vsel %vm1344_vm4, %v2569_v13, %v10615_v42  ;;  %v4450_v49 = vsel %vm3313_vm12, 1.0, %v9787_v45  ;;  %v2571_v3 = vsel %vm1313_vm3, %v4628_v44, %v10616_v41  ;;  %v10620_v0 = vld [vmem:[#allocation102_spill] sm:$0xff]  ;;  %v10621_v31 = vld [vmem:[#allocation208_spill] sm:$0xff]  ;;  %v10626_v6 = vld [vmem:[#allocation255_spill] sm:$0xff] }
 0x578   : > { %v1522_v47 = vsel %vm9786_vm9, %v1491_v43, %v10612_v21  ;;  %v3232_v38 = vmax.f32 %v3202_v50, 0.0  ;;  %v2629_v17 = vsel %vm1375_vm5, %v2599_v56, %v10617_v16  ;;  %v2601_v19 = vsel %vm1344_vm4, %v2571_v3, %v10620_v0  ;;  %v10624_v50 = vld [vmem:[#allocation152_spill] sm:$0xff]  ;;  %v10630_v21 = vld [vmem:[#allocation51_spill] sm:$0xff]  ;;  %v4630_v8 = vld [vmem:[%s6068_s11 + $0xe0] sm:$0xff] }
 0x579   : > { %v1553_v32 = vsel %vm9785_vm11, %v1522_v47, %v10618_v35  ;;  %v2659_v25 = vsel %vm1406_vm6, %v2629_v17, %v10621_v31  ;;  %v4451_v55 = vsel %vm8425_vm14, 1.0, %v9787_v45  ;;  %v2631_v62 = vsel %vm1375_vm5, %v2601_v19, %v10622_v54  ;;  %v10632_v4 = vld [vmem:[#allocation252_spill] sm:$0xff]  ;;  %vm3348_vm12 = vmand %vm8425_vm14, %vm3345_vm13  ;;  %v10633_v56 = vld [vmem:[#allocation114_spill] sm:$0xff] }
 0x57a   : > { %v2689_v22 = vsel %vm1437_vm7, %v2659_v25, %v10623_v59  ;;  %v8494_v9 = vmul.f32 %v4450_v49, %v3232_v38  ;;  %v1461_v12 = vsel %vm1437_vm7, %v1430_v24, %v10624_v50  ;;  %v2661_v57 = vsel %vm1406_vm6, %v2631_v62, %v10625_v46  ;;  %v10634_v41 = vld [vmem:[#allocation126_spill] sm:$0xff]  ;;  %v10635_v3 = vld [vmem:[#allocation180_spill] sm:$0xff]  ;;  %v10638_v0 = vld [vmem:[#allocation121_spill] sm:$0xff] }
 0x57b   : > { %v2911_v53 = vpop.f32.mrf.mxu0  ;;  %v2719_v1 = vsel %vm1468_vm8, %v2689_v22, %v10626_v6  ;;  %v1492_v28 = vsel %vm1468_vm8, %v1461_v12, %v10627_v61  ;;  %v2691_v63 = vsel %vm1437_vm7, %v2661_v57, %v10628_v29  ;;  %v1338_v23 = vsel %vm1313_vm3, %v4629_v52, %v10629_v34  ;;  %v10639_v31 = vld [vmem:[#allocation250_spill] sm:$0xff]  ;;  %v10640_v62 = vld [vmem:[#allocation143_spill] sm:$0xff]  ;;  %v10641_v22 = vld [vmem:[#allocation256_spill] sm:$0xff]  ;;  %v2504_v6 = vpop.permute.xlu2 %2503 }
 0x57c   : > { %v3112_v60 = vadd.f32 %v8245_v36, %v2911_v53  ;;  %v2401_v26 = vpop.permute.xlu0 %2400  ;;  %v2498_v51 = vpop.permute.xlu1 %2497  ;;  %v1523_v47 = vsel %vm9786_vm9, %v1492_v28, %v10630_v21  ;;  %v2572_v53 = vsel %vm1313_vm3, %v4630_v8, %v10631_v40  ;;  %v2721_v15 = vsel %vm1468_vm8, %v2691_v63, %v10632_v4  ;;  %v10642_v50 = vld [vmem:[#allocation164_spill] sm:$0xff]  ;;  %v10645_v21 = vld [vmem:[#allocation74_spill] sm:$0xff]  ;;  %v4631_v8 = vld [vmem:[%s4769_s13 + $0x108] sm:$0xff] }
 0x57d   : > { %v2749_v14 = vsel %vm9786_vm9, %v2719_v1, %v2401_v26  ;;  %v2751_v48 = vsel %vm9786_vm9, %v2721_v15, %v2405_v20  ;;  %v3490_v26 = vrot.slane %v8494_v9, 1  ;;  %v2602_v49 = vsel %vm1344_vm4, %v2572_v53, %v10633_v56  ;;  %v10643_v1 = vld [vmem:[#allocation22_spill] sm:$0xff]  ;;  %v8565_v61 = vpop.f32.mrf.mxu1  ;;  %v10649_v4 = vld [vmem:[#allocation92_spill] sm:$0xff] }
 0x57e   : > { %v3203_v36 = vadd.f32 %v8394_v7, %v3112_v60  ;;  %4402 = vmatmul.msk.f32.gmra.mxu0 %vm9784_vm10, %v2778_v10  ;;  %v2779_v10 = vsel %vm9785_vm11, %v2749_v14, %v2498_v51  ;;  %v2632_v16 = vsel %vm1375_vm5, %v2602_v49, %v10635_v3  ;;  %v10637_v51 = vld [vmem:[#allocation214_spill] sm:$0xff]  ;;  %v4452_v39 = vsel %vm3348_vm12, 1.0, %v9787_v45  ;;  %v10644_v14 = vld [vmem:[#allocation188_spill] sm:$0xff]  ;;  %v10654_v3 = vld [vmem:[#allocation187_spill] sm:$0xff] }
 0x57f   : > { %4438 = vmatmul.msk.f32.gmra.mxu3 %vm9784_vm10, %v1553_v32  ;;  %v2662_v32 = vsel %vm1406_vm6, %v2632_v16, %v10637_v51  ;;  %v3264_v54 = vadd.s32 1, %v8377_v58  ;;  %v10646_v40 = vld [vmem:[#allocation62_spill] sm:$0xff] }
 0x580   : > { %v3233_v2 = vmax.f32 %v3203_v36, 0.0  ;;  %v10636_v36 = vld [vmem:[#allocation93_spill] sm:$0xff]  ;;  %v2692_v25 = vsel %vm1437_vm7, %v2662_v32, %v10639_v31  ;;  %v1339_v53 = vsel %vm1313_vm3, %v4631_v8, %v10646_v40  ;;  %v4632_v32 = vld [vmem:[%s4769_s13 + $0x110] sm:$0xff] }
 0x581   : > { %v1369_v35 = vsel %vm1344_vm4, %v1338_v23, %v10636_v36  ;;  %vm3281_vm14 = vcmp.ge.s32.totalorder %v3264_v54, 0  ;;  %vm3291_vm12 = vcmp.lt.s32.totalorder %v3264_v54, 16  ;;  %v1370_v15 = vsel %vm1344_vm4, %v1339_v53, %v10649_v4  ;;  %v10665_v8 = vld [vmem:[#allocation96_spill] sm:$0xff]  ;;  %v10666_v4 = vld [vmem:[#allocation123_spill] sm:$0xff] }
 0x582   : > { %v8509_v43 = vmul.f32 %v4451_v55, %v3233_v2  ;;  %v1400_v19 = vsel %vm1375_vm5, %v1369_v35, %v10638_v0  ;;  %v2722_v2 = vsel %vm1468_vm8, %v2692_v25, %v10641_v22  ;;  %vm8579_vm2 = vmand %vm3281_vm14, %vm3291_vm12  ;;  %v10655_v35 = vld [vmem:[#allocation36_spill] sm:$0xff]  ;;  %v10657_v0 = vld [vmem:[#allocation82_spill] sm:$0xff] }
 0x583   : > { %v2914_v13 = vpop.f32.mrf.mxu0  ;;  %v1431_v59 = vsel %vm1406_vm6, %v1400_v19, %v10640_v62  ;;  %vm3316_vm14 = vmand %vm8579_vm2, %vm3310_vm15  ;;  %v10659_v62 = vld [vmem:[#allocation134_spill] sm:$0xff] }
 0x584   : > { %v3115_v38 = vadd.f32 %v8290_v30, %v2914_v13  ;;  %v2502_v60 = vpop.permute.xlu0 %2501  ;;  %v3491_v42 = vrot.slane %v8509_v43, 1  ;;  %v1554_v30 = vsel %vm9785_vm11, %v1523_v47, %v10634_v41  ;;  %v2407_v24 = vpop.permute.xlu1 %2406  ;;  %v1462_v12 = vsel %vm1437_vm7, %v1431_v59, %v10642_v50  ;;  %vm3351_vm12 = vmand %vm8579_vm2, %vm3345_vm13 }
 0x585   : > { %v2781_v44 = vsel %vm9785_vm11, %v2751_v48, %v2502_v60  ;;  %v2752_v57 = vsel %vm9786_vm9, %v2722_v2, %v2407_v24  ;;  %v1493_v20 = vsel %vm1468_vm8, %v1462_v12, %v10643_v1  ;;  %v10650_v48 = vld [vmem:[#allocation120_spill] sm:$0xff]  ;;  %v10651_v60 = vld [vmem:[#allocation142_spill] sm:$0xff]  ;;  %v10660_v2 = vld [vmem:[#allocation155_spill] sm:$0xff] }
 0x586   : > { %v3204_v5 = vadd.f32 %v8394_v7, %v3115_v38  ;;  %4403 = vmatmul.msk.f32.gmra.mxu0 %vm9784_vm10, %v2779_v10  ;;  %4405 = vmatmul.msk.f32.gmra.mxu2 %vm9784_vm10, %v2781_v44  ;;  %v3492_v17 = vsel %vm415_vm0, %v3490_v26, %v3491_v42  ;;  %v1524_v52 = vsel %vm9786_vm9, %v1493_v20, %v10644_v14  ;;  %v10653_v10 = vld [vmem:[#allocation21_spill] sm:$0xff]  ;;  %v4633_v14 = vld [vmem:[%s4769_s13 + $0x120] sm:$0xff] }
 0x587   : > { %3530 = vrot.lane.b32.xlu0 %v3492_v17, %s4677_s14  ;;  %4439 = vmatmul.msk.f32.gmra.mxu3 %vm9784_vm10, %v1554_v30  ;;  %v2782_v34 = vsel %vm9785_vm11, %v2752_v57, %v2504_v6  ;;  %v1555_v47 = vsel %vm9785_vm11, %v1524_v52, %v10645_v21  ;;  %v1401_v38 = vsel %vm1375_vm5, %v1370_v15, %v10650_v48  ;;  %v4453_v17 = vsel %vm3316_vm14, 1.0, %v9787_v45  ;;  %v10661_v57 = vld [vmem:[#allocation11_spill] sm:$0xff]  ;;  %v10663_v52 = vld [vmem:[#allocation66_spill] sm:$0xff]  ;;  %v10664_v21 = vld [vmem:[#allocation61_spill] sm:$0xff] }
 0x588   : > { %v3234_v55 = vmax.f32 %v3204_v5, 0.0  ;;  %v1432_v26 = vsel %vm1406_vm6, %v1401_v38, %v10651_v60  ;;  %v8603_v5 = vpop.f32.mrf.mxu1  ;;  %v3265_v48 = vadd.s32 2, %v8377_v58  ;;  %v10667_v38 = vld [vmem:[#allocation145_spill] sm:$0xff] }
 0x58a   : > { %v8560_v46 = vmul.f32 %v4452_v39, %v3234_v55  ;;  %v10656_v39 = vld [vmem:[#allocation52_spill] sm:$0xff]  ;;  %vm3292_vm14 = vcmp.lt.s32.totalorder %v3265_v48, 16 }
 0x58b   : > { %v2917_v28 = vpop.f32.mrf.mxu0  ;;  %v1340_v24 = vsel %vm1313_vm3, %v4632_v32, %v10656_v39  ;;  %v10658_v55 = vld [vmem:[#allocation112_spill] sm:$0xff]  ;;  %v10672_v32 = vld [vmem:[#allocation65_spill] sm:$0xff] }
 0x58c   : > { %v3493_v29 = vrot.slane %v8560_v46, 1  ;;  %v3118_v63 = vadd.f32 %v8341_v11, %v2917_v28  ;;  %v1371_v19 = vsel %vm1344_vm4, %v1340_v24, %v10657_v0  ;;  %v4455_v11 = vsel %vm3351_vm12, 1.0, %v9787_v45 }
 0x58d   : > { %v1402_v54 = vsel %vm1375_vm5, %v1371_v19, %v10658_v55  ;;  %v10676_v19 = vld [vmem:[#allocation122_spill] sm:$0xff] }
 0x58e   : > { %4406 = vmatmul.msk.f32.gmra.mxu2 %vm9784_vm10, %v2782_v34  ;;  %v3494_v23 = vsel %vm415_vm0, %v3491_v42, %v3493_v29  ;;  %v3205_v13 = vadd.f32 %v8394_v7, %v3118_v63  ;;  %v10652_v42 = vld [vmem:[#allocation163_spill] sm:$0xff]  ;;  %v1433_v59 = vsel %vm1406_vm6, %v1402_v54, %v10659_v62  ;;  %v10662_v29 = vld [vmem:[#allocation173_spill] sm:$0xff]  ;;  %v1341_v34 = vsel %vm1313_vm3, %v4633_v14, %v10663_v52  ;;  %v10677_v54 = vld [vmem:[#allocation144_spill] sm:$0xff] }
 0x58f   : > { %3532 = vrot.lane.b32.xlu1 %v3494_v23, %s4677_s14  ;;  %4440 = vmatmul.msk.f32.gmra.mxu3 %vm9784_vm10, %v1555_v47  ;;  %v1463_v56 = vsel %vm1437_vm7, %v1432_v26, %v10652_v42  ;;  %v1464_v50 = vsel %vm1437_vm7, %v1433_v59, %v10660_v2  ;;  %v1372_v40 = vsel %vm1344_vm4, %v1341_v34, %v10665_v8  ;;  %v10668_v26 = vld [vmem:[#allocation166_spill] sm:$0xff]  ;;  %v10678_v2 = vld [vmem:[#allocation165_spill] sm:$0xff]  ;;  %v10681_v52 = vld [vmem:[#allocation128_spill] sm:$0xff] }
 0x590   : > { %v1494_v44 = vsel %vm1468_vm8, %v1463_v56, %v10653_v10  ;;  %v3235_v41 = vmax.f32 %v3205_v13, 0.0  ;;  %v1495_v6 = vsel %vm1468_vm8, %v1464_v50, %v10661_v57  ;;  %v3132_v53 = vpop.f32.mrf.mxu1  ;;  %v1403_v15 = vsel %vm1375_vm5, %v1372_v40, %v10666_v4  ;;  %v10679_v57 = vld [vmem:[#allocation27_spill] sm:$0xff] }
 0x591   : > { %v1525_v16 = vsel %vm9786_vm9, %v1494_v44, %v10654_v3  ;;  %v1526_v63 = vsel %vm9786_vm9, %v1495_v6, %v10662_v29  ;;  %v1434_v60 = vsel %vm1406_vm6, %v1403_v15, %v10667_v38  ;;  %v10670_v3 = vld [vmem:[#allocation195_spill] sm:$0xff] }
 0x592   : > { %v1556_v51 = vsel %vm9785_vm11, %v1525_v16, %v10655_v35  ;;  %v8618_v31 = vmul.f32 %v4453_v17, %v3235_v41  ;;  %v1557_v47 = vsel %vm9785_vm11, %v1526_v63, %v10664_v21  ;;  %v1465_v42 = vsel %vm1437_vm7, %v1434_v60, %v10668_v26  ;;  %v10682_v21 = vld [vmem:[#allocation55_spill] sm:$0xff] }
 0x593   : > { %v2920_v49 = vpop.f32.mrf.mxu0  ;;  %v10684_v15 = vld [vmem:[#allocation115_spill] sm:$0xff] }
 0x594   : > { %v3121_v30 = vadd.f32 %v8417_v33, %v2920_v49  ;;  %v4454_v33 = vsel %vm8579_vm2, 1.0, %v9787_v45  ;;  %v3495_v20 = vrot.slane %v8618_v31, 1  ;;  %v10669_v49 = vld [vmem:[#allocation28_spill] sm:$0xff]  ;;  %vm3282_vm2 = vcmp.ge.s32.totalorder %v3265_v48, 0  ;;  %v10685_v48 = vld [vmem:[#allocation137_spill] sm:$0xff] }
 0x595   : > { %v1496_v10 = vsel %vm1468_vm8, %v1465_v42, %v10669_v49  ;;  %vm8677_vm12 = vmand %vm3282_vm2, %vm3292_vm14  ;;  %v10686_v42 = vld [vmem:[#allocation158_spill] sm:$0xff] }
 0x596   : > { %v3206_v36 = vadd.f32 %v8394_v7, %v3121_v30  ;;  %v1527_v16 = vsel %vm9786_vm9, %v1496_v10, %v10670_v3  ;;  %vm3319_vm2 = vmand %vm8677_vm12, %vm3310_vm15  ;;  %v4457_v8 = vsel %vm8677_vm12, 1.0, %v9787_v45 }
 0x597   : > { %4441 = vmatmul.msk.f32.gmra.mxu3 %vm9784_vm10, %v1556_v51  ;;  %v4634_v51 = vld [vmem:[%s4769_s13 + $0x128] sm:$0xff]  ;;  %v4456_v63 = vsel %vm3319_vm2, 1.0, %v9787_v45  ;;  %vm3354_vm14 = vmand %vm8677_vm12, %vm3345_vm13 }
 0x598   : > { %v3236_v25 = vmax.f32 %v3206_v36, 0.0  ;;  %v10671_v36 = vld [vmem:[#allocation19_spill] sm:$0xff]  ;;  %v1342_v39 = vsel %vm1313_vm3, %v4634_v51, %v10672_v32  ;;  %v3135_v55 = vpop.f32.mrf.mxu1 }
 0x599   : > { %v1558_v35 = vsel %vm9785_vm11, %v1527_v16, %v10671_v36 }
 0x59a   : > { %v8624_v22 = vmul.f32 %v4454_v33, %v3236_v25 }
 0x59b   : > { %v2923_v12 = vpop.f32.mrf.mxu0 }
 0x59c   : > { %v3124_v1 = vadd.f32 %v8498_v18, %v2923_v12  ;;  %v3496_v28 = vrot.slane %v8624_v22, 1 }
 0x59e   : > { %v3207_v23 = vadd.f32 %v8394_v7, %v3124_v1  ;;  %v8644_v18 = vsel %vm415_vm0, %v3495_v20, %v3496_v28 }
 0x59f   : > { %3534 = vrot.lane.b32.xlu2 %v8644_v18, %s4677_s14  ;;  %4442 = vmatmul.msk.f32.gmra.mxu3 %vm9784_vm10, %v1557_v47 }
 0x5a0   : > { %v3237_v13 = vmax.f32 %v3207_v23, 0.0  ;;  %v4635_v23 = vld [vmem:[%s4769_s13 + $0x130] sm:$0xff]  ;;  %v3138_v10 = vpop.f32.mrf.mxu1 }
 0x5a1   : > { %v1343_v47 = vsel %vm1313_vm3, %v4635_v23, %v10682_v21 }
 0x5a2   : > { %v8661_v56 = vmul.f32 %v4455_v11, %v3237_v13 }
 0x5a3   : > { %v2926_v44 = vpop.f32.mrf.mxu0 }
 0x5a4   : > { %v3498_v41 = vrot.slane %v8661_v56, 1  ;;  %v3127_v30 = vadd.f32 %v8565_v61, %v2926_v44  ;;  %v10675_v61 = vld [vmem:[#allocation95_spill] sm:$0xff] }
 0x5a5   : > { %v1373_v33 = vsel %vm1344_vm4, %v1342_v39, %v10675_v61  ;;  %v10689_v61 = vld [vmem:[#allocation91_spill] sm:$0xff] }
 0x5a6   : > { %v8670_v17 = vsel %vm415_vm0, %v3496_v28, %v3498_v41  ;;  %v3208_v0 = vadd.f32 %v8394_v7, %v3127_v30  ;;  %v1404_v25 = vsel %vm1375_vm5, %v1373_v33, %v10676_v19  ;;  %v10680_v28 = vld [vmem:[#allocation194_spill] sm:$0xff]  ;;  %v10687_v41 = vld [vmem:[#allocation168_spill] sm:$0xff]  ;;  %v4458_v33 = vsel %vm3354_vm14, 1.0, %v9787_v45 }
 0x5a7   : > { %3536 = vrot.lane.b32.xlu0 %v8670_v17, %s4677_s14  ;;  %4443 = vmatmul.msk.f32.gmra.mxu3 %vm9784_vm10, %v1558_v35  ;;  %v1435_v62 = vsel %vm1406_vm6, %v1404_v25, %v10677_v54  ;;  %v10688_v35 = vld [vmem:[#allocation176_spill] sm:$0xff] }
 0x5a8   : > { %v1466_v50 = vsel %vm1437_vm7, %v1435_v62, %v10678_v2  ;;  %v3238_v1 = vmax.f32 %v3208_v0, 0.0  ;;  %v3266_v0 = vadd.s32 3, %v8377_v58 }
 0x5a9   : > { %v1497_v6 = vsel %vm1468_vm8, %v1466_v50, %v10679_v57  ;;  %v3141_v50 = vpop.f32.mrf.mxu1 }
 0x5aa   : > { %v8695_v59 = vpop.f32.mrf.mxu3  ;;  %v1528_v29 = vsel %vm9786_vm9, %v1497_v6, %v10680_v28  ;;  %v8717_v11 = vmul.f32 %v4456_v63, %v3238_v1  ;;  %vm3283_vm12 = vcmp.ge.s32.totalorder %v3266_v0, 0  ;;  %vm3293_vm2 = vcmp.lt.s32.totalorder %v3266_v0, 16 }
 0x5ab   : > { %v2929_v12 = vpop.f32.mrf.mxu0  ;;  %v1559_v34 = vsel %vm9785_vm11, %v1528_v29, %v10681_v52  ;;  %vm8758_vm14 = vmand %vm3283_vm12, %vm3293_vm2 }
 0x5ac   : > { %v3130_v20 = vadd.f32 %v8603_v5, %v2929_v12  ;;  %v10683_v5 = vld [vmem:[#allocation85_spill] sm:$0xff]  ;;  %v3500_v16 = vrot.slane %v8717_v11, 1  ;;  %v4460_v52 = vsel %vm8758_vm14, 1.0, %v9787_v45 }
 0x5ad   : > { %v1374_v40 = vsel %vm1344_vm4, %v1343_v47, %v10683_v5 }
 0x5ae   : > { %v3209_v14 = vadd.f32 %v8394_v7, %v3130_v20  ;;  %v1405_v13 = vsel %vm1375_vm5, %v1374_v40, %v10684_v15 }
 0x5af   : > { %4444 = vmatmul.msk.f32.gmra.mxu3 %vm9784_vm10, %v1559_v34  ;;  %v1436_v38 = vsel %vm1406_vm6, %v1405_v13, %v10685_v48 }
 0x5b0   : > { %v3239_v4 = vmax.f32 %v3209_v14, 0.0  ;;  %v1467_v49 = vsel %vm1437_vm7, %v1436_v38, %v10686_v42  ;;  %v3267_v42 = vadd.s32 4, %v8377_v58 }
 0x5b1   : > { %v1498_v30 = vsel %vm1468_vm8, %v1467_v49, %v10687_v41  ;;  %v3144_v14 = vpop.f32.mrf.mxu1 }
 0x5b2   : > { %v8723_v60 = vmul.f32 %v4457_v8, %v3239_v4  ;;  %v8725_v26 = vpop.f32.mrf.mxu3  ;;  %v1529_v51 = vsel %vm9786_vm9, %v1498_v30, %v10688_v35  ;;  %vm3284_vm12 = vcmp.ge.s32.totalorder %v3267_v42, 0  ;;  %vm3294_vm2 = vcmp.lt.s32.totalorder %v3267_v42, 16 }
 0x5b3   : > { %v2932_v44 = vpop.f32.mrf.mxu0 }
 0x5b4   : > { %v3133_v3 = vadd.f32 %v3132_v53, %v2932_v44  ;;  %v3501_v36 = vrot.slane %v8723_v60, 1  ;;  %v1560_v53 = vsel %vm9785_vm11, %v1529_v51, %v10689_v61 }
 0x5b6   : > { %v3210_v32 = vadd.f32 %v8394_v7, %v3133_v3  ;;  %v8741_v39 = vsel %vm415_vm0, %v3500_v16, %v3501_v36 }
 0x5b7   : > { %3538 = vrot.lane.b32.xlu1 %v8741_v39, %s4677_s14  ;;  %4445 = vmatmul.msk.f32.gmra.mxu3 %vm9784_vm10, %v1560_v53  ;;  %vm3322_vm10 = vmand %vm8758_vm14, %vm3310_vm15 }
 0x5b8   : > { %v3240_v24 = vmax.f32 %v3210_v32, 0.0  ;;  %v4459_v29 = vsel %vm3322_vm10, 1.0, %v9787_v45  ;;  %vm3357_vm10 = vmand %vm8758_vm14, %vm3345_vm13 }
 0x5b9   : > { %v4461_v48 = vsel %vm3357_vm10, 1.0, %v9787_v45  ;;  %v3147_v49 = vpop.f32.mrf.mxu1  ;;  %vm8804_vm14 = vmand %vm3284_vm12, %vm3294_vm2 }
 0x5ba   : > { %v8750_v19 = vmul.f32 %v4458_v33, %v3240_v24  ;;  %v8752_v25 = vpop.f32.mrf.mxu3  ;;  %vm3325_vm10 = vmand %vm8804_vm14, %vm3310_vm15 }
 0x5bb   : > { %v2935_v54 = vpop.f32.mrf.mxu0  ;;  %v4462_v24 = vsel %vm3325_vm10, 1.0, %v9787_v45  ;;  %vm3360_vm12 = vmand %vm8804_vm14, %vm3345_vm13 }
 0x5bc   : > { %v3503_v62 = vrot.slane %v8750_v19, 1  ;;  %v3136_v2 = vadd.f32 %v3135_v55, %v2935_v54  ;;  %v4463_v54 = vsel %vm8804_vm14, 1.0, %v9787_v45 }
 0x5be   : > { %v8756_v12 = vsel %vm415_vm0, %v3501_v36, %v3503_v62  ;;  %v3211_v6 = vadd.f32 %v8394_v7, %v3136_v2 }
 0x5bf   : > { %3540 = vrot.lane.b32.xlu2 %v8756_v12, %s4677_s14 }
 0x5c0   : > { %v3241_v20 = vmax.f32 %v3211_v6, 0.0 }
 0x5c1   : > { %v3150_v32 = vpop.f32.mrf.mxu1 }
 0x5c2   : > { %v8769_v55 = vpop.f32.mrf.mxu3  ;;  %v8776_v34 = vmul.f32 %v4459_v29, %v3241_v20 }
 0x5c3   : > { %v2938_v1 = vpop.f32.mrf.mxu0 }
 0x5c4   : > { %v3139_v28 = vadd.f32 %v3138_v10, %v2938_v1  ;;  %v3505_v40 = vrot.slane %v8776_v34, 1 }
 0x5c6   : > { %v3212_v63 = vadd.f32 %v8394_v7, %v3139_v28 }
 0x5c8   : > { %v3242_v23 = vmax.f32 %v3212_v63, 0.0 }
 0x5c9   : > { %v3153_v29 = vpop.f32.mrf.mxu1 }
 0x5ca   : > { %v8778_v21 = vmul.f32 %v4460_v52, %v3242_v23  ;;  %v8780_v47 = vpop.f32.mrf.mxu3  ;;  %v4464_v52 = vsel %vm3360_vm12, 1.0, %v9787_v45 }
 0x5cb   : > { %v2941_v8 = vpop.f32.mrf.mxu0 }
 0x5cc   : > { %v3142_v5 = vadd.f32 %v3141_v50, %v2941_v8  ;;  %v3506_v4 = vrot.slane %v8778_v21, 1  ;;  %v3268_v8 = vadd.s32 5, %v8377_v58 }
 0x5ce   : > { %v3213_v15 = vadd.f32 %v8394_v7, %v3142_v5  ;;  %v8790_v13 = vsel %vm415_vm0, %v3505_v40, %v3506_v4  ;;  %vm3285_vm2 = vcmp.ge.s32.totalorder %v3268_v8, 0  ;;  %vm3295_vm14 = vcmp.lt.s32.totalorder %v3268_v8, 16 }
 0x5cf   : > { %3542 = vrot.lane.b32.xlu0 %v8790_v13, %s4677_s14  ;;  %vm8848_vm10 = vmand %vm3285_vm2, %vm3295_vm14 }
 0x5d0   : > { %v3243_v38 = vmax.f32 %v3213_v15, 0.0  ;;  %vm3328_vm12 = vmand %vm8848_vm10, %vm3310_vm15 }
 0x5d1   : > { %v3156_v42 = vpop.f32.mrf.mxu1  ;;  %vm3363_vm2 = vmand %vm8848_vm10, %vm3345_vm13 }
 0x5d2   : > { %v8796_v10 = vmul.f32 %v4461_v48, %v3243_v38  ;;  %v8798_v44 = vpop.f32.mrf.mxu3 }
 0x5d3   : > { %v2944_v41 = vpop.f32.mrf.mxu0 }
 0x5d4   : > { %v3508_v30 = vrot.slane %v8796_v10, 1  ;;  %v3145_v3 = vadd.f32 %v3144_v14, %v2944_v41 }
 0x5d6   : > { %v8802_v16 = vsel %vm415_vm0, %v3506_v4, %v3508_v30  ;;  %v3214_v35 = vadd.f32 %v8394_v7, %v3145_v3 }
 0x5d7   : > { %3544 = vrot.lane.b32.xlu1 %v8802_v16, %s4677_s14 }
 0x5d8   : > { %v3244_v53 = vmax.f32 %v3214_v35, 0.0 }
 0x5da   : > { %v8815_v51 = vpop.f32.mrf.mxu3  ;;  %v8822_v62 = vmul.f32 %v4462_v24, %v3244_v53  ;;  %v4466_v53 = vsel %vm8848_vm10, 1.0, %v9787_v45 }
 0x5db   : > { %v2947_v61 = vpop.f32.mrf.mxu0 }
 0x5dc   : > { %v3148_v33 = vadd.f32 %v3147_v49, %v2947_v61  ;;  %v3510_v20 = vrot.slane %v8822_v62, 1 }
 0x5de   : > { %v3215_v0 = vadd.f32 %v8394_v7, %v3148_v33 }
 0x5e0   : > { %v3245_v2 = vmax.f32 %v3215_v0, 0.0  ;;  %v3159_v0 = vpop.f32.mrf.mxu1 }
 0x5e2   : > { %v8824_v50 = vmul.f32 %v4463_v54, %v3245_v2  ;;  %v8826_v57 = vpop.f32.mrf.mxu3 }
 0x5e3   : > { %v2950_v6 = vpop.f32.mrf.mxu0 }
 0x5e4   : > { %v3151_v1 = vadd.f32 %v3150_v32, %v2950_v6  ;;  %v3511_v28 = vrot.slane %v8824_v50, 1  ;;  %v4465_v32 = vsel %vm3328_vm12, 1.0, %v9787_v45 }
 0x5e6   : > { %v3216_v63 = vadd.f32 %v8394_v7, %v3151_v1  ;;  %v8836_v14 = vsel %vm415_vm0, %v3510_v20, %v3511_v28  ;;  %v3269_v1 = vadd.s32 6, %v8377_v58 }
 0x5e7   : > { %3546 = vrot.lane.b32.xlu2 %v8836_v14, %s4677_s14 }
 0x5e8   : > { %v3246_v23 = vmax.f32 %v3216_v63, 0.0  ;;  %vm3286_vm14 = vcmp.ge.s32.totalorder %v3269_v1, 0  ;;  %vm3296_vm12 = vcmp.lt.s32.totalorder %v3269_v1, 16 }
 0x5e9   : > { %vm8883_vm10 = vmand %vm3286_vm14, %vm3296_vm12 }
 0x5ea   : > { %v8842_v5 = vmul.f32 %v4464_v52, %v3246_v23  ;;  %v3165_v40 = vpop.f32.mrf.mxu3  ;;  %vm3366_vm9 = vmand %vm8883_vm10, %vm3345_vm13 }
 0x5eb   : > { %v2953_v4 = vpop.f32.mrf.mxu0 }
 0x5ec   : > { %v3513_v15 = vrot.slane %v8842_v5, 1  ;;  %v3154_v48 = vadd.f32 %v3153_v29, %v2953_v4  ;;  %v4467_v4 = vsel %vm3363_vm2, 1.0, %v9787_v45  ;;  %vm3331_vm2 = vmand %vm8883_vm10, %vm3310_vm15 }
 0x5ed   : > { %v4468_v1 = vsel %vm3331_vm2, 1.0, %v9787_v45 }
 0x5ee   : > { %v8846_v38 = vsel %vm415_vm0, %v3511_v28, %v3513_v15  ;;  %v3217_v41 = vadd.f32 %v8394_v7, %v3154_v48 }
 0x5ef   : > { %3548 = vrot.lane.b32.xlu0 %v8846_v38, %s4677_s14 }
 0x5f0   : > { %v3247_v36 = vmax.f32 %v3217_v41, 0.0  ;;  %v3270_v41 = vadd.s32 7, %v8377_v58 }
 0x5f2   : > { %v3168_v30 = vpop.f32.mrf.mxu3  ;;  %v8864_v33 = vmul.f32 %v4465_v32, %v3247_v36  ;;  %vm3287_vm14 = vcmp.ge.s32.totalorder %v3270_v41, 0  ;;  %vm3297_vm12 = vcmp.lt.s32.totalorder %v3270_v41, 16 }
 0x5f3   : > { %v2956_v3 = vpop.f32.mrf.mxu0  ;;  %vm8909_vm11 = vmand %vm3287_vm14, %vm3297_vm12  ;;  %vm10703_vm14 = vcmask 261120   ;;  %vm10704_vm12 = vcmask 293888  }
 0x5f4   : > { %v3157_v35 = vadd.f32 %v3156_v42, %v2956_v3  ;;  %v3515_v63 = vrot.slane %v8864_v33, 1  ;;  %v3162_v3 = vpop.f32.mrf.mxu1  ;;  %vm3369_vm2 = vmand %vm8909_vm11, %vm3345_vm13 }
 0x5f6   : > { %v3218_v61 = vadd.f32 %v8394_v7, %v3157_v35 }
 0x5f8   : > { %v3248_v24 = vmax.f32 %v3218_v61, 0.0 }
 0x5fa   : > { %v8866_v54 = vmul.f32 %v4466_v53, %v3248_v24  ;;  %v2965_v2 = vpop.f32.mrf.mxu2  ;;  %v3171_v6 = vpop.f32.mrf.mxu3  ;;  %v4469_v24 = vsel %vm8883_vm10, 1.0, %v9787_v45  ;;  %vm10702_vm10 = vcmask 228352  }
 0x5fb   : > { %v2959_v20 = vpop.f32.mrf.mxu0  ;;  %v3166_v28 = vadd.f32 %v3165_v40, %v2965_v2 }
 0x5fc   : > { %v3160_v29 = vadd.f32 %v3159_v0, %v2959_v20  ;;  %v3516_v52 = vrot.slane %v8866_v54, 1 }
 0x5fd   : > { %v3221_v40 = vadd.f32 %v8394_v7, %v3166_v28 }
 0x5fe   : > { %v3219_v23 = vadd.f32 %v8394_v7, %v3160_v29  ;;  %v8877_v8 = vsel %vm415_vm0, %v3515_v63, %v3516_v52 }
 0x5ff   : > { %3550 = vrot.lane.b32.xlu1 %v8877_v8, %s4677_s14  ;;  %v3251_v32 = vmax.f32 %v3221_v40, 0.0 }
 0x600   : > { %v3249_v15 = vmax.f32 %v3219_v23, 0.0 }
 0x601   : > { %v8907_v20 = vmul.f32 %v4469_v24, %v3251_v32 }
 0x602   : > { %v8887_v42 = vmul.f32 %v4467_v4, %v3249_v15  ;;  %v3174_v49 = vpop.f32.mrf.mxu3 }
 0x603   : > { %v3175_v36 = vadd.f32 %v3174_v49, %v8695_v59  ;;  %v2962_v35 = vpop.f32.mrf.mxu0  ;;  %v4472_v49 = vsel %vm8909_vm11, 1.0, %v9787_v45  ;;  %v3521_v48 = vrot.slane %v8907_v20, 1 }
 0x604   : > { %v3518_v61 = vrot.slane %v8887_v42, 1  ;;  %v3163_v53 = vadd.f32 %v3162_v3, %v2962_v35  ;;  %v4470_v3 = vsel %vm3366_vm9, 1.0, %v9787_v45  ;;  %v4473_v35 = vsel %vm3369_vm2, 1.0, %v9787_v45  ;;  %vm3334_vm9 = vmand %vm8909_vm11, %vm3310_vm15 }
 0x605   : > { %v3224_v2 = vadd.f32 %v8394_v7, %v3175_v36  ;;  %vm10701_vm11 = vcmask 1043456   ;;  %vm10705_vm2 = vmmov %vm10702_vm10 }
 0x606   : > { %v3220_v0 = vadd.f32 %v8394_v7, %v3163_v53  ;;  %v8901_v59 = vsel %vm415_vm0, %v3516_v52, %v3518_v61 }
 0x607   : > { %3552 = vrot.lane.b32.xlu2 %v8901_v59, %s4677_s14  ;;  %v3254_v40 = vmax.f32 %v3224_v2, 0.0 }
 0x608   : > { %v3250_v28 = vmax.f32 %v3220_v0, 0.0 }
 0x609   : > { %v2968_v63 = vpop.f32.mrf.mxu2  ;;  %v8936_v61 = vmul.f32 %v4472_v49, %v3254_v40 }
 0x60a   : > { %v8913_v23 = vmul.f32 %v4468_v1, %v3250_v28  ;;  %v3169_v4 = vadd.f32 %v3168_v30, %v2968_v63  ;;  %v3177_v52 = vpop.f32.mrf.mxu3 }
 0x60b   : > { %v3178_v15 = vadd.f32 %v3177_v52, %v8725_v26 }
 0x60c   : > { %v3222_v30 = vadd.f32 %v8394_v7, %v3169_v4  ;;  %v3520_v41 = vrot.slane %v8913_v23, 1  ;;  %v3526_v4 = vrot.slane %v8936_v61, 1 }
 0x60d   : > { %v3225_v36 = vadd.f32 %v8394_v7, %v3178_v15  ;;  %v4471_v15 = vsel %vm3334_vm9, 1.0, %v9787_v45  ;;  %vm10706_vm9 = vmmov %vm10703_vm14 }
 0x60e   : > { %v3252_v26 = vmax.f32 %v3222_v30, 0.0  ;;  %v8934_v32 = vsel %vm415_vm0, %v3520_v41, %v3521_v48  ;;  %v3579_v30 = vrot.slane %v8509_v43, 2 }
 0x60f   : > { %v3255_v53 = vmax.f32 %v3225_v36, 0.0  ;;  %3554 = vrot.lane.b32.xlu0 %v8934_v32, %s4677_s14 }
 0x610   : > { %v8940_v24 = vmul.f32 %v4470_v3, %v3252_v26  ;;  %v3583_v26 = vrot.slane %v8618_v31, 2 }
 0x611   : > { %v8942_v0 = vmul.f32 %v4473_v35, %v3255_v53  ;;  %v2971_v2 = vpop.f32.mrf.mxu2  ;;  %v3581_v53 = vrot.slane %v8560_v46, 2  ;;  %v3594_v46 = vrot.slane %v8778_v21, 2 }
 0x612   : > { %v3523_v1 = vrot.slane %v8940_v24, 1  ;;  %v3172_v28 = vadd.f32 %v3171_v6, %v2971_v2  ;;  %v3586_v2 = vrot.slane %v8661_v56, 2  ;;  %v3593_v56 = vrot.slane %v8776_v34, 2 }
 0x613   : > { %v3528_v63 = vrot.slane %v8942_v0, 1 }
 0x614   : > { %v3223_v52 = vadd.f32 %v8394_v7, %v3172_v28  ;;  %v8953_v40 = vsel %vm415_vm0, %v3521_v48, %v3523_v1  ;;  %v3578_v7 = vrot.slane %v8494_v9, 2  ;;  %v3584_v48 = vrot.slane %v8624_v22, 2 }
 0x615   : > { %3556 = vrot.lane.b32.xlu1 %v8953_v40, %s4677_s14  ;;  %v8959_v6 = vsel %vm415_vm0, %v3526_v4, %v3528_v63  ;;  %v3591_v1 = vrot.slane %v8750_v19, 2  ;;  %v3582_v63 = vsel %vm576_vm1, %v3579_v30, %v3581_v53  ;;  %v3588_v19 = vrot.slane %v8717_v11, 2 }
 0x616   : > { %v3253_v49 = vmax.f32 %v3223_v52, 0.0  ;;  %v3580_v3 = vsel %vm576_vm1, %v3578_v7, %v3579_v30  ;;  %v3585_v35 = vsel %vm576_vm1, %v3583_v26, %v3584_v48  ;;  %v3587_v28 = vsel %vm576_vm1, %v3584_v48, %v3586_v2 }
 0x617   : > { %3560 = vrot.lane.b32.xlu0 %v8959_v6, %s4677_s14  ;;  %v3598_v7 = vrot.slane %v8822_v62, 2  ;;  %v3596_v48 = vrot.slane %v8796_v10, 2  ;;  %v3606_v26 = vrot.slane %v8887_v42, 2  ;;  %v3603_v10 = vrot.slane %v8864_v33, 2  ;;  %v3535_v42 = vpop.permute.xlu2 %3534 }
 0x618   : > { %v8963_v29 = vmul.f32 %v4471_v15, %v3253_v49  ;;  %v3599_v15 = vrot.slane %v8824_v50, 2  ;;  %v3595_v49 = vsel %vm576_vm1, %v3593_v56, %v3594_v46 }
 0x619   : > { %v3597_v2 = vsel %vm576_vm1, %v3594_v46, %v3596_v48 }
 0x61a   : > { %v3525_v41 = vrot.slane %v8963_v29, 1 }
 0x61c   : > { %v8971_v36 = vsel %vm415_vm0, %v3525_v41, %v3526_v4  ;;  %v3589_v4 = vrot.slane %v8723_v60, 2  ;;  %v8999_v41 = vsel %vm576_vm1, %v3598_v7, %v3599_v15 }
 0x61d   : > { %3618 = vrot.lane.b32.xlu1 %v3580_v3, %s4678_s15  ;;  %3558 = vrot.lane.b32.xlu2 %v8971_v36, %s4677_s14  ;;  %v3601_v3 = vrot.slane %v8842_v5, 2 }
 0x61e   : > { %v3592_v52 = vsel %vm576_vm1, %v3589_v4, %v3591_v1  ;;  %v3590_v30 = vsel %vm576_vm1, %v3588_v19, %v3589_v4  ;;  %v3604_v1 = vrot.slane %v8866_v54, 2 }
 0x61f   : > { %3622 = vrot.lane.b32.xlu0 %v3585_v35, %s4678_s15  ;;  %v9007_v53 = vsel %vm576_vm1, %v3599_v15, %v3601_v3 }
 0x620   : > { %v9021_v5 = vsel %vm576_vm1, %v3603_v10, %v3604_v1 }
 0x625   : > { %3624 = vrot.lane.b32.xlu1 %v3587_v28, %s4678_s15  ;;  %3620 = vrot.lane.b32.xlu2 %v3582_v63, %s4678_s15  ;;  %v9015_v63 = vsel %vm576_vm1, %v3604_v1, %v3606_v26 }
 0x627   : > { %3628 = vrot.lane.b32.xlu0 %v3592_v52, %s4678_s15 }
 0x62d   : > { %3630 = vrot.lane.b32.xlu1 %v3595_v49, %s4678_s15  ;;  %3626 = vrot.lane.b32.xlu2 %v3590_v30, %s4678_s15 }
 0x62f   : > { %3634 = vrot.lane.b32.xlu0 %v8999_v41, %s4678_s15 }
 0x635   : > { %3636 = vrot.lane.b32.xlu1 %v9007_v53, %s4678_s15  ;;  %3632 = vrot.lane.b32.xlu2 %v3597_v2, %s4678_s15 }
 0x637   : > { %3640 = vrot.lane.b32.xlu0 %v9015_v63, %s4678_s15 }
 0x63d   : > { %3668 = vrot.lane.b32.xlu1 %v8618_v31, %s4679_s16  ;;  %3638 = vrot.lane.b32.xlu2 %v9021_v5, %s4678_s15 }
 0x63f   : > { %3775 = vrot.lane.b32.xlu0 %v3585_v35, %s4681_s18  ;;  %v9048_v35 = vpop.permute.xlu0 %3530 }
 0x645   : > { %3825 = vrot.lane.b32.xlu1 %v8717_v11, %s4682_s19  ;;  %3722 = vrot.lane.b32.xlu2 %v8644_v18, %s4680_s17  ;;  %v3541_v18 = vpop.permute.xlu2 %3540 }
 0x647   : > { %3932 = vrot.lane.b32.xlu0 %v3590_v30, %s4684_s21  ;;  %v3537_v4 = vpop.permute.xlu0 %3536 }
 0x64d   : > { %3670 = vrot.lane.b32.xlu1 %v8624_v22, %s4679_s16  ;;  %3879 = vrot.lane.b32.xlu2 %v8741_v39, %s4683_s20 }
 0x64f   : > { %3777 = vrot.lane.b32.xlu0 %v3587_v28, %s4681_s18  ;;  %v9056_v28 = vpop.permute.xlu2 %3546  ;;  %v3543_v19 = vpop.permute.xlu0 %3542 }
 0x655   : > { %3827 = vrot.lane.b32.xlu1 %v8723_v60, %s4682_s19  ;;  %3724 = vrot.lane.b32.xlu2 %v8670_v17, %s4680_s17  ;;  %v9054_v17 = vpop.permute.xlu1 %3532 }
 0x657   : > { %3934 = vrot.lane.b32.xlu0 %v3592_v52, %s4684_s21 }
 0x65d   : > { %3672 = vrot.lane.b32.xlu1 %v8717_v11, %s4679_s16  ;;  %3881 = vrot.lane.b32.xlu2 %v8756_v12, %s4683_s20  ;;  %v3539_v46 = vpop.permute.xlu1 %3538 }
 0x65f   : > { %3779 = vrot.lane.b32.xlu0 %v3590_v30, %s4681_s18 }
 0x661   : > { %v9063_v56 = vpop.permute.xlu2 %3552  ;;  %v3549_v30 = vpop.permute.xlu0 %3548 }
 0x665   : > { %3829 = vrot.lane.b32.xlu1 %v8776_v34, %s4682_s19  ;;  %3726 = vrot.lane.b32.xlu2 %v8741_v39, %s4680_s17  ;;  %v3545_v39 = vpop.permute.xlu1 %3544 }
 0x667   : > { %3936 = vrot.lane.b32.xlu0 %v3595_v49, %s4684_s21 }
 0x66d   : > { %3674 = vrot.lane.b32.xlu1 %v8723_v60, %s4679_s16  ;;  %3883 = vrot.lane.b32.xlu2 %v8790_v13, %s4683_s20 }
 0x66f   : > { %3781 = vrot.lane.b32.xlu0 %v3592_v52, %s4681_s18 }
 0x671   : > { %v3551_v52 = vpop.permute.xlu1 %3550 }
 0x675   : > { %3831 = vrot.lane.b32.xlu1 %v8778_v21, %s4682_s19  ;;  %3728 = vrot.lane.b32.xlu2 %v8756_v12, %s4680_s17  ;;  %v3984_v12 = vsel %vm1313_vm3, %v8717_v11, %v3539_v46  ;;  %v3987_v11 = vsel %vm1313_vm3, %v8778_v21, %v3545_v39 }
 0x677   : > { %3938 = vrot.lane.b32.xlu0 %v3597_v2, %s4684_s21  ;;  %v9071_v15 = vpop.permute.xlu2 %3558 }
 0x67d   : > { %3676 = vrot.lane.b32.xlu1 %v8776_v34, %s4679_s16  ;;  %3885 = vrot.lane.b32.xlu2 %v8802_v16, %s4683_s20 }
 0x67f   : > { %3783 = vrot.lane.b32.xlu0 %v3595_v49, %s4681_s18  ;;  %v9078_v7 = vpop.permute.xlu2 %3620 }
 0x681   : > { %v9080_v48 = vpop.permute.xlu0 %3554 }
 0x685   : > { %3833 = vrot.lane.b32.xlu1 %v8822_v62, %s4682_s19  ;;  %3730 = vrot.lane.b32.xlu2 %v8790_v13, %s4680_s17 }
 0x687   : > { %3940 = vrot.lane.b32.xlu0 %v8999_v41, %s4684_s21  ;;  %v9090_v3 = vpop.permute.xlu1 %3556  ;;  %v3627_v26 = vpop.permute.xlu2 %3626 }
 0x688   : > { %v9093_v49 = vsel %vm1344_vm4, %v3984_v12, %v3627_v26  ;;  %v3982_v12 = vsel %vm1313_vm3, %v8618_v31, %v3535_v42  ;;  %v4110_v31 = vld [vmem:[%s9611_s5 + $0x10] sm:$0xff]  ;;  %v3990_v42 = vsel %vm1313_vm3, %v8864_v33, %v3551_v52 }
 0x689   : > { %v9095_v1 = vpop.permute.xlu0 %3560 }
 0x68a   : > { %10700 = vst [vmem:[#allocation20_spill] sm:$0xff] %v9095_v1  ;;  %v4112_v1 = vld [vmem:[%s9611_s5 + $0x20] sm:$0xf] }
 0x68b   : > { %4480 = vmatpush.msk.msrb.mxu2 %vm10701_vm11, %v4112_v1  ;;  %vm10707_vm11 = vmmov %vm10704_vm12 }
 0x68d   : > { %3678 = vrot.lane.b32.xlu1 %v8778_v21, %s4679_s16  ;;  %3887 = vrot.lane.b32.xlu2 %v8836_v14, %s4683_s20  ;;  %v4111_v21 = vld [vmem:[%s9611_s5 + $0x18] sm:$0xff] }
 0x68e   : > { %4180 = vmatpush.msrb.mxu2 %v4111_v21 }
 0x68f   : > { %3785 = vrot.lane.b32.xlu0 %v3597_v2, %s4681_s18  ;;  %v3619_v13 = vpop.permute.xlu1 %3618  ;;  %v3633_v10 = vpop.permute.xlu2 %3632  ;;  %v3983_v2 = vsel %vm1313_vm3, %v8624_v22, %v3537_v4  ;;  %v3985_v22 = vsel %vm1313_vm3, %v8723_v60, %v3541_v18 }
 0x690   : > { %v9105_v46 = vsel %vm1344_vm4, %v3987_v11, %v3633_v10  ;;  %4181 = vmatpush.msrb.mxu2 %v4110_v31  ;;  %v4109_v10 = vld [vmem:[%s9611_s5 + $0x8] sm:$0xff]  ;;  %v3988_v31 = vsel %vm1313_vm3, %v8822_v62, %v9056_v28  ;;  %v3991_v28 = vsel %vm1313_vm3, %v8866_v54, %v9063_v56 }
 0x691   : > { %v3623_v26 = vpop.permute.xlu0 %3622 }
 0x692   : > { %v9110_v45 = vsel %vm1344_vm4, %v3982_v12, %v3623_v26  ;;  %4182 = vmatpush.msrb.mxu2 %v4109_v10  ;;  %v4108_v12 = vld [vmem:[%s9611_s5] sm:$0xff]  ;;  %v3986_v26 = vsel %vm1313_vm3, %v8776_v34, %v3543_v19  ;;  %v3989_v34 = vsel %vm1313_vm3, %v8824_v50, %v3549_v30 }
 0x694   : > { %4183 = vmatpush.msrb.mxu2 %v4108_v12 }
 0x695   : > { %3835 = vrot.lane.b32.xlu1 %v8824_v50, %s4682_s19  ;;  %3732 = vrot.lane.b32.xlu2 %v8802_v16, %s4680_s17 }
 0x697   : > { %3942 = vrot.lane.b32.xlu0 %v9007_v53, %s4684_s21  ;;  %v3625_v39 = vpop.permute.xlu1 %3624  ;;  %v3639_v1 = vpop.permute.xlu2 %3638 }
 0x698   : > { %v9133_v11 = vsel %vm1344_vm4, %v3983_v2, %v3625_v39  ;;  %v9136_v16 = vsel %vm1344_vm4, %v3990_v42, %v3639_v1 }
 0x699   : > { %v3629_v4 = vpop.permute.xlu0 %3628 }
 0x69a   : > { %v9144_v52 = vsel %vm1344_vm4, %v3985_v22, %v3629_v4 }
 0x69d   : > { %3680 = vrot.lane.b32.xlu1 %v8822_v62, %s4679_s16  ;;  %3889 = vrot.lane.b32.xlu2 %v8846_v38, %s4683_s20 }
 0x69f   : > { %3787 = vrot.lane.b32.xlu0 %v8999_v41, %s4681_s18  ;;  %v3631_v60 = vpop.permute.xlu1 %3630  ;;  %v3723_v18 = vpop.permute.xlu2 %3722 }
 0x6a0   : > { %v9158_v21 = vsel %vm1344_vm4, %v3986_v26, %v3631_v60 }
 0x6a1   : > { %v3635_v2 = vpop.permute.xlu0 %3634 }
 0x6a2   : > { %v9164_v42 = vsel %vm1344_vm4, %v3988_v31, %v3635_v2 }
 0x6a5   : > { %3837 = vrot.lane.b32.xlu1 %v8864_v33, %s4682_s19  ;;  %3734 = vrot.lane.b32.xlu2 %v8836_v14, %s4680_s17  ;;  %v3980_v14 = vsel %vm1313_vm3, %v8494_v9, %v9048_v35 }
 0x6a6   : > { %v3996_v56 = vsel %vm1344_vm4, %v3980_v14, %v3619_v13 }
 0x6a7   : > { %3944 = vrot.lane.b32.xlu0 %v9021_v5, %s4684_s21  ;;  %v3637_v41 = vpop.permute.xlu1 %3636  ;;  %v3880_v19 = vpop.permute.xlu2 %3879 }
 0x6a8   : > { %v9175_v62 = vsel %vm1344_vm4, %v3989_v34, %v3637_v41 }
 0x6a9   : > { %v3641_v39 = vpop.permute.xlu0 %3640 }
 0x6aa   : > { %v9181_v1 = vsel %vm1344_vm4, %v3991_v28, %v3641_v39  ;;  %v3609_v28 = vrot.slane %v8907_v20, 2 }
 0x6ad   : > { %3682 = vrot.lane.b32.xlu1 %v8824_v50, %s4679_s16  ;;  %3891 = vrot.lane.b32.xlu2 %v8877_v8, %s4683_s20 }
 0x6af   : > { %3789 = vrot.lane.b32.xlu0 %v9007_v53, %s4681_s18  ;;  %v3669_v30 = vpop.permute.xlu1 %3668  ;;  %v3725_v10 = vpop.permute.xlu2 %3724 }
 0x6b0   : > { %v4012_v22 = vsel %vm1375_vm5, %v3996_v56, %v3669_v30 }
 0x6b1   : > { %v3776_v4 = vpop.permute.xlu0 %3775  ;;  %v4028_v12 = vsel %vm1406_vm6, %v4012_v22, %v3723_v18 }
 0x6b2   : > { %v4044_v9 = vsel %vm1437_vm7, %v4028_v12, %v3776_v4  ;;  %v3611_v12 = vrot.slane %v8940_v24, 2 }
 0x6b5   : > { %3839 = vrot.lane.b32.xlu1 %v8866_v54, %s4682_s19  ;;  %3736 = vrot.lane.b32.xlu2 %v8846_v38, %s4680_s17  ;;  %v3981_v38 = vsel %vm1313_vm3, %v8509_v43, %v9054_v17 }
 0x6b6   : > { %v3997_v2 = vsel %vm1344_vm4, %v3981_v38, %v9078_v7 }
 0x6b7   : > { %3946 = vrot.lane.b32.xlu0 %v9015_v63, %s4684_s21  ;;  %v3826_v50 = vpop.permute.xlu1 %3825  ;;  %v3882_v53 = vpop.permute.xlu2 %3881 }
 0x6b8   : > { %v4060_v35 = vsel %vm1468_vm8, %v4044_v9, %v3826_v50 }
 0x6b9   : > { %v4076_v13 = vsel %vm10702_vm10, %v4060_v35, %v3880_v19  ;;  %v3933_v26 = vpop.permute.xlu0 %3932  ;;  %vm10708_vm10 = vmmov %vm10705_vm2 }
 0x6ba   : > { %v4092_v60 = vsel %vm10703_vm14, %v4076_v13, %v3933_v26  ;;  %vm10709_vm14 = vmmov %vm10706_vm9 }
 0x6bb   : > { %4481 = vmatmul.msk.f32.vlgmr.msrb.gmra.mxu2 %vm10704_vm12, %v4092_v60  ;;  %vm10710_vm12 = vmmov %vm10707_vm11 }
 0x6bd   : > { %3684 = vrot.lane.b32.xlu1 %v8864_v33, %s4679_s16  ;;  %3893 = vrot.lane.b32.xlu2 %v8901_v59, %s4683_s20  ;;  %v3608_v33 = vrot.slane %v8913_v23, 2 }
 0x6bf   : > { %3791 = vrot.lane.b32.xlu0 %v9021_v5, %s4681_s18  ;;  %v3671_v18 = vpop.permute.xlu1 %3670  ;;  %v3727_v31 = vpop.permute.xlu2 %3726  ;;  %v9226_v43 = vsel %vm576_vm1, %v3608_v33, %v3609_v28 }
 0x6c0   : > { %v4013_v34 = vsel %vm1375_vm5, %v3997_v2, %v3671_v18  ;;  %v3613_v18 = vrot.slane %v8963_v29, 2 }
 0x6c1   : > { %v3778_v41 = vpop.permute.xlu0 %3777  ;;  %v4029_v19 = vsel %vm1406_vm6, %v4013_v34, %v3725_v10  ;;  %v3614_v34 = vrot.slane %v8936_v61, 2 }
 0x6c2   : > { %v4045_v5 = vsel %vm1437_vm7, %v4029_v19, %v3778_v41 }
 0x6c3   : > { %v9275_v41 = vsel %vm576_vm1, %v3613_v18, %v3614_v34 }
 0x6c5   : > { %3841 = vrot.lane.b32.xlu1 %v8913_v23, %s4682_s19  ;;  %3738 = vrot.lane.b32.xlu2 %v8877_v8, %s4680_s17 }
 0x6c7   : > { %3948 = vrot.lane.b32.xlu0 %v9226_v43, %s4684_s21  ;;  %v3828_v17 = vpop.permute.xlu1 %3827  ;;  %v3884_v7 = vpop.permute.xlu2 %3883 }
 0x6c8   : > { %v4061_v39 = vsel %vm1468_vm8, %v4045_v5, %v3828_v17 }
 0x6c9   : > { %v3935_v14 = vpop.permute.xlu0 %3934  ;;  %v4077_v30 = vsel %vm10705_vm2, %v4061_v39, %v3882_v53 }
 0x6ca   : > { %v4093_v10 = vsel %vm10706_vm9, %v4077_v30, %v3935_v14  ;;  %v3271_v30 = vadd.s32 8, %v8377_v58 }
 0x6cb   : > { %4482 = vmatmul.msk.f32.gmra.mxu2 %vm10707_vm11, %v4093_v10 }
 0x6cd   : > { %3686 = vrot.lane.b32.xlu1 %v8866_v54, %s4679_s16  ;;  %3895 = vrot.lane.b32.xlu2 %v8934_v32, %s4683_s20  ;;  %v9250_v54 = vsel %vm576_vm1, %v3609_v28, %v3611_v12 }
 0x6cf   : > { %3793 = vrot.lane.b32.xlu0 %v9015_v63, %s4681_s18  ;;  %v3673_v8 = vpop.permute.xlu1 %3672  ;;  %v3729_v56 = vpop.permute.xlu2 %3728 }
 0x6d0   : > { %v4014_v22 = vsel %vm1375_vm5, %v9110_v45, %v3673_v8 }
 0x6d1   : > { %v3780_v4 = vpop.permute.xlu0 %3779  ;;  %v4030_v9 = vsel %vm1406_vm6, %v4014_v22, %v3727_v31  ;;  %v3180_v31 = vpop.f32.mrf.mxu3 }
 0x6d2   : > { %v4046_v63 = vsel %vm1437_vm7, %v4030_v9, %v3780_v4  ;;  %v3181_v4 = vadd.f32 %v3180_v31, %v8752_v25 }
 0x6d5   : > { %3843 = vrot.lane.b32.xlu1 %v8907_v20, %s4682_s19  ;;  %3740 = vrot.lane.b32.xlu2 %v8901_v59, %s4680_s17 }
 0x6d7   : > { %3950 = vrot.lane.b32.xlu0 %v9250_v54, %s4684_s21  ;;  %v3830_v45 = vpop.permute.xlu1 %3829  ;;  %v3886_v50 = vpop.permute.xlu2 %3885 }
 0x6d8   : > { %v4062_v24 = vsel %vm1468_vm8, %v4046_v63, %v3830_v45 }
 0x6d9   : > { %v3937_v53 = vpop.permute.xlu0 %3936  ;;  %v4078_v35 = vsel %vm10708_vm10, %v4062_v24, %v3884_v7  ;;  %vm3288_vm10 = vcmp.ge.s32.totalorder %v3271_v30, 0 }
 0x6da   : > { %v4094_v13 = vsel %vm10709_vm14, %v4078_v35, %v3937_v53  ;;  %vm3298_vm14 = vcmp.lt.s32.totalorder %v3271_v30, 16 }
 0x6db   : > { %4483 = vmatmul.msk.f32.gmra.mxu2 %vm10710_vm12, %v4094_v13  ;;  %vm9310_vm12 = vmand %vm3288_vm10, %vm3298_vm14  ;;  %vm10715_vm10 = vcmask 293888  }
 0x6dc   : > { %vm10716_vm14 = vmmov %vm10705_vm2 }
 0x6dd   : > { %3688 = vrot.lane.b32.xlu1 %v8913_v23, %s4679_s16  ;;  %3897 = vrot.lane.b32.xlu2 %v8953_v40, %s4683_s20 }
 0x6df   : > { %3795 = vrot.lane.b32.xlu0 %v9226_v43, %s4681_s18  ;;  %v3675_v59 = vpop.permute.xlu1 %3674  ;;  %v3731_v26 = vpop.permute.xlu2 %3730 }
 0x6e0   : > { %v4015_v60 = vsel %vm1375_vm5, %v9133_v11, %v3675_v59  ;;  %v10714_v59 = vmov 0.0  }
 0x6e1   : > { %v3782_v38 = vpop.permute.xlu0 %3781  ;;  %v4031_v2 = vsel %vm1406_vm6, %v4015_v60, %v3729_v56  ;;  %v3616_v56 = vrot.slane %v8942_v0, 2 }
 0x6e2   : > { %v4047_v33 = vsel %vm1437_vm7, %v4031_v2, %v3782_v38 }
 0x6e5   : > { %3845 = vrot.lane.b32.xlu1 %v8963_v29, %s4682_s19  ;;  %3742 = vrot.lane.b32.xlu2 %v8934_v32, %s4680_s17  ;;  %v3183_v32 = vpop.f32.mrf.mxu3 }
 0x6e6   : > { %v3184_v22 = vadd.f32 %v3183_v32, %v8769_v55  ;;  %v9308_v55 = vsel %vm576_vm1, %v3614_v34, %v3616_v56 }
 0x6e7   : > { %v3832_v11 = vpop.permute.xlu1 %3831  ;;  %3952 = vrot.lane.b32.xlu0 %v9275_v41, %s4684_s21  ;;  %v3888_v19 = vpop.permute.xlu2 %3887 }
 0x6e8   : > { %v4063_v28 = vsel %vm1468_vm8, %v4047_v33, %v3832_v11 }
 0x6e9   : > { %v3939_v5 = vpop.permute.xlu0 %3938  ;;  %v4079_v17 = vsel %vm10705_vm2, %v4063_v28, %v3886_v50 }
 0x6ea   : > { %v4095_v7 = vsel %vm10706_vm9, %v4079_v17, %v3939_v5  ;;  %vm3337_vm9 = vmand %vm9310_vm12, %vm3310_vm15 }
 0x6eb   : > { %4484 = vmatmul.msk.f32.gmra.mxu2 %vm10707_vm11, %v4095_v7  ;;  %vm10713_vm11 = vcmask 261120   ;;  %v4474_v38 = vsel %vm3337_vm9, 1.0, %v10714_v59  ;;  %vm10718_vm9 = vmmov %vm10715_vm10 }
 0x6ed   : > { %3690 = vrot.lane.b32.xlu1 %v8907_v20, %s4679_s16  ;;  %3899 = vrot.lane.b32.xlu2 %v8971_v36, %s4683_s20 }
 0x6ef   : > { %v3677_v39 = vpop.permute.xlu1 %3676  ;;  %3797 = vrot.lane.b32.xlu0 %v9250_v54, %s4681_s18  ;;  %v3733_v14 = vpop.permute.xlu2 %3732 }
 0x6f0   : > { %v4016_v10 = vsel %vm1375_vm5, %v9093_v49, %v3677_v39  ;;  %v9304_v49 = vld [vmem:[%s9610_s4] ss:$0 sm:$0xff] }
 0x6f1   : > { %v3784_v8 = vpop.permute.xlu0 %3783  ;;  %v4032_v12 = vsel %vm1406_vm6, %v4016_v10, %v3731_v26  ;;  %v3227_v0 = vadd.f32 %v9304_v49, %v3184_v22  ;;  %v3226_v45 = vadd.f32 %v9304_v49, %v3181_v4  ;;  %v4475_v26 = vsel %vm9310_vm12, 1.0, %v10714_v59 }
 0x6f2   : > { %v4048_v9 = vsel %vm1437_vm7, %v4032_v12, %v3784_v8 }
 0x6f3   : > { %v3257_v35 = vmax.f32 %v3227_v0, 0.0  ;;  %v3256_v60 = vmax.f32 %v3226_v45, 0.0 }
 0x6f5   : > { %3847 = vrot.lane.b32.xlu1 %v8936_v61, %s4682_s19  ;;  %3744 = vrot.lane.b32.xlu2 %v8953_v40, %s4680_s17  ;;  %v9334_v18 = vmul.f32 %v4475_v26, %v3257_v35  ;;  %v9338_v34 = vmul.f32 %v4474_v38, %v3256_v60 }
 0x6f7   : > { %v3834_v63 = vpop.permute.xlu1 %3833  ;;  %3954 = vrot.lane.b32.xlu0 %v9308_v55, %s4684_s21  ;;  %v3890_v40 = vpop.permute.xlu2 %3889  ;;  %v3718_v28 = vrot.slane %v9334_v18, 1  ;;  %v3717_v5 = vrot.slane %v9338_v34, 1  ;;  %v3770_v56 = vrot.slane %v9338_v34, 2 }
 0x6f8   : > { %v4064_v50 = vsel %vm1468_vm8, %v4048_v9, %v3834_v63 }
 0x6f9   : > { %v3941_v24 = vpop.permute.xlu0 %3940  ;;  %v4080_v53 = vsel %vm10705_vm2, %v4064_v50, %v3888_v19  ;;  %v3186_v19 = vpop.f32.mrf.mxu3  ;;  %vm10717_vm2 = vmmov %vm10713_vm11 }
 0x6fa   : > { %v4096_v13 = vsel %vm10713_vm11, %v4080_v53, %v3941_v24  ;;  %v3187_v32 = vadd.f32 %v3186_v19, %v8780_v47  ;;  %vm3372_vm11 = vmand %vm9310_vm12, %vm3345_vm13 }
 0x6fb   : > { %4485 = vmatmul.msk.f32.gmra.mxu2 %vm10715_vm10, %v4096_v13  ;;  %v4476_v63 = vsel %vm3372_vm11, 1.0, %v10714_v59  ;;  %vm10719_vm12 = vmmov %vm10716_vm14 }
 0x6fc   : > { %v3228_v22 = vadd.f32 %v9304_v49, %v3187_v32  ;;  %vm10720_vm10 = vmmov %vm10717_vm2 }
 0x6fd   : > { %3642 = vrot.lane.b32.xlu1 %v9226_v43, %s4678_s15  ;;  %3901 = vrot.lane.b32.xlu2 %v8959_v6, %s4683_s20 }
 0x6fe   : > { %v3258_v9 = vmax.f32 %v3228_v22, 0.0 }
 0x6ff   : > { %v3679_v31 = vpop.permute.xlu1 %3678  ;;  %3746 = vrot.lane.b32.xlu0 %v8971_v36, %s4680_s17  ;;  %v3735_v2 = vpop.permute.xlu2 %3734  ;;  %v9350_v36 = vsel %vm415_vm0, %v3717_v5, %v3718_v28 }
 0x700   : > { %v4017_v33 = vsel %vm1375_vm5, %v9144_v52, %v3679_v31  ;;  %v3462_v50 = vmul.f32 %v4476_v63, %v3258_v9 }
 0x701   : > { %v3786_v11 = vpop.permute.xlu0 %3785  ;;  %v4033_v43 = vsel %vm1406_vm6, %v4017_v33, %v3733_v14  ;;  %v3771_v14 = vrot.slane %v9334_v18, 2  ;;  %v3189_v4 = vpop.f32.mrf.mxu3 }
 0x702   : > { %v4049_v17 = vsel %vm1437_vm7, %v4033_v43, %v3786_v11  ;;  %v3720_v26 = vrot.slane %v3462_v50, 1  ;;  %v3773_v19 = vrot.slane %v3462_v50, 2 }
 0x703   : > { %v3772_v12 = vsel %vm576_vm1, %v3770_v56, %v3771_v14 }
 0x704   : > { %v3721_v33 = vsel %vm415_vm0, %v3718_v28, %v3720_v26  ;;  %v3774_v32 = vsel %vm576_vm1, %v3771_v14, %v3773_v19 }
 0x705   : > { %3799 = vrot.lane.b32.xlu1 %v9275_v41, %s4681_s18  ;;  %3692 = vrot.lane.b32.xlu2 %v8963_v29, %s4679_s16 }
 0x707   : > { %v3836_v52 = vpop.permute.xlu1 %3835  ;;  %3903 = vrot.lane.b32.xlu0 %v9350_v36, %s4683_s20  ;;  %v3892_v7 = vpop.permute.xlu2 %3891 }
 0x708   : > { %v4065_v39 = vsel %vm1468_vm8, %v4049_v17, %v3836_v52 }
 0x709   : > { %v3943_v30 = vpop.permute.xlu0 %3942  ;;  %v4081_v10 = vsel %vm10716_vm14, %v4065_v39, %v3890_v40  ;;  %v3192_v25 = vpop.f32.mrf.mxu3  ;;  %vm10721_vm14 = vmmov %vm10718_vm9 }
 0x70a   : > { %v4097_v8 = vsel %vm10717_vm2, %v4081_v10, %v3943_v30 }
 0x70b   : > { %4486 = vmatmul.msk.f32.gmra.mxu2 %vm10718_vm9, %v4097_v8 }
 0x70d   : > { %3956 = vrot.lane.b32.xlu1 %v3772_v12, %s4684_s21  ;;  %3849 = vrot.lane.b32.xlu2 %v9338_v34, %s4682_s19 }
 0x70f   : > { %v3681_v47 = vpop.permute.xlu1 %3680  ;;  %3694 = vrot.lane.b32.xlu0 %v8936_v61, %s4679_s16  ;;  %v3737_v0 = vpop.permute.xlu2 %3736 }
 0x710   : > { %v4018_v40 = vsel %vm1375_vm5, %v9158_v21, %v3681_v47  ;;  %v3272_v21 = vadd.s32 9, %v8377_v58 }
 0x711   : > { %v3788_v45 = vpop.permute.xlu0 %3787  ;;  %v4034_v24 = vsel %vm1406_vm6, %v4018_v40, %v3735_v2  ;;  %v3190_v2 = vadd.f32 %v3189_v4, %v8798_v44 }
 0x712   : > { %v4050_v53 = vsel %vm1437_vm7, %v4034_v24, %v3788_v45  ;;  %vm3289_vm2 = vcmp.ge.s32.totalorder %v3272_v21, 0  ;;  %vm3299_vm9 = vcmp.lt.s32.totalorder %v3272_v21, 16 }
 0x713   : > { %vm9396_vm11 = vmand %vm3289_vm2, %vm3299_vm9  ;;  %v3229_v43 = vadd.f32 %v9304_v49, %v3190_v2 }
 0x714   : > { %v4478_v52 = vsel %vm9396_vm11, 1.0, %v10714_v59  ;;  %vm3375_vm2 = vmand %vm9396_vm11, %vm3345_vm13 }
 0x715   : > { %3748 = vrot.lane.b32.xlu1 %v8959_v6, %s4680_s17  ;;  %3644 = vrot.lane.b32.xlu2 %v9250_v54, %s4678_s15  ;;  %v3193_v6 = vadd.f32 %v3192_v25, %v8815_v51  ;;  %v4479_v25 = vsel %vm3375_vm2, 1.0, %v10714_v59  ;;  %vm10726_vm9 = vmmov %vm10720_vm10 }
 0x717   : > { %v3838_v35 = vpop.permute.xlu1 %3837  ;;  %3851 = vrot.lane.b32.xlu0 %v9334_v18, %s4682_s19  ;;  %v3894_v13 = vpop.permute.xlu2 %3893  ;;  %v3230_v58 = vadd.f32 %v9304_v49, %v3193_v6 }
 0x718   : > { %v4066_v60 = vsel %vm1468_vm8, %v4050_v53, %v3838_v35 }
 0x719   : > { %v3945_v38 = vpop.permute.xlu0 %3944  ;;  %v4082_v31 = vsel %vm10719_vm12, %v4066_v60, %v3892_v7  ;;  %vm3340_vm12 = vmand %vm9396_vm11, %vm3310_vm15  ;;  %v3260_v17 = vmax.f32 %v3230_v58, 0.0  ;;  %v3259_v7 = vmax.f32 %v3229_v43, 0.0  ;;  %vm10724_vm15 = vcmask 228352  }
 0x71a   : > { %v4098_v54 = vsel %vm10720_vm10, %v4082_v31, %v3945_v38  ;;  %v4477_v39 = vsel %vm3340_vm12, 1.0, %v10714_v59  ;;  %vm10725_vm13 = vmmov %vm10724_vm15 }
 0x71b   : > { %4487 = vmatmul.msk.f32.gmra.mxu2 %vm10721_vm14, %v4098_v54  ;;  %v9418_v37 = vmul.f32 %v4478_v52, %v3260_v17  ;;  %v3463_v56 = vmul.f32 %v4477_v39, %v3259_v7  ;;  %vm10727_vm11 = vmmov %vm10721_vm14 }
 0x71c   : > { %vm10729_vm12 = vmmov %vm10726_vm9 }
 0x71d   : > { %3905 = vrot.lane.b32.xlu1 %v3721_v33, %s4683_s20  ;;  %3801 = vrot.lane.b32.xlu2 %v9308_v55, %s4681_s18  ;;  %v3927_v9 = vrot.slane %v3463_v56, 2  ;;  %v3875_v45 = vrot.slane %v9418_v37, 1  ;;  %v3874_v24 = vrot.slane %v3463_v56, 1 }
 0x71f   : > { %v3683_v51 = vpop.permute.xlu1 %3682  ;;  %3646 = vrot.lane.b32.xlu0 %v9275_v41, %s4678_s15  ;;  %v3739_v44 = vpop.permute.xlu2 %3738  ;;  %v3876_v35 = vsel %vm415_vm0, %v3874_v24, %v3875_v45 }
 0x720   : > { %v4019_v28 = vsel %vm1375_vm5, %v9105_v46, %v3683_v51  ;;  %v3195_v46 = vpop.f32.mrf.mxu3 }
 0x721   : > { %v3790_v5 = vpop.permute.xlu0 %3789  ;;  %v4035_v41 = vsel %vm1406_vm6, %v4019_v28, %v3737_v0  ;;  %v3928_v0 = vrot.slane %v9418_v37, 2 }
 0x722   : > { %v4051_v30 = vsel %vm1437_vm7, %v4035_v41, %v3790_v5 }
 0x723   : > { %v3929_v63 = vsel %vm576_vm1, %v3927_v9, %v3928_v0 }
 0x725   : > { %3696 = vrot.lane.b32.xlu1 %v9338_v34, %s4679_s16  ;;  %3958 = vrot.lane.b32.xlu2 %v3774_v32, %s4684_s21  ;;  %v3196_v34 = vadd.f32 %v3195_v46, %v8826_v57 }
 0x727   : > { %v3840_v10 = vpop.permute.xlu1 %3839  ;;  %3803 = vrot.lane.b32.xlu0 %v3772_v12, %s4681_s18  ;;  %v3896_v8 = vpop.permute.xlu2 %3895  ;;  %v3231_v12 = vadd.f32 %v9304_v49, %v3196_v34 }
 0x728   : > { %v4067_v14 = vsel %vm1468_vm8, %v4051_v30, %v3840_v10 }
 0x729   : > { %v3947_v22 = vpop.permute.xlu0 %3946  ;;  %v4083_v4 = vsel %vm10724_vm15, %v4067_v14, %v3894_v13  ;;  %v3261_v49 = vmax.f32 %v3231_v12, 0.0  ;;  %vm10730_vm15 = vmmov %vm10727_vm11 }
 0x72a   : > { %v4099_v47 = vsel %vm10720_vm10, %v4083_v4, %v3947_v22  ;;  %vm10732_vm10 = vmmov %vm10726_vm9 }
 0x72b   : > { %4488 = vmatmul.msk.f32.gmra.mxu2 %vm10721_vm14, %v4099_v47  ;;  %v3465_v27 = vmul.f32 %v4479_v25, %v3261_v49  ;;  %vm10733_vm14 = vmmov %vm10727_vm11 }
 0x72d   : > { %3853 = vrot.lane.b32.xlu1 %v3463_v56, %s4682_s19  ;;  %3750 = vrot.lane.b32.xlu2 %v9350_v36, %s4680_s17  ;;  %v3877_v38 = vrot.slane %v3465_v27, 1  ;;  %v3930_v11 = vrot.slane %v3465_v27, 2 }
 0x72f   : > { %v3685_v40 = vpop.permute.xlu1 %3684  ;;  %3960 = vrot.lane.b32.xlu0 %v3929_v63, %s4684_s21  ;;  %v3741_v57 = vpop.permute.xlu2 %3740  ;;  %v3878_v54 = vsel %vm415_vm0, %v3875_v45, %v3877_v38  ;;  %v3931_v43 = vsel %vm576_vm1, %v3928_v0, %v3930_v11  ;;  %vm10728_vm0 = vmmov %vm10725_vm13 }
 0x730   : > { %v4020_v50 = vsel %vm1375_vm5, %v9164_v42, %v3685_v40  ;;  %vm10731_vm1 = vmmov %vm10728_vm0 }
 0x731   : > { %v3792_v36 = vpop.permute.xlu0 %3791  ;;  %v4036_v53 = vsel %vm1406_vm6, %v4020_v50, %v3739_v44  ;;  %vm10734_vm2 = vmmov %vm10728_vm0 }
 0x732   : > { %v4052_v13 = vsel %vm1437_vm7, %v4036_v53, %v3792_v36 }
 0x735   : > { %3648 = vrot.lane.b32.xlu1 %v9308_v55, %s4678_s15  ;;  %3907 = vrot.lane.b32.xlu2 %v3876_v35, %s4683_s20  ;;  %s320_s15 = sadd.s32 %s4380_s23, %s4379_s22  ;;  %v9459_v55 = vld [vmem:[%s9612_s6] ss:$0 sm:$0xff] }
 0x736   : > { %s4381_s25 = sshll.u32 %s320_s15, 3 }
 0x737   : > { %v3842_v42 = vpop.permute.xlu1 %3841  ;;  %3752 = vrot.lane.b32.xlu0 %v3721_v33, %s4680_s17  ;;  %v3898_v26 = vpop.permute.xlu2 %3897  ;;  %s9470_s9 = scalar_lea.vmem %s9613_s7, %s4381_s25 }
 0x738   : > { %v4068_v59 = vsel %vm1468_vm8, %v4052_v13, %v3842_v42 }
 0x739   : > { %v3949_v21 = vpop.permute.xlu0 %3948  ;;  %v4084_v60 = vsel %vm10725_vm13, %v4068_v59, %v3896_v8  ;;  %vm10735_vm13 = vmmov %vm10726_vm9  ;;  %v3992_v59 = vsel %vm1313_vm3, %v8913_v23, %v9080_v48 }
 0x73a   : > { %v4100_v31 = vsel %vm10726_vm9, %v4084_v60, %v3949_v21  ;;  %vm10736_vm9 = vmmov %vm10727_vm11 }
 0x73b   : > { %4489 = vmatmul.msk.f32.gmra.mxu2 %vm10727_vm11, %v4100_v31  ;;  %vm10737_vm11 = vmmov %vm10728_vm0 }
 0x73d   : > { %3805 = vrot.lane.b32.xlu1 %v3774_v32, %s4681_s18  ;;  %3698 = vrot.lane.b32.xlu2 %v9334_v18, %s4679_s16 }
 0x73e   : > { %v4185_v6 = vpop.f32.mrf.mxu2 }
 0x73f   : > { %v4186_v2 = vadd.f32 %v9459_v55, %v4185_v6  ;;  %v3687_v33 = vpop.permute.xlu1 %3686  ;;  %3909 = vrot.lane.b32.xlu0 %v3878_v54, %s4683_s20  ;;  %v3743_v58 = vpop.permute.xlu2 %3742 }
 0x740   : > { %v4021_v18 = vsel %vm1375_vm5, %v9175_v62, %v3687_v33 }
 0x741   : > { %v4233_v51 = vmax.f32 %v4186_v2, 0.0  ;;  %v3794_v44 = vpop.permute.xlu0 %3793  ;;  %v4037_v19 = vsel %vm1406_vm6, %v4021_v18, %v3741_v57 }
 0x742   : > { %v4053_v28 = vsel %vm1437_vm7, %v4037_v19, %v3794_v44 }
 0x743   : > { %4249 = vst.msk [vmem:[%s9470_s9] sm:$0xff] %vm1313_vm3, %v4233_v51 }
 0x745   : > { %3962 = vrot.lane.b32.xlu1 %v3931_v43, %s4684_s21  ;;  %3855 = vrot.lane.b32.xlu2 %v9418_v37, %s4682_s19 }
 0x747   : > { %v3844_v5 = vpop.permute.xlu1 %3843  ;;  %v3900_v17 = vpop.permute.xlu2 %3899 }
 0x748   : > { %v4069_v52 = vsel %vm1468_vm8, %v4053_v28, %v3844_v5  ;;  %v3993_v5 = vsel %vm1313_vm3, %v8907_v20, %v9090_v3 }
 0x749   : > { %v3951_v62 = vpop.permute.xlu0 %3950  ;;  %v4085_v7 = vsel %vm10728_vm0, %v4069_v52, %v3898_v26  ;;  %vm10738_vm0 = vmmov %vm10732_vm10 }
 0x74a   : > { %v4101_v41 = vsel %vm10729_vm12, %v4085_v7, %v3951_v62  ;;  %vm10739_vm12 = vmmov %vm10736_vm9 }
 0x74b   : > { %4490 = vmatmul.msk.f32.gmra.mxu2 %vm10730_vm15, %v4101_v41  ;;  %vm10740_vm15 = vmmov %vm10731_vm1 }
 0x74e   : > { %v4188_v32 = vpop.f32.mrf.mxu2 }
 0x74f   : > { %v4189_v39 = vadd.f32 %v9459_v55, %v4188_v32  ;;  %v3689_v46 = vpop.permute.xlu1 %3688  ;;  %v3745_v30 = vpop.permute.xlu2 %3744 }
 0x750   : > { %v4022_v10 = vsel %vm1375_vm5, %v9136_v16, %v3689_v46 }
 0x751   : > { %v4234_v37 = vmax.f32 %v4189_v39, 0.0  ;;  %v3796_v8 = vpop.permute.xlu0 %3795  ;;  %v4038_v56 = vsel %vm1406_vm6, %v4022_v10, %v3743_v58 }
 0x752   : > { %v4054_v14 = vsel %vm1437_vm7, %v4038_v56, %v3796_v8 }
 0x753   : > { %4250 = vst.msk [vmem:[%s9470_s9 + $0x8] sm:$0xff] %vm1313_vm3, %v4234_v37 }
 0x757   : > { %v3846_v22 = vpop.permute.xlu1 %3845  ;;  %v3902_v34 = vpop.permute.xlu2 %3901 }
 0x758   : > { %v4070_v4 = vsel %vm1468_vm8, %v4054_v14, %v3846_v22  ;;  %v3994_v22 = vsel %vm1313_vm3, %v8963_v29, %v9071_v15 }
 0x759   : > { %v3953_v47 = vpop.permute.xlu0 %3952  ;;  %v4086_v0 = vsel %vm10731_vm1, %v4070_v4, %v3900_v17  ;;  %vm10741_vm1 = vmmov %vm10738_vm0 }
 0x75a   : > { %v4102_v9 = vsel %vm10732_vm10, %v4086_v0, %v3953_v47  ;;  %vm10742_vm10 = vmmov %vm10736_vm9 }
 0x75b   : > { %4491 = vmatmul.msk.f32.gmra.mxu2 %vm10733_vm14, %v4102_v9  ;;  %vm10743_vm14 = vmmov %vm10734_vm2 }
 0x75e   : > { %v4191_v16 = vpop.f32.mrf.mxu2 }
 0x75f   : > { %v4192_v12 = vadd.f32 %v9459_v55, %v4191_v16  ;;  %v3691_v63 = vpop.permute.xlu1 %3690  ;;  %v3693_v50 = vpop.permute.xlu2 %3692 }
 0x760   : > { %v4023_v57 = vsel %vm1375_vm5, %v9181_v1, %v3691_v63 }
 0x761   : > { %v4235_v40 = vmax.f32 %v4192_v12, 0.0  ;;  %v3798_v45 = vpop.permute.xlu0 %3797  ;;  %v4039_v36 = vsel %vm1406_vm6, %v4023_v57, %v3745_v30 }
 0x762   : > { %v4055_v49 = vsel %vm1437_vm7, %v4039_v36, %v3798_v45 }
 0x763   : > { %4251 = vst.msk [vmem:[%s9470_s9 + $0x10] sm:$0xff] %vm1313_vm3, %v4235_v40 }
 0x767   : > { %v3848_v24 = vpop.permute.xlu1 %3847  ;;  %v3850_v1 = vpop.permute.xlu2 %3849 }
 0x768   : > { %v4071_v25 = vsel %vm1468_vm8, %v4055_v49, %v3848_v24  ;;  %v10746_v24 = vld [vmem:[#allocation20_spill] sm:$0xff] }
 0x769   : > { %v3955_v53 = vpop.permute.xlu0 %3954  ;;  %v4087_v35 = vsel %vm10734_vm2, %v4071_v25, %v3902_v34  ;;  %vm10744_vm2 = vmmov %vm10738_vm0  ;;  %v3995_v25 = vsel %vm1313_vm3, %v8936_v61, %v10746_v24 }
 0x76a   : > { %v4103_v27 = vsel %vm10735_vm13, %v4087_v35, %v3955_v53  ;;  %vm10745_vm13 = vmmov %vm10736_vm9 }
 0x76b   : > { %4492 = vmatmul.msk.f32.gmra.mxu2 %vm10736_vm9, %v4103_v27 }
 0x76e   : > { %v4194_v13 = vpop.f32.mrf.mxu2 }
 0x76f   : > { %v4195_v42 = vadd.f32 %v9459_v55, %v4194_v13  ;;  %v3643_v26 = vpop.permute.xlu1 %3642  ;;  %v3645_v6 = vpop.permute.xlu2 %3644 }
 0x770   : > { %v4008_v38 = vsel %vm1344_vm4, %v3992_v59, %v3643_v26  ;;  %v4009_v17 = vsel %vm1344_vm4, %v3993_v5, %v3645_v6 }
 0x771   : > { %v4236_v21 = vmax.f32 %v4195_v42, 0.0  ;;  %v3747_v60 = vpop.permute.xlu0 %3746  ;;  %v4024_v31 = vsel %vm1375_vm5, %v4008_v38, %v3693_v50 }
 0x772   : > { %v4040_v2 = vsel %vm1406_vm6, %v4024_v31, %v3747_v60 }
 0x773   : > { %4252 = vst.msk [vmem:[%s9470_s9 + $0x18] sm:$0xff] %vm1313_vm3, %v4236_v21 }
 0x777   : > { %v3800_v54 = vpop.permute.xlu1 %3799  ;;  %v3802_v19 = vpop.permute.xlu2 %3801 }
 0x778   : > { %v4056_v33 = vsel %vm1437_vm7, %v4040_v2, %v3800_v54 }
 0x779   : > { %v3904_v58 = vpop.permute.xlu0 %3903  ;;  %v4072_v11 = vsel %vm1468_vm8, %v4056_v33, %v3850_v1 }
 0x77a   : > { %v4088_v23 = vsel %vm10737_vm11, %v4072_v11, %v3904_v58 }
 0x77e   : > { %v4197_v51 = vpop.f32.mrf.mxu2 }
 0x77f   : > { %v4198_v48 = vadd.f32 %v9459_v55, %v4197_v51  ;;  %v3957_v18 = vpop.permute.xlu1 %3956  ;;  %v3959_v32 = vpop.permute.xlu2 %3958 }
 0x780   : > { %v4104_v44 = vsel %vm10738_vm0, %v4088_v23, %v3957_v18 }
 0x781   : > { %v4237_v43 = vmax.f32 %v4198_v48, 0.0  ;;  %4493 = vmatmul.msk.f32.gmra.mxu2 %vm10739_vm12, %v4104_v44  ;;  %v3695_v28 = vpop.permute.xlu0 %3694 }
 0x782   : > { %v4025_v62 = vsel %vm1375_vm5, %v4009_v17, %v3695_v28 }
 0x783   : > { %4253 = vst.msk [vmem:[%s9470_s9 + $0x20] sm:$0xff] %vm1313_vm3, %v4237_v43 }
 0x787   : > { %v3749_v52 = vpop.permute.xlu1 %3748  ;;  %v3751_v14 = vpop.permute.xlu2 %3750 }
 0x788   : > { %v4041_v7 = vsel %vm1406_vm6, %v4025_v62, %v3749_v52 }
 0x789   : > { %v3852_v41 = vpop.permute.xlu0 %3851  ;;  %v4057_v39 = vsel %vm1437_vm7, %v4041_v7, %v3802_v19 }
 0x78a   : > { %v4073_v30 = vsel %vm1468_vm8, %v4057_v39, %v3852_v41 }
 0x78e   : > { %v4200_v46 = vpop.f32.mrf.mxu2 }
 0x78f   : > { %v4201_v37 = vadd.f32 %v9459_v55, %v4200_v46  ;;  %v3906_v10 = vpop.permute.xlu1 %3905  ;;  %v3908_v12 = vpop.permute.xlu2 %3907 }
 0x790   : > { %v4089_v20 = vsel %vm10740_vm15, %v4073_v30, %v3906_v10 }
 0x791   : > { %v4238_v3 = vmax.f32 %v4201_v37, 0.0  ;;  %v3647_v8 = vpop.permute.xlu0 %3646  ;;  %v4105_v56 = vsel %vm10741_vm1, %v4089_v20, %v3959_v32 }
 0x792   : > { %4494 = vmatmul.msk.f32.gmra.mxu2 %vm10742_vm10, %v4105_v56  ;;  %v4010_v34 = vsel %vm1344_vm4, %v3994_v22, %v3647_v8 }
 0x793   : > { %4254 = vst.msk [vmem:[%s9470_s9 + $0x28] sm:$0xff] %vm1313_vm3, %v4238_v3 }
 0x797   : > { %v3697_v4 = vpop.permute.xlu1 %3696  ;;  %v3699_v53 = vpop.permute.xlu2 %3698 }
 0x798   : > { %v4026_v47 = vsel %vm1375_vm5, %v4010_v34, %v3697_v4 }
 0x799   : > { %v3804_v0 = vpop.permute.xlu0 %3803  ;;  %v4042_v9 = vsel %vm1406_vm6, %v4026_v47, %v3751_v14 }
 0x79a   : > { %v4058_v63 = vsel %vm1437_vm7, %v4042_v9, %v3804_v0 }
 0x79e   : > { %v4203_v16 = vpop.f32.mrf.mxu2 }
 0x79f   : > { %v4204_v40 = vadd.f32 %v9459_v55, %v4203_v16  ;;  %v3854_v57 = vpop.permute.xlu1 %3853  ;;  %v3856_v38 = vpop.permute.xlu2 %3855 }
 0x7a0   : > { %v4074_v45 = vsel %vm1468_vm8, %v4058_v63, %v3854_v57 }
 0x7a1   : > { %v4239_v50 = vmax.f32 %v4204_v40, 0.0  ;;  %v3961_v29 = vpop.permute.xlu0 %3960  ;;  %v4090_v15 = vsel %vm10743_vm14, %v4074_v45, %v3908_v12 }
 0x7a2   : > { %v4106_v36 = vsel %vm10744_vm2, %v4090_v15, %v3961_v29 }
 0x7a3   : > { %4255 = vst.msk [vmem:[%s9470_s9 + $0x30] sm:$0xff] %vm1313_vm3, %v4239_v50  ;;  %4495 = vmatmul.msk.f32.gmra.mxu2 %vm10745_vm13, %v4106_v36 }
 0x7a7   : > { %v3649_v49 = vpop.permute.xlu1 %3648 }
 0x7a8   : > { %v4011_v35 = vsel %vm1344_vm4, %v3995_v25, %v3649_v49  ;;  %vm10747_vm4 = vmmov %vm10737_vm11 }
 0x7a9   : > { %v3753_v27 = vpop.permute.xlu0 %3752  ;;  %v4027_v1 = vsel %vm1375_vm5, %v4011_v35, %v3699_v53  ;;  %vm10748_vm5 = vmmov %vm10738_vm0 }
 0x7aa   : > { %v4043_v59 = vsel %vm1406_vm6, %v4027_v1, %v3753_v27 }
 0x7ae   : > { %v4206_v13 = vpop.f32.mrf.mxu2 }
 0x7af   : > { %v4207_v42 = vadd.f32 %v9459_v55, %v4206_v13  ;;  %v3806_v26 = vpop.permute.xlu1 %3805 }
 0x7b0   : > { %v4059_v60 = vsel %vm1437_vm7, %v4043_v59, %v3806_v26 }
 0x7b1   : > { %v4240_v21 = vmax.f32 %v4207_v42, 0.0  ;;  %v4075_v61 = vsel %vm1468_vm8, %v4059_v60, %v3856_v38  ;;  %v3910_v31 = vpop.permute.xlu0 %3909 }
 0x7b2   : > { %v4091_v6 = vsel %vm10747_vm4, %v4075_v61, %v3910_v31 }
 0x7b3   : > { %4256 = vst.msk [vmem:[%s9470_s9 + $0x38] sm:$0xff] %vm1313_vm3, %v4240_v21 }
 0x7b7   : > { %v3963_v54 = vpop.permute.xlu1 %3962 }
 0x7b8   : > { %v4107_v2 = vsel %vm10748_vm5, %v4091_v6, %v3963_v54 }
 0x7b9   : > { %4496 = vmatmul.msk.f32.gmra.mxu2 %vm10736_vm9, %v4107_v2 }
 0x7be   : > { %v4209_v33 = vpop.f32.mrf.mxu2 }
 0x7bf   : > { %v4210_v58 = vadd.f32 %v9459_v55, %v4209_v33 }
 0x7c1   : > { %v4241_v11 = vmax.f32 %v4210_v58, 0.0 }
 0x7c3   : > { %4257 = vst.msk [vmem:[%s9470_s9 + $0x40] sm:$0xff] %vm1313_vm3, %v4241_v11 }
 0x7ce   : > { %v4212_v51 = vpop.f32.mrf.mxu2 }
 0x7cf   : > { %v4213_v23 = vadd.f32 %v9459_v55, %v4212_v51 }
 0x7d1   : > { %v4242_v48 = vmax.f32 %v4213_v23, 0.0 }
 0x7d3   : > { %4258 = vst.msk [vmem:[%s9470_s9 + $0x48] sm:$0xff] %vm1313_vm3, %v4242_v48 }
 0x7de   : > { %v4215_v18 = vpop.f32.mrf.mxu2 }
 0x7df   : > { %v4216_v44 = vadd.f32 %v9459_v55, %v4215_v18 }
 0x7e1   : > { %v4243_v19 = vmax.f32 %v4216_v44, 0.0 }
 0x7e3   : > { %4259 = vst.msk [vmem:[%s9470_s9 + $0x50] sm:$0xff] %vm1313_vm3, %v4243_v19 }
 0x7ee   : > { %v4218_v43 = vpop.f32.mrf.mxu2 }
 0x7ef   : > { %v4219_v28 = vadd.f32 %v9459_v55, %v4218_v43 }
 0x7f1   : > { %v4244_v5 = vmax.f32 %v4219_v28, 0.0 }
 0x7f3   : > { %4260 = vst.msk [vmem:[%s9470_s9 + $0x58] sm:$0xff] %vm1313_vm3, %v4244_v5 }
 0x804   : > { %v4221_v17 = vpop.f32.mrf.mxu2 }
 0x805   : > { %v4222_v52 = vadd.f32 %v9459_v55, %v4221_v17 }
 0x807   : > { %v4245_v62 = vmax.f32 %v4222_v52, 0.0 }
 0x809   : > { %4261 = vst.msk [vmem:[%s9470_s9 + $0x60] sm:$0xff] %vm1313_vm3, %v4245_v62 }
 0x815   : > { %v4224_v7 = vpop.f32.mrf.mxu2 }
 0x816   : > { %v4225_v41 = vadd.f32 %v9459_v55, %v4224_v7 }
 0x818   : > { %v4246_v32 = vmax.f32 %v4225_v41, 0.0 }
 0x81a   : > { %4262 = vst.msk [vmem:[%s9470_s9 + $0x68] sm:$0xff] %vm1313_vm3, %v4246_v32 }
 0x826   : > { %v4227_v39 = vpop.f32.mrf.mxu2 }
 0x827   : > { %v4228_v46 = vadd.f32 %v9459_v55, %v4227_v39 }
 0x829   : > { %v4247_v30 = vmax.f32 %v4228_v46, 0.0 }
 0x82b   : > { %4263 = vst.msk [vmem:[%s9470_s9 + $0x70] sm:$0xff] %vm1313_vm3, %v4247_v30 }
 0x83c   : > { %v4230_v37 = vpop.f32.mrf.mxu2 }
 0x83d   : > { %v4231_v10 = vadd.f32 %v9459_v55, %v4230_v37 }
 0x83f   : > { %v4248_v20 = vmax.f32 %v4231_v10, 0.0 }
 0x841   : > { %4264 = vst.msk [vmem:[%s9470_s9 + $0x78] sm:$0xff] %vm1313_vm3, %v4248_v20 }
 0x842 PF: > { %s17_s28 = sadd.s32 1, %s4675_s28   ;;  %s10749_s24 = smov %s4667_s26 }
 0x843   : > { %p14_p7 = scmp.ge.s32.totalorder %s17_s28, 6   ;;  %s10750_s25 = smov %s4671_s27 }
 0x844   : > { %s10751_s26 = smov %s10754_s29  ;;  %s10752_s27 = smov %s10758_s30 }
 0x845   :  { %16 = sbr.rel (!%p14_p7) target bundleno = 3 (0x3), region = 83 }

</bundles_post_ra>
